<compile_context>
chip_gen: v6e
topology: v6e:2x2x1
jax: 0.10.0
libtpu: 0.0.40
codegen_flags: <defaults>
</compile_context>

<pallas_src>
import jax
import jax.numpy as jnp
from jax.experimental import pallas as pl
from jax.experimental.pallas import tpu as pltpu

_TAPS = tuple((dy, dx) for dy in range(3) for dx in range(3))
C1, C2, C3 = 64, 128, 256          # channel widths fixed by the module


# ----------------------------------------------------------------------------
# In-kernel helpers (traced inside the Pallas kernel body).
# ----------------------------------------------------------------------------
def _mm_bias_relu(x, w, b):
    # bf16 x bf16 MXU matmul with f32 accumulation; bias + ReLU in f32.
    y = jnp.dot(x, w, preferred_element_type=jnp.float32)
    return jnp.maximum(y + b, 0.0)


def _maxpool2(y):
    # y: (bb, H, W, C) f32 -> (bb, H//2, W//2, C) via elementwise max of slices.
    bb, H, W, C = y.shape
    y = y.reshape(bb, H // 2, 2, W, C)
    y = jnp.maximum(y[:, :, 0], y[:, :, 1])
    y = y.reshape(bb, H // 2, W // 2, 2, C)
    return jnp.maximum(y[:, :, :, 0], y[:, :, :, 1])


def _make_fused_kernel(bb, H, W):
    H1, W1 = H // 2, W // 2            # after pool 1
    H2, W2 = H // 4, W // 4            # after pool 2
    H3, W3 = H // 8, W // 8            # after pool 3

    def kernel(p1_ref, w1_ref, b1_ref, w2_ref, b2_ref, w3_ref, b3_ref,
               wl_ref, bl_ref, o_ref, pad2_ref, pad3_ref):
        k1 = p1_ref.shape[2]                                 # 9 * Cin

        # --- layer 1: 3x3 conv as ONE im2col matmul (patches prebuilt) -----
        x1 = p1_ref[...].reshape(bb * H * W, k1)             # bf16
        y1 = _mm_bias_relu(x1, w1_ref[...], b1_ref[...])     # (bb*H*W, 64) f32
        y1 = _maxpool2(y1.reshape(bb, H, W, C1))             # (bb, H1, W1, 64)

        # zero-padded layer-2 input stays in VMEM scratch (in-kernel padding)
        pad2_ref[...] = jnp.zeros(pad2_ref.shape, pad2_ref.dtype)
        pad2_ref[:, 1:H1 + 1, 1:W1 + 1, :] = y1.astype(pad2_ref.dtype)

        # --- layer 2: tap-fused im2col -> one matmul, K = 9*64 = 576 -------
        cols = [pad2_ref[:, dy:dy + H1, dx:dx + W1, :] for dy, dx in _TAPS]
        x2 = jnp.concatenate(cols, axis=-1).reshape(bb * H1 * W1, 9 * C1)
        y2 = _mm_bias_relu(x2, w2_ref[...], b2_ref[...])     # (bb*H1*W1, 128)
        y2 = _maxpool2(y2.reshape(bb, H1, W1, C2))           # (bb, H2, W2, 128)

        pad3_ref[...] = jnp.zeros(pad3_ref.shape, pad3_ref.dtype)
        pad3_ref[:, 1:H2 + 1, 1:W2 + 1, :] = y2.astype(pad3_ref.dtype)

        # --- layer 3: tap-fused im2col -> one matmul, K = 9*128 = 1152 -----
        cols = [pad3_ref[:, dy:dy + H2, dx:dx + W2, :] for dy, dx in _TAPS]
        x3 = jnp.concatenate(cols, axis=-1).reshape(bb * H2 * W2, 9 * C2)
        y3 = _mm_bias_relu(x3, w3_ref[...], b3_ref[...])     # (bb*H2*W2, 256)
        y3 = _maxpool2(y3.reshape(bb, H2, W2, C3))           # (bb, H3, W3, 256)

        # --- flatten (NHWC order; linear weight pre-permuted) + Linear -----
        feat = y3.reshape(bb, H3 * W3 * C3).astype(jnp.bfloat16)
        out = _mm_bias_relu(feat, wl_ref[...], bl_ref[...])  # (bb, D) f32
        o_ref[0] = out.astype(o_ref.dtype)

    return kernel


# ----------------------------------------------------------------------------
# Wrapper: layer-1 im2col (cheap XLA ops on the tiny raw input) + fused kernel.
# ----------------------------------------------------------------------------
def _choose_block_b(B, max_bb=8):
    """Largest divisor of B that is <= max_bb, preferring >= 2 grid steps so
    both v7x TensorCores get work on the parallel batch axis."""
    divisors = [d for d in range(1, min(B, max_bb) + 1) if B % d == 0]
    two_plus = [d for d in divisors if B // d >= 2]
    return max(two_plus) if two_plus else max(divisors)


def _layer1_patches(x_nchw):
    """XLA-side im2col for the raw input (also folds the NCHW->NHWC transpose).
    Column order is (ky, kx, cin) to match the reshaped conv weight."""
    B, Cin, H, W = x_nchw.shape
    x = jnp.transpose(x_nchw, (0, 2, 3, 1))
    xp = jnp.pad(x, ((0, 0), (1, 1), (1, 1), (0, 0)))
    cols = [xp[:, dy:dy + H, dx:dx + W, :] for dy, dx in _TAPS]
    patches = jnp.concatenate(cols, axis=-1)                 # (B, H, W, 9*Cin)
    return patches.reshape(B, H * W, 9 * Cin).astype(jnp.bfloat16)


def prototypical_forward(x_nchw, kparams, *, max_block_b=8):
    B, Cin, H, W = x_nchw.shape
    assert H % 8 == 0 and W % 8 == 0, "spatial dims must be divisible by 8"
    D = kparams["wl"].shape[1]
    k1 = 9 * Cin
    H1, W1, H2, W2, H3, W3 = H // 2, W // 2, H // 4, W // 4, H // 8, W // 8

    patches = _layer1_patches(x_nchw)                        # (B, H*W, 9*Cin)
    bb = _choose_block_b(B, max_block_b)
    nblk = B // bb

    out = pl.pallas_call(
        _make_fused_kernel(bb, H, W),
        out_shape=jax.ShapeDtypeStruct((nblk, bb, D), jnp.float32),
        grid=(nblk,),
        in_specs=[
            pl.BlockSpec((bb, H * W, k1), lambda i: (i, 0, 0)),
            pl.BlockSpec((k1, C1), lambda i: (0, 0)),
            pl.BlockSpec((1, C1), lambda i: (0, 0)),
            pl.BlockSpec((9 * C1, C2), lambda i: (0, 0)),
            pl.BlockSpec((1, C2), lambda i: (0, 0)),
            pl.BlockSpec((9 * C2, C3), lambda i: (0, 0)),
            pl.BlockSpec((1, C3), lambda i: (0, 0)),
            pl.BlockSpec((H3 * W3 * C3, D), lambda i: (0, 0)),
            pl.BlockSpec((1, D), lambda i: (0, 0)),
        ],
        out_specs=pl.BlockSpec((1, bb, D), lambda i: (i, 0, 0)),
        scratch_shapes=[
            pltpu.VMEM((bb, H1 + 2, W1 + 2, C1), jnp.bfloat16),   # padded act 1
            pltpu.VMEM((bb, H2 + 2, W2 + 2, C2), jnp.bfloat16),   # padded act 2
        ],
        compiler_params=pltpu.CompilerParams(
            dimension_semantics=("parallel",)),
    )(patches, kparams["w1"], kparams["b1"], kparams["w2"], kparams["b2"],
      kparams["w3"], kparams["b3"], kparams["wl"], kparams["bl"])
    return out.reshape(B, D)


# ----------------------------------------------------------------------------
# Parameters (PyTorch layout) and one-time conversion to kernel layout.
# ----------------------------------------------------------------------------
def init_params(key, input_channels, output_dim):
    """Deterministic synthetic params in PyTorch layout: conv weight
    (Cout, Cin, 3, 3); linear weight (D, 256*4*4) with NCHW-flatten columns."""
    ks = jax.random.split(key, 8)

    def conv_w(k, cin, cout):
        w = jax.random.normal(k, (cout, cin, 3, 3), jnp.float32)
        return w * (2.0 / (cin * 9)) ** 0.5

    K = C3 * 4 * 4
    return {
        "w1": conv_w(ks[0], input_channels, C1),
        "b1": jax.random.normal(ks[1], (C1,), jnp.float32) * 0.01,
        "w2": conv_w(ks[2], C1, C2),
        "b2": jax.random.normal(ks[3], (C2,), jnp.float32) * 0.01,
        "w3": conv_w(ks[4], C2, C3),
        "b3": jax.random.normal(ks[5], (C3,), jnp.float32) * 0.01,
        "wl": jax.random.normal(ks[6], (output_dim, K), jnp.float32) * (1.0 / K) ** 0.5,
        "bl": jax.random.normal(ks[7], (output_dim,), jnp.float32) * 0.01,
    }


def prepare_kernel_params(p):
    """One-time host-side conversion from PyTorch layout to kernel layout."""
    def conv_w(w):
        cout, cin = w.shape[0], w.shape[1]
        # (Cout, Cin, 3, 3) -> (ky, kx, cin, cout) -> (9*Cin, Cout), bf16
        return jnp.transpose(w, (2, 3, 1, 0)).reshape(9 * cin, cout).astype(jnp.bfloat16)

    wl = p["wl"]                                   # (D, C*H*W): NCHW flatten
    D = wl.shape[0]
    # permute columns from (c, h, w) to (h, w, c) so the kernel can flatten its
    # NHWC activations directly (no runtime transpose); exact same math.
    wl = wl.reshape(D, C3, 4, 4).transpose(0, 2, 3, 1).reshape(D, 4 * 4 * C3)
    return {
        "w1": conv_w(p["w1"]), "b1": p["b1"].reshape(1, -1).astype(jnp.float32),
        "w2": conv_w(p["w2"]), "b2": p["b2"].reshape(1, -1).astype(jnp.float32),
        "w3": conv_w(p["w3"]), "b3": p["b3"].reshape(1, -1).astype(jnp.float32),
        "wl": jnp.transpose(wl, (1, 0)).astype(jnp.bfloat16),
        "bl": p["bl"].reshape(1, -1).astype(jnp.float32),
    }


# ----------------------------------------------------------------------------
# Pure-JAX (XLA) reference with the same bf16/f32 numerics as the kernel.
# ----------------------------------------------------------------------------
def reference_forward(x_nchw, kp):
    B = x_nchw.shape[0]
    x = jnp.transpose(x_nchw, (0, 2, 3, 1))

    def conv_relu_pool(x, w9, b):
        Bx, H, W, Cin = x.shape
        cout = w9.shape[1]
        xp = jnp.pad(x, ((0, 0), (1, 1), (1, 1), (0, 0)))
        cols = [xp[:, dy:dy + H, dx:dx + W, :] for dy, dx in _TAPS]
        patches = jnp.concatenate(cols, axis=-1).astype(jnp.bfloat16)
        y = jnp.dot(patches.reshape(Bx * H * W, 9 * Cin), w9,
                    preferred_element_type=jnp.float32)
        y = jnp.maximum(y + b, 0.0).reshape(Bx, H, W, cout)
        y = jnp.max(y.reshape(Bx, H // 2, 2, W, cout), axis=2)
        y = jnp.max(y.reshape(Bx, H // 2, W // 2, 2, cout), axis=3)
        return y

    x = conv_relu_pool(x, kp["w1"], kp["b1"])
    x = conv_relu_pool(x, kp["w2"], kp["b2"])
    x = conv_relu_pool(x, kp["w3"], kp["b3"])
    feat = x.reshape(B, -1).astype(jnp.bfloat16)
    y = jnp.dot(feat, kp["wl"], preferred_element_type=jnp.float32)
    return jnp.maximum(y + kp["bl"], 0.0)


if __name__ == "__main__":
    key = jax.random.PRNGKey(0)
    k_x, k_p = jax.random.split(key)

    input_channels = 3
    output_dim = 32
    batch = 2
    # 32x32 spatial input so Flatten yields 256*4*4 features, matching the
    # Linear layer of the reference module.
    x = jax.random.normal(k_x, (batch, input_channels, 32, 32), jnp.float32)

    params_pt = init_params(k_p, input_channels, output_dim)
    kparams = prepare_kernel_params(params_pt)

    out = jax.block_until_ready(jax.jit(prototypical_forward)(x, kparams))
    ref = jax.block_until_ready(jax.jit(reference_forward)(x, kparams))

    assert out.shape == (batch, output_dim), out.shape
    assert out.dtype == jnp.float32
    assert bool(jnp.all(jnp.isfinite(out)))
    assert bool(jnp.all(out >= 0.0))          # final ReLU
    err = float(jnp.max(jnp.abs(out - ref)))
    scale = float(jnp.max(jnp.abs(ref))) + 1.0
    assert err <= 2e-2 * scale, (err, scale)
    print("KERNEL_OK")
</pallas_src>

<mosaic_0001>
module attributes {stable_mosaic.version = 11 : i64} {
  func.func @kernel(%arg0: i32, %arg1: memref<1x1024x27xbf16, #tpu.memory_space<vmem>>, %arg2: memref<27x64xbf16, #tpu.memory_space<vmem>>, %arg3: memref<1x64xf32, #tpu.memory_space<vmem>>, %arg4: memref<576x128xbf16, #tpu.memory_space<vmem>>, %arg5: memref<1x128xf32, #tpu.memory_space<vmem>>, %arg6: memref<1152x256xbf16, #tpu.memory_space<vmem>>, %arg7: memref<1x256xf32, #tpu.memory_space<vmem>>, %arg8: memref<4096x32xbf16, #tpu.memory_space<vmem>>, %arg9: memref<1x32xf32, #tpu.memory_space<vmem>>, %arg10: memref<1x1x32xf32, #tpu.memory_space<vmem>>, %arg11: memref<1x18x18x64xbf16, #tpu.memory_space<vmem>>, %arg12: memref<1x10x10x128xbf16, #tpu.memory_space<vmem>>) attributes {dimension_semantics = [#tpu.dimension_semantics<parallel>], iteration_bounds = array<i64: 2>, scalar_prefetch = 0 : i64, scratch_operands = 2 : i64, tpu.core_type = #tpu.core_type<tc>, window_params = [{transform_indices = @transform_0, window_bounds = array<i64: 1, 1024, 27>}, {pipeline_mode = #tpu.pipeline_mode<synchronous>, transform_indices = @transform_1, window_bounds = array<i64: 27, 64>}, {pipeline_mode = #tpu.pipeline_mode<synchronous>, transform_indices = @transform_2, window_bounds = array<i64: 1, 64>}, {pipeline_mode = #tpu.pipeline_mode<synchronous>, transform_indices = @transform_3, window_bounds = array<i64: 576, 128>}, {pipeline_mode = #tpu.pipeline_mode<synchronous>, transform_indices = @transform_4, window_bounds = array<i64: 1, 128>}, {pipeline_mode = #tpu.pipeline_mode<synchronous>, transform_indices = @transform_5, window_bounds = array<i64: 1152, 256>}, {pipeline_mode = #tpu.pipeline_mode<synchronous>, transform_indices = @transform_6, window_bounds = array<i64: 1, 256>}, {pipeline_mode = #tpu.pipeline_mode<synchronous>, transform_indices = @transform_7, window_bounds = array<i64: 4096, 32>}, {pipeline_mode = #tpu.pipeline_mode<synchronous>, transform_indices = @transform_8, window_bounds = array<i64: 1, 32>}, {transform_indices = @transform_9, window_bounds = array<i64: 1, 1, 32>}]} {
    %c0 = arith.constant 0 : index
    %c0_0 = arith.constant 0 : index
    %c0_1 = arith.constant 0 : index
    %0 = vector.load %arg1[%c0, %c0_0, %c0_1] : memref<1x1024x27xbf16, #tpu.memory_space<vmem>>, vector<1x1024x27xbf16>
    %1 = vector.shape_cast %0 : vector<1x1024x27xbf16> to vector<1024x27xbf16>
    %c0_2 = arith.constant 0 : index
    %c0_3 = arith.constant 0 : index
    %2 = vector.load %arg2[%c0_2, %c0_3] : memref<27x64xbf16, #tpu.memory_space<vmem>>, vector<27x64xbf16>
    %c0_4 = arith.constant 0 : index
    %c0_5 = arith.constant 0 : index
    %3 = vector.load %arg3[%c0_4, %c0_5] : memref<1x64xf32, #tpu.memory_space<vmem>>, vector<1x64xf32>
    %cst = arith.constant dense<0.000000e+00> : vector<1024x64xf32>
    %4 = tpu.matmul %1, %2, %cst {dimension_numbers = #tpu.dot_dimension_numbers<[1], [0], [0], [1], [0, 0, 1, 1], [], []>} : vector<1024x27xbf16>, vector<27x64xbf16>, vector<1024x64xf32> -> vector<1024x64xf32>
    %5 = vector.broadcast %3 : vector<1x64xf32> to vector<1024x64xf32>
    %6 = arith.addf %4, %5 : vector<1024x64xf32>
    %cst_6 = arith.constant 0.000000e+00 : f32
    %7 = vector.broadcast %cst_6 : f32 to vector<1024x64xf32>
    %8 = arith.maximumf %6, %7 : vector<1024x64xf32>
    %9 = vector.shape_cast %8 : vector<1024x64xf32> to vector<1x32x32x64xf32>
    %10 = vector.shape_cast %9 : vector<1x32x32x64xf32> to vector<1x16x2x32x64xf32>
    %11 = vector.extract_strided_slice %10 {offsets = [0, 0, 0, 0, 0], sizes = [1, 16, 1, 32, 64], strides = [1, 1, 1, 1, 1]} : vector<1x16x2x32x64xf32> to vector<1x16x1x32x64xf32>
    %12 = vector.shape_cast %11 : vector<1x16x1x32x64xf32> to vector<1x16x32x64xf32>
    %13 = vector.extract_strided_slice %10 {offsets = [0, 0, 1, 0, 0], sizes = [1, 16, 1, 32, 64], strides = [1, 1, 1, 1, 1]} : vector<1x16x2x32x64xf32> to vector<1x16x1x32x64xf32>
    %14 = vector.shape_cast %13 : vector<1x16x1x32x64xf32> to vector<1x16x32x64xf32>
    %15 = arith.maximumf %12, %14 : vector<1x16x32x64xf32>
    %16 = vector.shape_cast %15 : vector<1x16x32x64xf32> to vector<1x16x16x2x64xf32>
    %17 = vector.extract_strided_slice %16 {offsets = [0, 0, 0, 0, 0], sizes = [1, 16, 16, 1, 64], strides = [1, 1, 1, 1, 1]} : vector<1x16x16x2x64xf32> to vector<1x16x16x1x64xf32>
    %18 = vector.shape_cast %17 : vector<1x16x16x1x64xf32> to vector<1x16x16x64xf32>
    %19 = vector.extract_strided_slice %16 {offsets = [0, 0, 0, 1, 0], sizes = [1, 16, 16, 1, 64], strides = [1, 1, 1, 1, 1]} : vector<1x16x16x2x64xf32> to vector<1x16x16x1x64xf32>
    %20 = vector.shape_cast %19 : vector<1x16x16x1x64xf32> to vector<1x16x16x64xf32>
    %21 = arith.maximumf %18, %20 : vector<1x16x16x64xf32>
    %cst_7 = arith.constant 0.000000e+00 : bf16
    %22 = vector.broadcast %cst_7 : bf16 to vector<1x18x18x64xbf16>
    %c0_8 = arith.constant 0 : index
    %c0_9 = arith.constant 0 : index
    %c0_10 = arith.constant 0 : index
    %c0_11 = arith.constant 0 : index
    %23 = vector.load %arg11[%c0_8, %c0_9, %c0_10, %c0_11] : memref<1x18x18x64xbf16, #tpu.memory_space<vmem>>, vector<1x18x18x64xbf16>
    tpu.vector_store %arg11[%c0_8, %c0_9, %c0_10, %c0_11], %22 {strides = array<i32>} : memref<1x18x18x64xbf16, #tpu.memory_space<vmem>>, vector<1x18x18x64xbf16>,
    %24 = arith.truncf %21 : vector<1x16x16x64xf32> to vector<1x16x16x64xbf16>
    %c0_12 = arith.constant 0 : index
    %c1 = arith.constant 1 : index
    %c1_13 = arith.constant 1 : index
    %c0_14 = arith.constant 0 : index
    %25 = vector.load %arg11[%c0_12, %c1, %c1_13, %c0_14] : memref<1x18x18x64xbf16, #tpu.memory_space<vmem>>, vector<1x16x16x64xbf16>
    tpu.vector_store %arg11[%c0_12, %c1, %c1_13, %c0_14], %24 {strides = array<i32>} : memref<1x18x18x64xbf16, #tpu.memory_space<vmem>>, vector<1x16x16x64xbf16>,
    %c0_15 = arith.constant 0 : index
    %c0_16 = arith.constant 0 : index
    %c0_17 = arith.constant 0 : index
    %c0_18 = arith.constant 0 : index
    %26 = vector.load %arg11[%c0_15, %c0_16, %c0_17, %c0_18] : memref<1x18x18x64xbf16, #tpu.memory_space<vmem>>, vector<1x16x16x64xbf16>
    %c0_19 = arith.constant 0 : index
    %c0_20 = arith.constant 0 : index
    %c1_21 = arith.constant 1 : index
    %c0_22 = arith.constant 0 : index
    %27 = vector.load %arg11[%c0_19, %c0_20, %c1_21, %c0_22] : memref<1x18x18x64xbf16, #tpu.memory_space<vmem>>, vector<1x16x16x64xbf16>
    %c0_23 = arith.constant 0 : index
    %c0_24 = arith.constant 0 : index
    %c2 = arith.constant 2 : index
    %c0_25 = arith.constant 0 : index
    %28 = vector.load %arg11[%c0_23, %c0_24, %c2, %c0_25] : memref<1x18x18x64xbf16, #tpu.memory_space<vmem>>, vector<1x16x16x64xbf16>
    %c0_26 = arith.constant 0 : index
    %c1_27 = arith.constant 1 : index
    %c0_28 = arith.constant 0 : index
    %c0_29 = arith.constant 0 : index
    %29 = vector.load %arg11[%c0_26, %c1_27, %c0_28, %c0_29] : memref<1x18x18x64xbf16, #tpu.memory_space<vmem>>, vector<1x16x16x64xbf16>
    %c0_30 = arith.constant 0 : index
    %c1_31 = arith.constant 1 : index
    %c1_32 = arith.constant 1 : index
    %c0_33 = arith.constant 0 : index
    %30 = vector.load %arg11[%c0_30, %c1_31, %c1_32, %c0_33] : memref<1x18x18x64xbf16, #tpu.memory_space<vmem>>, vector<1x16x16x64xbf16>
    %c0_34 = arith.constant 0 : index
    %c1_35 = arith.constant 1 : index
    %c2_36 = arith.constant 2 : index
    %c0_37 = arith.constant 0 : index
    %31 = vector.load %arg11[%c0_34, %c1_35, %c2_36, %c0_37] : memref<1x18x18x64xbf16, #tpu.memory_space<vmem>>, vector<1x16x16x64xbf16>
    %c0_38 = arith.constant 0 : index
    %c2_39 = arith.constant 2 : index
    %c0_40 = arith.constant 0 : index
    %c0_41 = arith.constant 0 : index
    %32 = vector.load %arg11[%c0_38, %c2_39, %c0_40, %c0_41] : memref<1x18x18x64xbf16, #tpu.memory_space<vmem>>, vector<1x16x16x64xbf16>
    %c0_42 = arith.constant 0 : index
    %c2_43 = arith.constant 2 : index
    %c1_44 = arith.constant 1 : index
    %c0_45 = arith.constant 0 : index
    %33 = vector.load %arg11[%c0_42, %c2_43, %c1_44, %c0_45] : memref<1x18x18x64xbf16, #tpu.memory_space<vmem>>, vector<1x16x16x64xbf16>
    %c0_46 = arith.constant 0 : index
    %c2_47 = arith.constant 2 : index
    %c2_48 = arith.constant 2 : index
    %c0_49 = arith.constant 0 : index
    %34 = vector.load %arg11[%c0_46, %c2_47, %c2_48, %c0_49] : memref<1x18x18x64xbf16, #tpu.memory_space<vmem>>, vector<1x16x16x64xbf16>
    %35 = tpu.concatenate %26, %27, %28, %29, %30, %31, %32, %33, %34 in 3 : vector<1x16x16x64xbf16>, vector<1x16x16x64xbf16>, vector<1x16x16x64xbf16>, vector<1x16x16x64xbf16>, vector<1x16x16x64xbf16>, vector<1x16x16x64xbf16>, vector<1x16x16x64xbf16>, vector<1x16x16x64xbf16>, vector<1x16x16x64xbf16> -> vector<1x16x16x576xbf16>
    %36 = vector.shape_cast %35 : vector<1x16x16x576xbf16> to vector<256x576xbf16>
    %c0_50 = arith.constant 0 : index
    %c0_51 = arith.constant 0 : index
    %37 = vector.load %arg4[%c0_50, %c0_51] : memref<576x128xbf16, #tpu.memory_space<vmem>>, vector<576x128xbf16>
    %c0_52 = arith.constant 0 : index
    %c0_53 = arith.constant 0 : index
    %38 = vector.load %arg5[%c0_52, %c0_53] : memref<1x128xf32, #tpu.memory_space<vmem>>, vector<1x128xf32>
    %cst_54 = arith.constant dense<0.000000e+00> : vector<256x128xf32>
    %39 = tpu.matmul %36, %37, %cst_54 {dimension_numbers = #tpu.dot_dimension_numbers<[1], [0], [0], [1], [0, 0, 1, 1], [], []>} : vector<256x576xbf16>, vector<576x128xbf16>, vector<256x128xf32> -> vector<256x128xf32>
    %40 = vector.broadcast %38 : vector<1x128xf32> to vector<256x128xf32>
    %41 = arith.addf %39, %40 : vector<256x128xf32>
    %cst_55 = arith.constant 0.000000e+00 : f32
    %42 = vector.broadcast %cst_55 : f32 to vector<256x128xf32>
    %43 = arith.maximumf %41, %42 : vector<256x128xf32>
    %44 = vector.shape_cast %43 : vector<256x128xf32> to vector<1x16x16x128xf32>
    %45 = vector.shape_cast %44 : vector<1x16x16x128xf32> to vector<1x8x2x16x128xf32>
    %46 = vector.extract_strided_slice %45 {offsets = [0, 0, 0, 0, 0], sizes = [1, 8, 1, 16, 128], strides = [1, 1, 1, 1, 1]} : vector<1x8x2x16x128xf32> to vector<1x8x1x16x128xf32>
    %47 = vector.shape_cast %46 : vector<1x8x1x16x128xf32> to vector<1x8x16x128xf32>
    %48 = vector.extract_strided_slice %45 {offsets = [0, 0, 1, 0, 0], sizes = [1, 8, 1, 16, 128], strides = [1, 1, 1, 1, 1]} : vector<1x8x2x16x128xf32> to vector<1x8x1x16x128xf32>
    %49 = vector.shape_cast %48 : vector<1x8x1x16x128xf32> to vector<1x8x16x128xf32>
    %50 = arith.maximumf %47, %49 : vector<1x8x16x128xf32>
    %51 = vector.shape_cast %50 : vector<1x8x16x128xf32> to vector<1x8x8x2x128xf32>
    %52 = vector.extract_strided_slice %51 {offsets = [0, 0, 0, 0, 0], sizes = [1, 8, 8, 1, 128], strides = [1, 1, 1, 1, 1]} : vector<1x8x8x2x128xf32> to vector<1x8x8x1x128xf32>
    %53 = vector.shape_cast %52 : vector<1x8x8x1x128xf32> to vector<1x8x8x128xf32>
    %54 = vector.extract_strided_slice %51 {offsets = [0, 0, 0, 1, 0], sizes = [1, 8, 8, 1, 128], strides = [1, 1, 1, 1, 1]} : vector<1x8x8x2x128xf32> to vector<1x8x8x1x128xf32>
    %55 = vector.shape_cast %54 : vector<1x8x8x1x128xf32> to vector<1x8x8x128xf32>
    %56 = arith.maximumf %53, %55 : vector<1x8x8x128xf32>
    %cst_56 = arith.constant 0.000000e+00 : bf16
    %57 = vector.broadcast %cst_56 : bf16 to vector<1x10x10x128xbf16>
    %c0_57 = arith.constant 0 : index
    %c0_58 = arith.constant 0 : index
    %c0_59 = arith.constant 0 : index
    %c0_60 = arith.constant 0 : index
    %58 = vector.load %arg12[%c0_57, %c0_58, %c0_59, %c0_60] : memref<1x10x10x128xbf16, #tpu.memory_space<vmem>>, vector<1x10x10x128xbf16>
    tpu.vector_store %arg12[%c0_57, %c0_58, %c0_59, %c0_60], %57 {strides = array<i32>} : memref<1x10x10x128xbf16, #tpu.memory_space<vmem>>, vector<1x10x10x128xbf16>,
    %59 = arith.truncf %56 : vector<1x8x8x128xf32> to vector<1x8x8x128xbf16>
    %c0_61 = arith.constant 0 : index
    %c1_62 = arith.constant 1 : index
    %c1_63 = arith.constant 1 : index
    %c0_64 = arith.constant 0 : index
    %60 = vector.load %arg12[%c0_61, %c1_62, %c1_63, %c0_64] : memref<1x10x10x128xbf16, #tpu.memory_space<vmem>>, vector<1x8x8x128xbf16>
    tpu.vector_store %arg12[%c0_61, %c1_62, %c1_63, %c0_64], %59 {strides = array<i32>} : memref<1x10x10x128xbf16, #tpu.memory_space<vmem>>, vector<1x8x8x128xbf16>,
    %c0_65 = arith.constant 0 : index
    %c0_66 = arith.constant 0 : index
    %c0_67 = arith.constant 0 : index
    %c0_68 = arith.constant 0 : index
    %61 = vector.load %arg12[%c0_65, %c0_66, %c0_67, %c0_68] : memref<1x10x10x128xbf16, #tpu.memory_space<vmem>>, vector<1x8x8x128xbf16>
    %c0_69 = arith.constant 0 : index
    %c0_70 = arith.constant 0 : index
    %c1_71 = arith.constant 1 : index
    %c0_72 = arith.constant 0 : index
    %62 = vector.load %arg12[%c0_69, %c0_70, %c1_71, %c0_72] : memref<1x10x10x128xbf16, #tpu.memory_space<vmem>>, vector<1x8x8x128xbf16>
    %c0_73 = arith.constant 0 : index
    %c0_74 = arith.constant 0 : index
    %c2_75 = arith.constant 2 : index
    %c0_76 = arith.constant 0 : index
    %63 = vector.load %arg12[%c0_73, %c0_74, %c2_75, %c0_76] : memref<1x10x10x128xbf16, #tpu.memory_space<vmem>>, vector<1x8x8x128xbf16>
    %c0_77 = arith.constant 0 : index
    %c1_78 = arith.constant 1 : index
    %c0_79 = arith.constant 0 : index
    %c0_80 = arith.constant 0 : index
    %64 = vector.load %arg12[%c0_77, %c1_78, %c0_79, %c0_80] : memref<1x10x10x128xbf16, #tpu.memory_space<vmem>>, vector<1x8x8x128xbf16>
    %c0_81 = arith.constant 0 : index
    %c1_82 = arith.constant 1 : index
    %c1_83 = arith.constant 1 : index
    %c0_84 = arith.constant 0 : index
    %65 = vector.load %arg12[%c0_81, %c1_82, %c1_83, %c0_84] : memref<1x10x10x128xbf16, #tpu.memory_space<vmem>>, vector<1x8x8x128xbf16>
    %c0_85 = arith.constant 0 : index
    %c1_86 = arith.constant 1 : index
    %c2_87 = arith.constant 2 : index
    %c0_88 = arith.constant 0 : index
    %66 = vector.load %arg12[%c0_85, %c1_86, %c2_87, %c0_88] : memref<1x10x10x128xbf16, #tpu.memory_space<vmem>>, vector<1x8x8x128xbf16>
    %c0_89 = arith.constant 0 : index
    %c2_90 = arith.constant 2 : index
    %c0_91 = arith.constant 0 : index
    %c0_92 = arith.constant 0 : index
    %67 = vector.load %arg12[%c0_89, %c2_90, %c0_91, %c0_92] : memref<1x10x10x128xbf16, #tpu.memory_space<vmem>>, vector<1x8x8x128xbf16>
    %c0_93 = arith.constant 0 : index
    %c2_94 = arith.constant 2 : index
    %c1_95 = arith.constant 1 : index
    %c0_96 = arith.constant 0 : index
    %68 = vector.load %arg12[%c0_93, %c2_94, %c1_95, %c0_96] : memref<1x10x10x128xbf16, #tpu.memory_space<vmem>>, vector<1x8x8x128xbf16>
    %c0_97 = arith.constant 0 : index
    %c2_98 = arith.constant 2 : index
    %c2_99 = arith.constant 2 : index
    %c0_100 = arith.constant 0 : index
    %69 = vector.load %arg12[%c0_97, %c2_98, %c2_99, %c0_100] : memref<1x10x10x128xbf16, #tpu.memory_space<vmem>>, vector<1x8x8x128xbf16>
    %70 = tpu.concatenate %61, %62, %63, %64, %65, %66, %67, %68, %69 in 3 : vector<1x8x8x128xbf16>, vector<1x8x8x128xbf16>, vector<1x8x8x128xbf16>, vector<1x8x8x128xbf16>, vector<1x8x8x128xbf16>, vector<1x8x8x128xbf16>, vector<1x8x8x128xbf16>, vector<1x8x8x128xbf16>, vector<1x8x8x128xbf16> -> vector<1x8x8x1152xbf16>
    %71 = vector.shape_cast %70 : vector<1x8x8x1152xbf16> to vector<64x1152xbf16>
    %c0_101 = arith.constant 0 : index
    %c0_102 = arith.constant 0 : index
    %72 = vector.load %arg6[%c0_101, %c0_102] : memref<1152x256xbf16, #tpu.memory_space<vmem>>, vector<1152x256xbf16>
    %c0_103 = arith.constant 0 : index
    %c0_104 = arith.constant 0 : index
    %73 = vector.load %arg7[%c0_103, %c0_104] : memref<1x256xf32, #tpu.memory_space<vmem>>, vector<1x256xf32>
    %cst_105 = arith.constant dense<0.000000e+00> : vector<64x256xf32>
    %74 = tpu.matmul %71, %72, %cst_105 {dimension_numbers = #tpu.dot_dimension_numbers<[1], [0], [0], [1], [0, 0, 1, 1], [], []>} : vector<64x1152xbf16>, vector<1152x256xbf16>, vector<64x256xf32> -> vector<64x256xf32>
    %75 = vector.broadcast %73 : vector<1x256xf32> to vector<64x256xf32>
    %76 = arith.addf %74, %75 : vector<64x256xf32>
    %cst_106 = arith.constant 0.000000e+00 : f32
    %77 = vector.broadcast %cst_106 : f32 to vector<64x256xf32>
    %78 = arith.maximumf %76, %77 : vector<64x256xf32>
    %79 = vector.shape_cast %78 : vector<64x256xf32> to vector<1x8x8x256xf32>
    %80 = vector.shape_cast %79 : vector<1x8x8x256xf32> to vector<1x4x2x8x256xf32>
    %81 = vector.extract_strided_slice %80 {offsets = [0, 0, 0, 0, 0], sizes = [1, 4, 1, 8, 256], strides = [1, 1, 1, 1, 1]} : vector<1x4x2x8x256xf32> to vector<1x4x1x8x256xf32>
    %82 = vector.shape_cast %81 : vector<1x4x1x8x256xf32> to vector<1x4x8x256xf32>
    %83 = vector.extract_strided_slice %80 {offsets = [0, 0, 1, 0, 0], sizes = [1, 4, 1, 8, 256], strides = [1, 1, 1, 1, 1]} : vector<1x4x2x8x256xf32> to vector<1x4x1x8x256xf32>
    %84 = vector.shape_cast %83 : vector<1x4x1x8x256xf32> to vector<1x4x8x256xf32>
    %85 = arith.maximumf %82, %84 : vector<1x4x8x256xf32>
    %86 = vector.shape_cast %85 : vector<1x4x8x256xf32> to vector<1x4x4x2x256xf32>
    %87 = vector.extract_strided_slice %86 {offsets = [0, 0, 0, 0, 0], sizes = [1, 4, 4, 1, 256], strides = [1, 1, 1, 1, 1]} : vector<1x4x4x2x256xf32> to vector<1x4x4x1x256xf32>
    %88 = vector.shape_cast %87 : vector<1x4x4x1x256xf32> to vector<1x4x4x256xf32>
    %89 = vector.extract_strided_slice %86 {offsets = [0, 0, 0, 1, 0], sizes = [1, 4, 4, 1, 256], strides = [1, 1, 1, 1, 1]} : vector<1x4x4x2x256xf32> to vector<1x4x4x1x256xf32>
    %90 = vector.shape_cast %89 : vector<1x4x4x1x256xf32> to vector<1x4x4x256xf32>
    %91 = arith.maximumf %88, %90 : vector<1x4x4x256xf32>
    %92 = vector.shape_cast %91 : vector<1x4x4x256xf32> to vector<1x4096xf32>
    %93 = arith.truncf %92 : vector<1x4096xf32> to vector<1x4096xbf16>
    %c0_107 = arith.constant 0 : index
    %c0_108 = arith.constant 0 : index
    %94 = vector.load %arg8[%c0_107, %c0_108] : memref<4096x32xbf16, #tpu.memory_space<vmem>>, vector<4096x32xbf16>
    %c0_109 = arith.constant 0 : index
    %c0_110 = arith.constant 0 : index
    %95 = vector.load %arg9[%c0_109, %c0_110] : memref<1x32xf32, #tpu.memory_space<vmem>>, vector<1x32xf32>
    %cst_111 = arith.constant dense<0.000000e+00> : vector<1x32xf32>
    %96 = tpu.matmul %93, %94, %cst_111 {dimension_numbers = #tpu.dot_dimension_numbers<[1], [0], [0], [1], [0, 0, 1, 1], [], []>} : vector<1x4096xbf16>, vector<4096x32xbf16>, vector<1x32xf32> -> vector<1x32xf32>
    %97 = arith.addf %96, %95 : vector<1x32xf32>
    %cst_112 = arith.constant 0.000000e+00 : f32
    %98 = vector.broadcast %cst_112 : f32 to vector<1x32xf32>
    %99 = arith.maximumf %97, %98 : vector<1x32xf32>
    %c0_113 = arith.constant 0 : index
    %c0_114 = arith.constant 0 : index
    %c0_115 = arith.constant 0 : index
    %100 = vector.load %arg10[%c0_113, %c0_114, %c0_115] : memref<1x1x32xf32, #tpu.memory_space<vmem>>, vector<1x1x32xf32>
    %101 = vector.shape_cast %100 : vector<1x1x32xf32> to vector<1x32xf32>
    %102 = vector.shape_cast %99 : vector<1x32xf32> to vector<1x1x32xf32>
    tpu.vector_store %arg10[%c0_113, %c0_114, %c0_115], %102 {strides = array<i32>} : memref<1x1x32xf32, #tpu.memory_space<vmem>>, vector<1x1x32xf32>,
    return
  }
  func.func @transform_0(%arg0: i32) -> (i32, i32, i32) {
    %c0_i32 = arith.constant 0 : i32
    %c0_i32_0 = arith.constant 0 : i32
    %c0_i32_1 = arith.constant 0 : i32
    return %arg0, %c0_i32, %c0_i32_0 : i32, i32, i32
  }
  func.func @transform_1(%arg0: i32) -> (i32, i32) {
    %c0_i32 = arith.constant 0 : i32
    %c0_i32_0 = arith.constant 0 : i32
    %c0_i32_1 = arith.constant 0 : i32
    return %c0_i32, %c0_i32_0 : i32, i32
  }
  func.func @transform_2(%arg0: i32) -> (i32, i32) {
    %c0_i32 = arith.constant 0 : i32
    %c0_i32_0 = arith.constant 0 : i32
    %c0_i32_1 = arith.constant 0 : i32
    return %c0_i32, %c0_i32_0 : i32, i32
  }
  func.func @transform_3(%arg0: i32) -> (i32, i32) {
    %c0_i32 = arith.constant 0 : i32
    %c0_i32_0 = arith.constant 0 : i32
    %c0_i32_1 = arith.constant 0 : i32
    return %c0_i32, %c0_i32_0 : i32, i32
  }
  func.func @transform_4(%arg0: i32) -> (i32, i32) {
    %c0_i32 = arith.constant 0 : i32
    %c0_i32_0 = arith.constant 0 : i32
    %c0_i32_1 = arith.constant 0 : i32
    return %c0_i32, %c0_i32_0 : i32, i32
  }
  func.func @transform_5(%arg0: i32) -> (i32, i32) {
    %c0_i32 = arith.constant 0 : i32
    %c0_i32_0 = arith.constant 0 : i32
    %c0_i32_1 = arith.constant 0 : i32
    return %c0_i32, %c0_i32_0 : i32, i32
  }
  func.func @transform_6(%arg0: i32) -> (i32, i32) {
    %c0_i32 = arith.constant 0 : i32
    %c0_i32_0 = arith.constant 0 : i32
    %c0_i32_1 = arith.constant 0 : i32
    return %c0_i32, %c0_i32_0 : i32, i32
  }
  func.func @transform_7(%arg0: i32) -> (i32, i32) {
    %c0_i32 = arith.constant 0 : i32
    %c0_i32_0 = arith.constant 0 : i32
    %c0_i32_1 = arith.constant 0 : i32
    return %c0_i32, %c0_i32_0 : i32, i32
  }
  func.func @transform_8(%arg0: i32) -> (i32, i32) {
    %c0_i32 = arith.constant 0 : i32
    %c0_i32_0 = arith.constant 0 : i32
    %c0_i32_1 = arith.constant 0 : i32
    return %c0_i32, %c0_i32_0 : i32, i32
  }
  func.func @transform_9(%arg0: i32) -> (i32, i32, i32) {
    %c0_i32 = arith.constant 0 : i32
    %c0_i32_0 = arith.constant 0 : i32
    %c0_i32_1 = arith.constant 0 : i32
    return %arg0, %c0_i32, %c0_i32_0 : i32, i32, i32
  }
}

</mosaic_0001>

<bundles_post_ra>
// kernel: prototypical_forward.1
= control target key start
LH: loop header
LB: loop body
LE: loop exit
PB: predicated region body
PF: predicated region fallthrough
CT: control target
= control target key end

     0   :  { %14 = vsyncpa [#allocation5], 0  ;;  %s23687_s0 = inlined_call_operand.vmem [shape: bf16[2,1024,27], index: 0, kind: input, shape index: {}]   ;;  %s23688_s1 = inlined_call_operand.vmem [shape: bf16[27,64], index: 1, kind: input, shape index: {}]   ;;  %s23689_s2 = inlined_call_operand.vmem [shape: f32[1,64], index: 2, kind: input, shape index: {}]   ;;  %s23690_s3 = inlined_call_operand.vmem [shape: bf16[576,128], index: 3, kind: input, shape index: {}]   ;;  %s23691_s4 = inlined_call_operand.vmem [shape: f32[1,128], index: 4, kind: input, shape index: {}]   ;;  %s23692_s5 = inlined_call_operand.vmem [shape: bf16[1152,256], index: 5, kind: input, shape index: {}]   ;;  %s23693_s6 = inlined_call_operand.vmem [shape: f32[1,256], index: 6, kind: input, shape index: {}]   ;;  %s23694_s7 = inlined_call_operand.vmem [shape: bf16[4096,32], index: 7, kind: input, shape index: {}]   ;;  %s23695_s8 = inlined_call_operand.vmem [shape: f32[1,32], index: 8, kind: input, shape index: {}]   ;;  %s23696_s9 = inlined_call_operand.hbm [shape: f32[2,1,32], index: 9, kind: output, shape index: {}]  }
   0x1   :  { %16 = vsyncpa [#allocation5 + $0x1], 0  ;;  %s18775_s30 = smov 0   ;;  %s18777_s10 = smov 0  }
   0x2   :  { %s18779_s11 = smov 0   ;;  %s18781_s12 = smov 0  }
   0x3 LB: > { %s18796_s13 = sadd.s32 4294967295, %s18716_s12   ;;  %s15109_s14 = sadd.s32 4294967294, %s18716_s12   ;;  %s18716_s12 = sphi %s18781_s12, %s23977_s12   ;;  %s18712_s11 = sphi %s18779_s11, %s23976_s11   ;;  %s18708_s10 = sphi %s18777_s10, %s23975_s10   ;;  %s18704_s30 = sphi %s18775_s30, %s23974_s30  }
   0x4   : > { %s18800_s15 = sadd.s32 1, %s18716_s12   ;;  %s223_s16 = sadd.s32 1, %s18712_s11 }
   0x5   : > { %s220_s17 = ssub.s32 %s18716_s12, %s18800_s15  ;;  %p233_p0 = scmp.ne.s32.totalorder %s18712_s11, %s18708_s10 }
   0x6   : > { %p221_p1 = scmp.eq.s32.totalorder %s220_s17, 0  ;;  %p234_p2 = scmp.eq.s32.totalorder %s18796_s13, 1 }
   0x7   : > { %p239_p3 = scmp.ne.s32.totalorder %s18708_s10, %s18704_s30  ;;  %p240_p4 = scmp.eq.s32.totalorder %s15109_s14, 1 }
   0x8   : > { %s18811_s18 = scalar_select %p221_p1, %s18712_s11, %s223_s16  }
   0x9   : > { %p18813_p5 = por %p234_p2, %p233_p0  ;;  %p18817_p6 = por %p240_p4, %p239_p3 }
   0xa   : > { %p15112_p7 = scmp.ge.s32.totalorder %s18716_s12, 1  ;;  %p290_p8 = scmp.lt.s32.totalorder %s18716_s12, 3 }
   0xc   : > { %p291_p9 = pnand %p15112_p7, %p290_p8 }
   0xe   : > { %294 = sbr.rel (%p291_p9) target bundleno = 2083 (0x823), region = 56 }
  0x13   : > { %v17834_v0 = vld [vmem:[%s23688_s1 + $0x8] sm:$0x3f]   ;;  %vm994_vm0 = vcmask 1044480   ;;  %vm995_vm1 = vcmask 1045504   ;;  %v18718_v1 = vmov 65535   ;;  %v17835_v3 = vld [vmem:[%s23688_s1] sm:$0xff]  }
  0x14   : > { %v996_v2 = vsel %vm994_vm0, 4294967295, %v18718_v1  ;;  %p325_p10 = scmp.lt.s32.totalorder %s18796_s13, 1  ;;  %vm801_vm2 = vcmask 220160   ;;  %vm4173_vm3 = vcmask 516096   ;;  %v23697_v33 = vmov 0   ;;  %s18721_s14 = smov 64  }
  0x15   : > { %v997_v4 = vsel %vm995_vm1, %v996_v2, 0  ;;  %4177 = vst.msk [vmem:[#allocation2 + $0x14] sm:$0x1] %vm4173_vm3, %v23697_v33  ;;  %4174 = vst.msk [vmem:[#allocation2 + $0x8] sm:$0x1] %vm4173_vm3, %v23697_v33  ;;  %vm4170_vm4 = vcmask 519168  }
  0x16   : > { %v999_v5 = vand.u32 %v17834_v0, %v997_v4  ;;  %s326_s25 = scalar_select %p325_p10, %s18796_s13, 1  ;;  %4180 = vst.msk [vmem:[#allocation2 + $0x20] sm:$0x1] %vm4173_vm3, %v23697_v33  ;;  %4183 = vst.msk [vmem:[#allocation2 + $0x2c] sm:$0x1] %vm4173_vm3, %v23697_v33  ;;  %vm5508_vm5 = vcmask 1042434  }
  0x17   : > { %4186 = vst.msk [vmem:[#allocation2 + $0x38] sm:$0x1] %vm4173_vm3, %v23697_v33  ;;  %4189 = vst.msk [vmem:[#allocation2 + $0x44] sm:$0x1] %vm4173_vm3, %v23697_v33  ;;  %v19067_v58 = vld [vmem:[%s23689_s2] ss:$0 sm:$0xff] }
  0x18   : > { %17617 = vmatprep.subr.bf16.mxu0 %v999_v5  ;;  %s16610_s26 = sshll.u32 %s326_s25, 9  ;;  %4192 = vst.msk [vmem:[#allocation2 + $0x50] sm:$0x1] %vm4173_vm3, %v23697_v33  ;;  %4195 = vst.msk [vmem:[#allocation2 + $0x5c] sm:$0x1] %vm4173_vm3, %v23697_v33  ;;  %vm5511_vm6 = vcmask 1043459  }
  0x19   : > { %17618 = vmatpush3.bf16.msra.mxu0 %v999_v5  ;;  %s18834_s29 = scalar_lea.vmem %s23687_s0, %s16610_s26  ;;  %4198 = vst.msk [vmem:[#allocation2 + $0x68] sm:$0x1] %vm4173_vm3, %v23697_v33  ;;  %4201 = vst.msk [vmem:[#allocation2 + $0x74] sm:$0x1] %vm4173_vm3, %v23697_v33  ;;  %v18720_v1 = vmov 1983009808  }
  0x1a   : > { %17619 = vmatprep.subr.bf16.mxu0 %v17835_v3  ;;  %v17836_v6 = vld [vmem:[%s18834_s29] sm:$0xff]   ;;  %v17837_v7 = vld [vmem:[%s18834_s29 + $0x8] sm:$0xff]   ;;  %v17838_v8 = vld [vmem:[%s18834_s29 + $0x10] sm:$0xff]   ;;  %4204 = vst.msk [vmem:[#allocation2 + $0x80] sm:$0x1] %vm4173_vm3, %v23697_v33  ;;  %v1804_v2 = vunpack.c.l.s4 %v18720_v1  ;;  %vm5514_vm7 = vcmask 1044484  }
  0x1b   : > { %17621 = vmatprep.mubr.msk.bf16.mxu0 %vm801_vm2, %v17836_v6  ;;  %v17839_v9 = vld [vmem:[%s18834_s29 + $0x18] sm:$0xff]   ;;  %v17840_v10 = vld [vmem:[%s18834_s29 + $0x20] sm:$0xff]   ;;  %v17841_v11 = vld [vmem:[%s18834_s29 + $0x28] sm:$0xff]   ;;  %4207 = vst.msk [vmem:[#allocation2 + $0x8c] sm:$0x1] %vm4173_vm3, %v23697_v33  ;;  %vm5517_vm9 = vcmask 1045509  }
  0x1c   : > { %v17842_v12 = vld [vmem:[%s18834_s29 + $0x30] sm:$0xff]   ;;  %v17843_v13 = vld [vmem:[%s18834_s29 + $0x38] sm:$0xff]   ;;  %v17844_v14 = vld [vmem:[%s18834_s29 + $0x40] sm:$0xff]   ;;  %4210 = vst.msk [vmem:[#allocation2 + $0x98] sm:$0x1] %vm4173_vm3, %v23697_v33  ;;  %vm5520_vm10 = vcmask 1046534  }
  0x1d   : > { %17620 = vmatpush3.bf16.msra.mxu0 %v17835_v3  ;;  %v17845_v15 = vld [vmem:[%s18834_s29 + $0x48] sm:$0xff]   ;;  %v17846_v16 = vld [vmem:[%s18834_s29 + $0x50] sm:$0xff]   ;;  %v17847_v17 = vld [vmem:[%s18834_s29 + $0x58] sm:$0xff]   ;;  %4213 = vst.msk [vmem:[#allocation2 + $0xa4] sm:$0x1] %vm4173_vm3, %v23697_v33  ;;  %v1806_v3 = vlaneseq  ;;  %vm5526_vm11 = vcmask 1041409  }
  0x1e   : > { %v17848_v18 = vld [vmem:[%s18834_s29 + $0x60] sm:$0xff]   ;;  %v17849_v19 = vld [vmem:[%s18834_s29 + $0x68] sm:$0xff]   ;;  %v17850_v20 = vld [vmem:[%s18834_s29 + $0x70] sm:$0xff]   ;;  %4216 = vst.msk [vmem:[#allocation2 + $0xb0] sm:$0x1] %vm4173_vm3, %v23697_v33  ;;  %vm5523_vm13 = vcmask 1047559  }
  0x1f   : > { %v17851_v21 = vld [vmem:[%s18834_s29 + $0x78] sm:$0xff]   ;;  %v17852_v22 = vld [vmem:[%s18834_s29 + $0x80] sm:$0xff]   ;;  %v17853_v23 = vld [vmem:[%s18834_s29 + $0x88] sm:$0xff]   ;;  %4219 = vst.msk [vmem:[#allocation2 + $0xbc] sm:$0x1] %vm4173_vm3, %v23697_v33  ;;  %vm6754_vm1 = vcmask 1046528  }
  0x20   : > { %17622 = vmatmul.mubr.msk.bf16.vlgmr.msra.gmra.mxu0 %vm801_vm2, %v17837_v7  ;;  %v17854_v24 = vld [vmem:[%s18834_s29 + $0x90] sm:$0xff]   ;;  %v17855_v25 = vld [vmem:[%s18834_s29 + $0x98] sm:$0xff]   ;;  %v17856_v26 = vld [vmem:[%s18834_s29 + $0xa0] sm:$0xff]   ;;  %4222 = vst.msk [vmem:[#allocation2 + $0xc8] sm:$0x1] %vm4173_vm3, %v23697_v33  ;;  %s323_s16 = sand.u32 1, %s18708_s10  }
  0x21   : > { %17625 = vmatprep.mubr.msk.bf16.mxu0 %vm801_vm2, %v17838_v8  ;;  %v17857_v27 = vld [vmem:[%s18834_s29 + $0xa8] sm:$0xff]   ;;  %v17858_v28 = vld [vmem:[%s18834_s29 + $0xb0] sm:$0xff]   ;;  %v17859_v29 = vld [vmem:[%s18834_s29 + $0xb8] sm:$0xff]   ;;  %4225 = vst.msk [vmem:[#allocation2 + $0xd4] sm:$0x1] %vm4173_vm3, %v23697_v33  ;;  %s16607_s17 = sshll.u32 %s18796_s13, 4 }
  0x22   : > { %v17860_v30 = vld [vmem:[%s18834_s29 + $0xc0] sm:$0xff]   ;;  %v17861_v31 = vld [vmem:[%s18834_s29 + $0xc8] sm:$0xff]   ;;  %v17862_v32 = vld [vmem:[%s18834_s29 + $0xd0] sm:$0xff]   ;;  %9438 = vst [vmem:[#allocation3] sm:$0xf] %v23697_v33  ;;  %s324_s21 = scalar_lea.vmem [#allocation4], %s323_s16  ;;  %s15052_s25 = scalar_lea.hbm %s23696_s9, %s16607_s17 }
  0x23   : > { %9439 = vst [vmem:[#allocation3 + $0x4] sm:$0x1] %v23697_v33  ;;  %9440 = vst [vmem:[#allocation3 + $0x8] sm:$0xf] %v23697_v33  ;;  %v17863_v34 = vld [vmem:[%s18834_s29 + $0xd8] sm:$0xff]   ;;  %v17864_v35 = vld [vmem:[%s18834_s29 + $0xe0] sm:$0xff]  }
  0x24   : > { %9441 = vst [vmem:[#allocation3 + $0xc] sm:$0x1] %v23697_v33  ;;  %9442 = vst [vmem:[#allocation3 + $0x10] sm:$0xf] %v23697_v33  ;;  %v17865_v36 = vld [vmem:[%s18834_s29 + $0xe8] sm:$0xff]   ;;  %v17866_v37 = vld [vmem:[%s18834_s29 + $0xf0] sm:$0xff]  }
  0x25   : > { %9443 = vst [vmem:[#allocation3 + $0x14] sm:$0x1] %v23697_v33  ;;  %9444 = vst [vmem:[#allocation3 + $0x18] sm:$0xf] %v23697_v33  ;;  %v17867_v38 = vld [vmem:[%s18834_s29 + $0xf8] sm:$0xff]   ;;  %v17868_v39 = vld [vmem:[%s18834_s29 + $0x100] sm:$0xff]  }
  0x26   : > { %9445 = vst [vmem:[#allocation3 + $0x1c] sm:$0x1] %v23697_v33  ;;  %9446 = vst [vmem:[#allocation3 + $0x20] sm:$0xf] %v23697_v33  ;;  %v17869_v40 = vld [vmem:[%s18834_s29 + $0x108] sm:$0xff]   ;;  %v17870_v41 = vld [vmem:[%s18834_s29 + $0x110] sm:$0xff]  }
  0x27   : > { %9447 = vst [vmem:[#allocation3 + $0x24] sm:$0x1] %v23697_v33  ;;  %9448 = vst [vmem:[#allocation3 + $0x28] sm:$0xf] %v23697_v33  ;;  %v17871_v42 = vld [vmem:[%s18834_s29 + $0x118] sm:$0xff]   ;;  %v17872_v43 = vld [vmem:[%s18834_s29 + $0x120] sm:$0xff]  }
  0x28   : > { %17626 = vmatmul.mubr.msk.bf16.gmra.mxu0 %vm801_vm2, %v17839_v9  ;;  %9449 = vst [vmem:[#allocation3 + $0x2c] sm:$0x1] %v23697_v33  ;;  %9450 = vst [vmem:[#allocation3 + $0x30] sm:$0xf] %v23697_v33  ;;  %v17873_v44 = vld [vmem:[%s18834_s29 + $0x128] sm:$0xff]   ;;  %v17874_v45 = vld [vmem:[%s18834_s29 + $0x130] sm:$0xff]  }
  0x29   : > { %17629 = vmatprep.mubr.msk.bf16.mxu0 %vm801_vm2, %v17840_v10  ;;  %9451 = vst [vmem:[#allocation3 + $0x34] sm:$0x1] %v23697_v33  ;;  %9452 = vst [vmem:[#allocation3 + $0x38] sm:$0xf] %v23697_v33  ;;  %v17875_v46 = vld [vmem:[%s18834_s29 + $0x138] sm:$0xff]   ;;  %v17876_v47 = vld [vmem:[%s18834_s29 + $0x140] sm:$0xff]  }
  0x2a   : > { %9453 = vst [vmem:[#allocation3 + $0x3c] sm:$0x1] %v23697_v33  ;;  %9454 = vst [vmem:[#allocation3 + $0x40] sm:$0xf] %v23697_v33  ;;  %v17877_v48 = vld [vmem:[%s18834_s29 + $0x148] sm:$0xff]   ;;  %v17878_v49 = vld [vmem:[%s18834_s29 + $0x150] sm:$0xff]  }
  0x2b   : > { %9455 = vst [vmem:[#allocation3 + $0x44] sm:$0x1] %v23697_v33  ;;  %9456 = vst [vmem:[#allocation3 + $0x48] sm:$0xf] %v23697_v33  ;;  %v17879_v50 = vld [vmem:[%s18834_s29 + $0x158] sm:$0xff]   ;;  %v17880_v51 = vld [vmem:[%s18834_s29 + $0x160] sm:$0xff]  }
  0x2c   : > { %9457 = vst [vmem:[#allocation3 + $0x4c] sm:$0x1] %v23697_v33  ;;  %4175 = vst.msk [vmem:[#allocation2 + $0xc] sm:$0xf] %vm4170_vm4, %v23697_v33  ;;  %v17881_v52 = vld [vmem:[%s18834_s29 + $0x168] sm:$0xff]   ;;  %v17882_v53 = vld [vmem:[%s18834_s29 + $0x170] sm:$0xff]  }
  0x2d   : > { %4171 = vst.msk [vmem:[#allocation2] sm:$0xf] %vm4170_vm4, %v23697_v33  ;;  %4172 = vst.msk [vmem:[#allocation2 + $0x4] sm:$0xf] %vm4170_vm4, %v23697_v33  ;;  %v17883_v54 = vld [vmem:[%s18834_s29 + $0x178] sm:$0xff]   ;;  %v17884_v55 = vld [vmem:[%s18834_s29 + $0x180] sm:$0xff]  }
  0x2e   : > { %4176 = vst.msk [vmem:[#allocation2 + $0x10] sm:$0xf] %vm4170_vm4, %v23697_v33  ;;  %4178 = vst.msk [vmem:[#allocation2 + $0x18] sm:$0xf] %vm4170_vm4, %v23697_v33  ;;  %v17885_v56 = vld [vmem:[%s18834_s29 + $0x188] sm:$0xff]   ;;  %v17886_v57 = vld [vmem:[%s18834_s29 + $0x190] sm:$0xff]  }
  0x2f   : > { %4179 = vst.msk [vmem:[#allocation2 + $0x1c] sm:$0xf] %vm4170_vm4, %v23697_v33  ;;  %4181 = vst.msk [vmem:[#allocation2 + $0x24] sm:$0xf] %vm4170_vm4, %v23697_v33  ;;  %v17887_v6 = vld [vmem:[%s18834_s29 + $0x198] sm:$0xff]   ;;  %v17888_v8 = vld [vmem:[%s18834_s29 + $0x1a0] sm:$0xff]  }
  0x30   : > { %17630 = vmatmul.mubr.msk.bf16.gmra.mxu0 %vm801_vm2, %v17841_v11  ;;  %4182 = vst.msk [vmem:[#allocation2 + $0x28] sm:$0xf] %vm4170_vm4, %v23697_v33  ;;  %4184 = vst.msk [vmem:[#allocation2 + $0x30] sm:$0xf] %vm4170_vm4, %v23697_v33  ;;  %vm6050_vm8 = vsmask.f32 256 }
  0x31   : > { %17633 = vmatprep.mubr.msk.bf16.mxu0 %vm801_vm2, %v17842_v12  ;;  %4185 = vst.msk [vmem:[#allocation2 + $0x34] sm:$0xf] %vm4170_vm4, %v23697_v33  ;;  %4187 = vst.msk [vmem:[#allocation2 + $0x3c] sm:$0xf] %vm4170_vm4, %v23697_v33  ;;  %vm6043_vm14 = vsmask.f32 7938 }
  0x32   : > { %4188 = vst.msk [vmem:[#allocation2 + $0x40] sm:$0xf] %vm4170_vm4, %v23697_v33  ;;  %4190 = vst.msk [vmem:[#allocation2 + $0x48] sm:$0xf] %vm4170_vm4, %v23697_v33  ;;  %vm6481_vm0 = vsmask.f32 7424 }
  0x33   : > { %4191 = vst.msk [vmem:[#allocation2 + $0x4c] sm:$0xf] %vm4170_vm4, %v23697_v33  ;;  %4193 = vst.msk [vmem:[#allocation2 + $0x54] sm:$0xf] %vm4170_vm4, %v23697_v33  ;;  %s15054_s22 = sshll.u32 %s324_s21, 4  ;;  %s15042_s26 = scalar_lea.sflag [#allocation5], %s323_s16  ;;  %s15055_s22 = int_to_ptr.vmem [resolvable:$true] %s15054_s22 }
  0x34   : > { %4194 = vst.msk [vmem:[#allocation2 + $0x58] sm:$0xf] %vm4170_vm4, %v23697_v33  ;;  %4196 = vst.msk [vmem:[#allocation2 + $0x60] sm:$0xf] %vm4170_vm4, %v23697_v33  ;;  %v6160_v60 = vld [vmem:[#allocation2] sm:$0xf] }
  0x35   : > { %4197 = vst.msk [vmem:[#allocation2 + $0x64] sm:$0xf] %vm4170_vm4, %v23697_v33  ;;  %4199 = vst.msk [vmem:[#allocation2 + $0x6c] sm:$0xf] %vm4170_vm4, %v23697_v33  ;;  %v6161_v61 = vld [vmem:[#allocation2 + $0x4] sm:$0xf] }
  0x36   : > { %4200 = vst.msk [vmem:[#allocation2 + $0x70] sm:$0xf] %vm4170_vm4, %v23697_v33  ;;  %4202 = vst.msk [vmem:[#allocation2 + $0x78] sm:$0xf] %vm4170_vm4, %v23697_v33  ;;  %v19071_v63 = vcombine.low %v6160_v60, %v6161_v61  ;;  %v17891_v60 = vld [vmem:[%s18834_s29 + $0x1b8] sm:$0xff]   ;;  %s18724_s27 = smov [#allocation4]  }
  0x37   : > { %4203 = vst.msk [vmem:[#allocation2 + $0x7c] sm:$0xf] %vm4170_vm4, %v23697_v33  ;;  %4205 = vst.msk [vmem:[#allocation2 + $0x84] sm:$0xf] %vm4170_vm4, %v23697_v33  ;;  %s18660_s13 = sshll.u32 %s18724_s27, 4  ;;  %s18661_s13 = int_to_ptr.vmem [resolvable:$false] %s18660_s13 }
  0x38   : > { %17634 = vmatmul.mubr.msk.bf16.gmra.mxu0 %vm801_vm2, %v17843_v13  ;;  %4206 = vst.msk [vmem:[#allocation2 + $0x88] sm:$0xf] %vm4170_vm4, %v23697_v33  ;;  %4208 = vst.msk [vmem:[#allocation2 + $0x90] sm:$0xf] %vm4170_vm4, %v23697_v33  ;;  %v6485_v9 = vshll.u32 %v19071_v63, 16  ;;  %v1805_v13 = vunpack.c.0.s8 %v1804_v2  ;;  %v17892_v2 = vld [vmem:[%s18834_s29 + $0x1c0] sm:$0xff]   ;;  %p18663_p0 = scmp.lt.s32.totalorder %s15055_s22, %s18661_s13 }
  0x39   : > { %17637 = vmatprep.mubr.msk.bf16.mxu0 %vm801_vm2, %v17844_v14  ;;  %4209 = vst.msk [vmem:[#allocation2 + $0x94] sm:$0xf] %vm4170_vm4, %v23697_v33  ;;  %4211 = vst.msk [vmem:[#allocation2 + $0x9c] sm:$0xf] %vm4170_vm4, %v23697_v33  ;;  %v19081_v14 = vshrl.u32 %v1806_v3, 7  ;;  %s18662_s28 = scalar_lea.vmem %s18661_s13, 32 }
  0x3a   : > { %4212 = vst.msk [vmem:[#allocation2 + $0xa0] sm:$0xf] %vm4170_vm4, %v23697_v33  ;;  %4214 = vst.msk [vmem:[#allocation2 + $0xa8] sm:$0xf] %vm4170_vm4, %v23697_v33 }
  0x3b   : > { %4215 = vst.msk [vmem:[#allocation2 + $0xac] sm:$0xf] %vm4170_vm4, %v23697_v33  ;;  %4217 = vst.msk [vmem:[#allocation2 + $0xb4] sm:$0xf] %vm4170_vm4, %v23697_v33 }
  0x3c   : > { %4218 = vst.msk [vmem:[#allocation2 + $0xb8] sm:$0xf] %vm4170_vm4, %v23697_v33  ;;  %4220 = vst.msk [vmem:[#allocation2 + $0xc0] sm:$0xf] %vm4170_vm4, %v23697_v33 }
  0x3d   : > { %4221 = vst.msk [vmem:[#allocation2 + $0xc4] sm:$0xf] %vm4170_vm4, %v23697_v33  ;;  %4223 = vst.msk [vmem:[#allocation2 + $0xcc] sm:$0xf] %vm4170_vm4, %v23697_v33 }
  0x3e   : > { %4224 = vst.msk [vmem:[#allocation2 + $0xd0] sm:$0xf] %vm4170_vm4, %v23697_v33  ;;  %v19076_v7 = vld [vmem:[#allocation2 + $0x8] ss:$0 sps:$4 sm:$0x11]   ;;  %23756 = vst [vmem:[#allocation7_spill] sm:$0xff] %v19081_v14 }
  0x3f   : > { %vm19158_vm12 = vmand %vm4173_vm3, %vm6050_vm8  ;;  %vm9920_vm3 = vcmask 1040384  }
  0x40   : > { %17638 = vmatmul.mubr.msk.bf16.gmra.mxu0 %vm801_vm2, %v17845_v15  ;;  %vm19198_vm15 = vmand %vm4170_vm4, %vm6043_vm14 }
  0x41   : > { %17641 = vmatprep.mubr.msk.bf16.mxu0 %vm801_vm2, %v17846_v16 }
  0x48   : > { %17642 = vmatmul.mubr.msk.bf16.gmra.mxu0 %vm801_vm2, %v17847_v17  ;;  %v6483_v17 = vshrl.u32 %v19071_v63, 16 }
  0x49   : > { %17645 = vmatprep.mubr.msk.bf16.mxu0 %vm801_vm2, %v17848_v18 }
  0x50   : > { %17646 = vmatmul.mubr.msk.bf16.gmra.mxu0 %vm801_vm2, %v17849_v19 }
  0x51   : > { %17649 = vmatprep.mubr.msk.bf16.mxu0 %vm801_vm2, %v17850_v20  ;;  %v19090_v20 = vrot.slane %v6485_v9, 1 }
  0x58   : > { %17650 = vmatmul.mubr.msk.bf16.gmra.mxu0 %vm801_vm2, %v17851_v21  ;;  %v6490_v21 = vshll.u32 %v19076_v7, 16 }
  0x59   : > { %17653 = vmatprep.mubr.msk.bf16.mxu0 %vm801_vm2, %v17852_v22 }
  0x60   : > { %17654 = vmatmul.mubr.msk.bf16.gmra.mxu0 %vm801_vm2, %v17853_v23  ;;  %v17889_v23 = vld [vmem:[%s18834_s29 + $0x1a8] sm:$0xff]  }
  0x61   : > { %17657 = vmatprep.mubr.msk.bf16.mxu0 %vm801_vm2, %v17854_v24 }
  0x68   : > { %17658 = vmatmul.mubr.msk.bf16.gmra.mxu0 %vm801_vm2, %v17855_v25 }
  0x69   : > { %17661 = vmatprep.mubr.msk.bf16.mxu0 %vm801_vm2, %v17856_v26  ;;  %v19095_v26 = vsub.s32 %v1805_v13, %v19081_v14 }
  0x6b   : > { %23757 = vst [vmem:[#allocation8_spill] sm:$0xff] %v19095_v26 }
  0x70   : > { %17662 = vmatmul.mubr.msk.bf16.gmra.mxu0 %vm801_vm2, %v17857_v27 }
  0x71   : > { %17665 = vmatprep.mubr.msk.bf16.mxu0 %vm801_vm2, %v17858_v28 }
  0x78   : > { %17666 = vmatmul.mubr.msk.bf16.gmra.mxu0 %vm801_vm2, %v17859_v29 }
  0x79   : > { %17669 = vmatprep.mubr.msk.bf16.mxu0 %vm801_vm2, %v17860_v30 }
  0x80   : > { %17670 = vmatmul.mubr.msk.bf16.gmra.mxu0 %vm801_vm2, %v17861_v31 }
  0x81   : > { %17673 = vmatprep.mubr.msk.bf16.mxu0 %vm801_vm2, %v17862_v32 }
  0x88   : > { %17674 = vmatmul.mubr.msk.bf16.gmra.mxu0 %vm801_vm2, %v17863_v34  ;;  %v17890_v34 = vld [vmem:[%s18834_s29 + $0x1b0] sm:$0xff]  }
  0x89   : > { %17677 = vmatprep.mubr.msk.bf16.mxu0 %vm801_vm2, %v17864_v35 }
  0x90   : > { %17678 = vmatmul.mubr.msk.bf16.gmra.mxu0 %vm801_vm2, %v17865_v36 }
  0x91   : > { %17681 = vmatprep.mubr.msk.bf16.mxu0 %vm801_vm2, %v17866_v37 }
  0x98   : > { %17682 = vmatmul.mubr.msk.bf16.gmra.mxu0 %vm801_vm2, %v17867_v38 }
  0x99   : > { %17685 = vmatprep.mubr.msk.bf16.mxu0 %vm801_vm2, %v17868_v39 }
  0xa0   : > { %17686 = vmatmul.mubr.msk.bf16.gmra.mxu0 %vm801_vm2, %v17869_v40 }
  0xa1   : > { %17689 = vmatprep.mubr.msk.bf16.mxu0 %vm801_vm2, %v17870_v41 }
  0xa8   : > { %17690 = vmatmul.mubr.msk.bf16.gmra.mxu0 %vm801_vm2, %v17871_v42 }
  0xa9   : > { %17693 = vmatprep.mubr.msk.bf16.mxu0 %vm801_vm2, %v17872_v43 }
  0xb0   : > { %17694 = vmatmul.mubr.msk.bf16.gmra.mxu0 %vm801_vm2, %v17873_v44 }
  0xb1   : > { %17697 = vmatprep.mubr.msk.bf16.mxu0 %vm801_vm2, %v17874_v45 }
  0xb8   : > { %17698 = vmatmul.mubr.msk.bf16.gmra.mxu0 %vm801_vm2, %v17875_v46 }
  0xb9   : > { %17701 = vmatprep.mubr.msk.bf16.mxu0 %vm801_vm2, %v17876_v47 }
  0xc0   : > { %17702 = vmatmul.mubr.msk.bf16.gmra.mxu0 %vm801_vm2, %v17877_v48 }
  0xc1   : > { %17705 = vmatprep.mubr.msk.bf16.mxu0 %vm801_vm2, %v17878_v49 }
  0xc8   : > { %17706 = vmatmul.mubr.msk.bf16.gmra.mxu0 %vm801_vm2, %v17879_v50 }
  0xc9   : > { %17709 = vmatprep.mubr.msk.bf16.mxu0 %vm801_vm2, %v17880_v51 }
  0xd0   : > { %17710 = vmatmul.mubr.msk.bf16.gmra.mxu0 %vm801_vm2, %v17881_v52 }
  0xd1   : > { %17713 = vmatprep.mubr.msk.bf16.mxu0 %vm801_vm2, %v17882_v53 }
  0xd8   : > { %17714 = vmatmul.mubr.msk.bf16.gmra.mxu0 %vm801_vm2, %v17883_v54  ;;  %v17906_v54 = vld [vmem:[%s23690_s3 + $0x118] sm:$0xff]  }
  0xd9   : > { %17717 = vmatprep.mubr.msk.bf16.mxu0 %vm801_vm2, %v17884_v55  ;;  %17749 = vmatprep.subr.bf16.mxu0 %v17906_v54 }
  0xda   : > { %17750 = vmatpush3.bf16.msra.mxu0 %v17906_v54 }
  0xe0   : > { %v17623_v59 = vpop.f32.mrf.mxu0  ;;  %17718 = vmatmul.mubr.msk.bf16.gmra.mxu0 %vm801_vm2, %v17885_v56 }
  0xe1   : > { %17721 = vmatprep.mubr.msk.bf16.mxu0 %vm801_vm2, %v17886_v57  ;;  %v1044_v0 = vadd.f32 %v17623_v59, %v19067_v58 }
  0xe2   : > { %v1035_v62 = vpop.f32.mrf.mxu0 }
  0xe3   : > { %v1036_v4 = vadd.f32 %v19067_v58, %v1035_v62  ;;  %v1548_v11 = vmax.f32 %v1044_v0, 0.0 }
  0xe4   : > { %v17624_v5 = vpop.f32.mrf.mxu0 }
  0xe5   : > { %v1047_v12 = vadd.f32 %v17624_v5, %v19067_v58  ;;  %v1546_v15 = vmax.f32 %v1036_v4, 0.0 }
  0xe6   : > { %v1038_v10 = vpop.f32.mrf.mxu0 }
  0xe7   : > { %v19086_v18 = vadd.f32 %v19067_v58, %v1038_v10  ;;  %v1549_v24 = vmax.f32 %v1047_v12, 0.0 }
  0xe8   : > { %v17627_v16 = vpop.f32.mrf.mxu0  ;;  %17722 = vmatmul.mubr.msk.bf16.gmra.mxu0 %vm801_vm2, %v17887_v6 }
  0xe9   : > { %v1060_v19 = vadd.f32 %v17627_v16, %v19067_v58  ;;  %17725 = vmatprep.mubr.msk.bf16.mxu0 %vm801_vm2, %v17888_v8  ;;  %v1547_v29 = vmax.f32 %v19086_v18, 0.0 }
  0xea   : > { %v1051_v22 = vpop.f32.mrf.mxu0 }
  0xeb   : > { %v1552_v25 = vmax.f32 %v1060_v19, 0.0  ;;  %v1052_v27 = vadd.f32 %v19067_v58, %v1051_v22 }
  0xec   : > { %v17628_v28 = vpop.f32.mrf.mxu0 }
  0xed   : > { %v1676_v30 = vmax.f32 %v1548_v11, %v1552_v25  ;;  %v1550_v31 = vmax.f32 %v1052_v27, 0.0  ;;  %v1063_v32 = vadd.f32 %v17628_v28, %v19067_v58 }
  0xee   : > { %v1054_v35 = vpop.f32.mrf.mxu0 }
  0xef   : > { %v1836_v36 = vcombine.high %v1676_v30, %v1676_v30  ;;  %v1843_v37 = vrot.slane %v1676_v30, %v19095_v26  ;;  %v1674_v38 = vmax.f32 %v1546_v15, %v1550_v31  ;;  %v1553_v39 = vmax.f32 %v1063_v32, 0.0 }
  0xf0   : > { %v19103_v40 = vadd.f32 %v19067_v58, %v1054_v35  ;;  %v17631_v41 = vpop.f32.mrf.mxu0  ;;  %17726 = vmatmul.mubr.msk.bf16.gmra.mxu0 %vm801_vm2, %v17889_v23 }
  0xf1   : > { %v1850_v42 = vrot.slane %v1836_v36, %v19095_v26  ;;  %v1851_v43 = vcombine.high %v1843_v37, %v1843_v37  ;;  %v15254_v44 = vrot.slane %v1843_v37, 9  ;;  %v1802_v45 = vcombine.high %v1674_v38, %v1674_v38  ;;  %17729 = vmatprep.mubr.msk.bf16.mxu0 %vm801_vm2, %v17890_v34  ;;  %v17893_v34 = vld [vmem:[%s18834_s29 + $0x1c8] sm:$0xff]  }
  0xf2   : > { %v1809_v46 = vrot.slane %v1674_v38, %v19095_v26  ;;  %v1677_v47 = vmax.f32 %v1549_v24, %v1553_v39  ;;  %v1551_v48 = vmax.f32 %v19103_v40, 0.0  ;;  %v19111_v49 = vadd.f32 %v17631_v41, %v19067_v58  ;;  %v19119_v8 = vpop.f32.mrf.mxu0 }
  0xf3   : > { %v1852_v50 = vcombine.high %v1850_v42, %v1850_v42  ;;  %v15255_v51 = vrot.slane %v1851_v43, 9  ;;  %v15256_v52 = vrot.slane %v1850_v42, 9  ;;  %v3922_v53 = vmax.f32 %v1843_v37, %v15254_v44  ;;  %v17894_v44 = vld [vmem:[%s18834_s29 + $0x1d0] sm:$0xff]  }
  0xf4   : > { %v1816_v55 = vrot.slane %v1802_v45, %v19095_v26  ;;  %v1817_v56 = vcombine.high %v1809_v46, %v1809_v46  ;;  %v15246_v57 = vrot.slane %v1809_v46, 9  ;;  %v1853_v59 = vcombine.high %v1677_v47, %v1677_v47  ;;  %v19130_v32 = vpop.f32.mrf.mxu0 }
  0xf5   : > { %v15257_v61 = vrot.slane %v1852_v50, 9  ;;  %v3923_v62 = vmax.f32 %v1851_v43, %v15255_v51  ;;  %v3924_v0 = vmax.f32 %v1850_v42, %v15256_v52  ;;  %v16619_v1 = vpack.c.bf16 %v3922_v53, %v3922_v53 }
  0xf6   : > { %v1818_v3 = vcombine.high %v1816_v55, %v1816_v55  ;;  %v15247_v4 = vrot.slane %v1817_v56, 9  ;;  %v15248_v5 = vrot.slane %v1816_v55, 9  ;;  %v3914_v6 = vmax.f32 %v1809_v46, %v15246_v57 }
  0xf7   : > { %v3925_v9 = vmax.f32 %v1852_v50, %v15257_v61  ;;  %v16620_v10 = vpack.c.bf16 %v3923_v62, %v3923_v62  ;;  %v16621_v11 = vpack.c.bf16 %v3924_v0, %v3924_v0  ;;  %v19121_v12 = vunpack.c.l.b16 %v16619_v1 }
  0xf8   : > { %v15249_v13 = vrot.slane %v1818_v3, 9  ;;  %v3915_v15 = vmax.f32 %v1817_v56, %v15247_v4  ;;  %v3916_v16 = vmax.f32 %v1816_v55, %v15248_v5  ;;  %v16611_v19 = vpack.c.bf16 %v3914_v6, %v3914_v6  ;;  %17730 = vmatmul.mubr.msk.bf16.gmra.mxu0 %vm801_vm2, %v17891_v60 }
  0xf9   : > { %v16622_v22 = vpack.c.bf16 %v3925_v9, %v3925_v9  ;;  %v19124_v23 = vunpack.c.l.b16 %v16620_v10  ;;  %v19126_v24 = vunpack.c.l.b16 %v16621_v11  ;;  %v5525_v25 = vrot.slane %v19121_v12, 7  ;;  %17733 = vmatprep.mubr.msk.bf16.mxu0 %vm801_vm2, %v17892_v2  ;;  %v17895_v10 = vld [vmem:[%s18834_s29 + $0x1d8] sm:$0xff]  }
  0xfa   : > { %v3917_v27 = vmax.f32 %v1818_v3, %v15249_v13  ;;  %v16612_v28 = vpack.c.bf16 %v3915_v15, %v3915_v15  ;;  %v16613_v30 = vpack.c.bf16 %v3916_v16, %v3916_v16  ;;  %v5250_v31 = vunpack.c.l.b16 %v16611_v19  ;;  %v17896_v19 = vld [vmem:[%s18834_s29 + $0x1e0] sm:$0xff]  }
  0xfb   : > { %v19133_v35 = vunpack.c.l.b16 %v16622_v22  ;;  %v5528_v36 = vrot.slane %v19124_v23, 6  ;;  %v5530_v37 = vrot.slane %v19126_v24, 5  ;;  %v1860_v38 = vrot.slane %v1677_v47, %v19095_v26  ;;  %v1070_v47 = vpop.f32.mrf.mxu0 }
  0xfc   : > { %v16614_v39 = vpack.c.bf16 %v3917_v27, %v3917_v27  ;;  %v5251_v41 = vunpack.c.l.b16 %v16612_v28  ;;  %v5252_v42 = vunpack.c.l.b16 %v16613_v30  ;;  %v5506_v43 = vrot.slane %v5250_v31, 7 }
  0xfd   : > { %v5532_v45 = vrot.slane %v19133_v35, 4  ;;  %v1867_v46 = vrot.slane %v1853_v59, %v19095_v26  ;;  %v1868_v50 = vcombine.high %v1860_v38, %v1860_v38  ;;  %v15258_v51 = vrot.slane %v1860_v38, 9  ;;  %v17635_v9 = vpop.f32.mrf.mxu0 }
  0xfe   : > { %v5253_v52 = vunpack.c.l.b16 %v16614_v39  ;;  %v5507_v53 = vrot.slane %v5251_v41, 6  ;;  %v5510_v54 = vrot.slane %v5252_v42, 5  ;;  %v1675_v55 = vmax.f32 %v1547_v29, %v1551_v48  ;;  %v6052_v48 = vld [vmem:[#allocation2 + $0x14] sm:$0x1] }
  0xff   : > { %v1869_v56 = vcombine.high %v1867_v46, %v1867_v46  ;;  %v15259_v57 = vrot.slane %v1868_v50, 9  ;;  %v15260_v60 = vrot.slane %v1867_v46, 9  ;;  %v3926_v61 = vmax.f32 %v1860_v38, %v15258_v51 }
 0x100   : > { %v5509_v62 = vsel %vm5508_vm5, %v5507_v53, %v5506_v43  ;;  %v5513_v0 = vrot.slane %v5253_v52, 4  ;;  %v1819_v59 = vcombine.high %v1675_v55, %v1675_v55  ;;  %v1826_v1 = vrot.slane %v1675_v55, %v19095_v26  ;;  %17734 = vmatmul.mubr.msk.bf16.gmra.mxu0 %vm801_vm2, %v17893_v34 }
 0x101   : > { %v5512_v2 = vsel %vm5511_vm6, %v5510_v54, %v5509_v62  ;;  %v15261_v40 = vrot.slane %v1869_v56, 9  ;;  %v3927_v3 = vmax.f32 %v1868_v50, %v15259_v57  ;;  %v3928_v18 = vmax.f32 %v1867_v46, %v15260_v60  ;;  %17737 = vmatprep.mubr.msk.bf16.mxu0 %vm801_vm2, %v17894_v44  ;;  %v1083_v50 = vpop.f32.mrf.mxu0 }
 0x102   : > { %v16623_v29 = vpack.c.bf16 %v3926_v61, %v3926_v61  ;;  %v1833_v4 = vrot.slane %v1819_v59, %v19095_v26  ;;  %v1834_v5 = vcombine.high %v1826_v1, %v1826_v1  ;;  %v15250_v6 = vrot.slane %v1826_v1, 9 }
 0x103   : > { %v3929_v11 = vmax.f32 %v1869_v56, %v15261_v40  ;;  %v16624_v13 = vpack.c.bf16 %v3927_v3, %v3927_v3  ;;  %v16625_v15 = vpack.c.bf16 %v3928_v18, %v3928_v18  ;;  %v5515_v16 = vsel %vm5514_vm7, %v5513_v0, %v5512_v2  ;;  %v17636_v3 = vpop.f32.mrf.mxu0  ;;  %v17897_v18 = vld [vmem:[%s18834_s29 + $0x1e8] sm:$0xff]  }
 0x104   : > { %v19154_v22 = vunpack.c.l.b16 %v16623_v29  ;;  %v1835_v28 = vcombine.high %v1833_v4, %v1833_v4  ;;  %v15251_v30 = vrot.slane %v1834_v5, 9  ;;  %v15252_v31 = vrot.slane %v1833_v4, 9 }
 0x105   : > { %v19162_v34 = vunpack.c.l.b16 %v16624_v13  ;;  %v19164_v38 = vunpack.c.l.b16 %v16625_v15  ;;  %v16867_v39 = vpack.c.bf16 %v3929_v11, %v3929_v11  ;;  %v3918_v41 = vmax.f32 %v1826_v1, %v15250_v6  ;;  %v6045_v13 = vld [vmem:[#allocation2 + $0xc] sm:$0xf] }
 0x106   : > { %v5534_v42 = vrot.slane %v19154_v22, 3  ;;  %v15253_v43 = vrot.slane %v1835_v28, 9  ;;  %v3919_v44 = vmax.f32 %v1834_v5, %v15251_v30  ;;  %v3920_v46 = vmax.f32 %v1833_v4, %v15252_v31  ;;  %v1086_v30 = vpop.f32.mrf.mxu0 }
 0x107   : > { %v5536_v51 = vrot.slane %v19162_v34, 2  ;;  %v5538_v52 = vrot.slane %v19164_v38, 1  ;;  %v6053_v53 = vsel %vm19158_vm12, %v16867_v39, %v6052_v48  ;;  %v16615_v54 = vpack.c.bf16 %v3918_v41, %v3918_v41 }
 0x108   : > { %6054 = vst [vmem:[#allocation2 + $0x14] sm:$0x1] %v6053_v53  ;;  %v3921_v55 = vmax.f32 %v1835_v28, %v15253_v43  ;;  %v16616_v56 = vpack.c.bf16 %v3919_v44, %v3919_v44  ;;  %v16617_v57 = vpack.c.bf16 %v3920_v46, %v3920_v46  ;;  %v1556_v60 = vmax.f32 %v19111_v49, 0.0  ;;  %17738 = vmatmul.mubr.msk.bf16.gmra.mxu0 %vm801_vm2, %v17895_v10  ;;  %v17900_v10 = vld [vmem:[%s18834_s29 + $0x1f0] sm:$0xff]  }
 0x109   : > { %v5254_v61 = vunpack.c.l.b16 %v16615_v54  ;;  %v1068_v62 = vadd.f32 %v19067_v58, %v19119_v8  ;;  %v1079_v0 = vadd.f32 %v19130_v32, %v19067_v58  ;;  %v19178_v59 = vadd.f32 %v19067_v58, %v1070_v47  ;;  %17741 = vmatprep.mubr.msk.bf16.mxu0 %vm801_vm2, %v17896_v19 }
 0x10a   : > { %v16618_v1 = vpack.c.bf16 %v3921_v55, %v3921_v55  ;;  %v5255_v2 = vunpack.c.l.b16 %v16616_v56  ;;  %v5256_v40 = vunpack.c.l.b16 %v16617_v57  ;;  %v1092_v49 = vadd.f32 %v17635_v9, %v19067_v58  ;;  %v17639_v57 = vpop.f32.mrf.mxu0 }
 0x10b   : > { %v5516_v29 = vrot.slane %v5254_v61, 3  ;;  %v1554_v48 = vmax.f32 %v1068_v62, 0.0  ;;  %v1557_v4 = vmax.f32 %v1079_v0, 0.0  ;;  %v1555_v8 = vmax.f32 %v19178_v59, 0.0 }
 0x10c   : > { %v5257_v5 = vunpack.c.l.b16 %v16618_v1  ;;  %v5519_v32 = vrot.slane %v5255_v2, 2  ;;  %v5522_v6 = vrot.slane %v5256_v40, 1  ;;  %v1560_v47 = vmax.f32 %v1092_v49, 0.0 }
 0x10d   : > { %v5518_v11 = vsel %vm5517_vm9, %v5516_v29, %v5515_v16  ;;  %v1084_v15 = vadd.f32 %v19067_v58, %v1083_v50  ;;  %v1095_v19 = vadd.f32 %v17636_v3, %v19067_v58  ;;  %v19213_v50 = vadd.f32 %v19067_v58, %v1086_v30 }
 0x10e   : > { %v5521_v9 = vsel %vm5520_vm10, %v5519_v32, %v5518_v11  ;;  %v5527_v22 = vsel %vm5526_vm11, %v5525_v25, %v5257_v5  ;;  %v1680_v28 = vmax.f32 %v1556_v60, %v1560_v47  ;;  %v17901_v60 = vld [vmem:[%s18834_s29 + $0x1f8] sm:$0xff]   ;;  %v19228_v32 = vpop.f32.mrf.mxu0  ;;  %v17912_v11 = vld [vmem:[%s23690_s3 + $0x110] sm:$0xff]  }
 0x10f   : > { %v5524_v31 = vsel %vm5523_vm13, %v5522_v6, %v5521_v9  ;;  %v5529_v34 = vsel %vm5508_vm5, %v5528_v36, %v5527_v22  ;;  %v1558_v39 = vmax.f32 %v1084_v15, 0.0  ;;  %v1561_v41 = vmax.f32 %v1095_v19, 0.0  ;;  %17751 = vmatprep.subr.bf16.mxu0 %v17912_v11 }
 0x110   : > { %v5531_v12 = vsel %vm5511_vm6, %v5530_v37, %v5529_v34  ;;  %v5945_v25 = vpack.c.b16 %v5524_v31, %v5524_v31  ;;  %v1904_v43 = vcombine.high %v1680_v28, %v1680_v28  ;;  %v1911_v44 = vrot.slane %v1680_v28, %v19095_v26  ;;  %17742 = vmatmul.mubr.msk.bf16.gmra.mxu0 %vm801_vm2, %v17897_v18 }
 0x111   : > { %v5533_v23 = vsel %vm5514_vm7, %v5532_v45, %v5531_v12  ;;  %v1678_v36 = vmax.f32 %v1554_v48, %v1558_v39  ;;  %v19210_v46 = vmax.f32 %v1557_v4, %v1561_v41  ;;  %17745 = vmatprep.mubr.msk.bf16.mxu0 %vm801_vm2, %v17900_v10  ;;  %v1559_v31 = vmax.f32 %v19213_v50, 0.0  ;;  %17752 = vmatpush3.bf16.msra.mxu0 %v17912_v11  ;;  %v6059_v11 = vld [vmem:[#allocation2 + $0x20] sm:$0x1] }
 0x112   : > { %v5535_v24 = vsel %vm5517_vm9, %v5534_v42, %v5533_v23  ;;  %v6046_v37 = vsel %vm19198_vm15, %v5945_v25, %v6045_v13  ;;  %v1918_v53 = vrot.slane %v1904_v43, %v19095_v26  ;;  %v1919_v54 = vcombine.high %v1911_v44, %v1911_v44  ;;  %v19242_v25 = vpop.f32.mrf.mxu0 }
 0x113   : > { %v5537_v35 = vsel %vm5520_vm10, %v5536_v51, %v5535_v24  ;;  %6047 = vst [vmem:[#allocation2 + $0xc] sm:$0xf] %v6046_v37  ;;  %v15270_v45 = vrot.slane %v1911_v44, 9  ;;  %v1870_v55 = vcombine.high %v1678_v36, %v1678_v36  ;;  %v1877_v56 = vrot.slane %v1678_v36, %v19095_v26 }
 0x114   : > { %v5539_v61 = vsel %vm5523_vm13, %v5538_v52, %v5537_v35  ;;  %v1920_v42 = vcombine.high %v1918_v53, %v1918_v53  ;;  %v15271_v62 = vrot.slane %v1919_v54, 9  ;;  %v15272_v0 = vrot.slane %v1918_v53, 9 }
 0x115   : > { %v5946_v1 = vpack.c.b16 %v5539_v61, %v5539_v61  ;;  %v3938_v2 = vmax.f32 %v1911_v44, %v15270_v45  ;;  %v1884_v40 = vrot.slane %v1870_v55, %v19095_v26  ;;  %v1885_v49 = vcombine.high %v1877_v56, %v1877_v56 }
 0x116   : > { %v15273_v51 = vrot.slane %v1920_v42, 9  ;;  %v3939_v3 = vmax.f32 %v1919_v54, %v15271_v62  ;;  %v3940_v18 = vmax.f32 %v1918_v53, %v15272_v0  ;;  %v15262_v29 = vrot.slane %v1877_v56, 9 }
 0x117   : > { %6048 = vst.msk [vmem:[#allocation2 + $0x10] sm:$0xf] %vm4170_vm4, %v5946_v1  ;;  %v16635_v48 = vpack.c.bf16 %v3938_v2, %v3938_v2  ;;  %v1886_v4 = vcombine.high %v1884_v40, %v1884_v40  ;;  %v15263_v5 = vrot.slane %v1885_v49, 9  ;;  %v15264_v38 = vrot.slane %v1884_v40, 9 }
 0x118   : > { %v3941_v52 = vmax.f32 %v1920_v42, %v15273_v51  ;;  %v16636_v6 = vpack.c.bf16 %v3939_v3, %v3939_v3  ;;  %v16637_v47 = vpack.c.bf16 %v3940_v18, %v3940_v18  ;;  %v3930_v10 = vmax.f32 %v1877_v56, %v15262_v29  ;;  %17746 = vmatmul.mubr.msk.bf16.gmra.mxu0 %vm801_vm2, %v17901_v60  ;;  %v19257_v42 = vpop.f32.mrf.mxu0  ;;  %v17915_v29 = vld [vmem:[%s23690_s3 + $0x108] sm:$0xff]  }
 0x119   : > { %v19234_v13 = vunpack.c.l.b16 %v16635_v48  ;;  %v15265_v15 = vrot.slane %v1886_v4, 9  ;;  %v3931_v19 = vmax.f32 %v1885_v49, %v15263_v5  ;;  %v3932_v9 = vmax.f32 %v1884_v40, %v15264_v38  ;;  %17753 = vmatprep.subr.bf16.mxu0 %v17915_v29 }
 0x11a   : > { %v16638_v22 = vpack.c.bf16 %v3941_v52, %v3941_v52  ;;  %v19236_v28 = vunpack.c.l.b16 %v16636_v6  ;;  %v16627_v30 = vpack.c.bf16 %v3930_v10, %v3930_v10  ;;  %v19240_v12 = vadd.f32 %v17639_v57, %v19067_v58  ;;  %v17643_v52 = vpop.f32.mrf.mxu0  ;;  %v17916_v6 = vld [vmem:[%s23690_s3 + $0x100] sm:$0xff]   ;;  %17754 = vmatpush3.bf16.msra.mxu0 %v17915_v29 }
 0x11b   : > { %v3933_v34 = vmax.f32 %v1886_v4, %v15265_v15  ;;  %v16628_v39 = vpack.c.bf16 %v3931_v19, %v3931_v19  ;;  %v16629_v41 = vpack.c.bf16 %v3932_v9, %v3932_v9  ;;  %v19244_v43 = vunpack.c.l.b16 %v16637_v47  ;;  %17755 = vmatprep.subr.bf16.mxu0 %v17916_v6 }
 0x11c   : > { %v19246_v44 = vunpack.c.l.b16 %v16638_v22  ;;  %v5553_v23 = vrot.slane %v19234_v13, 7  ;;  %v5266_v36 = vunpack.c.l.b16 %v16627_v30  ;;  %v1921_v53 = vcombine.high %v19210_v46, %v19210_v46 }
 0x11d   : > { %v16630_v24 = vpack.c.bf16 %v3933_v34, %v3933_v34  ;;  %v5267_v37 = vunpack.c.l.b16 %v16628_v39  ;;  %v5268_v50 = vunpack.c.l.b16 %v16629_v41  ;;  %v5555_v54 = vrot.slane %v19236_v28, 6 }
 0x11e   : > { %v5540_v35 = vrot.slane %v5266_v36, 7  ;;  %v1928_v45 = vrot.slane %v19210_v46, %v19095_v26  ;;  %v1679_v55 = vmax.f32 %v1555_v8, %v1559_v31  ;;  %v1935_v61 = vrot.slane %v1921_v53, %v19095_v26  ;;  %17756 = vmatpush3.bf16.msra.mxu0 %v17916_v6  ;;  %v19281_v6 = vld [vmem:[%s23689_s2] ss:$0 sm:$0xff] }
 0x11f   : > { %v5269_v56 = vunpack.c.l.b16 %v16630_v24  ;;  %v5541_v57 = vrot.slane %v5267_v37, 6  ;;  %v5543_v60 = vrot.slane %v5268_v50, 5  ;;  %vm7731_vm2 = vcmask 523264  }
 0x120   : > { %v1936_v62 = vcombine.high %v1928_v45, %v1928_v45  ;;  %v15274_v0 = vrot.slane %v1928_v45, 9  ;;  %v1887_v1 = vcombine.high %v1679_v55, %v1679_v55  ;;  %v1894_v2 = vrot.slane %v1679_v55, %v19095_v26 }
 0x121   : > { %v5542_v40 = vsel %vm5508_vm5, %v5541_v57, %v5540_v35  ;;  %v5545_v49 = vrot.slane %v5269_v56, 4  ;;  %v1937_v51 = vcombine.high %v1935_v61, %v1935_v61  ;;  %v15276_v46 = vrot.slane %v1935_v61, 9  ;;  %v1115_v35 = vpop.f32.mrf.mxu0 }
 0x122   : > { %v5544_v59 = vsel %vm5511_vm6, %v5543_v60, %v5542_v40  ;;  %v15275_v8 = vrot.slane %v1936_v62, 9  ;;  %v3942_v3 = vmax.f32 %v1928_v45, %v15274_v0  ;;  %v1901_v18 = vrot.slane %v1887_v1, %v19095_v26 }
 0x123   : > { %v15277_v48 = vrot.slane %v1937_v51, 9  ;;  %v3944_v4 = vmax.f32 %v1935_v61, %v15276_v46  ;;  %v1902_v5 = vcombine.high %v1894_v2, %v1894_v2  ;;  %v15266_v38 = vrot.slane %v1894_v2, 9 }
 0x124   : > { %v3943_v47 = vmax.f32 %v1936_v62, %v15275_v8  ;;  %v16639_v10 = vpack.c.bf16 %v3942_v3, %v3942_v3  ;;  %v1903_v15 = vcombine.high %v1901_v18, %v1901_v18  ;;  %v15268_v19 = vrot.slane %v1901_v18, 9  ;;  %v17644_v3 = vpop.f32.mrf.mxu0 }
 0x125   : > { %v3945_v9 = vmax.f32 %v1937_v51, %v15277_v48  ;;  %v16641_v22 = vpack.c.bf16 %v3944_v4, %v3944_v4  ;;  %v15267_v30 = vrot.slane %v1902_v5, 9  ;;  %v3934_v31 = vmax.f32 %v1894_v2, %v15266_v38 }
 0x126   : > { %v16640_v34 = vpack.c.bf16 %v3943_v47, %v3943_v47  ;;  %v5278_v39 = vunpack.c.l.b16 %v16639_v10  ;;  %v15269_v41 = vrot.slane %v1903_v15, 9  ;;  %v3936_v36 = vmax.f32 %v1901_v18, %v15268_v19  ;;  %v6055_v47 = vld [vmem:[#allocation2 + $0x18] sm:$0xf] }
 0x127   : > { %v5280_v24 = vunpack.c.l.b16 %v16641_v22  ;;  %v16868_v37 = vpack.c.bf16 %v3945_v9, %v3945_v9  ;;  %v3935_v50 = vmax.f32 %v1902_v5, %v15267_v30  ;;  %v16631_v53 = vpack.c.bf16 %v3934_v31, %v3934_v31 }
 0x128   : > { %v5557_v45 = vrot.slane %v19244_v43, 5  ;;  %v5279_v55 = vunpack.c.l.b16 %v16640_v34  ;;  %v3937_v56 = vmax.f32 %v1903_v15, %v15269_v41  ;;  %v16633_v57 = vpack.c.bf16 %v3936_v36, %v3936_v36 }
 0x129   : > { %v5559_v60 = vrot.slane %v19246_v44, 4  ;;  %v6060_v61 = vsel %vm19158_vm12, %v16868_v37, %v6059_v11  ;;  %v16632_v62 = vpack.c.bf16 %v3935_v50, %v3935_v50  ;;  %v5270_v0 = vunpack.c.l.b16 %v16631_v53 }
 0x12a   : > { %v5561_v1 = vrot.slane %v5278_v39, 3  ;;  %6061 = vst [vmem:[#allocation2 + $0x20] sm:$0x1] %v6060_v61  ;;  %v16634_v2 = vpack.c.bf16 %v3937_v56, %v3937_v56  ;;  %v5272_v40 = vunpack.c.l.b16 %v16633_v57  ;;  %v5546_v51 = vsel %vm5514_vm7, %v5545_v49, %v5544_v59 }
 0x12b   : > { %v5565_v46 = vrot.slane %v5280_v24, 1  ;;  %v5271_v8 = vunpack.c.l.b16 %v16632_v62  ;;  %v5547_v43 = vrot.slane %v5270_v0, 3  ;;  %v5563_v18 = vrot.slane %v5279_v55, 2 }
 0x12c   : > { %v5273_v29 = vunpack.c.l.b16 %v16634_v2  ;;  %v5551_v48 = vrot.slane %v5272_v40, 1  ;;  %v1100_v44 = vadd.f32 %v19067_v58, %v19228_v32  ;;  %v1564_v38 = vmax.f32 %v19240_v12, 0.0 }
 0x12d   : > { %v5548_v4 = vsel %vm5517_vm9, %v5547_v43, %v5546_v51  ;;  %v5549_v5 = vrot.slane %v5271_v8, 2  ;;  %v1124_v49 = vadd.f32 %v19281_v6, %v17643_v52  ;;  %v1111_v58 = vadd.f32 %v19281_v6, %v19242_v25 }
 0x12e   : > { %v5554_v59 = vsel %vm5526_vm11, %v5553_v23, %v5273_v29  ;;  %v19291_v32 = vadd.f32 %v19281_v6, %v19257_v42  ;;  %v1116_v12 = vadd.f32 %v19281_v6, %v1115_v35  ;;  %v1127_v13 = vadd.f32 %v19281_v6, %v17644_v3  ;;  %v1118_v23 = vpop.f32.mrf.mxu0 }
 0x12f   : > { %v5550_v10 = vsel %vm5520_vm10, %v5549_v5, %v5548_v4  ;;  %v5556_v52 = vsel %vm5508_vm5, %v5555_v54, %v5554_v59  ;;  %v1568_v11 = vmax.f32 %v1124_v49, 0.0  ;;  %v1562_v19 = vmax.f32 %v1100_v44, 0.0 }
 0x130   : > { %v5552_v15 = vsel %vm5523_vm13, %v5551_v48, %v5550_v10  ;;  %v5558_v25 = vsel %vm5511_vm6, %v5557_v45, %v5556_v52  ;;  %v1566_v9 = vmax.f32 %v1116_v12, 0.0  ;;  %v1569_v31 = vmax.f32 %v1127_v13, 0.0  ;;  %v17647_v2 = vpop.f32.mrf.mxu0 }
 0x131   : > { %v5560_v42 = vsel %vm5514_vm7, %v5559_v60, %v5558_v25  ;;  %v5948_v22 = vpack.c.b16 %v5552_v15, %v5552_v15  ;;  %v1684_v30 = vmax.f32 %v1564_v38, %v1568_v11  ;;  %v1565_v28 = vmax.f32 %v1111_v58, 0.0 }
 0x132   : > { %v5562_v34 = vsel %vm5517_vm9, %v5561_v1, %v5560_v42  ;;  %v1682_v39 = vmax.f32 %v1562_v19, %v1566_v9  ;;  %v19304_v54 = vadd.f32 %v19281_v6, %v1118_v23  ;;  %v19315_v58 = vpop.f32.mrf.mxu0  ;;  %v19325_v42 = vor.u32 %v19090_v20, %v6483_v17 }
 0x133   : > { %v5564_v41 = vsel %vm5520_vm10, %v5563_v18, %v5562_v34  ;;  %v6056_v36 = vsel %vm19198_vm15, %v5948_v22, %v6055_v47  ;;  %v1972_v24 = vcombine.high %v1684_v30, %v1684_v30  ;;  %v1979_v37 = vrot.slane %v1684_v30, %v19095_v26 }
 0x134   : > { %v5566_v50 = vsel %vm5523_vm13, %v5565_v46, %v5564_v41  ;;  %6057 = vst [vmem:[#allocation2 + $0x18] sm:$0xf] %v6056_v36  ;;  %v1938_v53 = vcombine.high %v1682_v39, %v1682_v39  ;;  %v1945_v35 = vrot.slane %v1682_v39, %v19095_v26  ;;  %v1685_v45 = vmax.f32 %v1565_v28, %v1569_v31  ;;  %v19334_v39 = vpop.f32.mrf.mxu0 }
 0x135   : > { %v5949_v55 = vpack.c.b16 %v5566_v50, %v5566_v50  ;;  %v1986_v56 = vrot.slane %v1972_v24, %v19095_v26  ;;  %v1987_v57 = vcombine.high %v1979_v37, %v1979_v37  ;;  %v15286_v60 = vrot.slane %v1979_v37, 9 }
 0x136   : > { %v1952_v61 = vrot.slane %v1938_v53, %v19095_v26  ;;  %v1953_v62 = vcombine.high %v1945_v35, %v1945_v35  ;;  %v15278_v0 = vrot.slane %v1945_v35, 9  ;;  %v1989_v1 = vcombine.high %v1685_v45, %v1685_v45 }
 0x137   : > { %6058 = vst.msk [vmem:[#allocation2 + $0x1c] sm:$0xf] %vm4170_vm4, %v5949_v55  ;;  %v1988_v40 = vcombine.high %v1986_v56, %v1986_v56  ;;  %v15287_v51 = vrot.slane %v1987_v57, 9  ;;  %v15288_v46 = vrot.slane %v1986_v56, 9  ;;  %v3954_v8 = vmax.f32 %v1979_v37, %v15286_v60 }
 0x138   : > { %v1954_v43 = vcombine.high %v1952_v61, %v1952_v61  ;;  %v15279_v3 = vrot.slane %v1953_v62, 9  ;;  %v15280_v18 = vrot.slane %v1952_v61, 9  ;;  %v3946_v29 = vmax.f32 %v1945_v35, %v15278_v0 }
 0x139   : > { %v15289_v48 = vrot.slane %v1988_v40, 9  ;;  %v3955_v44 = vmax.f32 %v1987_v57, %v15287_v51  ;;  %v3956_v4 = vmax.f32 %v1986_v56, %v15288_v46  ;;  %v16651_v5 = vpack.c.bf16 %v3954_v8, %v3954_v8 }
 0x13a   : > { %v15281_v38 = vrot.slane %v1954_v43, 9  ;;  %v3947_v49 = vmax.f32 %v1953_v62, %v15279_v3  ;;  %v3948_v59 = vmax.f32 %v1952_v61, %v15280_v18  ;;  %v16643_v47 = vpack.c.bf16 %v3946_v29, %v3946_v29  ;;  %v6066_v3 = vld [vmem:[#allocation2 + $0x2c] sm:$0x1] }
 0x13b   : > { %v3957_v12 = vmax.f32 %v1988_v40, %v15289_v48  ;;  %v16652_v10 = vpack.c.bf16 %v3955_v44, %v3955_v44  ;;  %v16653_v52 = vpack.c.bf16 %v3956_v4, %v3956_v4  ;;  %v19317_v11 = vunpack.c.l.b16 %v16651_v5 }
 0x13c   : > { %v3949_v13 = vmax.f32 %v1954_v43, %v15281_v38  ;;  %v16644_v23 = vpack.c.bf16 %v3947_v49, %v3947_v49  ;;  %v16645_v15 = vpack.c.bf16 %v3948_v59, %v3948_v59  ;;  %v5282_v25 = vunpack.c.l.b16 %v16643_v47 }
 0x13d   : > { %v19319_v19 = vunpack.c.l.b16 %v16652_v10  ;;  %v1567_v9 = vmax.f32 %v19304_v54, 0.0  ;;  %v19329_v22 = vrot.slane %v6490_v21, 1  ;;  %v1563_v30 = vmax.f32 %v19291_v32, 0.0 }
 0x13e   : > { %v16654_v31 = vpack.c.bf16 %v3957_v12, %v3957_v12  ;;  %v19332_v34 = vunpack.c.l.b16 %v16653_v52  ;;  %v5283_v28 = vunpack.c.l.b16 %v16644_v23  ;;  %v5580_v41 = vrot.slane %v19317_v11, 7 }
 0x13f   : > { %v16646_v54 = vpack.c.bf16 %v3949_v13, %v3949_v13  ;;  %v1996_v36 = vrot.slane %v1685_v45, %v19095_v26  ;;  %v19339_v17 = vadd.f32 %v19281_v6, %v17647_v2  ;;  %v5582_v7 = vrot.slane %v19319_v19, 6  ;;  %v19346_v45 = vpop.f32.mrf.mxu0 }
 0x140   : > { %v5284_v20 = vunpack.c.l.b16 %v16645_v15  ;;  %v5567_v21 = vrot.slane %v5282_v25, 7  ;;  %v2003_v32 = vrot.slane %v1989_v1, %v19095_v26  ;;  %v5568_v24 = vrot.slane %v5283_v28, 6 }
 0x141   : > { %v2004_v37 = vcombine.high %v1996_v36, %v1996_v36  ;;  %v15290_v50 = vrot.slane %v1996_v36, 9  ;;  %v1683_v53 = vmax.f32 %v1563_v30, %v1567_v9  ;;  %v19343_v35 = vunpack.c.l.b16 %v16654_v31  ;;  %v17651_v5 = vpop.f32.mrf.mxu0 }
 0x142   : > { %v5584_v55 = vrot.slane %v19332_v34, 5  ;;  %v2005_v56 = vcombine.high %v2003_v32, %v2003_v32  ;;  %v15292_v57 = vrot.slane %v2003_v32, 9  ;;  %v5285_v60 = vunpack.c.l.b16 %v16646_v54 }
 0x143   : > { %v15291_v61 = vrot.slane %v2004_v37, 9  ;;  %v3958_v62 = vmax.f32 %v1996_v36, %v15290_v50  ;;  %v1955_v0 = vcombine.high %v1683_v53, %v1683_v53  ;;  %v5570_v2 = vrot.slane %v5284_v20, 5  ;;  %v6225_v36 = vld [vmem:[#allocation2 + $0x10] sm:$0xf]  ;;  %v1147_v20 = vpop.f32.mrf.mxu0  ;;  %v6224_v50 = vld [vmem:[#allocation2 + $0xc] sm:$0xf] }
 0x144   : > { %v15293_v40 = vrot.slane %v2005_v56, 9  ;;  %v3960_v51 = vmax.f32 %v2003_v32, %v15292_v57  ;;  %v1962_v1 = vrot.slane %v1683_v53, %v19095_v26  ;;  %v5569_v46 = vsel %vm5508_vm5, %v5568_v24, %v5567_v21 }
 0x145   : > { %v3959_v8 = vmax.f32 %v2004_v37, %v15291_v61  ;;  %v16655_v43 = vpack.c.bf16 %v3958_v62, %v3958_v62  ;;  %v1969_v18 = vrot.slane %v1955_v0, %v19095_v26  ;;  %v5586_v38 = vrot.slane %v19343_v35, 4 }
 0x146   : > { %v3961_v29 = vmax.f32 %v2005_v56, %v15293_v40  ;;  %v16657_v48 = vpack.c.bf16 %v3960_v51, %v3960_v51  ;;  %v1970_v44 = vcombine.high %v1962_v1, %v1962_v1  ;;  %v15282_v4 = vrot.slane %v1962_v1, 9 }
 0x147   : > { %v16656_v49 = vpack.c.bf16 %v3959_v8, %v3959_v8  ;;  %v1971_v59 = vcombine.high %v1969_v18, %v1969_v18  ;;  %v15284_v47 = vrot.slane %v1969_v18, 9  ;;  %v5572_v12 = vrot.slane %v5285_v60, 4 }
 0x148   : > { %v16869_v10 = vpack.c.bf16 %v3961_v29, %v3961_v29  ;;  %v15283_v52 = vrot.slane %v1970_v44, 9  ;;  %v3950_v13 = vmax.f32 %v1962_v1, %v15282_v4  ;;  %v5571_v23 = vsel %vm5511_vm6, %v5570_v2, %v5569_v46  ;;  %v17652_v1 = vpop.f32.mrf.mxu0 }
 0x149   : > { %v5294_v15 = vunpack.c.l.b16 %v16655_v43  ;;  %v15285_v25 = vrot.slane %v1971_v59, 9  ;;  %v3952_v9 = vmax.f32 %v1969_v18, %v15284_v47  ;;  %v5296_v30 = vunpack.c.l.b16 %v16657_v48 }
 0x14a   : > { %v6067_v31 = vsel %vm19158_vm12, %v16869_v10, %v6066_v3  ;;  %v3951_v28 = vmax.f32 %v1970_v44, %v15283_v52  ;;  %v16647_v54 = vpack.c.bf16 %v3950_v13, %v3950_v13  ;;  %v5295_v21 = vunpack.c.l.b16 %v16656_v49 }
 0x14b   : > { %6068 = vst [vmem:[#allocation2 + $0x2c] sm:$0x1] %v6067_v31  ;;  %v3953_v32 = vmax.f32 %v1971_v59, %v15285_v25  ;;  %v16649_v24 = vpack.c.bf16 %v3952_v9, %v3952_v9  ;;  %v1572_v37 = vmax.f32 %v19339_v17, 0.0  ;;  %v5573_v56 = vsel %vm5514_vm7, %v5572_v12, %v5571_v23  ;;  %v1150_v9 = vpop.f32.mrf.mxu0 }
 0x14c   : > { %v16648_v53 = vpack.c.bf16 %v3951_v28, %v3951_v28  ;;  %v5286_v35 = vunpack.c.l.b16 %v16647_v54  ;;  %v5588_v57 = vrot.slane %v5294_v15, 3  ;;  %v19357_v62 = vcombine.low %v6224_v50, %v6225_v36 }
 0x14d   : > { %v16650_v60 = vpack.c.bf16 %v3953_v32, %v3953_v32  ;;  %v5288_v61 = vunpack.c.l.b16 %v16649_v24  ;;  %v5592_v0 = vrot.slane %v5296_v30, 1  ;;  %v1132_v51 = vadd.f32 %v19281_v6, %v19315_v58 }
 0x14e   : > { %23762 = vst [vmem:[#allocation9_spill] sm:$0xff] %v19357_v62  ;;  %v5287_v2 = vunpack.c.l.b16 %v16648_v53  ;;  %v5574_v40 = vrot.slane %v5286_v35, 3  ;;  %v5590_v46 = vrot.slane %v5295_v21, 2  ;;  %6883 = vrot.lane.b32.xlu0 %v19357_v62, %s18721_s14  ;;  %v6493_v43 = vsel %vm6481_vm0, %v19325_v42, %v19329_v22 }
 0x14f   : > { %v5289_v8 = vunpack.c.l.b16 %v16650_v60  ;;  %v5578_v17 = vrot.slane %v5288_v61, 1  ;;  %v1143_v29 = vadd.f32 %v19281_v6, %v19334_v39  ;;  %v1156_v58 = vadd.f32 %v19281_v6, %v17651_v5  ;;  %v6062_v5 = vld [vmem:[#allocation2 + $0x24] sm:$0xf] }
 0x150   : > { %v5575_v3 = vsel %vm5517_vm9, %v5574_v40, %v5573_v56  ;;  %v5576_v18 = vrot.slane %v5287_v2, 2  ;;  %v1148_v44 = vadd.f32 %v19281_v6, %v1147_v20  ;;  %v1159_v4 = vadd.f32 %v19281_v6, %v17652_v1 }
 0x151   : > { %v5581_v48 = vsel %vm5526_vm11, %v5580_v41, %v5289_v8  ;;  %v1570_v22 = vmax.f32 %v1132_v51, 0.0  ;;  %v1576_v59 = vmax.f32 %v1156_v58, 0.0  ;;  %v1573_v52 = vmax.f32 %v1143_v29, 0.0 }
 0x152   : > { %v5577_v49 = vsel %vm5520_vm10, %v5576_v18, %v5575_v3  ;;  %v5583_v42 = vsel %vm5508_vm5, %v5582_v7, %v5581_v48  ;;  %v1574_v41 = vmax.f32 %v1148_v44, 0.0  ;;  %v1577_v47 = vmax.f32 %v1159_v4, 0.0  ;;  %6674 = vrot.lane.b32.xlu0 %v6493_v43, %s18721_s14 }
 0x153   : > { %v5579_v39 = vsel %vm5523_vm13, %v5578_v17, %v5577_v49  ;;  %v5585_v11 = vsel %vm5511_vm6, %v5584_v55, %v5583_v42  ;;  %v1688_v19 = vmax.f32 %v1572_v37, %v1576_v59  ;;  %v19388_v13 = vadd.f32 %v19281_v6, %v19346_v45  ;;  %v17655_v42 = vpop.f32.mrf.mxu0 }
 0x154   : > { %v5587_v12 = vsel %vm5514_vm7, %v5586_v38, %v5585_v11  ;;  %v5951_v10 = vpack.c.b16 %v5579_v39, %v5579_v39  ;;  %v1686_v23 = vmax.f32 %v1570_v22, %v1574_v41  ;;  %v1689_v28 = vmax.f32 %v1573_v52, %v1577_v47 }
 0x155   : > { %v5589_v7 = vsel %vm5517_vm9, %v5588_v57, %v5587_v12  ;;  %v2040_v15 = vcombine.high %v1688_v19, %v1688_v19  ;;  %v2047_v25 = vrot.slane %v1688_v19, %v19095_v26  ;;  %v1151_v37 = vadd.f32 %v19281_v6, %v1150_v9 }
 0x156   : > { %v5591_v34 = vsel %vm5520_vm10, %v5590_v46, %v5589_v7  ;;  %v6063_v55 = vsel %vm19198_vm15, %v5951_v10, %v6062_v5  ;;  %v2006_v30 = vcombine.high %v1686_v23, %v1686_v23  ;;  %v2013_v31 = vrot.slane %v1686_v23, %v19095_v26 }
 0x157   : > { %v5593_v38 = vsel %vm5523_vm13, %v5592_v0, %v5591_v34  ;;  %6064 = vst [vmem:[#allocation2 + $0x24] sm:$0xf] %v6063_v55  ;;  %v2054_v45 = vrot.slane %v2040_v15, %v19095_v26  ;;  %v2055_v36 = vcombine.high %v2047_v25, %v2047_v25  ;;  %v15302_v20 = vrot.slane %v2047_v25, 9  ;;  %v1163_v34 = vpop.f32.mrf.mxu0 }
 0x158   : > { %v5952_v54 = vpack.c.b16 %v5593_v38, %v5593_v38  ;;  %v2020_v21 = vrot.slane %v2006_v30, %v19095_v26  ;;  %v2021_v32 = vcombine.high %v2013_v31, %v2013_v31  ;;  %v15294_v24 = vrot.slane %v2013_v31, 9 }
 0x159   : > { %v2056_v50 = vcombine.high %v2054_v45, %v2054_v45  ;;  %v15303_v53 = vrot.slane %v2055_v36, 9  ;;  %v15304_v35 = vrot.slane %v2054_v45, 9  ;;  %v3970_v56 = vmax.f32 %v2047_v25, %v15302_v20 }
 0x15a   : > { %6065 = vst.msk [vmem:[#allocation2 + $0x28] sm:$0xf] %vm4170_vm4, %v5952_v54  ;;  %v2022_v57 = vcombine.high %v2020_v21, %v2020_v21  ;;  %v15295_v60 = vrot.slane %v2021_v32, 9  ;;  %v15296_v61 = vrot.slane %v2020_v21, 9  ;;  %v3962_v0 = vmax.f32 %v2013_v31, %v15294_v24 }
 0x15b   : > { %v15305_v2 = vrot.slane %v2056_v50, 9  ;;  %v3971_v40 = vmax.f32 %v2055_v36, %v15303_v53  ;;  %v16667_v51 = vpack.c.bf16 %v3970_v56, %v3970_v56  ;;  %v2057_v1 = vcombine.high %v1689_v28, %v1689_v28 }
 0x15c   : > { %v15297_v46 = vrot.slane %v2022_v57, 9  ;;  %v3963_v8 = vmax.f32 %v2021_v32, %v15295_v60  ;;  %v3964_v17 = vmax.f32 %v2020_v21, %v15296_v61  ;;  %v16659_v43 = vpack.c.bf16 %v3962_v0, %v3962_v0  ;;  %v6073_v32 = vld [vmem:[#allocation2 + $0x38] sm:$0x1] }
 0x15d   : > { %v3972_v3 = vmax.f32 %v2054_v45, %v15304_v35  ;;  %v16668_v18 = vpack.c.bf16 %v3971_v40, %v3971_v40  ;;  %v19400_v29 = vunpack.c.l.b16 %v16667_v51  ;;  %v2064_v58 = vrot.slane %v1689_v28, %v19095_v26 }
 0x15e   : > { %v3965_v48 = vmax.f32 %v2022_v57, %v15297_v46  ;;  %v16660_v44 = vpack.c.bf16 %v3963_v8, %v3963_v8  ;;  %v16661_v4 = vpack.c.bf16 %v3964_v17, %v3964_v17  ;;  %v5298_v49 = vunpack.c.l.b16 %v16659_v43  ;;  %v6227_v8 = vld [vmem:[#allocation2 + $0x1c] sm:$0xf] }
 0x15f   : > { %v1575_v22 = vmax.f32 %v1151_v37, 0.0  ;;  %v3973_v59 = vmax.f32 %v2056_v50, %v15305_v2  ;;  %v19403_v39 = vunpack.c.l.b16 %v16668_v18  ;;  %v1571_v41 = vmax.f32 %v19388_v13, 0.0  ;;  %v19412_v50 = vpop.f32.mrf.mxu0 }
 0x160   : > { %v16662_v11 = vpack.c.bf16 %v3965_v48, %v3965_v48  ;;  %v5299_v5 = vunpack.c.l.b16 %v16660_v44  ;;  %v16669_v47 = vpack.c.bf16 %v3972_v3, %v3972_v3  ;;  %v5300_v12 = vunpack.c.l.b16 %v16661_v4 }
 0x161   : > { %v2071_v10 = vrot.slane %v2057_v1, %v19095_v26  ;;  %v5607_v52 = vrot.slane %v19400_v29, 7  ;;  %v5594_v7 = vrot.slane %v5298_v49, 7  ;;  %v2072_v23 = vcombine.high %v2064_v58, %v2064_v58 }
 0x162   : > { %v5301_v19 = vunpack.c.l.b16 %v16662_v11  ;;  %v5595_v55 = vrot.slane %v5299_v5, 6  ;;  %v15306_v25 = vrot.slane %v2064_v58, 9  ;;  %v16670_v38 = vpack.c.bf16 %v3973_v59, %v3973_v59 }
 0x163   : > { %v2073_v15 = vcombine.high %v2071_v10, %v2071_v10  ;;  %v15308_v9 = vrot.slane %v2071_v10, 9  ;;  %v5609_v30 = vrot.slane %v19403_v39, 6  ;;  %v15307_v31 = vrot.slane %v2072_v23, 9 }
 0x164   : > { %v1687_v28 = vmax.f32 %v1571_v41, %v1575_v22  ;;  %v5597_v13 = vrot.slane %v5300_v12, 5  ;;  %v3974_v45 = vmax.f32 %v2064_v58, %v15306_v25  ;;  %v19409_v20 = vunpack.c.l.b16 %v16669_v47  ;;  %v19420_v58 = vpop.f32.mrf.mxu0  ;;  %v6226_v22 = vld [vmem:[#allocation2 + $0x18] sm:$0xf] }
 0x165   : > { %v15309_v54 = vrot.slane %v2073_v15, 9  ;;  %v3976_v36 = vmax.f32 %v2071_v10, %v15308_v9  ;;  %v3975_v21 = vmax.f32 %v2072_v23, %v15307_v31  ;;  %v5596_v53 = vsel %vm5508_vm5, %v5595_v55, %v5594_v7  ;;  %v17908_v7 = vld [vmem:[#allocation2 + $0x20] ss:$0 sps:$4 sm:$0x11]  }
 0x166   : > { %v2023_v24 = vcombine.high %v1687_v28, %v1687_v28  ;;  %v2030_v37 = vrot.slane %v1687_v28, %v19095_v26  ;;  %v5599_v35 = vrot.slane %v5301_v19, 4  ;;  %v16671_v57 = vpack.c.bf16 %v3974_v45, %v3974_v45  ;;  %v6290_v19 = vld [vmem:[#allocation2 + $0x1c] sm:$0xf]  ;;  %v17659_v9 = vpop.f32.mrf.mxu0 }
 0x167   : > { %v3977_v56 = vmax.f32 %v2073_v15, %v15309_v54  ;;  %v16673_v60 = vpack.c.bf16 %v3976_v36, %v3976_v36  ;;  %v19416_v40 = vunpack.c.l.b16 %v16670_v38  ;;  %v16672_v51 = vpack.c.bf16 %v3975_v21, %v3975_v21  ;;  %v6337_v21 = vld [vmem:[#allocation2 + $0x18] sm:$0xe] }
 0x168   : > { %v2037_v61 = vrot.slane %v2023_v24, %v19095_v26  ;;  %v2038_v0 = vcombine.high %v2030_v37, %v2030_v37  ;;  %v15298_v2 = vrot.slane %v2030_v37, 9  ;;  %v1172_v46 = vadd.f32 %v19281_v6, %v17655_v42 }
 0x169   : > { %v16870_v1 = vpack.c.bf16 %v3977_v56, %v3977_v56  ;;  %v5598_v17 = vsel %vm5511_vm6, %v5597_v13, %v5596_v53  ;;  %v5611_v48 = vrot.slane %v19409_v20, 5  ;;  %v19423_v44 = vunpack.c.l.b16 %v16671_v57  ;;  %v6163_v53 = vld [vmem:[#allocation2 + $0x10] sm:$0xf] }
 0x16a   : > { %v2039_v43 = vcombine.high %v2037_v61, %v2037_v61  ;;  %v15299_v3 = vrot.slane %v2038_v0, 9  ;;  %v15300_v18 = vrot.slane %v2037_v61, 9  ;;  %v3966_v49 = vmax.f32 %v2030_v37, %v15298_v2 }
 0x16b   : > { %v6074_v4 = vsel %vm19158_vm12, %v16870_v1, %v6073_v32  ;;  %v19427_v59 = vunpack.c.l.b16 %v16673_v60  ;;  %v5613_v41 = vrot.slane %v19416_v40, 4  ;;  %v5311_v47 = vunpack.c.l.b16 %v16672_v51 }
 0x16c   : > { %6075 = vst [vmem:[#allocation2 + $0x38] sm:$0x1] %v6074_v4  ;;  %v15301_v42 = vrot.slane %v2039_v43, 9  ;;  %v3967_v11 = vmax.f32 %v2038_v0, %v15299_v3  ;;  %v3968_v5 = vmax.f32 %v2037_v61, %v15300_v18  ;;  %v16663_v12 = vpack.c.bf16 %v3966_v49, %v3966_v49  ;;  %v1179_v61 = vpop.f32.mrf.mxu0  ;;  %v6069_v3 = vld [vmem:[#allocation2 + $0x30] sm:$0xf] }
 0x16d   : > { %v5600_v10 = vsel %vm5514_vm7, %v5599_v35, %v5598_v17  ;;  %v19431_v25 = vcombine.low %v6226_v22, %v6227_v8  ;;  %v5615_v38 = vrot.slane %v19423_v44, 3  ;;  %v1580_v28 = vmax.f32 %v1172_v46, 0.0  ;;  %v17911_v8 = vld [vmem:[#allocation2 + $0x14] ss:$0 sps:$4 sm:$0x11]  }
 0x16e   : > { %v3969_v23 = vmax.f32 %v2039_v43, %v15301_v42  ;;  %v16664_v55 = vpack.c.bf16 %v3967_v11, %v3967_v11  ;;  %v16665_v15 = vpack.c.bf16 %v3968_v5, %v3968_v5  ;;  %v5302_v31 = vunpack.c.l.b16 %v16663_v12  ;;  %v6162_v4 = vld [vmem:[#allocation2 + $0xc] sm:$0xf] }
 0x16f   : > { %23763 = vst [vmem:[#allocation10_spill] sm:$0xff] %v19431_v25  ;;  %v1164_v13 = vadd.f32 %v19281_v6, %v1163_v34  ;;  %v5619_v54 = vrot.slane %v19427_v59, 1  ;;  %6885 = vrot.lane.b32.xlu1 %v19431_v25, %s18721_s14  ;;  %v5617_v32 = vrot.slane %v5311_v47, 2  ;;  %v1188_v37 = vadd.f32 %v19281_v6, %v17659_v9 }
 0x170   : > { %v16666_v45 = vpack.c.bf16 %v3969_v23, %v3969_v23  ;;  %v5303_v36 = vunpack.c.l.b16 %v16664_v55  ;;  %v5304_v20 = vunpack.c.l.b16 %v16665_v15  ;;  %v5601_v24 = vrot.slane %v5302_v31, 3 }
 0x171   : > { %v15902_v60 = vcombine.low %v6337_v21, %v6290_v19  ;;  %v1578_v0 = vmax.f32 %v1164_v13, 0.0  ;;  %v1584_v2 = vmax.f32 %v1188_v37, 0.0  ;;  %v7684_v40 = vrot.slane %v17908_v7, 1  ;;  %v17660_v21 = vpop.f32.mrf.mxu0  ;;  %v19471_v37 = vld [vmem:[%s23689_s2] ss:$0 sm:$0xff] }
 0x172   : > { %v5305_v35 = vunpack.c.l.b16 %v16666_v45  ;;  %v5603_v56 = vrot.slane %v5303_v36, 2  ;;  %v5605_v57 = vrot.slane %v5304_v20, 1  ;;  %v5602_v34 = vsel %vm5517_vm9, %v5601_v24, %v5600_v10 }
 0x173   : > { %v7683_v46 = vrot.slane %v15902_v60, 1  ;;  %v1692_v18 = vmax.f32 %v1580_v28, %v1584_v2  ;;  %v1180_v44 = vadd.f32 %v19281_v6, %v1179_v61  ;;  %v6502_v15 = vshll.u32 %v17911_v8, 16  ;;  %v6165_v8 = vld [vmem:[#allocation2 + $0x1c] sm:$0xf] }
 0x174   : > { %v5604_v51 = vsel %vm5520_vm10, %v5603_v56, %v5602_v34  ;;  %v5608_v1 = vsel %vm5526_vm11, %v5607_v52, %v5305_v35  ;;  %v19451_v52 = vcombine.low %v6162_v4, %v6163_v53  ;;  %v1167_v53 = vadd.f32 %v19471_v37, %v19420_v58 }
 0x175   : > { %v5606_v17 = vsel %vm5523_vm13, %v5605_v57, %v5604_v51  ;;  %v5610_v43 = vsel %vm5508_vm5, %v5609_v30, %v5608_v1  ;;  %v7685_v29 = vsel %vm6754_vm1, %v7683_v46, %v7684_v40  ;;  %v2108_v42 = vcombine.high %v1692_v18, %v1692_v18  ;;  %v1182_v40 = vpop.f32.mrf.mxu0 }
 0x176   : > { %v5612_v49 = vsel %vm5511_vm6, %v5611_v48, %v5610_v43  ;;  %v5954_v22 = vpack.c.b16 %v5606_v17, %v5606_v17  ;;  %v2115_v11 = vrot.slane %v1692_v18, %v19095_v26  ;;  %17757 = vmatprep.mubr.msk.bf16.mxu0 %vm7731_vm2, %v7685_v29  ;;  %v1582_v39 = vmax.f32 %v1180_v44, 0.0 }
 0x177   : > { %v5614_v59 = vsel %vm5514_vm7, %v5613_v41, %v5612_v49  ;;  %v6495_v48 = vshrl.u32 %v19451_v52, 16  ;;  %v6497_v47 = vshll.u32 %v19451_v52, 16  ;;  %v2122_v41 = vrot.slane %v2108_v42, %v19095_v26 }
 0x178   : > { %v5616_v30 = vsel %vm5517_vm9, %v5615_v38, %v5614_v59  ;;  %v6070_v5 = vsel %vm19198_vm15, %v5954_v22, %v6069_v3  ;;  %v2123_v10 = vcombine.high %v2115_v11, %v2115_v11  ;;  %v15318_v19 = vrot.slane %v2115_v11, 9 }
 0x179   : > { %v5618_v12 = vsel %vm5520_vm10, %v5617_v32, %v5616_v30  ;;  %6071 = vst [vmem:[#allocation2 + $0x30] sm:$0xf] %v6070_v5  ;;  %v1690_v23 = vmax.f32 %v1578_v0, %v1582_v39  ;;  %v6499_v55 = vrot.slane %v6497_v47, 1  ;;  %v2124_v38 = vcombine.high %v2122_v41, %v2122_v41  ;;  %v19481_v39 = vpop.f32.mrf.mxu0 }
 0x17a   : > { %v5620_v7 = vsel %vm5523_vm13, %v5619_v54, %v5618_v12  ;;  %v15319_v31 = vrot.slane %v2123_v10, 9  ;;  %v15320_v28 = vrot.slane %v2122_v41, 9  ;;  %v3986_v13 = vmax.f32 %v2115_v11, %v15318_v19  ;;  %v6164_v11 = vld [vmem:[#allocation2 + $0x18] sm:$0xf] }
 0x17b   : > { %v5955_v9 = vpack.c.b16 %v5620_v7, %v5620_v7  ;;  %v2074_v45 = vcombine.high %v1690_v23, %v1690_v23  ;;  %v2081_v36 = vrot.slane %v1690_v23, %v19095_v26  ;;  %v6500_v20 = vor.u32 %v6499_v55, %v6495_v48  ;;  %v17914_v7 = vld [vmem:[#allocation2 + $0x20] ss:$0 sps:$4 sm:$0x11]  }
 0x17c   : > { %v1175_v32 = vadd.f32 %v19281_v6, %v19412_v50  ;;  %v15321_v24 = vrot.slane %v2124_v38, 9  ;;  %v6504_v54 = vrot.slane %v6502_v15, 1  ;;  %v3987_v60 = vmax.f32 %v2123_v10, %v15319_v31 }
 0x17d   : > { %6072 = vst.msk [vmem:[#allocation2 + $0x34] sm:$0xf] %vm4170_vm4, %v5955_v9  ;;  %v2088_v35 = vrot.slane %v2074_v45, %v19095_v26  ;;  %v2089_v56 = vcombine.high %v2081_v36, %v2081_v36  ;;  %v15310_v57 = vrot.slane %v2081_v36, 9  ;;  %v3988_v61 = vmax.f32 %v2122_v41, %v15320_v28  ;;  %v19489_v45 = vpop.f32.mrf.mxu0 }
 0x17e   : > { %v16683_v34 = vpack.c.bf16 %v3986_v13, %v3986_v13  ;;  %v6505_v0 = vsel %vm6481_vm0, %v6500_v20, %v6504_v54  ;;  %v1581_v51 = vmax.f32 %v1175_v32, 0.0  ;;  %v3989_v1 = vmax.f32 %v2124_v38, %v15321_v24 }
 0x17f   : > { %v2090_v6 = vcombine.high %v2088_v35, %v2088_v35  ;;  %v15311_v50 = vrot.slane %v2089_v56, 9  ;;  %v15312_v2 = vrot.slane %v2088_v35, 9  ;;  %6676 = vrot.lane.b32.xlu1 %v6505_v0, %s18721_s14  ;;  %v3978_v46 = vmax.f32 %v2081_v36, %v15310_v57 }
 0x180   : > { %v1579_v58 = vmax.f32 %v1167_v53, 0.0  ;;  %v16684_v18 = vpack.c.bf16 %v3987_v60, %v3987_v60  ;;  %v16685_v44 = vpack.c.bf16 %v3988_v61, %v3988_v61  ;;  %v19478_v4 = vunpack.c.l.b16 %v16683_v34 }
 0x181   : > { %v15313_v17 = vrot.slane %v2090_v6, 9  ;;  %v3979_v43 = vmax.f32 %v2089_v56, %v15311_v50  ;;  %v3980_v3 = vmax.f32 %v2088_v35, %v15312_v2  ;;  %v16675_v49 = vpack.c.bf16 %v3978_v46, %v3978_v46  ;;  %v19501_v2 = vpop.f32.mrf.mxu0 }
 0x182   : > { %v1191_v42 = vadd.f32 %v19471_v37, %v17660_v21  ;;  %v16686_v30 = vpack.c.bf16 %v3989_v1, %v3989_v1  ;;  %v1183_v48 = vadd.f32 %v19471_v37, %v1182_v40  ;;  %v19484_v47 = vcombine.low %v6164_v11, %v6165_v8 }
 0x183   : > { %v3981_v22 = vmax.f32 %v2090_v6, %v15313_v17  ;;  %v16676_v29 = vpack.c.bf16 %v3979_v43, %v3979_v43  ;;  %v16677_v59 = vpack.c.bf16 %v3980_v3, %v3980_v3  ;;  %v5314_v5 = vunpack.c.l.b16 %v16675_v49  ;;  %v19505_v11 = vpop.f32.mrf.mxu0 }
 0x184   : > { %v1585_v19 = vmax.f32 %v1191_v42, 0.0  ;;  %v5634_v23 = vrot.slane %v19478_v4, 7  ;;  %v1583_v15 = vmax.f32 %v1183_v48, 0.0  ;;  %v6509_v9 = vshll.u32 %v19484_v47, 16 }
 0x185   : > { %v16678_v12 = vpack.c.bf16 %v3981_v22, %v3981_v22  ;;  %v5315_v41 = vunpack.c.l.b16 %v16676_v29  ;;  %v5316_v10 = vunpack.c.l.b16 %v16677_v59  ;;  %v5621_v55 = vrot.slane %v5314_v5, 7 }
 0x186   : > { %v1693_v28 = vmax.f32 %v1581_v51, %v1585_v19  ;;  %v6507_v13 = vshrl.u32 %v19484_v47, 16  ;;  %v19491_v36 = vunpack.c.l.b16 %v16684_v18  ;;  %v1691_v21 = vmax.f32 %v1579_v58, %v1583_v15 }
 0x187   : > { %v5317_v38 = vunpack.c.l.b16 %v16678_v12  ;;  %v5622_v31 = vrot.slane %v5315_v41, 6  ;;  %v5624_v20 = vrot.slane %v5316_v10, 5  ;;  %v6511_v32 = vrot.slane %v6509_v9, 1 }
 0x188   : > { %v2125_v54 = vcombine.high %v1693_v28, %v1693_v28  ;;  %v2132_v53 = vrot.slane %v1693_v28, %v19095_v26  ;;  %v6514_v35 = vshll.u32 %v17914_v7, 16  ;;  %v19495_v56 = vunpack.c.l.b16 %v16685_v44 }
 0x189   : > { %v5623_v24 = vsel %vm5508_vm5, %v5622_v31, %v5621_v55  ;;  %v19497_v57 = vunpack.c.l.b16 %v16686_v30  ;;  %v2091_v60 = vcombine.high %v1691_v21, %v1691_v21  ;;  %v2098_v61 = vrot.slane %v1691_v21, %v19095_v26  ;;  %v6080_v55 = vld [vmem:[#allocation2 + $0x44] sm:$0x1] }
 0x18a   : > { %v5626_v34 = vrot.slane %v5317_v38, 4  ;;  %v2139_v0 = vrot.slane %v2125_v54, %v19095_v26  ;;  %v2140_v6 = vcombine.high %v2132_v53, %v2132_v53  ;;  %v15322_v50 = vrot.slane %v2132_v53, 9  ;;  %v17667_v54 = vpop.f32.mrf.mxu0 }
 0x18b   : > { %v5625_v40 = vsel %vm5511_vm6, %v5624_v20, %v5623_v24  ;;  %v2105_v51 = vrot.slane %v2091_v60, %v19095_v26  ;;  %v2106_v1 = vcombine.high %v2098_v61, %v2098_v61  ;;  %v15314_v46 = vrot.slane %v2098_v61, 9 }
 0x18c   : > { %v2141_v8 = vcombine.high %v2139_v0, %v2139_v0  ;;  %v15323_v58 = vrot.slane %v2140_v6, 9  ;;  %v15324_v17 = vrot.slane %v2139_v0, 9  ;;  %v3990_v43 = vmax.f32 %v2132_v53, %v15322_v50 }
 0x18d   : > { %v2107_v3 = vcombine.high %v2105_v51, %v2105_v51  ;;  %v15315_v18 = vrot.slane %v2106_v1, 9  ;;  %v15316_v44 = vrot.slane %v2105_v51, 9  ;;  %v3982_v49 = vmax.f32 %v2098_v61, %v15314_v46 }
 0x18e   : > { %v15325_v22 = vrot.slane %v2141_v8, 9  ;;  %v3991_v29 = vmax.f32 %v2140_v6, %v15323_v58  ;;  %v3992_v59 = vmax.f32 %v2139_v0, %v15324_v17  ;;  %v16687_v42 = vpack.c.bf16 %v3990_v43, %v3990_v43  ;;  %v6228_v17 = vld [vmem:[#allocation2 + $0x24] sm:$0xf]  ;;  %v1211_v43 = vpop.f32.mrf.mxu0 }
 0x18f   : > { %v15317_v30 = vrot.slane %v2107_v3, 9  ;;  %v3983_v5 = vmax.f32 %v2106_v1, %v15315_v18  ;;  %v3984_v48 = vmax.f32 %v2105_v51, %v15316_v44  ;;  %v16679_v12 = vpack.c.bf16 %v3982_v49, %v3982_v49  ;;  %v19511_v51 = vld [vmem:[#allocation2 + $0x28] sm:$0xf]  ;;  %v6076_v49 = vld [vmem:[#allocation2 + $0x3c] sm:$0xf] }
 0x190   : > { %v3993_v41 = vmax.f32 %v2141_v8, %v15325_v22  ;;  %v16688_v10 = vpack.c.bf16 %v3991_v29, %v3991_v29  ;;  %v16689_v19 = vpack.c.bf16 %v3992_v59, %v3992_v59  ;;  %v6512_v7 = vor.u32 %v6511_v32, %v6507_v13 }
 0x191   : > { %v3985_v15 = vmax.f32 %v2107_v3, %v15317_v30  ;;  %v16680_v9 = vpack.c.bf16 %v3983_v5, %v3983_v5  ;;  %v16681_v38 = vpack.c.bf16 %v3984_v48, %v3984_v48  ;;  %v5318_v31 = vunpack.c.l.b16 %v16679_v12 }
 0x192   : > { %v5326_v28 = vunpack.c.l.b16 %v16687_v42  ;;  %v16871_v20 = vpack.c.bf16 %v3993_v41, %v3993_v41  ;;  %v5627_v21 = vsel %vm5514_vm7, %v5626_v34, %v5625_v40  ;;  %v6516_v24 = vrot.slane %v6514_v35, 1  ;;  %v17919_v42 = vld [vmem:[#allocation2 + $0x2c] ss:$0 sps:$4 sm:$0x11]  }
 0x193   : > { %v16682_v53 = vpack.c.bf16 %v3985_v15, %v3985_v15  ;;  %v5319_v60 = vunpack.c.l.b16 %v16680_v9  ;;  %v5320_v61 = vunpack.c.l.b16 %v16681_v38  ;;  %v5628_v0 = vrot.slane %v5318_v31, 3 }
 0x194   : > { %v5327_v6 = vunpack.c.l.b16 %v16688_v10  ;;  %v5328_v50 = vunpack.c.l.b16 %v16689_v19  ;;  %v6081_v13 = vsel %vm19158_vm12, %v16871_v20, %v6080_v55  ;;  %v6517_v32 = vsel %vm6481_vm0, %v6512_v7, %v6516_v24  ;;  %v17668_v19 = vpop.f32.mrf.mxu0 }
 0x195   : > { %6082 = vst [vmem:[#allocation2 + $0x44] sm:$0x1] %v6081_v13  ;;  %v5321_v1 = vunpack.c.l.b16 %v16682_v53  ;;  %v5629_v46 = vsel %vm5517_vm9, %v5628_v0, %v5627_v21  ;;  %v5630_v34 = vrot.slane %v5319_v60, 2  ;;  %v5632_v35 = vrot.slane %v5320_v61, 1  ;;  %6678 = vrot.lane.b32.xlu1 %v6517_v32, %s18721_s14 }
 0x196   : > { %v5636_v40 = vrot.slane %v19491_v36, 6  ;;  %v5638_v8 = vrot.slane %v19495_v56, 5  ;;  %v1204_v58 = vadd.f32 %v19471_v37, %v19481_v39  ;;  %v5640_v3 = vrot.slane %v19497_v57, 4  ;;  %v6292_v36 = vld [vmem:[#allocation2 + $0x28] sm:$0xf] }
 0x197   : > { %v5631_v18 = vsel %vm5520_vm10, %v5630_v34, %v5629_v46  ;;  %v5635_v44 = vsel %vm5526_vm11, %v5634_v23, %v5321_v1  ;;  %v19525_v22 = vcombine.low %v6228_v17, %v19511_v51  ;;  %v5642_v29 = vrot.slane %v5326_v28, 3  ;;  %v6338_v23 = vld [vmem:[#allocation2 + $0x24] sm:$0xe] }
 0x198   : > { %v5644_v56 = vrot.slane %v5327_v6, 2  ;;  %v5633_v59 = vsel %vm5523_vm13, %v5632_v35, %v5631_v18  ;;  %v5637_v39 = vsel %vm5508_vm5, %v5636_v40, %v5635_v44  ;;  %v5646_v30 = vrot.slane %v5328_v50, 1  ;;  %v6167_v6 = vld [vmem:[#allocation2 + $0x28] sm:$0xf]  ;;  %v6166_v35 = vld [vmem:[#allocation2 + $0x24] sm:$0xf] }
 0x199   : > { %23764 = vst [vmem:[#allocation11_spill] sm:$0xff] %v19525_v22  ;;  %v5639_v57 = vsel %vm5511_vm6, %v5638_v8, %v5637_v39  ;;  %v5957_v5 = vpack.c.b16 %v5633_v59, %v5633_v59  ;;  %v1196_v4 = vadd.f32 %v19471_v37, %v19489_v45  ;;  %6887 = vrot.lane.b32.xlu0 %v19525_v22, %s18721_s14  ;;  %v1588_v12 = vmax.f32 %v1204_v58, 0.0  ;;  %v17922_v59 = vld [vmem:[#allocation2 + $0x2c] ss:$0 sps:$4 sm:$0x11]  }
 0x19a   : > { %v5641_v48 = vsel %vm5514_vm7, %v5640_v3, %v5639_v57  ;;  %v1220_v41 = vadd.f32 %v19471_v37, %v17667_v54  ;;  %v15903_v10 = vcombine.low %v6338_v23, %v6292_v36  ;;  %v1207_v15 = vadd.f32 %v19471_v37, %v19501_v2 }
 0x19b   : > { %v5643_v7 = vsel %vm5517_vm9, %v5642_v29, %v5641_v48  ;;  %v6077_v55 = vsel %vm19198_vm15, %v5957_v5, %v6076_v49  ;;  %v1212_v45 = vadd.f32 %v19471_v37, %v1211_v43  ;;  %v7687_v28 = vrot.slane %v17919_v42, 1  ;;  %v1214_v49 = vpop.f32.mrf.mxu0 }
 0x19c   : > { %v5645_v9 = vsel %vm5520_vm10, %v5644_v56, %v5643_v7  ;;  %6078 = vst [vmem:[#allocation2 + $0x3c] sm:$0xf] %v6077_v55  ;;  %v1592_v38 = vmax.f32 %v1220_v41, 0.0  ;;  %v7686_v31 = vrot.slane %v15903_v10, 1  ;;  %v1586_v21 = vmax.f32 %v1196_v4, 0.0 }
 0x19d   : > { %v5647_v20 = vsel %vm5523_vm13, %v5646_v30, %v5645_v9  ;;  %v1590_v24 = vmax.f32 %v1212_v45, 0.0  ;;  %v1223_v54 = vadd.f32 %v19471_v37, %v17668_v19  ;;  %v1589_v32 = vmax.f32 %v1207_v15, 0.0  ;;  %v19559_v7 = vpop.f32.mrf.mxu0 }
 0x19e   : > { %v5958_v53 = vpack.c.b16 %v5647_v20, %v5647_v20  ;;  %v1696_v60 = vmax.f32 %v1588_v12, %v1592_v38  ;;  %v7688_v61 = vsel %vm6754_vm1, %v7686_v31, %v7687_v28  ;;  %v19551_v1 = vadd.f32 %v19471_v37, %v19505_v11 }
 0x19f   : > { %17758 = vmatmul.mubr.msk.bf16.vlgmr.msra.gmra.mxu0 %vm7731_vm2, %v7688_v61  ;;  %v1694_v2 = vmax.f32 %v1586_v21, %v1590_v24  ;;  %v1593_v0 = vmax.f32 %v1223_v54, 0.0  ;;  %v19555_v17 = vcombine.low %v6166_v35, %v6167_v6  ;;  %v6526_v45 = vshll.u32 %v17922_v59, 16  ;;  %v1227_v6 = vpop.f32.mrf.mxu0 }
 0x1a0   : > { %6079 = vst.msk [vmem:[#allocation2 + $0x40] sm:$0xf] %vm4170_vm4, %v5958_v53  ;;  %v2176_v50 = vcombine.high %v1696_v60, %v1696_v60  ;;  %v2183_v13 = vrot.slane %v1696_v60, %v19095_v26  ;;  %v1215_v9 = vadd.f32 %v19471_v37, %v1214_v49  ;;  %v1587_v21 = vmax.f32 %v19551_v1, 0.0 }
 0x1a1   : > { %v2142_v46 = vcombine.high %v1694_v2, %v1694_v2  ;;  %v2149_v34 = vrot.slane %v1694_v2, %v19095_v26  ;;  %v1697_v44 = vmax.f32 %v1589_v32, %v1593_v0  ;;  %v6521_v48 = vshll.u32 %v19555_v17, 16 }
 0x1a2   : > { %v2190_v40 = vrot.slane %v2176_v50, %v19095_v26  ;;  %v2191_v8 = vcombine.high %v2183_v13, %v2183_v13  ;;  %v15334_v58 = vrot.slane %v2183_v13, 9  ;;  %v6519_v54 = vshrl.u32 %v19555_v17, 16 }
 0x1a3   : > { %v2156_v43 = vrot.slane %v2142_v46, %v19095_v26  ;;  %v2157_v3 = vcombine.high %v2149_v34, %v2149_v34  ;;  %v15326_v18 = vrot.slane %v2149_v34, 9  ;;  %v2193_v15 = vcombine.high %v1697_v44, %v1697_v44 }
 0x1a4   : > { %v2192_v36 = vcombine.high %v2190_v40, %v2190_v40  ;;  %v15335_v29 = vrot.slane %v2191_v8, 9  ;;  %v15336_v11 = vrot.slane %v2190_v40, 9  ;;  %v4002_v56 = vmax.f32 %v2183_v13, %v15334_v58 }
 0x1a5   : > { %v2158_v39 = vcombine.high %v2156_v43, %v2156_v43  ;;  %v15327_v42 = vrot.slane %v2157_v3, 9  ;;  %v15328_v30 = vrot.slane %v2156_v43, 9  ;;  %v3994_v57 = vmax.f32 %v2149_v34, %v15326_v18 }
 0x1a6   : > { %v15337_v5 = vrot.slane %v2192_v36, 9  ;;  %v4003_v4 = vmax.f32 %v2191_v8, %v15335_v29  ;;  %v4004_v23 = vmax.f32 %v2190_v40, %v15336_v11  ;;  %v16699_v55 = vpack.c.bf16 %v4002_v56, %v4002_v56  ;;  %v19572_v11 = vpop.f32.mrf.mxu0 }
 0x1a7   : > { %v15329_v12 = vrot.slane %v2158_v39, 9  ;;  %v3995_v41 = vmax.f32 %v2157_v3, %v15327_v42  ;;  %v3996_v10 = vmax.f32 %v2156_v43, %v15328_v30  ;;  %v16691_v19 = vpack.c.bf16 %v3994_v57, %v3994_v57 }
 0x1a8   : > { %v4005_v38 = vmax.f32 %v2192_v36, %v15337_v5  ;;  %v16700_v24 = vpack.c.bf16 %v4003_v4, %v4003_v4  ;;  %v6523_v53 = vrot.slane %v6521_v48, 1  ;;  %v16701_v60 = vpack.c.bf16 %v4004_v23, %v4004_v23 }
 0x1a9   : > { %v3997_v31 = vmax.f32 %v2158_v39, %v15329_v12  ;;  %v16692_v28 = vpack.c.bf16 %v3995_v41, %v3995_v41  ;;  %v16693_v20 = vpack.c.bf16 %v3996_v10, %v3996_v10  ;;  %v5330_v2 = vunpack.c.l.b16 %v16691_v19 }
 0x1aa   : > { %v2200_v13 = vrot.slane %v1697_v44, %v19095_v26  ;;  %v6528_v32 = vrot.slane %v6526_v45, 1  ;;  %v1591_v46 = vmax.f32 %v1215_v9, 0.0  ;;  %v16702_v34 = vpack.c.bf16 %v4005_v38, %v4005_v38 }
 0x1ab   : > { %v16694_v61 = vpack.c.bf16 %v3997_v31, %v3997_v31  ;;  %v5331_v0 = vunpack.c.l.b16 %v16692_v28  ;;  %v5332_v50 = vunpack.c.l.b16 %v16693_v20  ;;  %v19565_v35 = vunpack.c.l.b16 %v16699_v55  ;;  %v19582_v55 = vpop.f32.mrf.mxu0  ;;  %v6087_v31 = vld [vmem:[#allocation2 + $0x50] sm:$0x1] }
 0x1ac   : > { %v2207_v1 = vrot.slane %v2193_v15, %v19095_v26  ;;  %v19568_v8 = vunpack.c.l.b16 %v16700_v24  ;;  %v2208_v58 = vcombine.high %v2200_v13, %v2200_v13  ;;  %v15338_v43 = vrot.slane %v2200_v13, 9 }
 0x1ad   : > { %v5649_v40 = vrot.slane %v5331_v0, 6  ;;  %v6524_v3 = vor.u32 %v6523_v53, %v6519_v54  ;;  %v19570_v18 = vunpack.c.l.b16 %v16701_v60  ;;  %v5333_v49 = vunpack.c.l.b16 %v16694_v61 }
 0x1ae   : > { %v5648_v36 = vrot.slane %v5330_v2, 7  ;;  %v2209_v29 = vcombine.high %v2207_v1, %v2207_v1  ;;  %v5651_v44 = vrot.slane %v5332_v50, 5  ;;  %v15339_v56 = vrot.slane %v2208_v58, 9  ;;  %v19590_v2 = vld [vmem:[#allocation2 + $0x34] sm:$0xf] }
 0x1af   : > { %v15340_v59 = vrot.slane %v2207_v1, 9  ;;  %v6529_v39 = vsel %vm6481_vm0, %v6524_v3, %v6528_v32  ;;  %v4006_v57 = vmax.f32 %v2200_v13, %v15338_v43  ;;  %v1695_v5 = vmax.f32 %v1587_v21, %v1591_v46  ;;  %23765 = vst [vmem:[#allocation12_spill] sm:$0xff] %v19590_v2  ;;  %v17675_v46 = vpop.f32.mrf.mxu0  ;;  %v6230_v43 = vld [vmem:[#allocation2 + $0x30] sm:$0xf] }
 0x1b0   : > { %v5650_v42 = vsel %vm5508_vm5, %v5649_v40, %v5648_v36  ;;  %v15341_v30 = vrot.slane %v2209_v29, 9  ;;  %6680 = vrot.lane.b32.xlu1 %v6529_v39, %s18721_s14  ;;  %v19577_v4 = vunpack.c.l.b16 %v16702_v34  ;;  %v5661_v23 = vrot.slane %v19565_v35, 7 }
 0x1b1   : > { %v4007_v48 = vmax.f32 %v2208_v58, %v15339_v56  ;;  %v5663_v12 = vrot.slane %v19568_v8, 6  ;;  %v2159_v10 = vcombine.high %v1695_v5, %v1695_v5  ;;  %v2166_v19 = vrot.slane %v1695_v5, %v19095_v26 }
 0x1b2   : > { %v4009_v41 = vmax.f32 %v2209_v29, %v15341_v30  ;;  %v5665_v15 = vrot.slane %v19570_v18, 5  ;;  %v5652_v45 = vsel %vm5511_vm6, %v5651_v44, %v5650_v42  ;;  %v5653_v9 = vrot.slane %v5333_v49, 4  ;;  %v19612_v42 = vld [vmem:[#allocation2 + $0x34] sm:$0xf] }
 0x1b3   : > { %v4008_v38 = vmax.f32 %v2207_v1, %v15340_v59  ;;  %v16703_v28 = vpack.c.bf16 %v4006_v57, %v4006_v57  ;;  %v2173_v21 = vrot.slane %v2159_v10, %v19095_v26  ;;  %v2174_v24 = vcombine.high %v2166_v19, %v2166_v19 }
 0x1b4   : > { %v16872_v20 = vpack.c.bf16 %v4009_v41, %v4009_v41  ;;  %v5667_v54 = vrot.slane %v19577_v4, 4  ;;  %v16704_v53 = vpack.c.bf16 %v4007_v48, %v4007_v48  ;;  %v15330_v60 = vrot.slane %v2166_v19, 9  ;;  %v17926_v41 = vld [vmem:[#allocation2 + $0x38] ss:$0 sps:$4 sm:$0x11]  }
 0x1b5   : > { %v1236_v61 = vadd.f32 %v19471_v37, %v19559_v7  ;;  %v2175_v50 = vcombine.high %v2173_v21, %v2173_v21  ;;  %v15331_v13 = vrot.slane %v2174_v24, 9  ;;  %v19595_v32 = vadd.f32 %v19471_v37, %v1227_v6  ;;  %v17943_v7 = vld [vmem:[%s23690_s3 + $0x78] sm:$0xff]  }
 0x1b6   : > { %v6088_v0 = vsel %vm19158_vm12, %v16872_v20, %v6087_v31  ;;  %v16705_v34 = vpack.c.bf16 %v4008_v38, %v4008_v38  ;;  %v15332_v40 = vrot.slane %v2173_v21, 9  ;;  %v3998_v1 = vmax.f32 %v2166_v19, %v15330_v60  ;;  %v17946_v6 = vld [vmem:[%s23690_s3 + $0x38] sm:$0xff]   ;;  %17021 = vmatprep.subr.bf16.mxu1 %v17943_v7  ;;  %v6339_v38 = vld [vmem:[#allocation2 + $0x30] sm:$0xe] }
 0x1b7   : > { %6089 = vst [vmem:[#allocation2 + $0x50] sm:$0x1] %v6088_v0  ;;  %v5654_v58 = vsel %vm5514_vm7, %v5653_v9, %v5652_v45  ;;  %v19601_v3 = vunpack.c.l.b16 %v16703_v28  ;;  %v15333_v49 = vrot.slane %v2175_v50, 9  ;;  %v3999_v36 = vmax.f32 %v2174_v24, %v15331_v13  ;;  %17022 = vmatpush3.bf16.msra.mxu1 %v17946_v6  ;;  %v17949_v31 = vld [vmem:[%s23690_s3 + $0x70] sm:$0xff]   ;;  %v1243_v13 = vpop.f32.mrf.mxu0 }
 0x1b8   : > { %v19604_v29 = vcombine.low %v6230_v43, %v19590_v2  ;;  %v19609_v44 = vunpack.c.l.b16 %v16704_v53  ;;  %v4000_v56 = vmax.f32 %v2173_v21, %v15332_v40  ;;  %v16695_v59 = vpack.c.bf16 %v3998_v1, %v3998_v1  ;;  %v17950_v53 = vld [vmem:[%s23690_s3 + $0x30] sm:$0xff]   ;;  %17023 = vmatprep.subr.bf16.mxu1 %v17949_v31 }
 0x1b9   : > { %v1252_v39 = vadd.f32 %v19471_v37, %v17675_v46  ;;  %v4001_v30 = vmax.f32 %v2175_v50, %v15333_v49  ;;  %v16696_v57 = vpack.c.bf16 %v3999_v36, %v3999_v36  ;;  %v1596_v5 = vmax.f32 %v1236_v61, 0.0 }
 0x1ba   : > { %23766 = vst [vmem:[#allocation13_spill] sm:$0xff] %v19604_v29  ;;  %v1594_v48 = vmax.f32 %v19595_v32, 0.0  ;;  %6889 = vrot.lane.b32.xlu0 %v19604_v29, %s18721_s14  ;;  %v5344_v10 = vunpack.c.l.b16 %v16705_v34  ;;  %v16697_v19 = vpack.c.bf16 %v4000_v56, %v4000_v56  ;;  %v5334_v45 = vunpack.c.l.b16 %v16695_v59  ;;  %v6083_v59 = vld [vmem:[#allocation2 + $0x48] sm:$0xf] }
 0x1bb   : > { %v1600_v9 = vmax.f32 %v1252_v39, 0.0  ;;  %v5669_v28 = vrot.slane %v19601_v3, 3  ;;  %v16698_v20 = vpack.c.bf16 %v4001_v30, %v4001_v30  ;;  %v5335_v21 = vunpack.c.l.b16 %v16696_v57  ;;  %17024 = vmatpush3.bf16.msra.mxu1 %v17950_v53 }
 0x1bc   : > { %v15904_v24 = vcombine.low %v6339_v38, %v19612_v42  ;;  %v5671_v60 = vrot.slane %v19609_v44, 2  ;;  %v5336_v61 = vunpack.c.l.b16 %v16697_v19  ;;  %v5655_v0 = vrot.slane %v5334_v45, 3  ;;  %v19646_v45 = vld [vmem:[#allocation2 + $0xc] sm:$0xe] }
 0x1bd   : > { %v1700_v50 = vmax.f32 %v1596_v5, %v1600_v9  ;;  %v5337_v32 = vunpack.c.l.b16 %v16698_v20  ;;  %v5657_v46 = vrot.slane %v5335_v21, 2  ;;  %v7690_v40 = vrot.slane %v17926_v41, 1  ;;  %v19651_v20 = vld [vmem:[#allocation2 + $0x10] sm:$0xf] }
 0x1be   : > { %v7689_v34 = vrot.slane %v15904_v24, 1  ;;  %v5656_v1 = vsel %vm5517_vm9, %v5655_v0, %v5654_v58  ;;  %v5659_v43 = vrot.slane %v5336_v61, 1  ;;  %v1244_v44 = vadd.f32 %v19471_v37, %v1243_v13 }
 0x1bf   : > { %v2244_v7 = vcombine.high %v1700_v50, %v1700_v50  ;;  %v2251_v3 = vrot.slane %v1700_v50, %v19095_v26  ;;  %v5658_v49 = vsel %vm5520_vm10, %v5657_v46, %v5656_v1  ;;  %v5662_v36 = vsel %vm5526_vm11, %v5661_v23, %v5337_v32 }
 0x1c0   : > { %v7691_v6 = vsel %vm6754_vm1, %v7689_v34, %v7690_v40  ;;  %v5660_v56 = vsel %vm5523_vm13, %v5659_v43, %v5658_v49  ;;  %v5664_v58 = vsel %vm5508_vm5, %v5663_v12, %v5662_v36  ;;  %v1598_v5 = vmax.f32 %v1244_v44, 0.0  ;;  %v6169_v44 = vld [vmem:[#allocation2 + $0x34] sm:$0xf] }
 0x1c1   : > { %v2258_v39 = vrot.slane %v2244_v7, %v19095_v26  ;;  %v2259_v30 = vcombine.high %v2251_v3, %v2251_v3  ;;  %17761 = vmatprep.mubr.msk.bf16.mxu0 %vm7731_vm2, %v7691_v6  ;;  %v5666_v35 = vsel %vm5511_vm6, %v5665_v15, %v5664_v58  ;;  %v5960_v23 = vpack.c.b16 %v5660_v56, %v5660_v56  ;;  %v17676_v15 = vpop.f32.mrf.mxu0  ;;  %v17929_v7 = vld [vmem:[#allocation2 + $0x38] ss:$0 sps:$4 sm:$0x11]  }
 0x1c2   : > { %v15350_v57 = vrot.slane %v2251_v3, 9  ;;  %v5668_v41 = vsel %vm5514_vm7, %v5667_v54, %v5666_v35  ;;  %v5673_v9 = vrot.slane %v5344_v10, 1  ;;  %v1698_v31 = vmax.f32 %v1594_v48, %v1598_v5  ;;  %v6168_v5 = vld [vmem:[#allocation2 + $0x30] sm:$0xf] }
 0x1c3   : > { %v2260_v8 = vcombine.high %v2258_v39, %v2258_v39  ;;  %v15351_v19 = vrot.slane %v2259_v30, 9  ;;  %v15352_v12 = vrot.slane %v2258_v39, 9  ;;  %v5670_v38 = vsel %vm5517_vm9, %v5669_v28, %v5668_v41  ;;  %v1246_v34 = vpop.f32.mrf.mxu0 }
 0x1c4   : > { %v6084_v18 = vsel %vm19198_vm15, %v5960_v23, %v6083_v59  ;;  %v5672_v54 = vsel %vm5520_vm10, %v5671_v60, %v5670_v38  ;;  %v1239_v21 = vadd.f32 %v19471_v37, %v19572_v11  ;;  %v4018_v24 = vmax.f32 %v2251_v3, %v15350_v57 }
 0x1c5   : > { %6085 = vst [vmem:[#allocation2 + $0x48] sm:$0xf] %v6084_v18  ;;  %v5674_v10 = vsel %vm5523_vm13, %v5673_v9, %v5672_v54  ;;  %v19661_v28 = vadd.f32 %v19471_v37, %v19582_v55  ;;  %v2210_v48 = vcombine.high %v1698_v31, %v1698_v31  ;;  %v2217_v53 = vrot.slane %v1698_v31, %v19095_v26  ;;  %v19670_v41 = vpop.f32.mrf.mxu0 }
 0x1c6   : > { %v5961_v61 = vpack.c.b16 %v5674_v10, %v5674_v10  ;;  %v15353_v0 = vrot.slane %v2260_v8, 9  ;;  %v4019_v50 = vmax.f32 %v2259_v30, %v15351_v19  ;;  %v4020_v13 = vmax.f32 %v2258_v39, %v15352_v12 }
 0x1c7   : > { %v2224_v32 = vrot.slane %v2210_v48, %v19095_v26  ;;  %v2225_v46 = vcombine.high %v2217_v53, %v2217_v53  ;;  %v15342_v11 = vrot.slane %v2217_v53, 9  ;;  %v6966_v40 = vshll.u32 %v19357_v62, 16 }
 0x1c8   : > { %6086 = vst.msk [vmem:[#allocation2 + $0x4c] sm:$0xf] %vm4170_vm4, %v5961_v61  ;;  %v1597_v55 = vmax.f32 %v1239_v21, 0.0  ;;  %v16715_v1 = vpack.c.bf16 %v4018_v24, %v4018_v24  ;;  %v1255_v43 = vadd.f32 %v19471_v37, %v17676_v15  ;;  %v1595_v3 = vmax.f32 %v19661_v28, 0.0 }
 0x1c9   : > { %v2226_v49 = vcombine.high %v2224_v32, %v2224_v32  ;;  %v15343_v36 = vrot.slane %v2225_v46, 9  ;;  %v15344_v6 = vrot.slane %v2224_v32, 9  ;;  %v4021_v56 = vmax.f32 %v2260_v8, %v15353_v0  ;;  %v1259_v0 = vpop.f32.mrf.mxu0 }
 0x1ca   : > { %v16716_v58 = vpack.c.bf16 %v4019_v50, %v4019_v50  ;;  %v16717_v59 = vpack.c.bf16 %v4020_v13, %v4020_v13  ;;  %v4010_v39 = vmax.f32 %v2217_v53, %v15342_v11  ;;  %v1601_v57 = vmax.f32 %v1255_v43, 0.0 }
 0x1cb   : > { %v15345_v30 = vrot.slane %v2226_v49, 9  ;;  %v4011_v35 = vmax.f32 %v2225_v46, %v15343_v36  ;;  %v4012_v23 = vmax.f32 %v2224_v32, %v15344_v6  ;;  %v19672_v19 = vunpack.c.l.b16 %v16715_v1 }
 0x1cc   : > { %v16707_v12 = vpack.c.bf16 %v4010_v39, %v4010_v39  ;;  %v19674_v9 = vcombine.low %v6168_v5, %v6169_v44  ;;  %v6538_v38 = vshll.u32 %v17929_v7, 16  ;;  %v1701_v8 = vmax.f32 %v1597_v55, %v1601_v57 }
 0x1cd   : > { %v4013_v18 = vmax.f32 %v2226_v49, %v15345_v30  ;;  %v16708_v31 = vpack.c.bf16 %v4011_v35, %v4011_v35  ;;  %v16709_v15 = vpack.c.bf16 %v4012_v23, %v4012_v23  ;;  %v16718_v54 = vpack.c.bf16 %v4021_v56, %v4021_v56  ;;  %v19685_v30 = vpop.f32.mrf.mxu0 }
 0x1ce   : > { %v19676_v21 = vunpack.c.l.b16 %v16716_v58  ;;  %v5346_v24 = vunpack.c.l.b16 %v16707_v12  ;;  %v6533_v10 = vshll.u32 %v19674_v9, 16  ;;  %v2261_v53 = vcombine.high %v1701_v8, %v1701_v8 }
 0x1cf   : > { %v16710_v28 = vpack.c.bf16 %v4013_v18, %v4013_v18  ;;  %v5347_v48 = vunpack.c.l.b16 %v16708_v31  ;;  %v6531_v61 = vshrl.u32 %v19674_v9, 16  ;;  %v5348_v50 = vunpack.c.l.b16 %v16709_v15 }
 0x1d0   : > { %v2268_v13 = vrot.slane %v1701_v8, %v19095_v26  ;;  %v6535_v32 = vrot.slane %v6533_v10, 1  ;;  %v1247_v46 = vadd.f32 %v19471_v37, %v1246_v34  ;;  %v19682_v11 = vunpack.c.l.b16 %v16717_v59 }
 0x1d1   : > { %v5676_v55 = vrot.slane %v5347_v48, 6  ;;  %v2275_v1 = vrot.slane %v2261_v53, %v19095_v26  ;;  %v6540_v43 = vrot.slane %v6538_v38, 1  ;;  %v5349_v44 = vunpack.c.l.b16 %v16710_v28  ;;  %v19699_v53 = vpop.f32.mrf.mxu0 }
 0x1d2   : > { %v2276_v7 = vcombine.high %v2268_v13, %v2268_v13  ;;  %v15354_v49 = vrot.slane %v2268_v13, 9  ;;  %v6536_v36 = vor.u32 %v6535_v32, %v6531_v61  ;;  %v1599_v6 = vmax.f32 %v1247_v46, 0.0  ;;  %v17954_v32 = vld [vmem:[%s23690_s3 + $0x28] sm:$0xff]  }
 0x1d3   : > { %v5675_v56 = vrot.slane %v5346_v24, 7  ;;  %v2277_v58 = vcombine.high %v2275_v1, %v2275_v1  ;;  %v15356_v39 = vrot.slane %v2275_v1, 9  ;;  %v5678_v35 = vrot.slane %v5348_v50, 5 }
 0x1d4   : > { %v15355_v23 = vrot.slane %v2276_v7, 9  ;;  %v4022_v57 = vmax.f32 %v2268_v13, %v15354_v49  ;;  %v6541_v34 = vsel %vm6481_vm0, %v6536_v36, %v6540_v43  ;;  %v1699_v38 = vmax.f32 %v1595_v3, %v1599_v6  ;;  %v17953_v3 = vld [vmem:[%s23690_s3 + $0x68] sm:$0xff]   ;;  %v6094_v13 = vld [vmem:[#allocation2 + $0x5c] sm:$0x1] }
 0x1d5   : > { %v5677_v59 = vsel %vm5508_vm5, %v5676_v55, %v5675_v56  ;;  %v15357_v5 = vrot.slane %v2277_v58, 9  ;;  %v4024_v12 = vmax.f32 %v2275_v1, %v15356_v39  ;;  %6682 = vrot.lane.b32.xlu1 %v6541_v34, %s18721_s14  ;;  %v19692_v18 = vrot.slane %v6966_v40, 1  ;;  %17025 = vmatprep.subr.bf16.mxu1 %v17953_v3 }
 0x1d6   : > { %v19694_v31 = vunpack.c.l.b16 %v16718_v54  ;;  %v5688_v15 = vrot.slane %v19672_v19, 7  ;;  %v5690_v8 = vrot.slane %v19676_v21, 6  ;;  %v4023_v24 = vmax.f32 %v2276_v7, %v15355_v23  ;;  %17026 = vmatpush3.bf16.msra.mxu1 %v17954_v32  ;;  %v17683_v23 = vpop.f32.mrf.mxu0  ;;  %v6296_v32 = vld [vmem:[#allocation2 + $0x40] sm:$0xf] }
 0x1d7   : > { %23767 = vst [vmem:[#allocation14_spill] sm:$0xff] %v19692_v18  ;;  %v4025_v10 = vmax.f32 %v2277_v58, %v15357_v5  ;;  %v2227_v28 = vcombine.high %v1699_v38, %v1699_v38  ;;  %v2234_v48 = vrot.slane %v1699_v38, %v19095_v26  ;;  %v5692_v40 = vrot.slane %v19682_v11, 5  ;;  %v6232_v5 = vld [vmem:[#allocation2 + $0x3c] sm:$0xf] }
 0x1d8   : > { %v5679_v54 = vsel %vm5511_vm6, %v5678_v35, %v5677_v59  ;;  %v5680_v61 = vrot.slane %v5349_v44, 4  ;;  %v16719_v50 = vpack.c.bf16 %v4022_v57, %v4022_v57  ;;  %v16721_v46 = vpack.c.bf16 %v4024_v12, %v4024_v12  ;;  %v19716_v44 = vld [vmem:[#allocation2 + $0x40] sm:$0xf] }
 0x1d9   : > { %v16873_v55 = vpack.c.bf16 %v4025_v10, %v4025_v10  ;;  %v2241_v1 = vrot.slane %v2227_v28, %v19095_v26  ;;  %v2242_v43 = vcombine.high %v2234_v48, %v2234_v48  ;;  %v5694_v7 = vrot.slane %v19694_v31, 4  ;;  %23768 = vst [vmem:[#allocation15_spill] sm:$0xff] %v19716_v44  ;;  %v17955_v57 = vld [vmem:[%s23690_s3 + $0x60] sm:$0xff]  }
 0x1da   : > { %v15346_v49 = vrot.slane %v2234_v48, 9  ;;  %v1268_v36 = vadd.f32 %v19471_v37, %v19670_v41  ;;  %v19714_v6 = vadd.f32 %v19471_v37, %v1259_v0  ;;  %v16720_v56 = vpack.c.bf16 %v4023_v24, %v4023_v24  ;;  %v17956_v12 = vld [vmem:[%s23690_s3 + $0x20] sm:$0xff]   ;;  %17027 = vmatprep.subr.bf16.mxu1 %v17955_v57 }
 0x1db   : > { %v6095_v58 = vsel %vm19158_vm12, %v16873_v55, %v6094_v13  ;;  %v2243_v39 = vcombine.high %v2241_v1, %v2241_v1  ;;  %v15347_v35 = vrot.slane %v2242_v43, 9  ;;  %v19723_v34 = vunpack.c.l.b16 %v16719_v50  ;;  %17028 = vmatpush3.bf16.msra.mxu1 %v17956_v12 }
 0x1dc   : > { %6096 = vst [vmem:[#allocation2 + $0x5c] sm:$0x1] %v6095_v58  ;;  %v15348_v41 = vrot.slane %v2241_v1, 9  ;;  %v4014_v0 = vmax.f32 %v2234_v48, %v15346_v49  ;;  %v5681_v59 = vsel %vm5514_vm7, %v5680_v61, %v5679_v54  ;;  %v19729_v38 = vunpack.c.l.b16 %v16721_v46  ;;  %v17932_v54 = vld [vmem:[#allocation2 + $0x44] ss:$0 sps:$4 sm:$0x11]  }
 0x1dd   : > { %v15349_v24 = vrot.slane %v2243_v39, 9  ;;  %v4015_v10 = vmax.f32 %v2242_v43, %v15347_v35  ;;  %v19732_v28 = vcombine.low %v6232_v5, %v19716_v44  ;;  %v1604_v13 = vmax.f32 %v1268_v36, 0.0  ;;  %v6340_v35 = vld [vmem:[#allocation2 + $0x3c] sm:$0xe] }
 0x1de   : > { %v4016_v3 = vmax.f32 %v2241_v1, %v15348_v41  ;;  %v16711_v50 = vpack.c.bf16 %v4014_v0, %v4014_v0  ;;  %v1284_v48 = vadd.f32 %v19471_v37, %v17683_v23  ;;  %v19735_v61 = vunpack.c.l.b16 %v16720_v56  ;;  %v17957_v1 = vld [vmem:[%s23690_s3 + $0x58] sm:$0xff]   ;;  %v1275_v23 = vpop.f32.mrf.mxu0 }
 0x1df   : > { %23769 = vst [vmem:[#allocation16_spill] sm:$0xff] %v19732_v28  ;;  %v4017_v55 = vmax.f32 %v2243_v39, %v15349_v24  ;;  %v16712_v49 = vpack.c.bf16 %v4015_v10, %v4015_v10  ;;  %v1602_v46 = vmax.f32 %v19714_v6, 0.0  ;;  %6891 = vrot.lane.b32.xlu0 %v19732_v28, %s18721_s14  ;;  %v5696_v43 = vrot.slane %v19723_v34, 3  ;;  %v17960_v56 = vld [vmem:[%s23690_s3 + $0x18] sm:$0xff]   ;;  %17029 = vmatprep.subr.bf16.mxu1 %v17957_v1 }
 0x1e0   : > { %v16713_v36 = vpack.c.bf16 %v4016_v3, %v4016_v3  ;;  %v5350_v37 = vunpack.c.l.b16 %v16711_v50  ;;  %v1608_v58 = vmax.f32 %v1284_v48, 0.0  ;;  %v5700_v6 = vrot.slane %v19729_v38, 1  ;;  %17030 = vmatpush3.bf16.msra.mxu1 %v17960_v56  ;;  %v19751_v50 = vld [vmem:[%s23689_s2] ss:$0 sm:$0xff] }
 0x1e1   : > { %v16714_v39 = vpack.c.bf16 %v4017_v55, %v4017_v55  ;;  %v5351_v57 = vunpack.c.l.b16 %v16712_v49  ;;  %v15905_v41 = vcombine.low %v6340_v35, %v6296_v32  ;;  %v7693_v24 = vrot.slane %v17932_v54, 1 }
 0x1e2   : > { %v5352_v0 = vunpack.c.l.b16 %v16713_v36  ;;  %v5682_v5 = vrot.slane %v5350_v37, 3  ;;  %v1704_v12 = vmax.f32 %v1604_v13, %v1608_v58  ;;  %v1276_v48 = vadd.f32 %v19751_v50, %v1275_v23  ;;  %v17964_v13 = vld [vmem:[%s23690_s3 + $0x50] sm:$0xff]  }
 0x1e3   : > { %v5353_v34 = vunpack.c.l.b16 %v16714_v39  ;;  %v5684_v10 = vrot.slane %v5351_v57, 2  ;;  %v7692_v3 = vrot.slane %v15905_v41, 1  ;;  %v6090_v23 = vld [vmem:[#allocation2 + $0x54] sm:$0xf]  ;;  %v5698_v19 = vrot.slane %v19735_v61, 2  ;;  %17031 = vmatprep.subr.bf16.mxu1 %v17964_v13 }
 0x1e4   : > { %v5683_v38 = vsel %vm5517_vm9, %v5682_v5, %v5681_v59  ;;  %v5686_v55 = vrot.slane %v5352_v0, 1  ;;  %v2312_v32 = vcombine.high %v1704_v12, %v1704_v12  ;;  %v2319_v49 = vrot.slane %v1704_v12, %v19095_v26  ;;  %v17965_v59 = vld [vmem:[%s23690_s3 + $0x10] sm:$0xff]   ;;  %v19780_v12 = vld [vmem:[#allocation2 + $0x18] sm:$0xe] }
 0x1e5   : > { %v5685_v54 = vsel %vm5520_vm10, %v5684_v10, %v5683_v38  ;;  %v5689_v1 = vsel %vm5526_vm11, %v5688_v15, %v5353_v34  ;;  %v7694_v36 = vsel %vm6754_vm1, %v7692_v3, %v7693_v24  ;;  %v1606_v37 = vmax.f32 %v1276_v48, 0.0  ;;  %17032 = vmatpush3.bf16.msra.mxu1 %v17965_v59  ;;  %v19785_v34 = vld [vmem:[#allocation2 + $0x1c] sm:$0xf]  ;;  %v6289_v10 = vld [vmem:[#allocation2 + $0x18] sm:$0xf]  ;;  %v17684_v48 = vpop.f32.mrf.mxu0 }
 0x1e6   : > { %v5687_v58 = vsel %vm5523_vm13, %v5686_v55, %v5685_v54  ;;  %v5691_v35 = vsel %vm5508_vm5, %v5690_v8, %v5689_v1  ;;  %v2326_v56 = vrot.slane %v2312_v32, %v19095_v26  ;;  %v2327_v39 = vcombine.high %v2319_v49, %v2319_v49  ;;  %17762 = vmatmul.mubr.msk.bf16.gmra.mxu0 %vm7731_vm2, %v7694_v36 }
 0x1e7   : > { %v5693_v15 = vsel %vm5511_vm6, %v5692_v40, %v5691_v35  ;;  %v5963_v57 = vpack.c.b16 %v5687_v58, %v5687_v58  ;;  %v1702_v41 = vmax.f32 %v1602_v46, %v1606_v37  ;;  %v15366_v0 = vrot.slane %v2319_v49, 9 }
 0x1e8   : > { %v5695_v21 = vsel %vm5514_vm7, %v5694_v7, %v5693_v15  ;;  %v2328_v8 = vcombine.high %v2326_v56, %v2326_v56  ;;  %v15367_v5 = vrot.slane %v2327_v39, 9  ;;  %v15368_v61 = vrot.slane %v2326_v56, 9  ;;  %v19799_v15 = vld [vmem:[#allocation2 + $0x24] sm:$0xe] }
 0x1e9   : > { %v5697_v24 = vsel %vm5517_vm9, %v5696_v43, %v5695_v21  ;;  %v6091_v11 = vsel %vm19198_vm15, %v5963_v57, %v6090_v23  ;;  %v2278_v40 = vcombine.high %v1702_v41, %v1702_v41  ;;  %v6978_v46 = vshll.u32 %v19431_v25, 16  ;;  %v18597_v43 = vld [vmem:[#allocation2 + $0x1c] sm:$0xf]  ;;  %v1278_v21 = vpop.f32.mrf.mxu0 }
 0x1ea   : > { %v5699_v3 = vsel %vm5520_vm10, %v5698_v19, %v5697_v24  ;;  %6092 = vst [vmem:[#allocation2 + $0x54] sm:$0xf] %v6091_v11  ;;  %v19792_v38 = vcombine.low %v6289_v10, %v18597_v43  ;;  %v2285_v32 = vrot.slane %v1702_v41, %v19095_v26  ;;  %v15369_v1 = vrot.slane %v2328_v8, 9  ;;  %v6170_v43 = vld [vmem:[#allocation2 + $0x3c] sm:$0xf] }
 0x1eb   : > { %v5701_v55 = vsel %vm5523_vm13, %v5700_v6, %v5699_v3  ;;  %v2292_v13 = vrot.slane %v2278_v40, %v19095_v26  ;;  %v4034_v36 = vmax.f32 %v2319_v49, %v15366_v0  ;;  %v4035_v37 = vmax.f32 %v2327_v39, %v15367_v5  ;;  %v6171_v5 = vld [vmem:[#allocation2 + $0x40] sm:$0xf]  ;;  %v19812_v60 = vpop.f32.mrf.mxu0 }
 0x1ec   : > { %23770 = vst [vmem:[#allocation17_spill] sm:$0xff] %v19792_v38  ;;  %v5964_v54 = vpack.c.b16 %v5701_v55, %v5701_v55  ;;  %v4036_v59 = vmax.f32 %v2326_v56, %v15368_v61  ;;  %v2293_v58 = vcombine.high %v2285_v32, %v2285_v32  ;;  %v15358_v23 = vrot.slane %v2285_v32, 9 }
 0x1ed   : > { %v2294_v35 = vcombine.high %v2292_v13, %v2292_v13  ;;  %v19797_v19 = vrot.slane %v6978_v46, 1  ;;  %v1271_v6 = vadd.f32 %v19751_v50, %v19685_v30  ;;  %v1263_v57 = vadd.f32 %v19751_v50, %v19699_v53  ;;  %v17935_v46 = vld [vmem:[#allocation2 + $0x44] ss:$0 sps:$4 sm:$0x11]  }
 0x1ee   : > { %6093 = vst.msk [vmem:[#allocation2 + $0x58] sm:$0xf] %vm4170_vm4, %v5964_v54  ;;  %v15360_v41 = vrot.slane %v2292_v13, 9  ;;  %v15359_v56 = vrot.slane %v2293_v58, 9  ;;  %v4026_v0 = vmax.f32 %v2285_v32, %v15358_v23  ;;  %v4037_v11 = vmax.f32 %v2328_v8, %v15369_v1 }
 0x1ef   : > { %23771 = vst [vmem:[#allocation18_spill] sm:$0xff] %v19797_v19  ;;  %v15361_v39 = vrot.slane %v2294_v35, 9  ;;  %v16731_v61 = vpack.c.bf16 %v4034_v36, %v4034_v36  ;;  %v16732_v10 = vpack.c.bf16 %v4035_v37, %v4035_v37  ;;  %v16733_v30 = vpack.c.bf16 %v4036_v59, %v4036_v59 }
 0x1f0   : > { %v4028_v40 = vmax.f32 %v2292_v13, %v15360_v41  ;;  %v4027_v3 = vmax.f32 %v2293_v58, %v15359_v56  ;;  %v1287_v53 = vadd.f32 %v19751_v50, %v17684_v48  ;;  %v1605_v55 = vmax.f32 %v1271_v6, 0.0 }
 0x1f1   : > { %v1603_v54 = vmax.f32 %v1263_v57, 0.0  ;;  %v16723_v33 = vpack.c.bf16 %v4026_v0, %v4026_v0  ;;  %v19810_v7 = vcombine.low %v6170_v43, %v6171_v5  ;;  %v4029_v32 = vmax.f32 %v2294_v35, %v15361_v39  ;;  %v19823_v39 = vpop.f32.mrf.mxu0 }
 0x1f2   : > { %v16724_v23 = vpack.c.bf16 %v4027_v3, %v4027_v3  ;;  %v16725_v49 = vpack.c.bf16 %v4028_v40, %v4028_v40  ;;  %v1609_v8 = vmax.f32 %v1287_v53, 0.0  ;;  %v16734_v1 = vpack.c.bf16 %v4037_v11, %v4037_v11 }
 0x1f3   : > { %v19814_v13 = vunpack.c.l.b16 %v16731_v61  ;;  %v6545_v36 = vshll.u32 %v19810_v7, 16  ;;  %v6550_v37 = vshll.u32 %v17935_v46, 16  ;;  %v19817_v59 = vunpack.c.l.b16 %v16732_v10 }
 0x1f4   : > { %v19819_v48 = vunpack.c.l.b16 %v16733_v30  ;;  %v5363_v58 = vunpack.c.l.b16 %v16724_v23  ;;  %v1705_v6 = vmax.f32 %v1605_v55, %v1609_v8  ;;  %v5362_v57 = vunpack.c.l.b16 %v16723_v33  ;;  %v17968_v33 = vld [vmem:[%s23690_s3 + $0x48] sm:$0xff]  }
 0x1f5   : > { %v6543_v41 = vshrl.u32 %v19810_v7, 16  ;;  %v6547_v56 = vrot.slane %v6545_v36, 1  ;;  %v1279_v35 = vadd.f32 %v19751_v50, %v1278_v21  ;;  %v16726_v0 = vpack.c.bf16 %v4029_v32, %v4029_v32  ;;  %v19837_v36 = vpop.f32.mrf.mxu0  ;;  %17033 = vmatprep.subr.bf16.mxu1 %v17968_v33 }
 0x1f6   : > { %v5364_v5 = vunpack.c.l.b16 %v16725_v49  ;;  %v2329_v11 = vcombine.high %v1705_v6, %v1705_v6  ;;  %v2336_v61 = vrot.slane %v1705_v6, %v19095_v26  ;;  %v5703_v40 = vrot.slane %v5363_v58, 6  ;;  %v17969_v49 = vld [vmem:[%s23690_s3 + $0x8] sm:$0xff]  }
 0x1f7   : > { %v6548_v46 = vor.u32 %v6547_v56, %v6543_v41  ;;  %v6552_v10 = vrot.slane %v6550_v37, 1  ;;  %v1607_v30 = vmax.f32 %v1279_v35, 0.0  ;;  %v19834_v55 = vunpack.c.l.b16 %v16734_v1  ;;  %17034 = vmatpush3.bf16.msra.mxu1 %v17969_v49 }
 0x1f8   : > { %v2343_v53 = vrot.slane %v2329_v11, %v19095_v26  ;;  %v2344_v21 = vcombine.high %v2336_v61, %v2336_v61  ;;  %v15370_v43 = vrot.slane %v2336_v61, 9  ;;  %v5702_v32 = vrot.slane %v5362_v57, 7 }
 0x1f9   : > { %v6553_v23 = vsel %vm6481_vm0, %v6548_v46, %v6552_v10  ;;  %v1703_v8 = vmax.f32 %v1603_v54, %v1607_v30  ;;  %v5365_v37 = vunpack.c.l.b16 %v16726_v0  ;;  %v5705_v58 = vrot.slane %v5364_v5, 5  ;;  %v17970_v54 = vld [vmem:[%s23690_s3 + $0x40] sm:$0xff]  }
 0x1fa   : > { %v2345_v6 = vcombine.high %v2343_v53, %v2343_v53  ;;  %v15371_v41 = vrot.slane %v2344_v21, 9  ;;  %6684 = vrot.lane.b32.xlu1 %v6553_v23, %s18721_s14  ;;  %v5704_v35 = vsel %vm5508_vm5, %v5703_v40, %v5702_v32  ;;  %v15372_v0 = vrot.slane %v2343_v53, 9  ;;  %v17971_v10 = vld [vmem:[%s23690_s3] sm:$0xff]   ;;  %v19852_v32 = vpop.f32.mrf.mxu0  ;;  %17035 = vmatprep.subr.bf16.mxu1 %v17970_v54 }
 0x1fb   : > { %v2295_v1 = vcombine.high %v1703_v8, %v1703_v8  ;;  %v2302_v57 = vrot.slane %v1703_v8, %v19095_v26  ;;  %v4038_v46 = vmax.f32 %v2336_v61, %v15370_v43  ;;  %v5706_v23 = vsel %vm5511_vm6, %v5705_v58, %v5704_v35  ;;  %17036 = vmatpush3.bf16.msra.mxu1 %v17971_v10  ;;  %v6101_v61 = vld [vmem:[#allocation2 + $0x68] sm:$0x1]  ;;  %v6235_v58 = vld [vmem:[#allocation2 + $0x4c] sm:$0xf] }
 0x1fc   : > { %v15373_v5 = vrot.slane %v2345_v6, 9  ;;  %v5707_v8 = vrot.slane %v5365_v37, 4  ;;  %v4039_v31 = vmax.f32 %v2344_v21, %v15371_v41  ;;  %v4040_v3 = vmax.f32 %v2343_v53, %v15372_v0  ;;  %v17691_v37 = vpop.f32.mrf.mxu0  ;;  %v6234_v0 = vld [vmem:[#allocation2 + $0x48] sm:$0xf] }
 0x1fd   : > { %v2309_v40 = vrot.slane %v2295_v1, %v19095_v26  ;;  %v2310_v33 = vcombine.high %v2302_v57, %v2302_v57  ;;  %v15362_v49 = vrot.slane %v2302_v57, 9  ;;  %v16735_v30 = vpack.c.bf16 %v4038_v46, %v4038_v46 }
 0x1fe   : > { %v4041_v4 = vmax.f32 %v2345_v6, %v15373_v5  ;;  %v1300_v1 = vadd.f32 %v19751_v50, %v19812_v60  ;;  %v16736_v21 = vpack.c.bf16 %v4039_v31, %v4039_v31  ;;  %v5708_v41 = vsel %vm5514_vm7, %v5707_v8, %v5706_v23 }
 0x1ff   : > { %v2311_v43 = vcombine.high %v2309_v40, %v2309_v40  ;;  %v15363_v24 = vrot.slane %v2310_v33, 9  ;;  %v15364_v11 = vrot.slane %v2309_v40, 9  ;;  %v4030_v56 = vmax.f32 %v2302_v57, %v15362_v49 }
 0x200   : > { %v16874_v14 = vpack.c.bf16 %v4041_v4, %v4041_v4  ;;  %v1292_v53 = vadd.f32 %v19751_v50, %v19823_v39  ;;  %v1316_v31 = vadd.f32 %v19751_v50, %v17691_v37  ;;  %v5375_v49 = vunpack.c.l.b16 %v16736_v21 }
 0x201   : > { %v15365_v19 = vrot.slane %v2311_v43, 9  ;;  %v4031_v25 = vmax.f32 %v2310_v33, %v15363_v24  ;;  %v4032_v54 = vmax.f32 %v2309_v40, %v15364_v11  ;;  %v16727_v18 = vpack.c.bf16 %v4030_v56, %v4030_v56  ;;  %v6298_v40 = vld [vmem:[#allocation2 + $0x4c] sm:$0xf]  ;;  %v17939_v33 = vld [vmem:[#allocation2 + $0x50] ss:$0 sps:$4 sm:$0x11]  }
 0x202   : > { %v6102_v6 = vsel %vm19158_vm12, %v16874_v14, %v6101_v61  ;;  %v16737_v24 = vpack.c.bf16 %v4040_v3, %v4040_v3  ;;  %v5374_v11 = vunpack.c.l.b16 %v16735_v30  ;;  %v19862_v56 = vcombine.low %v6234_v0, %v6235_v58  ;;  %v6341_v61 = vld [vmem:[#allocation2 + $0x48] sm:$0xe] }
 0x203   : > { %6103 = vst [vmem:[#allocation2 + $0x68] sm:$0x1] %v6102_v6  ;;  %v4033_v4 = vmax.f32 %v2311_v43, %v15365_v19  ;;  %v16728_v35 = vpack.c.bf16 %v4031_v25, %v4031_v25  ;;  %v16729_v57 = vpack.c.bf16 %v4032_v54, %v4032_v54  ;;  %v5366_v60 = vunpack.c.l.b16 %v16727_v18  ;;  %v1307_v18 = vpop.f32.mrf.mxu0 }
 0x204   : > { %23772 = vst [vmem:[#allocation19_spill] sm:$0xff] %v19862_v56  ;;  %v1612_v39 = vmax.f32 %v1300_v1, 0.0  ;;  %v1610_v23 = vmax.f32 %v1292_v53, 0.0  ;;  %6893 = vrot.lane.b32.xlu0 %v19862_v56, %s18721_s14  ;;  %v1616_v25 = vmax.f32 %v1316_v31, 0.0  ;;  %v5376_v43 = vunpack.c.l.b16 %v16737_v24 }
 0x205   : > { %v16730_v5 = vpack.c.bf16 %v4033_v4, %v4033_v4  ;;  %v5367_v46 = vunpack.c.l.b16 %v16728_v35  ;;  %v5368_v14 = vunpack.c.l.b16 %v16729_v57  ;;  %v5709_v10 = vrot.slane %v5366_v60, 3  ;;  %v6097_v60 = vld [vmem:[#allocation2 + $0x60] sm:$0xf] }
 0x206   : > { %v5723_v54 = vrot.slane %v5374_v11, 3  ;;  %v1708_v58 = vmax.f32 %v1612_v39, %v1616_v25  ;;  %v15906_v37 = vcombine.low %v6341_v61, %v6298_v40  ;;  %v23773_v1 = vrot.slane %v19814_v13, 7 }
 0x207   : > { %v5369_v19 = vunpack.c.l.b16 %v16730_v5  ;;  %v5710_v3 = vsel %vm5517_vm9, %v5709_v10, %v5708_v41  ;;  %v5711_v30 = vrot.slane %v5367_v46, 2  ;;  %v5713_v8 = vrot.slane %v5368_v14, 1  ;;  %v17692_v14 = vpop.f32.mrf.mxu0 }
 0x208   : > { %v7696_v53 = vrot.slane %v17939_v33, 1  ;;  %v1308_v4 = vadd.f32 %v19751_v50, %v1307_v18  ;;  %v23774_v41 = vrot.slane %v19817_v59, 6  ;;  %v2380_v0 = vcombine.high %v1708_v58, %v1708_v58 }
 0x209   : > { %v5712_v6 = vsel %vm5520_vm10, %v5711_v30, %v5710_v3  ;;  %v5716_v21 = vsel %vm5526_vm11, %v23773_v1, %v5369_v19  ;;  %v2387_v24 = vrot.slane %v1708_v58, %v19095_v26  ;;  %v23775_v11 = vrot.slane %v19819_v48, 5 }
 0x20a   : > { %v5714_v35 = vsel %vm5523_vm13, %v5713_v8, %v5712_v6  ;;  %v5718_v57 = vsel %vm5508_vm5, %v23774_v41, %v5716_v21  ;;  %v7695_v5 = vrot.slane %v15906_v37, 1  ;;  %v1614_v46 = vmax.f32 %v1308_v4, 0.0  ;;  %v19897_v37 = vpop.f32.mrf.mxu0 }
 0x20b   : > { %v5720_v31 = vsel %vm5511_vm6, %v23775_v11, %v5718_v57  ;;  %v5966_v13 = vpack.c.b16 %v5714_v35, %v5714_v35  ;;  %v5725_v10 = vrot.slane %v5375_v49, 2  ;;  %v5727_v40 = vrot.slane %v5376_v43, 1 }
 0x20c   : > { %v23776_v33 = vrot.slane %v19834_v55, 4  ;;  %v2394_v39 = vrot.slane %v2380_v0, %v19095_v26  ;;  %v7697_v48 = vsel %vm6754_vm1, %v7695_v5, %v7696_v53  ;;  %v1706_v19 = vmax.f32 %v1610_v23, %v1614_v46  ;;  %v19892_v55 = vld [vmem:[#allocation2 + $0x30] sm:$0xe] }
 0x20d   : > { %v6098_v18 = vsel %vm19198_vm15, %v5966_v13, %v6097_v60  ;;  %v2395_v49 = vcombine.high %v2387_v24, %v2387_v24  ;;  %v15382_v8 = vrot.slane %v2387_v24, 9  ;;  %17765 = vmatprep.mubr.msk.bf16.mxu0 %vm7731_vm2, %v7697_v48  ;;  %23777 = vst [vmem:[#allocation20_spill] sm:$0xff] %v19892_v55  ;;  %v1319_v58 = vadd.f32 %v19751_v50, %v17692_v14  ;;  %v6293_v13 = vld [vmem:[#allocation2 + $0x30] sm:$0xf] }
 0x20e   : > { %v5722_v59 = vsel %vm5514_vm7, %v23776_v33, %v5720_v31  ;;  %6099 = vst [vmem:[#allocation2 + $0x60] sm:$0xf] %v6098_v18  ;;  %v2346_v43 = vcombine.high %v1706_v19, %v1706_v19  ;;  %v23778_v23 = vshll.u32 %v19525_v22, 16  ;;  %v2396_v53 = vcombine.high %v2394_v39, %v2394_v39 }
 0x20f   : > { %v5724_v25 = vsel %vm5517_vm9, %v5723_v54, %v5722_v59  ;;  %v2353_v54 = vrot.slane %v1706_v19, %v19095_v26  ;;  %v1303_v4 = vadd.f32 %v19751_v50, %v19837_v36  ;;  %v15383_v0 = vrot.slane %v2395_v49, 9 }
 0x210   : > { %v5726_v30 = vsel %vm5520_vm10, %v5725_v10, %v5724_v25  ;;  %v19901_v6 = vrot.slane %v23778_v23, 1  ;;  %v2360_v35 = vrot.slane %v2346_v43, %v19095_v26  ;;  %v15384_v11 = vrot.slane %v2394_v39, 9 }
 0x211   : > { %v5728_v61 = vsel %vm5523_vm13, %v5727_v40, %v5726_v30  ;;  %v2361_v41 = vcombine.high %v2353_v54, %v2353_v54  ;;  %v15374_v57 = vrot.slane %v2353_v54, 9  ;;  %v4050_v31 = vmax.f32 %v2387_v24, %v15382_v8  ;;  %v19910_v40 = vpop.f32.mrf.mxu0 }
 0x212   : > { %23779 = vst [vmem:[#allocation21_spill] sm:$0xff] %v19901_v6  ;;  %v5967_v21 = vpack.c.b16 %v5728_v61, %v5728_v61  ;;  %v2362_v5 = vcombine.high %v2360_v35, %v2360_v35  ;;  %v15376_v14 = vrot.slane %v2360_v35, 9  ;;  %v1617_v10 = vmax.f32 %v1319_v58, 0.0  ;;  %v6173_v61 = vld [vmem:[#allocation2 + $0x4c] sm:$0xf] }
 0x213   : > { %v15375_v46 = vrot.slane %v2361_v41, 9  ;;  %v7002_v36 = vshll.u32 %v19604_v29, 16  ;;  %v19914_v33 = vcombine.low %v6293_v13, %v19612_v42  ;;  %v15385_v59 = vrot.slane %v2396_v53, 9  ;;  %v6172_v29 = vld [vmem:[#allocation2 + $0x48] sm:$0xf]  ;;  %v19916_v6 = vpop.f32.mrf.mxu0 }
 0x214   : > { %6100 = vst.msk [vmem:[#allocation2 + $0x64] sm:$0xf] %vm4170_vm4, %v5967_v21  ;;  %v4042_v25 = vmax.f32 %v2353_v54, %v15374_v57  ;;  %v1613_v18 = vmax.f32 %v1303_v4, 0.0  ;;  %v15377_v48 = vrot.slane %v2362_v5, 9  ;;  %v4044_v30 = vmax.f32 %v2360_v35, %v15376_v14 }
 0x215   : > { %23780 = vst [vmem:[#allocation22_spill] sm:$0xff] %v19914_v33  ;;  %v4043_v19 = vmax.f32 %v2361_v41, %v15375_v46  ;;  %v4051_v24 = vmax.f32 %v2395_v49, %v15383_v0  ;;  %v4052_v8 = vmax.f32 %v2394_v39, %v15384_v11  ;;  %v16747_v43 = vpack.c.bf16 %v4050_v31, %v4050_v31  ;;  %v17942_v21 = vld [vmem:[#allocation2 + $0x50] ss:$0 sps:$4 sm:$0x11]  }
 0x216   : > { %v16739_v23 = vpack.c.bf16 %v4042_v25, %v4042_v25  ;;  %v4045_v58 = vmax.f32 %v2362_v5, %v15377_v48  ;;  %v16741_v3 = vpack.c.bf16 %v4044_v30, %v4044_v30  ;;  %v1709_v1 = vmax.f32 %v1613_v18, %v1617_v10 }
 0x217   : > { %v16740_v60 = vpack.c.bf16 %v4043_v19, %v4043_v19  ;;  %v19918_v42 = vrot.slane %v7002_v36, 1  ;;  %v1295_v54 = vadd.f32 %v19751_v50, %v19852_v32  ;;  %v4053_v4 = vmax.f32 %v2396_v53, %v15385_v59  ;;  %v19929_v32 = vpop.f32.mrf.mxu0 }
 0x218   : > { %v19922_v35 = vcombine.low %v6172_v29, %v6173_v61  ;;  %v16742_v49 = vpack.c.bf16 %v4045_v58, %v4045_v58  ;;  %v5378_v39 = vunpack.c.l.b16 %v16739_v23  ;;  %v2397_v57 = vcombine.high %v1709_v1, %v1709_v1 }
 0x219   : > { %23781 = vst [vmem:[#allocation23_spill] sm:$0xff] %v19918_v42  ;;  %v5379_v41 = vunpack.c.l.b16 %v16740_v60  ;;  %v16748_v0 = vpack.c.bf16 %v4051_v24, %v4051_v24  ;;  %v2404_v11 = vrot.slane %v1709_v1, %v19095_v26  ;;  %v6562_v13 = vshll.u32 %v17942_v21, 16  ;;  %v19936_v23 = vpop.f32.mrf.mxu0 }
 0x21a   : > { %v6557_v31 = vshll.u32 %v19922_v35, 16  ;;  %v16749_v5 = vpack.c.bf16 %v4052_v8, %v4052_v8  ;;  %v19926_v46 = vunpack.c.l.b16 %v16747_v43  ;;  %v5380_v14 = vunpack.c.l.b16 %v16741_v3 }
 0x21b   : > { %v2411_v10 = vrot.slane %v2397_v57, %v19095_v26  ;;  %v5730_v29 = vrot.slane %v5379_v41, 6  ;;  %v2412_v53 = vcombine.high %v2404_v11, %v2404_v11  ;;  %v6555_v36 = vshrl.u32 %v19922_v35, 16 }
 0x21c   : > { %v6559_v60 = vrot.slane %v6557_v31, 1  ;;  %v16750_v59 = vpack.c.bf16 %v4053_v4, %v4053_v4  ;;  %v5381_v25 = vunpack.c.l.b16 %v16742_v49  ;;  %v5729_v18 = vrot.slane %v5378_v39, 7  ;;  %v19942_v39 = vld [vmem:[#allocation2 + $0x3c] sm:$0xe] }
 0x21d   : > { %v2413_v1 = vcombine.high %v2411_v10, %v2411_v10  ;;  %v15386_v48 = vrot.slane %v2404_v11, 9  ;;  %v15388_v19 = vrot.slane %v2411_v10, 9  ;;  %v6564_v61 = vrot.slane %v6562_v13, 1  ;;  %23782 = vst [vmem:[#allocation24_spill] sm:$0xff] %v19942_v39 }
 0x21e   : > { %v6560_v30 = vor.u32 %v6559_v60, %v6555_v36  ;;  %v19932_v24 = vunpack.c.l.b16 %v16748_v0  ;;  %v5732_v3 = vrot.slane %v5380_v14, 5  ;;  %v1311_v43 = vadd.f32 %v19751_v50, %v19897_v37 }
 0x21f   : > { %v15389_v8 = vrot.slane %v2413_v1, 9  ;;  %v19938_v21 = vunpack.c.l.b16 %v16749_v5  ;;  %v5731_v58 = vsel %vm5508_vm5, %v5730_v29, %v5729_v18  ;;  %v15387_v4 = vrot.slane %v2412_v53, 9  ;;  %v6108_v29 = vld [vmem:[#allocation2 + $0x74] sm:$0x1] }
 0x220   : > { %v6565_v49 = vsel %vm6481_vm0, %v6560_v30, %v6564_v61  ;;  %v1611_v41 = vmax.f32 %v1295_v54, 0.0  ;;  %v19944_v57 = vunpack.c.l.b16 %v16750_v59  ;;  %v1615_v31 = vmax.f32 %v1311_v43, 0.0  ;;  %v19953_v59 = vld [vmem:[#allocation2 + $0x58] sm:$0xf] }
 0x221   : > { %v4057_v0 = vmax.f32 %v2413_v1, %v15389_v8  ;;  %6686 = vrot.lane.b32.xlu1 %v6565_v49, %s18721_s14  ;;  %v5734_v13 = vrot.slane %v5381_v25, 4  ;;  %v4054_v5 = vmax.f32 %v2404_v11, %v15386_v48  ;;  %v19949_v14 = vmax.f32 %v2411_v10, %v15388_v19  ;;  %23783 = vst [vmem:[#allocation25_spill] sm:$0xff] %v19953_v59  ;;  %v17699_v1 = vpop.f32.mrf.mxu0  ;;  %v6300_v43 = vld [vmem:[#allocation2 + $0x58] sm:$0xf] }
 0x222   : > { %v5733_v60 = vsel %vm5511_vm6, %v5732_v3, %v5731_v58  ;;  %v1707_v54 = vmax.f32 %v1611_v41, %v1615_v31  ;;  %v19957_v8 = vmax.f32 %v2412_v53, %v15387_v4  ;;  %v1332_v11 = vadd.f32 %v19751_v50, %v19910_v40  ;;  %v6236_v3 = vld [vmem:[#allocation2 + $0x54] sm:$0xf]  ;;  %v17947_v40 = vld [vmem:[#allocation2 + $0x5c] ss:$0 sps:$4 sm:$0x11]  }
 0x223   : > { %v16875_v18 = vpack.c.bf16 %v4057_v0, %v4057_v0  ;;  %v16751_v58 = vpack.c.bf16 %v4054_v5, %v4054_v5  ;;  %v16753_v49 = vpack.c.bf16 %v19949_v14, %v19949_v14  ;;  %v5735_v53 = vsel %vm5514_vm7, %v5734_v13, %v5733_v60 }
 0x224   : > { %v2363_v48 = vcombine.high %v1707_v54, %v1707_v54  ;;  %v2370_v19 = vrot.slane %v1707_v54, %v19095_v26  ;;  %v19969_v4 = vcombine.low %v6236_v3, %v19953_v59  ;;  %v1339_v54 = vpop.f32.mrf.mxu0  ;;  %v16752_v5 = vpack.c.bf16 %v19957_v8, %v19957_v8 }
 0x225   : > { %v6109_v25 = vsel %vm19158_vm12, %v16875_v18, %v6108_v29  ;;  %v1348_v29 = vadd.f32 %v19751_v50, %v17699_v1  ;;  %v6342_v18 = vld [vmem:[#allocation2 + $0x54] sm:$0xe]  ;;  %v1620_v37 = vmax.f32 %v1332_v11, 0.0  ;;  %v1324_v14 = vadd.f32 %v19751_v50, %v19916_v6 }
 0x226   : > { %6110 = vst [vmem:[#allocation2 + $0x74] sm:$0x1] %v6109_v25  ;;  %23784 = vst [vmem:[#allocation26_spill] sm:$0xff] %v19969_v4  ;;  %v2377_v41 = vrot.slane %v2363_v48, %v19095_v26  ;;  %v2378_v0 = vcombine.high %v2370_v19, %v2370_v19  ;;  %v15378_v31 = vrot.slane %v2370_v19, 9  ;;  %6895 = vrot.lane.b32.xlu0 %v19969_v4, %s18721_s14  ;;  %v7699_v1 = vrot.slane %v17947_v40, 1 }
 0x227   : > { %v15907_v13 = vcombine.low %v6342_v18, %v6300_v43  ;;  %v1624_v10 = vmax.f32 %v1348_v29, 0.0  ;;  %v1340_v30 = vadd.f32 %v19751_v50, %v1339_v54  ;;  %v1618_v22 = vmax.f32 %v1324_v14, 0.0  ;;  %v17700_v14 = vpop.f32.mrf.mxu0 }
 0x228   : > { %v2379_v60 = vcombine.high %v2377_v41, %v2377_v41  ;;  %v15379_v25 = vrot.slane %v2378_v0, 9  ;;  %v15380_v48 = vrot.slane %v2377_v41, 9  ;;  %v4046_v3 = vmax.f32 %v2370_v19, %v15378_v31 }
 0x229   : > { %v7698_v61 = vrot.slane %v15907_v13, 1  ;;  %v1712_v62 = vmax.f32 %v1620_v37, %v1624_v10  ;;  %v1622_v44 = vmax.f32 %v1340_v30, 0.0  ;;  %v5390_v19 = vunpack.c.l.b16 %v16751_v58 }
 0x22a   : > { %v15381_v36 = vrot.slane %v2379_v60, 9  ;;  %v4047_v42 = vmax.f32 %v2378_v0, %v15379_v25  ;;  %v4048_v8 = vmax.f32 %v2377_v41, %v15380_v48  ;;  %v16743_v11 = vpack.c.bf16 %v4046_v3, %v4046_v3 }
 0x22b   : > { %v7700_v6 = vsel %vm6754_vm1, %v7698_v61, %v7699_v1  ;;  %v2448_v31 = vcombine.high %v1712_v62, %v1712_v62  ;;  %v2455_v40 = vrot.slane %v1712_v62, %v19095_v26  ;;  %v1710_v29 = vmax.f32 %v1618_v22, %v1622_v44 }
 0x22c   : > { %v4049_v39 = vmax.f32 %v2379_v60, %v15381_v36  ;;  %v16744_v43 = vpack.c.bf16 %v4047_v42, %v4047_v42  ;;  %v16745_v18 = vpack.c.bf16 %v4048_v8, %v4048_v8  ;;  %v5382_v33 = vunpack.c.l.b16 %v16743_v11  ;;  %17766 = vmatmul.mubr.msk.bf16.gmra.mxu0 %vm7731_vm2, %v7700_v6 }
 0x22d   : > { %v1335_v37 = vadd.f32 %v19751_v50, %v19929_v32  ;;  %v2462_v36 = vrot.slane %v2448_v31, %v19095_v26  ;;  %v2463_v42 = vcombine.high %v2455_v40, %v2455_v40  ;;  %v2414_v30 = vcombine.high %v1710_v29, %v1710_v29 }
 0x22e   : > { %v16746_v54 = vpack.c.bf16 %v4049_v39, %v4049_v39  ;;  %v5383_v0 = vunpack.c.l.b16 %v16744_v43  ;;  %v5384_v41 = vunpack.c.l.b16 %v16745_v18  ;;  %v5736_v13 = vrot.slane %v5382_v33, 3 }
 0x22f   : > { %v5391_v25 = vunpack.c.l.b16 %v16752_v5  ;;  %v5392_v62 = vunpack.c.l.b16 %v16753_v49  ;;  %v15398_v22 = vrot.slane %v2455_v40, 9  ;;  %v1351_v44 = vadd.f32 %v19751_v50, %v17700_v14  ;;  %v6104_v5 = vld [vmem:[#allocation2 + $0x6c] sm:$0xf] }
 0x230   : > { %v5385_v61 = vunpack.c.l.b16 %v16746_v54  ;;  %v5737_v10 = vsel %vm5517_vm9, %v5736_v13, %v5735_v53  ;;  %v5738_v58 = vrot.slane %v5383_v0, 2  ;;  %v5740_v60 = vrot.slane %v5384_v41, 1  ;;  %v20001_v54 = vpop.f32.mrf.mxu0 }
 0x231   : > { %v23785_v39 = vrot.slane %v19926_v46, 7  ;;  %v2464_v48 = vcombine.high %v2462_v36, %v2462_v36  ;;  %v2421_v3 = vrot.slane %v1710_v29, %v19095_v26  ;;  %v23786_v53 = vrot.slane %v19932_v24, 6 }
 0x232   : > { %v5739_v33 = vsel %vm5520_vm10, %v5738_v58, %v5737_v10  ;;  %v15399_v49 = vrot.slane %v2463_v42, 9  ;;  %v2428_v11 = vrot.slane %v2414_v30, %v19095_v26  ;;  %v5750_v6 = vrot.slane %v5390_v19, 3 }
 0x233   : > { %v5743_v32 = vsel %vm5526_vm11, %v23785_v39, %v5385_v61  ;;  %v5741_v1 = vsel %vm5523_vm13, %v5740_v60, %v5739_v33  ;;  %v23787_v43 = vrot.slane %v19938_v21, 5  ;;  %v15400_v31 = vrot.slane %v2462_v36, 9 }
 0x234   : > { %v5745_v8 = vsel %vm5508_vm5, %v23786_v53, %v5743_v32  ;;  %v5969_v18 = vpack.c.b16 %v5741_v1, %v5741_v1  ;;  %v5752_v29 = vrot.slane %v5391_v25, 2  ;;  %v23788_v0 = vrot.slane %v19944_v57, 4 }
 0x235   : > { %v5747_v46 = vsel %vm5511_vm6, %v23787_v43, %v5745_v8  ;;  %v4066_v41 = vmax.f32 %v2455_v40, %v15398_v22  ;;  %v2429_v13 = vcombine.high %v2421_v3, %v2421_v3  ;;  %v5754_v14 = vrot.slane %v5392_v62, 1  ;;  %v6175_v40 = vld [vmem:[#allocation2 + $0x58] sm:$0xf]  ;;  %v20011_v22 = vpop.f32.mrf.mxu0 }
 0x236   : > { %v5749_v24 = vsel %vm5514_vm7, %v23788_v0, %v5747_v46  ;;  %v6105_v19 = vsel %vm19198_vm15, %v5969_v18, %v6104_v5  ;;  %v15401_v21 = vrot.slane %v2464_v48, 9  ;;  %v4067_v10 = vmax.f32 %v2463_v42, %v15399_v49 }
 0x237   : > { %v5751_v61 = vsel %vm5517_vm9, %v5750_v6, %v5749_v24  ;;  %6106 = vst [vmem:[#allocation2 + $0x6c] sm:$0xf] %v6105_v19  ;;  %v2430_v58 = vcombine.high %v2428_v11, %v2428_v11  ;;  %v1625_v60 = vmax.f32 %v1351_v44, 0.0  ;;  %v1621_v57 = vmax.f32 %v1335_v37, 0.0  ;;  %v6174_v44 = vld [vmem:[#allocation2 + $0x54] sm:$0xf]  ;;  %v20020_v0 = vpop.f32.mrf.mxu0 }
 0x238   : > { %v5753_v30 = vsel %vm5520_vm10, %v5752_v29, %v5751_v61  ;;  %v4068_v33 = vmax.f32 %v2462_v36, %v15400_v31  ;;  %v15390_v39 = vrot.slane %v2421_v3, 9  ;;  %v20015_v32 = vadd.f32 %v19751_v50, %v19936_v23  ;;  %v17952_v23 = vld [vmem:[#allocation2 + $0x5c] ss:$0 sps:$4 sm:$0x11]  }
 0x239   : > { %v5755_v25 = vsel %vm5523_vm13, %v5754_v14, %v5753_v30  ;;  %v16763_v1 = vpack.c.bf16 %v4066_v41, %v4066_v41  ;;  %v15391_v53 = vrot.slane %v2429_v13, 9  ;;  %v4069_v8 = vmax.f32 %v2464_v48, %v15401_v21 }
 0x23a   : > { %v5970_v62 = vpack.c.b16 %v5755_v25, %v5755_v25  ;;  %v15392_v5 = vrot.slane %v2428_v11, 9  ;;  %v15393_v42 = vrot.slane %v2430_v58, 9  ;;  %v4058_v49 = vmax.f32 %v2421_v3, %v15390_v39 }
 0x23b   : > { %v16764_v37 = vpack.c.bf16 %v4067_v10, %v4067_v10  ;;  %v4059_v36 = vmax.f32 %v2429_v13, %v15391_v53  ;;  %v1713_v6 = vmax.f32 %v1621_v57, %v1625_v60  ;;  %v20018_v43 = vcombine.low %v6174_v44, %v6175_v40 }
 0x23c   : > { %6107 = vst.msk [vmem:[#allocation2 + $0x70] sm:$0xf] %vm4170_vm4, %v5970_v62  ;;  %v16765_v46 = vpack.c.bf16 %v4068_v33, %v4068_v33  ;;  %v4060_v18 = vmax.f32 %v2428_v11, %v15392_v5  ;;  %v4061_v31 = vmax.f32 %v2430_v58, %v15393_v42  ;;  %v16755_v29 = vpack.c.bf16 %v4058_v49, %v4058_v49  ;;  %v20028_v33 = vpop.f32.mrf.mxu0 }
 0x23d   : > { %v20022_v24 = vunpack.c.l.b16 %v16763_v1  ;;  %v16756_v48 = vpack.c.bf16 %v4059_v36, %v4059_v36  ;;  %v2465_v41 = vcombine.high %v1713_v6, %v1713_v6  ;;  %v2472_v3 = vrot.slane %v1713_v6, %v19095_v26 }
 0x23e   : > { %v16757_v14 = vpack.c.bf16 %v4060_v18, %v4060_v18  ;;  %v16758_v61 = vpack.c.bf16 %v4061_v31, %v4061_v31  ;;  %v5394_v19 = vunpack.c.l.b16 %v16755_v29  ;;  %v6569_v13 = vshll.u32 %v20018_v43, 16 }
 0x23f   : > { %v5395_v21 = vunpack.c.l.b16 %v16756_v48  ;;  %v2479_v30 = vrot.slane %v2465_v41, %v19095_v26  ;;  %v2480_v11 = vcombine.high %v2472_v3, %v2472_v3  ;;  %v15402_v10 = vrot.slane %v2472_v3, 9  ;;  %v20035_v41 = vpop.f32.mrf.mxu0 }
 0x240   : > { %v5396_v58 = vunpack.c.l.b16 %v16757_v14  ;;  %v6567_v60 = vshrl.u32 %v20018_v43, 16  ;;  %v6571_v25 = vrot.slane %v6569_v13, 1  ;;  %v6574_v57 = vshll.u32 %v17952_v23, 16 }
 0x241   : > { %v5757_v39 = vrot.slane %v5395_v21, 6  ;;  %v2481_v40 = vcombine.high %v2479_v30, %v2479_v30  ;;  %v15403_v62 = vrot.slane %v2480_v11, 9  ;;  %v15404_v1 = vrot.slane %v2479_v30, 9  ;;  %v6115_v21 = vld [vmem:[#allocation2 + $0x80] sm:$0x1] }
 0x242   : > { %v16766_v53 = vpack.c.bf16 %v4069_v8, %v4069_v8  ;;  %v5397_v5 = vunpack.c.l.b16 %v16758_v61  ;;  %v5756_v42 = vrot.slane %v5394_v19, 7  ;;  %v6572_v49 = vor.u32 %v6571_v25, %v6567_v60 }
 0x243   : > { %v20030_v44 = vunpack.c.l.b16 %v16764_v37  ;;  %v5759_v36 = vrot.slane %v5396_v58, 5  ;;  %v15405_v6 = vrot.slane %v2481_v40, 9  ;;  %v4070_v18 = vmax.f32 %v2472_v3, %v15402_v10 }
 0x244   : > { %v5758_v31 = vsel %vm5508_vm5, %v5757_v39, %v5756_v42  ;;  %v4071_v29 = vmax.f32 %v2480_v11, %v15403_v62  ;;  %v6576_v48 = vrot.slane %v6574_v57, 1  ;;  %v1343_v23 = vadd.f32 %v19751_v50, %v20001_v54  ;;  %v20048_v57 = vld [vmem:[#allocation2 + $0x64] sm:$0xf]  ;;  %v17707_v39 = vpop.f32.mrf.mxu0 }
 0x245   : > { %v1619_v14 = vmax.f32 %v20015_v32, 0.0  ;;  %v20038_v8 = vunpack.c.l.b16 %v16765_v46  ;;  %v4072_v61 = vmax.f32 %v2479_v30, %v15404_v1  ;;  %v4073_v19 = vmax.f32 %v2481_v40, %v15405_v6  ;;  %v6238_v6 = vld [vmem:[#allocation2 + $0x60] sm:$0xf] }
 0x246   : > { %v20040_v37 = vunpack.c.l.b16 %v16766_v53  ;;  %v5761_v13 = vrot.slane %v5397_v5, 4  ;;  %v6577_v3 = vsel %vm6481_vm0, %v6572_v49, %v6576_v48  ;;  %v1623_v10 = vmax.f32 %v1343_v23, 0.0  ;;  %v17962_v23 = vld [vmem:[#allocation2 + $0x68] ss:$0 sps:$4 sm:$0x11]  }
 0x247   : > { %v5760_v58 = vsel %vm5511_vm6, %v5759_v36, %v5758_v31  ;;  %v16767_v54 = vpack.c.bf16 %v4070_v18, %v4070_v18  ;;  %v16876_v60 = vpack.c.bf16 %v4073_v19, %v4073_v19  ;;  %6688 = vrot.lane.b32.xlu1 %v6577_v3, %s18721_s14  ;;  %v16768_v30 = vpack.c.bf16 %v4071_v29, %v4071_v29  ;;  %v6302_v18 = vld [vmem:[#allocation2 + $0x64] sm:$0xf]  ;;  %v20063_v29 = vld [vmem:[%s23689_s2] ss:$0 sm:$0xff] }
 0x248   : > { %v1711_v25 = vmax.f32 %v1619_v14, %v1623_v10  ;;  %v16769_v62 = vpack.c.bf16 %v4072_v61, %v4072_v61  ;;  %v1364_v53 = vadd.f32 %v19751_v50, %v20011_v22  ;;  %v5762_v36 = vsel %vm5514_vm7, %v5761_v13, %v5760_v58 }
 0x249   : > { %v6116_v1 = vsel %vm19158_vm12, %v16876_v60, %v6115_v21  ;;  %v20058_v31 = vunpack.c.l.b16 %v16767_v54  ;;  %v1356_v50 = vadd.f32 %v20063_v29, %v20020_v0  ;;  %v20068_v22 = vcombine.low %v6238_v6, %v20048_v57  ;;  %v6343_v21 = vld [vmem:[#allocation2 + $0x60] sm:$0xe] }
 0x24a   : > { %6117 = vst [vmem:[#allocation2 + $0x80] sm:$0x1] %v6116_v1  ;;  %v2431_v42 = vcombine.high %v1711_v25, %v1711_v25  ;;  %v2438_v49 = vrot.slane %v1711_v25, %v19095_v26  ;;  %v1380_v48 = vadd.f32 %v20063_v29, %v17707_v39  ;;  %v20071_v14 = vunpack.c.l.b16 %v16768_v30  ;;  %v1371_v1 = vpop.f32.mrf.mxu0 }
 0x24b   : > { %23789 = vst [vmem:[#allocation27_spill] sm:$0xff] %v20068_v22  ;;  %v20074_v3 = vunpack.c.l.b16 %v16769_v62  ;;  %v1628_v10 = vmax.f32 %v1364_v53, 0.0  ;;  %6897 = vrot.lane.b32.xlu0 %v20068_v22, %s18721_s14  ;;  %v15908_v58 = vcombine.low %v6343_v21, %v6302_v18  ;;  %v1626_v30 = vmax.f32 %v1356_v50, 0.0 }
 0x24c   : > { %v2445_v61 = vrot.slane %v2431_v42, %v19095_v26  ;;  %v2446_v19 = vcombine.high %v2438_v49, %v2438_v49  ;;  %v15394_v13 = vrot.slane %v2438_v49, 9  ;;  %v1632_v0 = vmax.f32 %v1380_v48, 0.0 }
 0x24d   : > { %v7701_v11 = vrot.slane %v15908_v58, 1  ;;  %v7702_v42 = vrot.slane %v17962_v23, 1  ;;  %v1372_v18 = vadd.f32 %v20063_v29, %v1371_v1 }
 0x24e   : > { %v2447_v54 = vcombine.high %v2445_v61, %v2445_v61  ;;  %v15395_v60 = vrot.slane %v2446_v19, 9  ;;  %v15396_v25 = vrot.slane %v2445_v61, 9  ;;  %v4062_v39 = vmax.f32 %v2438_v49, %v15394_v13 }
 0x24f   : > { %v1716_v6 = vmax.f32 %v1628_v10, %v1632_v0  ;;  %v7703_v2 = vsel %vm6754_vm1, %v7701_v11, %v7702_v42 }
 0x250   : > { %v15397_v5 = vrot.slane %v2447_v54, 9  ;;  %v4063_v40 = vmax.f32 %v2446_v19, %v15395_v60  ;;  %v4064_v46 = vmax.f32 %v2445_v61, %v15396_v25  ;;  %v16759_v62 = vpack.c.bf16 %v4062_v39, %v4062_v39  ;;  %17769 = vmatprep.mubr.msk.bf16.mxu0 %vm7731_vm2, %v7703_v2 }
 0x251   : > { %v2516_v32 = vcombine.high %v1716_v6, %v1716_v6  ;;  %v2523_v53 = vrot.slane %v1716_v6, %v19095_v26  ;;  %v1630_v19 = vmax.f32 %v1372_v18, 0.0  ;;  %v5777_v2 = vrot.slane %v20058_v31, 3 }
 0x252   : > { %v4065_v48 = vmax.f32 %v2447_v54, %v15397_v5  ;;  %v16760_v21 = vpack.c.bf16 %v4063_v40, %v4063_v40  ;;  %v16761_v55 = vpack.c.bf16 %v4064_v46, %v4064_v46  ;;  %v5398_v49 = vunpack.c.l.b16 %v16759_v62 }
 0x253   : > { %v2530_v50 = vrot.slane %v2516_v32, %v19095_v26  ;;  %v2531_v23 = vcombine.high %v2523_v53, %v2523_v53  ;;  %v15414_v13 = vrot.slane %v2523_v53, 9  ;;  %v5779_v32 = vrot.slane %v20071_v14, 2 }
 0x254   : > { %v16762_v61 = vpack.c.bf16 %v4065_v48, %v4065_v48  ;;  %v5399_v10 = vunpack.c.l.b16 %v16760_v21  ;;  %v5400_v0 = vunpack.c.l.b16 %v16761_v55  ;;  %v5763_v58 = vrot.slane %v5398_v49, 3  ;;  %v6208_v55 = vld [vmem:[#allocation2] sm:$0xe]  ;;  %v6111_v48 = vld [vmem:[#allocation2 + $0x78] sm:$0xf] }
 0x255   : > { %v2532_v60 = vcombine.high %v2530_v50, %v2530_v50  ;;  %v15415_v25 = vrot.slane %v2531_v23, 9  ;;  %v15416_v11 = vrot.slane %v2530_v50, 9  ;;  %v4082_v39 = vmax.f32 %v2523_v53, %v15414_v13 }
 0x256   : > { %v5401_v1 = vunpack.c.l.b16 %v16762_v61  ;;  %v5764_v40 = vsel %vm5517_vm9, %v5763_v58, %v5762_v36  ;;  %v5765_v46 = vrot.slane %v5399_v10, 2  ;;  %v5767_v5 = vrot.slane %v5400_v0, 1  ;;  %v18599_v0 = vld [vmem:[#allocation2 + $0x4] sm:$0xf] }
 0x257   : > { %v20088_v54 = vadd.f32 %v20063_v29, %v20028_v33  ;;  %v15417_v6 = vrot.slane %v2532_v60, 9  ;;  %v23790_v62 = vrot.slane %v20022_v24, 7  ;;  %v20096_v36 = vadd.f32 %v20063_v29, %v20035_v41 }
 0x258   : > { %v5766_v42 = vsel %vm5520_vm10, %v5765_v46, %v5764_v40  ;;  %v1714_v18 = vmax.f32 %v1626_v30, %v1630_v19  ;;  %v23791_v14 = vrot.slane %v20030_v44, 6  ;;  %v4083_v21 = vmax.f32 %v2531_v23, %v15415_v25  ;;  %v17708_v25 = vpop.f32.mrf.mxu0 }
 0x259   : > { %v5770_v53 = vsel %vm5526_vm11, %v23790_v62, %v5401_v1  ;;  %v5768_v31 = vsel %vm5523_vm13, %v5767_v5, %v5766_v42  ;;  %v4084_v49 = vmax.f32 %v2530_v50, %v15416_v11  ;;  %v23792_v13 = vrot.slane %v20038_v8, 5 }
 0x25a   : > { %v5772_v33 = vsel %vm5508_vm5, %v23791_v14, %v5770_v53  ;;  %v5972_v61 = vpack.c.b16 %v5768_v31, %v5768_v31  ;;  %v16779_v10 = vpack.c.bf16 %v4082_v39, %v4082_v39  ;;  %v15806_v58 = vcombine.low %v6208_v55, %v18599_v0  ;;  %v17967_v53 = vld [vmem:[#allocation2 + $0x68] ss:$0 sps:$4 sm:$0x11]   ;;  %v6884_v31 = vpop.permute.xlu0 %6883 }
 0x25b   : > { %v5774_v24 = vsel %vm5511_vm6, %v23792_v13, %v5772_v33  ;;  %v5781_v41 = vrot.slane %v20074_v3, 1  ;;  %v23793_v30 = vrot.slane %v20040_v37, 4  ;;  %v4085_v44 = vmax.f32 %v2532_v60, %v15417_v6  ;;  %v6177_v6 = vld [vmem:[#allocation2 + $0x64] sm:$0xf] }
 0x25c   : > { %v2482_v1 = vcombine.high %v1714_v18, %v1714_v18  ;;  %v6112_v50 = vsel %vm19198_vm15, %v5972_v61, %v6111_v48  ;;  %v1629_v8 = vmax.f32 %v20088_v54, 0.0  ;;  %v1627_v23 = vmax.f32 %v20096_v36, 0.0  ;;  %v18600_v33 = vld [vmem:[#allocation2 + $0x8] ss:$0 sps:$4 sm:$0x11]  }
 0x25d   : > { %v5776_v19 = vsel %vm5514_vm7, %v23793_v30, %v5774_v24  ;;  %6113 = vst [vmem:[#allocation2 + $0x78] sm:$0xf] %v6112_v50  ;;  %v16780_v3 = vpack.c.bf16 %v4083_v21, %v4083_v21  ;;  %v16781_v39 = vpack.c.bf16 %v4084_v49, %v4084_v49  ;;  %v2489_v37 = vrot.slane %v1714_v18, %v19095_v26  ;;  %v6176_v21 = vld [vmem:[#allocation2 + $0x60] sm:$0xf]  ;;  %v1374_v49 = vpop.f32.mrf.mxu0 }
 0x25e   : > { %v5778_v40 = vsel %vm5517_vm9, %v5777_v2, %v5776_v19  ;;  %v20117_v46 = vunpack.c.l.b16 %v16779_v10  ;;  %v2496_v5 = vrot.slane %v2482_v1, %v19095_v26  ;;  %v6755_v2 = vrot.slane %v15806_v58, 1 }
 0x25f   : > { %v5780_v11 = vsel %vm5520_vm10, %v5779_v32, %v5778_v40  ;;  %v16782_v54 = vpack.c.bf16 %v4085_v44, %v4085_v44  ;;  %v2497_v42 = vcombine.high %v2489_v37, %v2489_v37  ;;  %v15406_v62 = vrot.slane %v2489_v37, 9 }
 0x260   : > { %v5782_v60 = vsel %vm5523_vm13, %v5781_v41, %v5780_v11  ;;  %v2498_v32 = vcombine.high %v2496_v5, %v2496_v5  ;;  %v15408_v14 = vrot.slane %v2496_v5, 9  ;;  %v6756_v48 = vrot.slane %v18600_v33, 1 }
 0x261   : > { %v5973_v55 = vpack.c.b16 %v5782_v60, %v5782_v60  ;;  %v1383_v18 = vadd.f32 %v20063_v29, %v17708_v25  ;;  %v20122_v13 = vunpack.c.l.b16 %v16780_v3  ;;  %v15407_v24 = vrot.slane %v2497_v42, 9 }
 0x262   : > { %v4074_v61 = vmax.f32 %v2489_v37, %v15406_v62  ;;  %v20124_v10 = vcombine.low %v6176_v21, %v6177_v6  ;;  %v15409_v0 = vrot.slane %v2498_v32, 9  ;;  %v4076_v58 = vmax.f32 %v2496_v5, %v15408_v14  ;;  %v20131_v37 = vpop.f32.mrf.mxu0 }
 0x263   : > { %6114 = vst.msk [vmem:[#allocation2 + $0x7c] sm:$0xf] %vm4170_vm4, %v5973_v55  ;;  %v6757_v41 = vsel %vm6754_vm1, %v6755_v2, %v6756_v48  ;;  %v1633_v30 = vmax.f32 %v1383_v18, 0.0  ;;  %v20127_v19 = vunpack.c.l.b16 %v16781_v39  ;;  %v4075_v44 = vmax.f32 %v2497_v42, %v15407_v24 }
 0x264   : > { %v16771_v1 = vpack.c.bf16 %v4074_v61, %v4074_v61  ;;  %v7782_v40 = vsel %vm7731_vm2, %v6757_v41, %v6884_v31  ;;  %v4077_v50 = vmax.f32 %v2498_v32, %v15409_v0  ;;  %v6581_v11 = vshll.u32 %v20124_v10, 16  ;;  %v20140_v21 = vpop.f32.mrf.mxu0 }
 0x265   : > { %8331 = vmatprep.mubr.bf16.mxu1 %v7782_v40  ;;  %v1717_v25 = vmax.f32 %v1629_v8, %v1633_v30  ;;  %v6586_v3 = vshll.u32 %v17967_v53, 16  ;;  %v5796_v60 = vrot.slane %v20117_v46, 7  ;;  %v16772_v5 = vpack.c.bf16 %v4075_v44, %v4075_v44 }
 0x266   : > { %v16773_v6 = vpack.c.bf16 %v4076_v58, %v4076_v58  ;;  %v1375_v2 = vadd.f32 %v20063_v29, %v1374_v49  ;;  %v20135_v39 = vunpack.c.l.b16 %v16782_v54  ;;  %v6579_v62 = vshrl.u32 %v20124_v10, 16 }
 0x267   : > { %v2533_v55 = vcombine.high %v1717_v25, %v1717_v25  ;;  %v2540_v42 = vrot.slane %v1717_v25, %v19095_v26  ;;  %v5410_v31 = vunpack.c.l.b16 %v16771_v1  ;;  %v5411_v8 = vunpack.c.l.b16 %v16772_v5 }
 0x268   : > { %v6583_v32 = vrot.slane %v6581_v11, 1  ;;  %v1631_v14 = vmax.f32 %v1375_v2, 0.0  ;;  %v16774_v53 = vpack.c.bf16 %v4077_v50, %v4077_v50  ;;  %v6588_v18 = vrot.slane %v6586_v3, 1 }
 0x269   : > { %v2547_v33 = vrot.slane %v2533_v55, %v19095_v26  ;;  %v2548_v48 = vcombine.high %v2540_v42, %v2540_v42  ;;  %v5412_v24 = vunpack.c.l.b16 %v16773_v6  ;;  %v15418_v49 = vrot.slane %v2540_v42, 9  ;;  %v17712_v6 = vpop.f32.mrf.mxu0 }
 0x26a   : > { %v6584_v54 = vor.u32 %v6583_v32, %v6579_v62  ;;  %v1715_v61 = vmax.f32 %v1627_v23, %v1631_v14  ;;  %v5784_v0 = vrot.slane %v5411_v8, 6  ;;  %v5783_v44 = vrot.slane %v5410_v31, 7  ;;  %v6122_v14 = vld [vmem:[#allocation2 + $0x8c] sm:$0x1] }
 0x26b   : > { %v2549_v58 = vcombine.high %v2547_v33, %v2547_v33  ;;  %v15419_v41 = vrot.slane %v2548_v48, 9  ;;  %v15420_v30 = vrot.slane %v2547_v33, 9  ;;  %v4086_v1 = vmax.f32 %v2540_v42, %v15418_v49 }
 0x26c   : > { %v6589_v40 = vsel %vm6481_vm0, %v6584_v54, %v6588_v18  ;;  %v2499_v50 = vcombine.high %v1715_v61, %v1715_v61  ;;  %v5413_v25 = vunpack.c.l.b16 %v16774_v53  ;;  %v5798_v2 = vrot.slane %v20122_v13, 6  ;;  %v18601_v13 = vld [vmem:[#allocation2 + $0x10] sm:$0xf] }
 0x26d   : > { %v15421_v11 = vrot.slane %v2549_v58, 9  ;;  %v4087_v3 = vmax.f32 %v2548_v48, %v15419_v41  ;;  %v4088_v5 = vmax.f32 %v2547_v33, %v15420_v30  ;;  %6690 = vrot.lane.b32.xlu1 %v6589_v40, %s18721_s14  ;;  %v5786_v36 = vrot.slane %v5412_v24, 5  ;;  %v20151_v24 = vpop.f32.mrf.mxu0 }
 0x26e   : > { %v2506_v23 = vrot.slane %v1715_v61, %v19095_v26  ;;  %v2513_v55 = vrot.slane %v2499_v50, %v19095_v26  ;;  %v5785_v62 = vsel %vm5508_vm5, %v5784_v0, %v5783_v44  ;;  %v16783_v31 = vpack.c.bf16 %v4086_v1, %v4086_v1 }
 0x26f   : > { %v4089_v42 = vmax.f32 %v2549_v58, %v15421_v11  ;;  %v16784_v8 = vpack.c.bf16 %v4087_v3, %v4087_v3  ;;  %v16785_v32 = vpack.c.bf16 %v4088_v5, %v4088_v5  ;;  %v5800_v18 = vrot.slane %v20127_v19, 5  ;;  %v6241_v11 = vld [vmem:[#allocation2 + $0x70] sm:$0xf] }
 0x270   : > { %v2514_v53 = vcombine.high %v2506_v23, %v2506_v23  ;;  %v2515_v48 = vcombine.high %v2513_v55, %v2513_v55  ;;  %v15410_v33 = vrot.slane %v2506_v23, 9  ;;  %v5788_v49 = vrot.slane %v5413_v25, 4 }
 0x271   : > { %v16877_v54 = vpack.c.bf16 %v4089_v42, %v4089_v42  ;;  %v15412_v41 = vrot.slane %v2513_v55, 9  ;;  %v5787_v61 = vsel %vm5511_vm6, %v5786_v36, %v5785_v62  ;;  %v5422_v58 = vunpack.c.l.b16 %v16783_v31  ;;  %v6240_v31 = vld [vmem:[#allocation2 + $0x6c] sm:$0xf] }
 0x272   : > { %v15411_v30 = vrot.slane %v2514_v53, 9  ;;  %v15413_v40 = vrot.slane %v2515_v48, 9  ;;  %v4078_v0 = vmax.f32 %v2506_v23, %v15410_v33  ;;  %v20154_v44 = vunpack.c.l.b16 %v16784_v8  ;;  %v17715_v8 = vpop.f32.mrf.mxu0 }
 0x273   : > { %v6123_v1 = vsel %vm19158_vm12, %v16877_v54, %v6122_v14  ;;  %v4080_v50 = vmax.f32 %v2513_v55, %v15412_v41  ;;  %v20158_v3 = vunpack.c.l.b16 %v16785_v32  ;;  %v5802_v42 = vrot.slane %v20135_v39, 4  ;;  %v6675_v54 = vpop.permute.xlu0 %6674 }
 0x274   : > { %6124 = vst [vmem:[#allocation2 + $0x8c] sm:$0x1] %v6123_v1  ;;  %v4079_v19 = vmax.f32 %v2514_v53, %v15411_v30  ;;  %v4081_v25 = vmax.f32 %v2515_v48, %v15413_v40  ;;  %v16775_v5 = vpack.c.bf16 %v4078_v0, %v4078_v0  ;;  %v5789_v62 = vsel %vm5514_vm7, %v5788_v49, %v5787_v61  ;;  %v17974_v30 = vld [vmem:[#allocation2 + $0x74] ss:$0 sps:$4 sm:$0x11]  }
 0x275   : > { %v16777_v36 = vpack.c.bf16 %v4080_v50, %v4080_v50  ;;  %v1396_v23 = vadd.f32 %v20063_v29, %v20131_v37  ;;  %v20164_v32 = vcombine.low %v6240_v31, %v6241_v11  ;;  %v5804_v41 = vrot.slane %v5422_v58, 3  ;;  %v6304_v0 = vld [vmem:[#allocation2 + $0x70] sm:$0xf]  ;;  %v1403_v11 = vpop.f32.mrf.mxu0 }
 0x276   : > { %v16776_v33 = vpack.c.bf16 %v4079_v19, %v4079_v19  ;;  %v16778_v14 = vpack.c.bf16 %v4081_v25, %v4081_v25  ;;  %v5414_v55 = vunpack.c.l.b16 %v16775_v5  ;;  %v5806_v53 = vrot.slane %v20154_v44, 2  ;;  %v6344_v5 = vld [vmem:[#allocation2 + $0x6c] sm:$0xe] }
 0x277   : > { %23794 = vst [vmem:[#allocation28_spill] sm:$0xff] %v20164_v32  ;;  %v5416_v48 = vunpack.c.l.b16 %v16777_v36  ;;  %v1388_v39 = vadd.f32 %v20063_v29, %v20140_v21  ;;  %v5808_v49 = vrot.slane %v20158_v3, 1  ;;  %6899 = vrot.lane.b32.xlu0 %v20164_v32, %s18721_s14  ;;  %v1636_v50 = vmax.f32 %v1396_v23, 0.0 }
 0x278   : > { %v5415_v61 = vunpack.c.l.b16 %v16776_v33  ;;  %v5417_v37 = vunpack.c.l.b16 %v16778_v14  ;;  %v5790_v40 = vrot.slane %v5414_v55, 3  ;;  %v20173_v58 = vadd.f32 %v20063_v29, %v17712_v6  ;;  %v6209_v14 = vld [vmem:[#allocation2 + $0xc] sm:$0xe]  ;;  %v6118_v55 = vld [vmem:[#allocation2 + $0x84] sm:$0xf] }
 0x279   : > { %v5794_v1 = vrot.slane %v5416_v48, 1  ;;  %v7733_v44 = vsel %vm7731_vm2, %v19071_v63, %v6675_v54  ;;  %v1412_v25 = vadd.f32 %v20063_v29, %v17715_v8  ;;  %v1634_v36 = vmax.f32 %v1388_v39, 0.0 }
 0x27a   : > { %v5791_v21 = vsel %vm5517_vm9, %v5790_v40, %v5789_v62  ;;  %v5792_v19 = vrot.slane %v5415_v61, 2  ;;  %v5797_v3 = vsel %vm5526_vm11, %v5796_v60, %v5417_v37  ;;  %8332 = vmatmul.mubr.bf16.vlgmr.msra.gmra.mxu1 %v7733_v44  ;;  %v15909_v23 = vcombine.low %v6344_v5, %v6304_v0  ;;  %v17716_v37 = vpop.f32.mrf.mxu0  ;;  %v6886_v40 = vpop.permute.xlu1 %6885 }
 0x27b   : > { %v5799_v6 = vsel %vm5508_vm5, %v5798_v2, %v5797_v3  ;;  %v7705_v31 = vrot.slane %v17974_v30, 1  ;;  %v1640_v33 = vmax.f32 %v1412_v25, 0.0  ;;  %v1404_v46 = vadd.f32 %v20063_v29, %v1403_v11  ;;  %v18602_v11 = vld [vmem:[#allocation2 + $0x14] ss:$0 sps:$4 sm:$0x11]  }
 0x27c   : > { %v5793_v63 = vsel %vm5520_vm10, %v5792_v19, %v5791_v21  ;;  %v5801_v62 = vsel %vm5511_vm6, %v5800_v18, %v5799_v6  ;;  %v7704_v54 = vrot.slane %v15909_v23, 1  ;;  %v15807_v48 = vcombine.low %v6209_v14, %v18601_v13  ;;  %v20211_v14 = vld [vmem:[#allocation2 + $0x4c] sm:$0xf] }
 0x27d   : > { %v5795_v60 = vsel %vm5523_vm13, %v5794_v1, %v5793_v63  ;;  %v5803_v8 = vsel %vm5514_vm7, %v5802_v42, %v5801_v62  ;;  %v1720_v30 = vmax.f32 %v1636_v50, %v1640_v33  ;;  %v1638_v61 = vmax.f32 %v1404_v46, 0.0  ;;  %v20207_v33 = vld [vmem:[#allocation2 + $0x48] sm:$0xe]  ;;  %23798 = vst [vmem:[#allocation31_spill] sm:$0xff] %v20211_v14 }
 0x27e   : > { %v5805_v2 = vsel %vm5517_vm9, %v5804_v41, %v5803_v8  ;;  %v5975_v39 = vpack.c.b16 %v5795_v60, %v5795_v60  ;;  %v7706_v0 = vsel %vm6754_vm1, %v7704_v54, %v7705_v31  ;;  %v6758_v44 = vrot.slane %v15807_v48, 1  ;;  %23797 = vst [vmem:[#allocation30_spill] sm:$0xff] %v20207_v33  ;;  %v20231_v60 = vld [vmem:[#allocation2 + $0x54] sm:$0xe] }
 0x27f   : > { %v5807_v18 = vsel %vm5520_vm10, %v5806_v53, %v5805_v2  ;;  %v6759_v1 = vrot.slane %v18602_v11, 1  ;;  %v2584_v19 = vcombine.high %v1720_v30, %v1720_v30  ;;  %v2591_v41 = vrot.slane %v1720_v30, %v19095_v26  ;;  %17770 = vmatmul.mubr.msk.bf16.gmra.mxu0 %vm7731_vm2, %v7706_v0  ;;  %v20217_v30 = vpop.f32.mrf.mxu0  ;;  %23801 = vst [vmem:[#allocation34_spill] sm:$0xff] %v20231_v60 }
 0x280   : > { %v5809_v42 = vsel %vm5523_vm13, %v5808_v49, %v5807_v18  ;;  %v6119_v21 = vsel %vm19198_vm15, %v5975_v39, %v6118_v55  ;;  %v1718_v3 = vmax.f32 %v1634_v36, %v1638_v61  ;;  %v1415_v25 = vadd.f32 %v20063_v29, %v17716_v37 }
 0x281   : > { %v5976_v50 = vpack.c.b16 %v5809_v42, %v5809_v42  ;;  %6120 = vst [vmem:[#allocation2 + $0x84] sm:$0xf] %v6119_v21  ;;  %v6760_v53 = vsel %vm6754_vm1, %v6758_v44, %v6759_v1  ;;  %v2598_v5 = vrot.slane %v2584_v19, %v19095_v26  ;;  %v2599_v6 = vcombine.high %v2591_v41, %v2591_v41  ;;  %v6179_v42 = vld [vmem:[#allocation2 + $0x70] sm:$0xf] }
 0x282   : > { %v15430_v23 = vrot.slane %v2591_v41, 9  ;;  %v7786_v49 = vsel %vm7731_vm2, %v6760_v53, %v6886_v40  ;;  %v23795_v63 = vshll.u32 %v19732_v28, 16  ;;  %v2550_v36 = vcombine.high %v1718_v3, %v1718_v3  ;;  %v6297_v53 = vld [vmem:[#allocation2 + $0x48] sm:$0xf] }
 0x283   : > { %6121 = vst.msk [vmem:[#allocation2 + $0x88] sm:$0xf] %vm4170_vm4, %v5976_v50  ;;  %v2557_v46 = vrot.slane %v1718_v3, %v19095_v26  ;;  %8339 = vmatprep.mubr.bf16.mxu1 %v7786_v49  ;;  %v2600_v8 = vcombine.high %v2598_v5, %v2598_v5  ;;  %v15431_v55 = vrot.slane %v2599_v6, 9  ;;  %v1641_v54 = vmax.f32 %v1415_v25, 0.0 }
 0x284   : > { %v20205_v62 = vrot.slane %v23795_v63, 1  ;;  %v2564_v48 = vrot.slane %v2550_v36, %v19095_v26  ;;  %v1637_v61 = vmax.f32 %v20173_v58, 0.0  ;;  %v15432_v37 = vrot.slane %v2598_v5, 9  ;;  %v6178_v36 = vld [vmem:[#allocation2 + $0x6c] sm:$0xf] }
 0x285   : > { %v2565_v2 = vcombine.high %v2557_v46, %v2557_v46  ;;  %v15422_v39 = vrot.slane %v2557_v46, 9  ;;  %v15433_v18 = vrot.slane %v2600_v8, 9  ;;  %v4098_v40 = vmax.f32 %v2591_v41, %v15430_v23  ;;  %v20225_v41 = vpop.f32.mrf.mxu0  ;;  %v18604_v23 = vld [vmem:[#allocation2 + $0x4c] sm:$0xf] }
 0x286   : > { %23796 = vst [vmem:[#allocation29_spill] sm:$0xff] %v20205_v62  ;;  %v2566_v0 = vcombine.high %v2564_v48, %v2564_v48  ;;  %v15424_v11 = vrot.slane %v2564_v48, 9  ;;  %v7026_v21 = vshll.u32 %v19862_v56, 16  ;;  %v20223_v19 = vadd.f32 %v20063_v29, %v20151_v24 }
 0x287   : > { %v15423_v44 = vrot.slane %v2565_v2, 9  ;;  %v4090_v1 = vmax.f32 %v2557_v46, %v15422_v39  ;;  %v4099_v50 = vmax.f32 %v2599_v6, %v15431_v55  ;;  %v1721_v3 = vmax.f32 %v1637_v61, %v1641_v54 }
 0x288   : > { %v15425_v25 = vrot.slane %v2566_v0, 9  ;;  %v4092_v58 = vmax.f32 %v2564_v48, %v15424_v11  ;;  %v20227_v13 = vcombine.low %v6297_v53, %v18604_v23  ;;  %v4100_v46 = vmax.f32 %v2598_v5, %v15432_v37 }
 0x289   : > { %v4091_v49 = vmax.f32 %v2565_v2, %v15423_v44  ;;  %v16787_v63 = vpack.c.bf16 %v4090_v1, %v4090_v1  ;;  %v16795_v39 = vpack.c.bf16 %v4098_v40, %v4098_v40  ;;  %v20229_v31 = vcombine.low %v6178_v36, %v6179_v42  ;;  %v17977_v1 = vld [vmem:[#allocation2 + $0x74] ss:$0 sps:$4 sm:$0x11]   ;;  %v1419_v42 = vpop.f32.mrf.mxu0 }
 0x28a   : > { %23799 = vst [vmem:[#allocation32_spill] sm:$0xff] %v20227_v13  ;;  %v4101_v24 = vmax.f32 %v2600_v8, %v15433_v18  ;;  %v4093_v6 = vmax.f32 %v2566_v0, %v15425_v25  ;;  %v16789_v54 = vpack.c.bf16 %v4092_v58, %v4092_v58  ;;  %v20233_v61 = vrot.slane %v7026_v21, 1 }
 0x28b   : > { %23800 = vst [vmem:[#allocation33_spill] sm:$0xff] %v20229_v31  ;;  %v16788_v55 = vpack.c.bf16 %v4091_v49, %v4091_v49  ;;  %v7038_v48 = vshll.u32 %v19969_v4, 16  ;;  %v2601_v44 = vcombine.high %v1721_v3, %v1721_v3  ;;  %v1635_v11 = vmax.f32 %v20223_v19, 0.0  ;;  %v20247_v2 = vpop.f32.mrf.mxu0 }
 0x28c   : > { %23802 = vst [vmem:[#allocation35_spill] sm:$0xff] %v20233_v61  ;;  %v16796_v5 = vpack.c.bf16 %v4099_v50, %v4099_v50  ;;  %v5426_v37 = vunpack.c.l.b16 %v16787_v63  ;;  %v16790_v53 = vpack.c.bf16 %v4093_v6, %v4093_v6  ;;  %v5428_v8 = vunpack.c.l.b16 %v16789_v54 }
 0x28d   : > { %v5427_v40 = vunpack.c.l.b16 %v16788_v55  ;;  %v2608_v18 = vrot.slane %v1721_v3, %v19095_v26  ;;  %v2615_v0 = vrot.slane %v2601_v44, %v19095_v26  ;;  %v16797_v21 = vpack.c.bf16 %v4100_v46, %v4100_v46  ;;  %v20257_v60 = vpop.f32.mrf.mxu0 }
 0x28e   : > { %v16798_v25 = vpack.c.bf16 %v4101_v24, %v4101_v24  ;;  %v20241_v49 = vunpack.c.l.b16 %v16795_v39  ;;  %v6593_v58 = vshll.u32 %v20229_v31, 16  ;;  %v20244_v63 = vunpack.c.l.b16 %v16796_v5  ;;  %v6677_v39 = vpop.permute.xlu1 %6676 }
 0x28f   : > { %v5811_v36 = vrot.slane %v5427_v40, 6  ;;  %v2616_v23 = vcombine.high %v2608_v18, %v2608_v18  ;;  %v2617_v19 = vcombine.high %v2615_v0, %v2615_v0  ;;  %v15434_v50 = vrot.slane %v2608_v18, 9 }
 0x290   : > { %v6591_v55 = vshrl.u32 %v20229_v31, 16  ;;  %v6595_v6 = vrot.slane %v6593_v58, 1  ;;  %v6598_v54 = vshll.u32 %v17977_v1, 16  ;;  %v5429_v3 = vunpack.c.l.b16 %v16790_v53  ;;  %v6129_v1 = vld [vmem:[#allocation2 + $0x98] sm:$0x1] }
 0x291   : > { %v5810_v44 = vrot.slane %v5426_v37, 7  ;;  %v5813_v46 = vrot.slane %v5428_v8, 5  ;;  %v15437_v24 = vrot.slane %v2617_v19, 9  ;;  %v15436_v61 = vrot.slane %v2615_v0, 9 }
 0x292   : > { %v6596_v56 = vor.u32 %v6595_v6, %v6591_v55  ;;  %v6600_v62 = vrot.slane %v6598_v54, 1  ;;  %v1407_v40 = vadd.f32 %v20063_v29, %v20217_v30  ;;  %v15435_v28 = vrot.slane %v2616_v23, 9 }
 0x293   : > { %v5812_v5 = vsel %vm5508_vm5, %v5811_v36, %v5810_v44  ;;  %v4102_v59 = vmax.f32 %v2608_v18, %v15434_v50  ;;  %v4105_v31 = vmax.f32 %v2617_v19, %v15437_v24  ;;  %v20252_v58 = vunpack.c.l.b16 %v16797_v21  ;;  %v6243_v19 = vld [vmem:[#allocation2 + $0x7c] sm:$0xf] }
 0x294   : > { %v6601_v53 = vsel %vm6481_vm0, %v6596_v56, %v6600_v62  ;;  %v1639_v37 = vmax.f32 %v1407_v40, 0.0  ;;  %v7736_v8 = vsel %vm7731_vm2, %v19451_v52, %v6677_v39  ;;  %v20260_v6 = vrot.slane %v7038_v48, 1 }
 0x295   : > { %v20262_v30 = vunpack.c.l.b16 %v16798_v25  ;;  %v16878_v36 = vpack.c.bf16 %v4105_v31, %v4105_v31  ;;  %6692 = vrot.lane.b32.xlu1 %v6601_v53, %s18721_s14  ;;  %8340 = vmatmul.mubr.bf16.gmra.mxu1 %v7736_v8  ;;  %v5814_v56 = vsel %vm5511_vm6, %v5813_v46, %v5812_v5  ;;  %v5815_v62 = vrot.slane %v5429_v3, 4  ;;  %v6242_v46 = vld [vmem:[#allocation2 + $0x78] sm:$0xf]  ;;  %v17723_v3 = vpop.f32.mrf.mxu0  ;;  %v6306_v5 = vld [vmem:[#allocation2 + $0x7c] sm:$0xf] }
 0x296   : > { %23803 = vst [vmem:[#allocation36_spill] sm:$0xff] %v20260_v6  ;;  %v1719_v21 = vmax.f32 %v1635_v11, %v1639_v37  ;;  %v20267_v52 = vmax.f32 %v2616_v23, %v15435_v28  ;;  %v20269_v50 = vmax.f32 %v2615_v0, %v15436_v61  ;;  %v16799_v54 = vpack.c.bf16 %v4102_v59, %v4102_v59 }
 0x297   : > { %v6130_v48 = vsel %vm19158_vm12, %v16878_v36, %v6129_v1  ;;  %v1428_v28 = vadd.f32 %v20063_v29, %v20225_v41  ;;  %v1420_v59 = vadd.f32 %v20063_v29, %v1419_v42  ;;  %v20280_v61 = vcombine.low %v6242_v46, %v6243_v19  ;;  %v17981_v42 = vld [vmem:[#allocation2 + $0x80] ss:$0 sps:$4 sm:$0x11]  }
 0x298   : > { %6131 = vst [vmem:[#allocation2 + $0x98] sm:$0x1] %v6130_v48  ;;  %v2567_v44 = vcombine.high %v1719_v21, %v1719_v21  ;;  %v2574_v24 = vrot.slane %v1719_v21, %v19095_v26  ;;  %v5816_v40 = vsel %vm5514_vm7, %v5815_v62, %v5814_v56  ;;  %v16800_v1 = vpack.c.bf16 %v20267_v52, %v20267_v52  ;;  %v6345_v56 = vld [vmem:[#allocation2 + $0x78] sm:$0xe]  ;;  %v1435_v62 = vpop.f32.mrf.mxu0 }
 0x299   : > { %23804 = vst [vmem:[#allocation37_spill] sm:$0xff] %v20280_v61  ;;  %v16801_v53 = vpack.c.bf16 %v20269_v50, %v20269_v50  ;;  %v20288_v37 = vunpack.c.l.b16 %v16799_v54  ;;  %6901 = vrot.lane.b32.xlu0 %v20280_v61, %s18721_s14  ;;  %v1444_v41 = vadd.f32 %v20063_v29, %v17723_v3  ;;  %v1644_v48 = vmax.f32 %v1428_v28, 0.0 }
 0x29a   : > { %v2581_v0 = vrot.slane %v2567_v44, %v19095_v26  ;;  %v2582_v23 = vcombine.high %v2574_v24, %v2574_v24  ;;  %v15426_v39 = vrot.slane %v2574_v24, 9  ;;  %v1642_v44 = vmax.f32 %v1420_v59, 0.0 }
 0x29b   : > { %v1648_v52 = vmax.f32 %v1444_v41, 0.0  ;;  %v15910_v46 = vcombine.low %v6345_v56, %v6306_v5  ;;  %v7708_v18 = vrot.slane %v17981_v42, 1  ;;  %v1436_v3 = vadd.f32 %v20063_v29, %v1435_v62 }
 0x29c   : > { %v2583_v8 = vcombine.high %v2581_v0, %v2581_v0  ;;  %v15427_v36 = vrot.slane %v2582_v23, 9  ;;  %v15428_v21 = vrot.slane %v2581_v0, 9  ;;  %v4094_v19 = vmax.f32 %v2574_v24, %v15426_v39 }
 0x29d   : > { %v1724_v25 = vmax.f32 %v1644_v48, %v1648_v52  ;;  %v7707_v31 = vrot.slane %v15910_v46, 1  ;;  %v1646_v59 = vmax.f32 %v1436_v3, 0.0  ;;  %v5440_v62 = vunpack.c.l.b16 %v16801_v53  ;;  %v6125_v46 = vld [vmem:[#allocation2 + $0x90] sm:$0xf] }
 0x29e   : > { %v15429_v55 = vrot.slane %v2583_v8, 9  ;;  %v4095_v50 = vmax.f32 %v2582_v23, %v15427_v36  ;;  %v4096_v54 = vmax.f32 %v2581_v0, %v15428_v21  ;;  %v16791_v11 = vpack.c.bf16 %v4094_v19, %v4094_v19 }
 0x29f   : > { %v2652_v24 = vcombine.high %v1724_v25, %v1724_v25  ;;  %v2659_v39 = vrot.slane %v1724_v25, %v19095_v26  ;;  %v7709_v28 = vsel %vm6754_vm1, %v7707_v31, %v7708_v18  ;;  %v5439_v25 = vunpack.c.l.b16 %v16800_v1 }
 0x2a0   : > { %v4097_v6 = vmax.f32 %v2583_v8, %v15429_v55  ;;  %v16792_v4 = vpack.c.bf16 %v4095_v50, %v4095_v50  ;;  %v16793_v14 = vpack.c.bf16 %v4096_v54, %v4096_v54  ;;  %v5430_v33 = vunpack.c.l.b16 %v16791_v11  ;;  %17773 = vmatprep.mubr.msk.bf16.mxu0 %vm7731_vm2, %v7709_v28 }
 0x2a1   : > { %v2666_v42 = vrot.slane %v2652_v24, %v19095_v26  ;;  %v2667_v36 = vcombine.high %v2659_v39, %v2659_v39  ;;  %v15446_v21 = vrot.slane %v2659_v39, 9  ;;  %v1722_v55 = vmax.f32 %v1642_v44, %v1646_v59 }
 0x2a2   : > { %v16794_v5 = vpack.c.bf16 %v4097_v6, %v4097_v6  ;;  %v5431_v41 = vunpack.c.l.b16 %v16792_v4  ;;  %v5432_v23 = vunpack.c.l.b16 %v16793_v14  ;;  %v5817_v0 = vrot.slane %v5430_v33, 3 }
 0x2a3   : > { %v2668_v18 = vcombine.high %v2666_v42, %v2666_v42  ;;  %v15447_v31 = vrot.slane %v2667_v36, 9  ;;  %v23805_v33 = vrot.slane %v20241_v49, 7  ;;  %v15448_v6 = vrot.slane %v2666_v42, 9 }
 0x2a4   : > { %v5433_v8 = vunpack.c.l.b16 %v16794_v5  ;;  %v5818_v11 = vsel %vm5517_vm9, %v5817_v0, %v5816_v40  ;;  %v5819_v19 = vrot.slane %v5431_v41, 2  ;;  %v5821_v56 = vrot.slane %v5432_v23, 1  ;;  %v17724_v0 = vpop.f32.mrf.mxu0 }
 0x2a5   : > { %v2618_v48 = vcombine.high %v1722_v55, %v1722_v55  ;;  %v23806_v44 = vrot.slane %v20244_v63, 6  ;;  %v4114_v50 = vmax.f32 %v2659_v39, %v15446_v21  ;;  %v2625_v1 = vrot.slane %v1722_v55, %v19095_v26  ;;  %v20323_v21 = vld [vmem:[#allocation2 + $0x60] sm:$0xe] }
 0x2a6   : > { %v5820_v4 = vsel %vm5520_vm10, %v5819_v19, %v5818_v11  ;;  %v5824_v14 = vsel %vm5526_vm11, %v23805_v33, %v5433_v8  ;;  %v5831_v53 = vrot.slane %v20288_v37, 3  ;;  %v23807_v54 = vrot.slane %v20252_v58, 5  ;;  %v6210_v33 = vld [vmem:[#allocation2 + $0x18] sm:$0xe] }
 0x2a7   : > { %v5822_v52 = vsel %vm5523_vm13, %v5821_v56, %v5820_v4  ;;  %v5826_v40 = vsel %vm5508_vm5, %v23806_v44, %v5824_v14  ;;  %v15449_v24 = vrot.slane %v2668_v18, 9  ;;  %v5833_v28 = vrot.slane %v5439_v25, 2  ;;  %v1438_v44 = vpop.f32.mrf.mxu0 }
 0x2a8   : > { %v5828_v49 = vsel %vm5511_vm6, %v23807_v54, %v5826_v40  ;;  %v5978_v3 = vpack.c.b16 %v5822_v52, %v5822_v52  ;;  %v23808_v59 = vrot.slane %v20262_v30, 4  ;;  %v20317_v63 = vadd.f32 %v20063_v29, %v20247_v2  ;;  %v6181_v52 = vld [vmem:[#allocation2 + $0x7c] sm:$0xf] }
 0x2a9   : > { %v2632_v39 = vrot.slane %v2618_v48, %v19095_v26  ;;  %v5835_v41 = vrot.slane %v5440_v62, 1  ;;  %v4115_v23 = vmax.f32 %v2667_v36, %v15447_v31  ;;  %v4116_v55 = vmax.f32 %v2666_v42, %v15448_v6 }
 0x2aa   : > { %v5830_v5 = vsel %vm5514_vm7, %v23808_v59, %v5828_v49  ;;  %v6126_v58 = vsel %vm19198_vm15, %v5978_v3, %v6125_v46  ;;  %v16811_v8 = vpack.c.bf16 %v4114_v50, %v4114_v50  ;;  %v2633_v11 = vcombine.high %v2625_v1, %v2625_v1  ;;  %v18605_v50 = vld [vmem:[#allocation2 + $0x1c] sm:$0xf]  ;;  %v18606_v3 = vld [vmem:[#allocation2 + $0x20] ss:$0 sps:$4 sm:$0x11]   ;;  %v6888_v59 = vpop.permute.xlu0 %6887 }
 0x2ab   : > { %v5832_v37 = vsel %vm5517_vm9, %v5831_v53, %v5830_v5  ;;  %6127 = vst [vmem:[#allocation2 + $0x90] sm:$0xf] %v6126_v58  ;;  %v4117_v56 = vmax.f32 %v2668_v18, %v15449_v24  ;;  %v2634_v25 = vcombine.high %v2632_v39, %v2632_v39  ;;  %v1645_v4 = vmax.f32 %v20317_v63, 0.0  ;;  %v6679_v58 = vpop.permute.xlu1 %6678 }
 0x2ac   : > { %v5834_v30 = vsel %vm5520_vm10, %v5833_v28, %v5832_v37  ;;  %v20332_v36 = vadd.f32 %v20063_v29, %v20257_v60  ;;  %v15438_v31 = vrot.slane %v2625_v1, 9  ;;  %v16812_v14 = vpack.c.bf16 %v4115_v23, %v4115_v23  ;;  %v6180_v28 = vld [vmem:[#allocation2 + $0x78] sm:$0xf] }
 0x2ad   : > { %v5836_v19 = vsel %vm5523_vm13, %v5835_v41, %v5834_v30  ;;  %v15439_v42 = vrot.slane %v2633_v11, 9  ;;  %v15440_v6 = vrot.slane %v2632_v39, 9  ;;  %v15441_v48 = vrot.slane %v2634_v25, 9 }
 0x2ae   : > { %v5979_v62 = vpack.c.b16 %v5836_v19, %v5836_v19  ;;  %v16813_v40 = vpack.c.bf16 %v4116_v55, %v4116_v55  ;;  %v20335_v18 = vunpack.c.l.b16 %v16811_v8  ;;  %v4106_v46 = vmax.f32 %v2625_v1, %v15438_v31  ;;  %v17984_v8 = vld [vmem:[#allocation2 + $0x80] ss:$0 sps:$4 sm:$0x11]  }
 0x2af   : > { %v15808_v53 = vcombine.low %v6210_v33, %v18605_v50  ;;  %v16814_v54 = vpack.c.bf16 %v4117_v56, %v4117_v56  ;;  %v4107_v49 = vmax.f32 %v2633_v11, %v15439_v42  ;;  %v4108_v60 = vmax.f32 %v2632_v39, %v15440_v6  ;;  %v17727_v11 = vpop.f32.mrf.mxu0 }
 0x2b0   : > { %6128 = vst.msk [vmem:[#allocation2 + $0x94] sm:$0xf] %vm4170_vm4, %v5979_v62  ;;  %v6762_v24 = vrot.slane %v18606_v3, 1  ;;  %v4109_v5 = vmax.f32 %v2634_v25, %v15441_v48  ;;  %v1447_v41 = vadd.f32 %v20063_v29, %v17724_v0  ;;  %v20338_v37 = vcombine.low %v6180_v28, %v6181_v52 }
 0x2b1   : > { %v6761_v63 = vrot.slane %v15808_v53, 1  ;;  %v1643_v23 = vmax.f32 %v20332_v36, 0.0  ;;  %v20341_v30 = vunpack.c.l.b16 %v16812_v14  ;;  %v16803_v1 = vpack.c.bf16 %v4106_v46, %v4106_v46  ;;  %v1451_v50 = vpop.f32.mrf.mxu0 }
 0x2b2   : > { %23809 = vst [vmem:[#allocation38_spill] sm:$0xff] %v20338_v37  ;;  %v16804_v55 = vpack.c.bf16 %v4107_v49, %v4107_v49  ;;  %v20343_v39 = vunpack.c.l.b16 %v16813_v40  ;;  %v16805_v19 = vpack.c.bf16 %v4108_v60, %v4108_v60  ;;  %v1649_v25 = vmax.f32 %v1447_v41, 0.0  ;;  %v20357_v40 = vld [vmem:[%s23689_s2] ss:$0 sm:$0xff] }
 0x2b3   : > { %v6763_v56 = vsel %vm6754_vm1, %v6761_v63, %v6762_v24  ;;  %v20346_v62 = vunpack.c.l.b16 %v16814_v54  ;;  %v5850_v29 = vrot.slane %v20335_v18, 7  ;;  %v16806_v36 = vpack.c.bf16 %v4109_v5, %v4109_v5 }
 0x2b4   : > { %v5443_v0 = vunpack.c.l.b16 %v16804_v55  ;;  %v7790_v31 = vsel %vm7731_vm2, %v6763_v56, %v6888_v59  ;;  %v7739_v33 = vsel %vm7731_vm2, %v19484_v47, %v6679_v58  ;;  %v1725_v14 = vmax.f32 %v1645_v4, %v1649_v25  ;;  %v20364_v55 = vpop.f32.mrf.mxu0 }
 0x2b5   : > { %8347 = vmatprep.mubr.bf16.mxu1 %v7790_v31  ;;  %v6605_v42 = vshll.u32 %v20338_v37, 16  ;;  %v5852_v6 = vrot.slane %v20341_v30, 6  ;;  %v5442_v48 = vunpack.c.l.b16 %v16803_v1  ;;  %v6610_v52 = vshll.u32 %v17984_v8, 16 }
 0x2b6   : > { %8348 = vmatmul.mubr.bf16.gmra.mxu1 %v7739_v33  ;;  %v1439_v46 = vadd.f32 %v20357_v40, %v1438_v44  ;;  %v5444_v53 = vunpack.c.l.b16 %v16805_v19  ;;  %v2669_v54 = vcombine.high %v1725_v14, %v1725_v14  ;;  %v2676_v47 = vrot.slane %v1725_v14, %v19095_v26 }
 0x2b7   : > { %v6607_v4 = vrot.slane %v6605_v42, 1  ;;  %v5838_v60 = vrot.slane %v5443_v0, 6  ;;  %v6603_v3 = vshrl.u32 %v20338_v37, 16  ;;  %v5445_v28 = vunpack.c.l.b16 %v16806_v36  ;;  %v6143_v37 = vld [vmem:[#allocation2 + $0xb0] sm:$0x1] }
 0x2b8   : > { %v1647_v24 = vmax.f32 %v1439_v46, 0.0  ;;  %v2683_v59 = vrot.slane %v2669_v54, %v19095_v26  ;;  %v2684_v5 = vcombine.high %v2676_v47, %v2676_v47  ;;  %v15450_v63 = vrot.slane %v2676_v47, 9 }
 0x2b9   : > { %v5837_v41 = vrot.slane %v5442_v48, 7  ;;  %v6608_v58 = vor.u32 %v6607_v4, %v6603_v3  ;;  %v6612_v44 = vrot.slane %v6610_v52, 1  ;;  %v5840_v8 = vrot.slane %v5444_v53, 5  ;;  %v20372_v4 = vpop.f32.mrf.mxu0 }
 0x2ba   : > { %v1723_v1 = vmax.f32 %v1643_v23, %v1647_v24  ;;  %v2685_v19 = vcombine.high %v2683_v59, %v2683_v59  ;;  %v15451_v56 = vrot.slane %v2684_v5, 9  ;;  %v15452_v25 = vrot.slane %v2683_v59, 9 }
 0x2bb   : > { %v5839_v0 = vsel %vm5508_vm5, %v5838_v60, %v5837_v41  ;;  %v6613_v31 = vsel %vm6481_vm0, %v6608_v58, %v6612_v44  ;;  %v4118_v48 = vmax.f32 %v2676_v47, %v15450_v63  ;;  %v5842_v23 = vrot.slane %v5445_v28, 4  ;;  %v6136_v58 = vld [vmem:[#allocation2 + $0xa4] sm:$0x1] }
 0x2bc   : > { %v2635_v33 = vcombine.high %v1723_v1, %v1723_v1  ;;  %v2642_v36 = vrot.slane %v1723_v1, %v19095_v26  ;;  %v15453_v42 = vrot.slane %v2685_v19, 9  ;;  %v4119_v46 = vmax.f32 %v2684_v5, %v15451_v56  ;;  %6694 = vrot.lane.b32.xlu1 %v6613_v31, %s18721_s14 }
 0x2bd   : > { %v5841_v60 = vsel %vm5511_vm6, %v5840_v8, %v5839_v0  ;;  %v4120_v3 = vmax.f32 %v2683_v59, %v15452_v25  ;;  %v1460_v41 = vadd.f32 %v20357_v40, %v17727_v11  ;;  %v16815_v63 = vpack.c.bf16 %v4118_v48, %v4118_v48  ;;  %v20379_v8 = vld [vmem:[#allocation2 + $0x88] sm:$0xf]  ;;  %v17731_v59 = vpop.f32.mrf.mxu0 }
 0x2be   : > { %v2649_v52 = vrot.slane %v2635_v33, %v19095_v26  ;;  %v2650_v53 = vcombine.high %v2642_v36, %v2642_v36  ;;  %v15442_v54 = vrot.slane %v2642_v36, 9  ;;  %v4121_v24 = vmax.f32 %v2685_v19, %v15453_v42 }
 0x2bf   : > { %v16816_v56 = vpack.c.bf16 %v4119_v46, %v4119_v46  ;;  %v20377_v31 = vadd.f32 %v20357_v40, %v1451_v50  ;;  %v16817_v19 = vpack.c.bf16 %v4120_v3, %v4120_v3  ;;  %v5843_v25 = vsel %vm5514_vm7, %v5842_v23, %v5841_v60  ;;  %v6244_v46 = vld [vmem:[#allocation2 + $0x84] sm:$0xf]  ;;  %v17987_v60 = vld [vmem:[#allocation2 + $0x8c] ss:$0 sps:$4 sm:$0x11]  }
 0x2c0   : > { %v2651_v44 = vcombine.high %v2649_v52, %v2649_v52  ;;  %v15443_v1 = vrot.slane %v2650_v53, 9  ;;  %v15444_v47 = vrot.slane %v2649_v52, 9  ;;  %v4110_v5 = vmax.f32 %v2642_v36, %v15442_v54  ;;  %v6308_v54 = vld [vmem:[#allocation2 + $0x88] sm:$0xf]  ;;  %v6346_v23 = vld [vmem:[#allocation2 + $0x84] sm:$0xe] }
 0x2c1   : > { %v16879_v28 = vpack.c.bf16 %v4121_v24, %v4121_v24  ;;  %v1652_v0 = vmax.f32 %v1460_v41, 0.0  ;;  %v20385_v24 = vcombine.low %v6244_v46, %v20379_v8  ;;  %v1476_v3 = vadd.f32 %v20357_v40, %v17731_v59 }
 0x2c2   : > { %v15445_v33 = vrot.slane %v2651_v44, 9  ;;  %v4111_v2 = vmax.f32 %v2650_v53, %v15443_v1  ;;  %v4112_v14 = vmax.f32 %v2649_v52, %v15444_v47  ;;  %v16807_v49 = vpack.c.bf16 %v4110_v5, %v4110_v5 }
 0x2c3   : > { %v6137_v11 = vsel %vm19158_vm12, %v16879_v28, %v6136_v58  ;;  %v5454_v53 = vunpack.c.l.b16 %v16815_v63  ;;  %v5455_v52 = vunpack.c.l.b16 %v16816_v56  ;;  %23810 = vst [vmem:[#allocation39_spill] sm:$0xff] %v20385_v24  ;;  %v5456_v41 = vunpack.c.l.b16 %v16817_v19  ;;  %6903 = vrot.lane.b32.xlu0 %v20385_v24, %s18721_s14 }
 0x2c4   : > { %6138 = vst [vmem:[#allocation2 + $0xa4] sm:$0x1] %v6137_v11  ;;  %v4113_v36 = vmax.f32 %v2651_v44, %v15445_v33  ;;  %v16808_v42 = vpack.c.bf16 %v4111_v2, %v4111_v2  ;;  %v16809_v48 = vpack.c.bf16 %v4112_v14, %v4112_v14  ;;  %v5446_v50 = vunpack.c.l.b16 %v16807_v49  ;;  %v1467_v44 = vpop.f32.mrf.mxu0 }
 0x2c5   : > { %v1650_v2 = vmax.f32 %v20377_v31, 0.0  ;;  %v1656_v49 = vmax.f32 %v1476_v3, 0.0  ;;  %v15911_v14 = vcombine.low %v6346_v23, %v6308_v54  ;;  %v5858_v59 = vrot.slane %v5454_v53, 3  ;;  %v6132_v54 = vld [vmem:[#allocation2 + $0x9c] sm:$0xf] }
 0x2c6   : > { %v16810_v1 = vpack.c.bf16 %v4113_v36, %v4113_v36  ;;  %v5447_v47 = vunpack.c.l.b16 %v16808_v42  ;;  %v5448_v58 = vunpack.c.l.b16 %v16809_v48  ;;  %v5844_v5 = vrot.slane %v5446_v50, 3 }
 0x2c7   : > { %v5860_v11 = vrot.slane %v5455_v52, 2  ;;  %v1728_v36 = vmax.f32 %v1652_v0, %v1656_v49  ;;  %v7710_v42 = vrot.slane %v15911_v14, 1  ;;  %v7711_v19 = vrot.slane %v17987_v60, 1 }
 0x2c8   : > { %v5449_v63 = vunpack.c.l.b16 %v16810_v1  ;;  %v5845_v56 = vsel %vm5517_vm9, %v5844_v5, %v5843_v25  ;;  %v5846_v28 = vrot.slane %v5447_v47, 2  ;;  %v5848_v33 = vrot.slane %v5448_v58, 1 }
 0x2c9   : > { %v1468_v50 = vadd.f32 %v20357_v40, %v1467_v44  ;;  %v2720_v53 = vcombine.high %v1728_v36, %v1728_v36  ;;  %v2727_v0 = vrot.slane %v1728_v36, %v19095_v26  ;;  %v23811_v52 = vrot.slane %v20343_v39, 5 }
 0x2ca   : > { %v5847_v48 = vsel %vm5520_vm10, %v5846_v28, %v5845_v56  ;;  %v5851_v31 = vsel %vm5526_vm11, %v5850_v29, %v5449_v63  ;;  %v7712_v29 = vsel %vm6754_vm1, %v7710_v42, %v7711_v19  ;;  %v23812_v47 = vrot.slane %v20346_v62, 4  ;;  %v6211_v56 = vld [vmem:[#allocation2 + $0x24] sm:$0xe]  ;;  %v18608_v42 = vld [vmem:[#allocation2 + $0x28] sm:$0xf] }
 0x2cb   : > { %v5849_v46 = vsel %vm5523_vm13, %v5848_v33, %v5847_v48  ;;  %v5853_v25 = vsel %vm5508_vm5, %v5852_v6, %v5851_v31  ;;  %v1654_v1 = vmax.f32 %v1468_v50, 0.0  ;;  %v2734_v30 = vrot.slane %v2720_v53, %v19095_v26  ;;  %17774 = vmatmul.mubr.msk.bf16.gmra.mxu0 %vm7731_vm2, %v7712_v29  ;;  %v6301_v48 = vld [vmem:[#allocation2 + $0x60] sm:$0xf]  ;;  %v17732_v29 = vpop.f32.mrf.mxu0 }
 0x2cc   : > { %v5855_v3 = vsel %vm5511_vm6, %v23811_v52, %v5853_v25  ;;  %v5981_v18 = vpack.c.b16 %v5849_v46, %v5849_v46  ;;  %v2735_v5 = vcombine.high %v2727_v0, %v2727_v0  ;;  %v15462_v6 = vrot.slane %v2727_v0, 9 }
 0x2cd   : > { %v5857_v58 = vsel %vm5514_vm7, %v23812_v47, %v5855_v3  ;;  %v5862_v23 = vrot.slane %v5456_v41, 1  ;;  %v1726_v49 = vmax.f32 %v1650_v2, %v1654_v1  ;;  %v2736_v44 = vcombine.high %v2734_v30, %v2734_v30  ;;  %v18609_v2 = vld [vmem:[#allocation2 + $0x64] sm:$0xf]  ;;  %v18019_v1 = vld [vmem:[%s23690_s3 + $0xb8] sm:$0xff]  }
 0x2ce   : > { %v5859_v60 = vsel %vm5517_vm9, %v5858_v59, %v5857_v58  ;;  %v6133_v39 = vsel %vm19198_vm15, %v5981_v18, %v6132_v54  ;;  %v15463_v62 = vrot.slane %v2735_v5, 9  ;;  %v15464_v63 = vrot.slane %v2734_v30, 9 }
 0x2cf   : > { %v5861_v14 = vsel %vm5520_vm10, %v5860_v11, %v5859_v60  ;;  %6134 = vst [vmem:[#allocation2 + $0x9c] sm:$0xf] %v6133_v39  ;;  %v2686_v33 = vcombine.high %v1726_v49, %v1726_v49  ;;  %v2693_v36 = vrot.slane %v1726_v49, %v19095_v26  ;;  %v15809_v41 = vcombine.low %v6211_v56, %v18608_v42 }
 0x2d0   : > { %v5863_v28 = vsel %vm5523_vm13, %v5862_v23, %v5861_v14  ;;  %v15465_v31 = vrot.slane %v2736_v44, 9  ;;  %v4130_v19 = vmax.f32 %v2727_v0, %v15462_v6  ;;  %v4131_v50 = vmax.f32 %v2735_v5, %v15463_v62  ;;  %v18018_v0 = vld [vmem:[%s23690_s3 + $0xf8] sm:$0xff]  }
 0x2d1   : > { %v5982_v59 = vpack.c.b16 %v5863_v28, %v5863_v28  ;;  %v20417_v46 = vcombine.low %v6301_v48, %v18609_v2  ;;  %v2700_v11 = vrot.slane %v2686_v33, %v19095_v26  ;;  %v2701_v25 = vcombine.high %v2693_v36, %v2693_v36  ;;  %17133 = vmatprep.subr.bf16.mxu1 %v18018_v0  ;;  %v6681_v28 = vpop.permute.xlu1 %6680  ;;  %v17990_v2 = vld [vmem:[#allocation2 + $0x8c] ss:$0 sps:$4 sm:$0x11]  }
 0x2d2   : > { %v15454_v54 = vrot.slane %v2693_v36, 9  ;;  %v1463_v3 = vadd.f32 %v20357_v40, %v20364_v55  ;;  %v4132_v18 = vmax.f32 %v2734_v30, %v15464_v63  ;;  %v6764_v6 = vrot.slane %v15809_v41, 1  ;;  %v6890_v55 = vpop.permute.xlu0 %6889  ;;  %v18610_v63 = vld [vmem:[#allocation2 + $0x2c] ss:$0 sps:$4 sm:$0x11]   ;;  %17134 = vmatpush3.bf16.msra.mxu1 %v18019_v1  ;;  %v1470_v41 = vpop.f32.mrf.mxu0 }
 0x2d3   : > { %23813 = vst [vmem:[#allocation40_spill] sm:$0xff] %v20417_v46  ;;  %6135 = vst.msk [vmem:[#allocation2 + $0xa0] sm:$0xf] %vm4170_vm4, %v5982_v59  ;;  %v2702_v47 = vcombine.high %v2700_v11, %v2700_v11  ;;  %v15455_v58 = vrot.slane %v2701_v25, 9  ;;  %v15456_v5 = vrot.slane %v2700_v11, 9  ;;  %v4133_v23 = vmax.f32 %v2736_v44, %v15465_v31 }
 0x2d4   : > { %v16827_v60 = vpack.c.bf16 %v4130_v19, %v4130_v19  ;;  %v16828_v39 = vpack.c.bf16 %v4131_v50, %v4131_v50  ;;  %v4122_v49 = vmax.f32 %v2693_v36, %v15454_v54  ;;  %v6765_v56 = vrot.slane %v18610_v63, 1  ;;  %v6183_v50 = vld [vmem:[#allocation2 + $0x88] sm:$0xf] }
 0x2d5   : > { %v15457_v30 = vrot.slane %v2702_v47, 9  ;;  %v4123_v14 = vmax.f32 %v2701_v25, %v15455_v58  ;;  %v4124_v62 = vmax.f32 %v2700_v11, %v15456_v5  ;;  %v1653_v33 = vmax.f32 %v1463_v3, 0.0 }
 0x2d6   : > { %v1455_v42 = vadd.f32 %v20357_v40, %v20372_v4  ;;  %v16829_v48 = vpack.c.bf16 %v4132_v18, %v4132_v18  ;;  %v16819_v59 = vpack.c.bf16 %v4122_v49, %v4122_v49  ;;  %v6766_v36 = vsel %vm6754_vm1, %v6764_v6, %v6765_v56 }
 0x2d7   : > { %v4125_v44 = vmax.f32 %v2702_v47, %v15457_v30  ;;  %v16820_v31 = vpack.c.bf16 %v4123_v14, %v4123_v14  ;;  %v16821_v19 = vpack.c.bf16 %v4124_v62, %v4124_v62  ;;  %v16830_v25 = vpack.c.bf16 %v4133_v23, %v4133_v23  ;;  %v6182_v47 = vld [vmem:[#allocation2 + $0x84] sm:$0xf] }
 0x2d8   : > { %v20434_v11 = vunpack.c.l.b16 %v16827_v60  ;;  %v20436_v54 = vunpack.c.l.b16 %v16828_v39  ;;  %v7794_v3 = vsel %vm7731_vm2, %v6766_v36, %v6890_v55  ;;  %v7742_v4 = vsel %vm7731_vm2, %v19555_v17, %v6681_v28  ;;  %v20445_v60 = vpop.f32.mrf.mxu0 }
 0x2d9   : > { %v16822_v0 = vpack.c.bf16 %v4125_v44, %v4125_v44  ;;  %v5459_v1 = vunpack.c.l.b16 %v16820_v31  ;;  %8355 = vmatprep.mubr.bf16.mxu1 %v7794_v3  ;;  %v1479_v18 = vadd.f32 %v20357_v40, %v17732_v29  ;;  %v1651_v58 = vmax.f32 %v1455_v42, 0.0 }
 0x2da   : > { %v5458_v5 = vunpack.c.l.b16 %v16819_v59  ;;  %8356 = vmatmul.mubr.bf16.gmra.mxu1 %v7742_v4  ;;  %v20442_v6 = vcombine.low %v6182_v47, %v6183_v50  ;;  %v1471_v23 = vadd.f32 %v20357_v40, %v1470_v41  ;;  %v20447_v39 = vunpack.c.l.b16 %v16829_v48  ;;  %v20455_v31 = vpop.f32.mrf.mxu0 }
 0x2db   : > { %v5460_v49 = vunpack.c.l.b16 %v16821_v19  ;;  %v1657_v55 = vmax.f32 %v1479_v18, 0.0  ;;  %v6622_v30 = vshll.u32 %v17990_v2, 16  ;;  %v5865_v17 = vrot.slane %v5459_v1, 6 }
 0x2dc   : > { %23814 = vst [vmem:[#allocation41_spill] sm:$0xff] %v20442_v6  ;;  %v6617_v29 = vshll.u32 %v20442_v6, 16  ;;  %v1655_v62 = vmax.f32 %v1471_v23, 0.0  ;;  %v20451_v63 = vunpack.c.l.b16 %v16830_v25  ;;  %v5461_v28 = vunpack.c.l.b16 %v16822_v0 }
 0x2dd   : > { %v1729_v42 = vmax.f32 %v1653_v33, %v1657_v55  ;;  %v5864_v59 = vrot.slane %v5458_v5, 7  ;;  %v6615_v41 = vshrl.u32 %v20442_v6, 16  ;;  %v5867_v19 = vrot.slane %v5460_v49, 5  ;;  %v20463_v55 = vpop.f32.mrf.mxu0 }
 0x2de   : > { %v6619_v48 = vrot.slane %v6617_v29, 1  ;;  %v1727_v44 = vmax.f32 %v1651_v58, %v1655_v62  ;;  %v6624_v2 = vrot.slane %v6622_v30, 1  ;;  %v5869_v0 = vrot.slane %v5461_v28, 4  ;;  %v18029_v30 = vld [vmem:[%s23690_s3 + $0xf0] sm:$0xff]  }
 0x2df   : > { %v2737_v36 = vcombine.high %v1729_v42, %v1729_v42  ;;  %v2744_v50 = vrot.slane %v1729_v42, %v19095_v26  ;;  %v5866_v3 = vsel %vm5508_vm5, %v5865_v17, %v5864_v59  ;;  %v18030_v17 = vld [vmem:[%s23690_s3 + $0xb0] sm:$0xff]   ;;  %17135 = vmatprep.subr.bf16.mxu1 %v18029_v30  ;;  %v20473_v24 = vpop.f32.mrf.mxu0 }
 0x2e0   : > { %v6620_v25 = vor.u32 %v6619_v48, %v6615_v41  ;;  %v2703_v1 = vcombine.high %v1727_v44, %v1727_v44  ;;  %v2710_v4 = vrot.slane %v1727_v44, %v19095_v26  ;;  %17136 = vmatpush3.bf16.msra.mxu1 %v18030_v17 }
 0x2e1   : > { %v2751_v33 = vrot.slane %v2737_v36, %v19095_v26  ;;  %v2752_v18 = vcombine.high %v2744_v50, %v2744_v50  ;;  %v15466_v47 = vrot.slane %v2744_v50, 9  ;;  %v5868_v36 = vsel %vm5511_vm6, %v5867_v19, %v5866_v3 }
 0x2e2   : > { %v6625_v58 = vsel %vm6481_vm0, %v6620_v25, %v6624_v2  ;;  %v2717_v5 = vrot.slane %v2703_v1, %v19095_v26  ;;  %v2718_v23 = vcombine.high %v2710_v4, %v2710_v4  ;;  %v15458_v49 = vrot.slane %v2710_v4, 9 }
 0x2e3   : > { %v2753_v29 = vcombine.high %v2751_v33, %v2751_v33  ;;  %v15467_v62 = vrot.slane %v2752_v18, 9  ;;  %v15468_v28 = vrot.slane %v2751_v33, 9  ;;  %v4134_v42 = vmax.f32 %v2744_v50, %v15466_v47  ;;  %6696 = vrot.lane.b32.xlu1 %v6625_v58, %s18721_s14 }
 0x2e4   : > { %v2719_v59 = vcombine.high %v2717_v5, %v2717_v5  ;;  %v15459_v41 = vrot.slane %v2718_v23, 9  ;;  %v15460_v48 = vrot.slane %v2717_v5, 9  ;;  %v4126_v44 = vmax.f32 %v2710_v4, %v15458_v49 }
 0x2e5   : > { %v15469_v2 = vrot.slane %v2753_v29, 9  ;;  %v4135_v25 = vmax.f32 %v2752_v18, %v15467_v62  ;;  %v4136_v1 = vmax.f32 %v2751_v33, %v15468_v28  ;;  %v5881_v50 = vrot.slane %v20447_v39, 5  ;;  %v20479_v39 = vld [vmem:[#allocation2 + $0x94] sm:$0xf] }
 0x2e6   : > { %v15461_v53 = vrot.slane %v2719_v59, 9  ;;  %v4127_v52 = vmax.f32 %v2718_v23, %v15459_v41  ;;  %v4128_v56 = vmax.f32 %v2717_v5, %v15460_v48  ;;  %v16823_v14 = vpack.c.bf16 %v4126_v44, %v4126_v44  ;;  %v6246_v44 = vld [vmem:[#allocation2 + $0x90] sm:$0xf] }
 0x2e7   : > { %v4137_v47 = vmax.f32 %v2753_v29, %v15469_v2  ;;  %v16831_v58 = vpack.c.bf16 %v4134_v42, %v4134_v42  ;;  %v16832_v6 = vpack.c.bf16 %v4135_v25, %v4135_v25  ;;  %v16833_v3 = vpack.c.bf16 %v4136_v1, %v4136_v1  ;;  %v17739_v29 = vpop.f32.mrf.mxu0  ;;  %v6347_v25 = vld [vmem:[#allocation2 + $0x90] sm:$0xe] }
 0x2e8   : > { %v4129_v4 = vmax.f32 %v2719_v59, %v15461_v53  ;;  %v16824_v49 = vpack.c.bf16 %v4127_v52, %v4127_v52  ;;  %v16825_v30 = vpack.c.bf16 %v4128_v56, %v4128_v56  ;;  %v5462_v19 = vunpack.c.l.b16 %v16823_v14  ;;  %v20485_v14 = vld [vmem:[#allocation2 + $0x94] sm:$0xf]  ;;  %v17994_v56 = vld [vmem:[#allocation2 + $0x98] ss:$0 sps:$4 sm:$0x11]  }
 0x2e9   : > { %v16880_v18 = vpack.c.bf16 %v4137_v47, %v4137_v47  ;;  %v5870_v33 = vsel %vm5514_vm7, %v5869_v0, %v5868_v36  ;;  %v1492_v5 = vadd.f32 %v20357_v40, %v20445_v60  ;;  %v5470_v42 = vunpack.c.l.b16 %v16831_v58 }
 0x2ea   : > { %v16826_v23 = vpack.c.bf16 %v4129_v4, %v4129_v4  ;;  %v5463_v17 = vunpack.c.l.b16 %v16824_v49  ;;  %v5464_v62 = vunpack.c.l.b16 %v16825_v30  ;;  %v5871_v28 = vrot.slane %v5462_v19, 3  ;;  %v1499_v49 = vpop.f32.mrf.mxu0 }
 0x2eb   : > { %v5471_v41 = vunpack.c.l.b16 %v16832_v6  ;;  %v6144_v53 = vsel %vm19158_vm12, %v16880_v18, %v6143_v37  ;;  %v1484_v52 = vadd.f32 %v20357_v40, %v20455_v31  ;;  %v5883_v36 = vrot.slane %v20451_v63, 4 }
 0x2ec   : > { %6145 = vst [vmem:[#allocation2 + $0xb0] sm:$0x1] %v6144_v53  ;;  %v5465_v60 = vunpack.c.l.b16 %v16826_v23  ;;  %v5872_v0 = vsel %vm5517_vm9, %v5871_v28, %v5870_v33  ;;  %v5873_v59 = vrot.slane %v5463_v17, 2  ;;  %v5875_v48 = vrot.slane %v5464_v62, 1  ;;  %v6139_v33 = vld [vmem:[#allocation2 + $0xa8] sm:$0xf] }
 0x2ed   : > { %v1660_v2 = vmax.f32 %v1492_v5, 0.0  ;;  %v20490_v6 = vcombine.low %v6246_v44, %v20479_v39  ;;  %v1508_v37 = vadd.f32 %v20357_v40, %v17739_v29  ;;  %v5472_v31 = vunpack.c.l.b16 %v16833_v3  ;;  %v18611_v44 = vld [vmem:[#allocation2 + $0x34] sm:$0xf] }
 0x2ee   : > { %v5874_v1 = vsel %vm5520_vm10, %v5873_v59, %v5872_v0  ;;  %v23816_v47 = vrot.slane %v20434_v11, 7  ;;  %v15912_v4 = vcombine.low %v6347_v25, %v20485_v14  ;;  %v5885_v30 = vrot.slane %v5470_v42, 3  ;;  %v6212_v0 = vld [vmem:[#allocation2 + $0x30] sm:$0xe] }
 0x2ef   : > { %23815 = vst [vmem:[#allocation42_spill] sm:$0xff] %v20490_v6  ;;  %v5876_v63 = vsel %vm5523_vm13, %v5875_v48, %v5874_v1  ;;  %v23817_v19 = vrot.slane %v20436_v54, 6  ;;  %v1658_v5 = vmax.f32 %v1484_v52, 0.0  ;;  %6905 = vrot.lane.b32.xlu0 %v20490_v6, %s18721_s14  ;;  %v5887_v3 = vrot.slane %v5471_v41, 2  ;;  %v18036_v41 = vld [vmem:[%s23690_s3 + $0xa8] sm:$0xff]  }
 0x2f0   : > { %v5878_v58 = vsel %vm5526_vm11, %v23816_v47, %v5465_v60  ;;  %v5984_v23 = vpack.c.b16 %v5876_v63, %v5876_v63  ;;  %v1664_v17 = vmax.f32 %v1508_v37, 0.0  ;;  %v7713_v28 = vrot.slane %v15912_v4, 1  ;;  %v20525_v63 = vld [vmem:[#allocation2 + $0x6c] sm:$0xe] }
 0x2f1   : > { %v5880_v18 = vsel %vm5508_vm5, %v23817_v19, %v5878_v58  ;;  %v7714_v29 = vrot.slane %v17994_v56, 1  ;;  %v1500_v42 = vadd.f32 %v20357_v40, %v1499_v49  ;;  %v5889_v53 = vrot.slane %v5472_v31, 1  ;;  %v18612_v49 = vld [vmem:[#allocation2 + $0x38] ss:$0 sps:$4 sm:$0x11]  }
 0x2f2   : > { %v5882_v11 = vsel %vm5511_vm6, %v5881_v50, %v5880_v18  ;;  %v6140_v52 = vsel %vm19198_vm15, %v5984_v23, %v6139_v33  ;;  %v1732_v60 = vmax.f32 %v1660_v2, %v1664_v17  ;;  %v18035_v50 = vld [vmem:[%s23690_s3 + $0xe8] sm:$0xff]   ;;  %v23818_v37 = vshll.u32 %v20068_v22, 16  ;;  %v20529_v23 = vld [vmem:[#allocation2 + $0x70] sm:$0xf]  ;;  %v6248_v22 = vld [vmem:[#allocation2 + $0x9c] sm:$0xf] }
 0x2f3   : > { %v5884_v62 = vsel %vm5514_vm7, %v5883_v36, %v5882_v11  ;;  %6141 = vst [vmem:[#allocation2 + $0xa8] sm:$0xf] %v6140_v52  ;;  %v7715_v59 = vsel %vm6754_vm1, %v7713_v28, %v7714_v29  ;;  %v1662_v48 = vmax.f32 %v1500_v42, 0.0  ;;  %v15810_v36 = vcombine.low %v6212_v0, %v18611_v44  ;;  %17137 = vmatprep.subr.bf16.mxu1 %v18035_v50  ;;  %v6892_v11 = vpop.permute.xlu0 %6891  ;;  %v17740_v42 = vpop.f32.mrf.mxu0  ;;  %v20732_v27 = vld [vmem:[#allocation2 + $0xb0] ss:$0 sps:$4 sm:$0x11]  }
 0x2f4   : > { %v5886_v54 = vsel %vm5517_vm9, %v5885_v30, %v5884_v62  ;;  %v20520_v2 = vrot.slane %v23818_v37, 1  ;;  %v2788_v31 = vcombine.high %v1732_v60, %v1732_v60  ;;  %v2795_v1 = vrot.slane %v1732_v60, %v19095_v26  ;;  %17777 = vmatprep.mubr.msk.bf16.mxu0 %vm7731_vm2, %v7715_v59  ;;  %17138 = vmatpush3.bf16.msra.mxu1 %v18036_v41 }
 0x2f5   : > { %v5888_v56 = vsel %vm5520_vm10, %v5887_v3, %v5886_v54  ;;  %v1730_v58 = vmax.f32 %v1658_v5, %v1662_v48  ;;  %v6767_v4 = vrot.slane %v15810_v36, 1  ;;  %v6768_v30 = vrot.slane %v18612_v49, 1  ;;  %v6683_v5 = vpop.permute.xlu1 %6682 }
 0x2f6   : > { %23819 = vst [vmem:[#allocation43_spill] sm:$0xff] %v20520_v2  ;;  %v5890_v25 = vsel %vm5523_vm13, %v5889_v53, %v5888_v56  ;;  %v7062_v19 = vshll.u32 %v20164_v32, 16  ;;  %v2802_v18 = vrot.slane %v2788_v31, %v19095_v26  ;;  %v2803_v33 = vcombine.high %v2795_v1, %v2795_v1 }
 0x2f7   : > { %v5985_v47 = vpack.c.b16 %v5890_v25, %v5890_v25  ;;  %v15478_v3 = vrot.slane %v2795_v1, 9  ;;  %v2754_v62 = vcombine.high %v1730_v58, %v1730_v58  ;;  %v2761_v28 = vrot.slane %v1730_v58, %v19095_v26  ;;  %v1502_v58 = vpop.f32.mrf.mxu0 }
 0x2f8   : > { %v6769_v29 = vsel %vm6754_vm1, %v6767_v4, %v6768_v30  ;;  %v2804_v53 = vcombine.high %v2802_v18, %v2802_v18  ;;  %v15479_v54 = vrot.slane %v2803_v33, 9  ;;  %v15480_v52 = vrot.slane %v2802_v18, 9 }
 0x2f9   : > { %6142 = vst.msk [vmem:[#allocation2 + $0xac] sm:$0xf] %vm4170_vm4, %v5985_v47  ;;  %v4146_v60 = vmax.f32 %v2795_v1, %v15478_v3  ;;  %v2768_v0 = vrot.slane %v2754_v62, %v19095_v26  ;;  %v2769_v50 = vcombine.high %v2761_v28, %v2761_v28  ;;  %v15470_v41 = vrot.slane %v2761_v28, 9  ;;  %v6185_v47 = vld [vmem:[#allocation2 + $0x94] sm:$0xf] }
 0x2fa   : > { %v7798_v56 = vsel %vm7731_vm2, %v6769_v29, %v6892_v11  ;;  %v20538_v59 = vrot.slane %v7062_v19, 1  ;;  %v1495_v48 = vadd.f32 %v20357_v40, %v20463_v55  ;;  %v15481_v44 = vrot.slane %v2804_v53, 9  ;;  %v20549_v19 = vld [vmem:[#allocation2 + $0x78] sm:$0xe]  ;;  %v6184_v62 = vld [vmem:[#allocation2 + $0x90] sm:$0xf] }
 0x2fb   : > { %8363 = vmatprep.mubr.bf16.mxu1 %v7798_v56  ;;  %v7745_v36 = vsel %vm7731_vm2, %v19674_v9, %v6683_v5  ;;  %v2770_v37 = vcombine.high %v2768_v0, %v2768_v0  ;;  %v15471_v25 = vrot.slane %v2769_v50, 9  ;;  %v15472_v31 = vrot.slane %v2768_v0, 9  ;;  %23821 = vst [vmem:[#allocation45_spill] sm:$0xff] %v20549_v19  ;;  %v20552_v29 = vld [vmem:[#allocation2 + $0x7c] sm:$0xf] }
 0x2fc   : > { %23820 = vst [vmem:[#allocation44_spill] sm:$0xff] %v20538_v59  ;;  %v4138_v1 = vmax.f32 %v2761_v28, %v15470_v41  ;;  %8364 = vmatmul.mubr.bf16.gmra.mxu1 %v7745_v36  ;;  %v20546_v4 = vadd.f32 %v20357_v40, %v20473_v24  ;;  %v4147_v49 = vmax.f32 %v2803_v33, %v15479_v54  ;;  %23822 = vst [vmem:[#allocation46_spill] sm:$0xff] %v20552_v29  ;;  %v17743_v36 = vpop.f32.mrf.mxu0 }
 0x2fd   : > { %v4148_v30 = vmax.f32 %v2802_v18, %v15480_v52  ;;  %v1511_v55 = vadd.f32 %v20357_v40, %v17740_v42  ;;  %v16843_v3 = vpack.c.bf16 %v4146_v60, %v4146_v60  ;;  %v15473_v11 = vrot.slane %v2770_v37, 9  ;;  %v6305_v18 = vld [vmem:[#allocation2 + $0x78] sm:$0xf] }
 0x2fe   : > { %v4139_v9 = vmax.f32 %v2769_v50, %v15471_v25  ;;  %v4140_v5 = vmax.f32 %v2768_v0, %v15472_v31  ;;  %v16835_v24 = vpack.c.bf16 %v4138_v1, %v4138_v1  ;;  %v20556_v56 = vcombine.low %v6184_v62, %v6185_v47  ;;  %v17997_v60 = vld [vmem:[#allocation2 + $0x98] ss:$0 sps:$4 sm:$0x11]   ;;  %v18615_v50 = vld [vmem:[#allocation2 + $0x7c] sm:$0xf] }
 0x2ff   : > { %v4149_v33 = vmax.f32 %v2804_v53, %v15481_v44  ;;  %v4141_v42 = vmax.f32 %v2770_v37, %v15473_v11  ;;  %v20558_v0 = vcombine.low %v6305_v18, %v18615_v50  ;;  %v1661_v25 = vmax.f32 %v1495_v48, 0.0  ;;  %v18041_v37 = vld [vmem:[%s23690_s3 + $0xe0] sm:$0xff]  }
 0x300   : > { %23823 = vst [vmem:[#allocation47_spill] sm:$0xff] %v20556_v56  ;;  %v16836_v54 = vpack.c.bf16 %v4139_v9, %v4139_v9  ;;  %v16837_v52 = vpack.c.bf16 %v4140_v5, %v4140_v5  ;;  %v1659_v31 = vmax.f32 %v20546_v4, 0.0  ;;  %v1665_v28 = vmax.f32 %v1511_v55, 0.0  ;;  %v18042_v48 = vld [vmem:[%s23690_s3 + $0xa0] sm:$0xff]   ;;  %17139 = vmatprep.subr.bf16.mxu1 %v18041_v37 }
 0x301   : > { %23824 = vst [vmem:[#allocation48_spill] sm:$0xff] %v20558_v0  ;;  %v16844_v17 = vpack.c.bf16 %v4147_v49, %v4147_v49  ;;  %v16845_v6 = vpack.c.bf16 %v4148_v30, %v4148_v30  ;;  %v20561_v41 = vunpack.c.l.b16 %v16843_v3  ;;  %v16838_v47 = vpack.c.bf16 %v4141_v42, %v4141_v42  ;;  %v1515_v3 = vpop.f32.mrf.mxu0  ;;  %17140 = vmatpush3.bf16.msra.mxu1 %v18042_v48 }
 0x302   : > { %v5475_v1 = vunpack.c.l.b16 %v16836_v54  ;;  %v5474_v62 = vunpack.c.l.b16 %v16835_v24  ;;  %v1733_v53 = vmax.f32 %v1661_v25, %v1665_v28  ;;  %v6629_v44 = vshll.u32 %v20556_v56, 16 }
 0x303   : > { %v16846_v4 = vpack.c.bf16 %v4149_v33, %v4149_v33  ;;  %v5476_v55 = vunpack.c.l.b16 %v16837_v52  ;;  %v6634_v30 = vshll.u32 %v17997_v60, 16  ;;  %v1503_v28 = vadd.f32 %v20357_v40, %v1502_v58  ;;  %v20579_v58 = vpop.f32.mrf.mxu0 }
 0x304   : > { %v5892_v49 = vrot.slane %v5475_v1, 6  ;;  %v2805_v11 = vcombine.high %v1733_v53, %v1733_v53  ;;  %v2812_v9 = vrot.slane %v1733_v53, %v19095_v26  ;;  %v6631_v5 = vrot.slane %v6629_v44, 1 }
 0x305   : > { %v20572_v24 = vunpack.c.l.b16 %v16844_v17  ;;  %v20574_v18 = vunpack.c.l.b16 %v16845_v6  ;;  %v6627_v54 = vshrl.u32 %v20556_v56, 16  ;;  %v5477_v33 = vunpack.c.l.b16 %v16838_v47  ;;  %v6348_v56 = vld [vmem:[#allocation2 + $0x9c] sm:$0xe] }
 0x306   : > { %v5891_v52 = vrot.slane %v5474_v62, 7  ;;  %v2819_v60 = vrot.slane %v2805_v11, %v19095_v26  ;;  %v2820_v50 = vcombine.high %v2812_v9, %v2812_v9  ;;  %v5894_v25 = vrot.slane %v5476_v55, 5 }
 0x307   : > { %v6632_v1 = vor.u32 %v6631_v5, %v6627_v54  ;;  %v6636_v53 = vrot.slane %v6634_v30, 1  ;;  %v1663_v44 = vmax.f32 %v1503_v28, 0.0  ;;  %v15482_v37 = vrot.slane %v2812_v9, 9  ;;  %v20591_v54 = vpop.f32.mrf.mxu0 }
 0x308   : > { %v5893_v17 = vsel %vm5508_vm5, %v5892_v49, %v5891_v52  ;;  %v2821_v6 = vcombine.high %v2819_v60, %v2819_v60  ;;  %v15483_v59 = vrot.slane %v2820_v50, 9  ;;  %v20582_v42 = vunpack.c.l.b16 %v16846_v4 }
 0x309   : > { %v6637_v47 = vsel %vm6481_vm0, %v6632_v1, %v6636_v53  ;;  %v1731_v62 = vmax.f32 %v1659_v31, %v1663_v44  ;;  %v5896_v11 = vrot.slane %v5477_v33, 4  ;;  %v15484_v61 = vrot.slane %v2819_v60, 9  ;;  %v6150_v53 = vld [vmem:[#allocation2 + $0xbc] sm:$0x1] }
 0x30a   : > { %v15485_v55 = vrot.slane %v2821_v6, 9  ;;  %6698 = vrot.lane.b32.xlu1 %v6637_v47, %s18721_s14  ;;  %v1524_v30 = vadd.f32 %v20357_v40, %v17743_v36  ;;  %v5895_v49 = vsel %vm5511_vm6, %v5894_v25, %v5893_v17  ;;  %v4150_v52 = vmax.f32 %v2812_v9, %v15482_v37 }
 0x30b   : > { %v2771_v28 = vcombine.high %v1731_v62, %v1731_v62  ;;  %v2778_v4 = vrot.slane %v1731_v62, %v19095_v26  ;;  %v4151_v48 = vmax.f32 %v2820_v50, %v15483_v59  ;;  %v20594_v31 = vadd.f32 %v20357_v40, %v1515_v3  ;;  %v18047_v59 = vld [vmem:[%s23690_s3 + $0xd8] sm:$0xff]  }
 0x30c   : > { %v4153_v1 = vmax.f32 %v2821_v6, %v15485_v55  ;;  %v4152_v5 = vmax.f32 %v2819_v60, %v15484_v61  ;;  %v5897_v17 = vsel %vm5514_vm7, %v5896_v11, %v5895_v49  ;;  %v1668_v62 = vmax.f32 %v1524_v30, 0.0  ;;  %v18048_v3 = vld [vmem:[%s23690_s3 + $0x98] sm:$0xff]   ;;  %v20605_v55 = vld [vmem:[#allocation2 + $0xa0] sm:$0xf]  ;;  %17141 = vmatprep.subr.bf16.mxu1 %v18047_v59 }
 0x30d   : > { %v2785_v36 = vrot.slane %v2771_v28, %v19095_v26  ;;  %v2786_v44 = vcombine.high %v2778_v4, %v2778_v4  ;;  %v15474_v47 = vrot.slane %v2778_v4, 9  ;;  %v17747_v28 = vpop.f32.mrf.mxu0  ;;  %v6312_v61 = vld [vmem:[#allocation2 + $0xa0] sm:$0xf]  ;;  %v16847_v60 = vpack.c.bf16 %v4150_v52, %v4150_v52  ;;  %17142 = vmatpush3.bf16.msra.mxu1 %v18048_v3  ;;  %v18000_v52 = vld [vmem:[#allocation2 + $0xa4] ss:$0 sps:$4 sm:$0x11]  }
 0x30e   : > { %v16881_v25 = vpack.c.bf16 %v4153_v1, %v4153_v1  ;;  %v16848_v1 = vpack.c.bf16 %v4151_v48, %v4151_v48  ;;  %v1666_v30 = vmax.f32 %v20594_v31, 0.0  ;;  %v1540_v48 = vadd.f32 %v20357_v40, %v17747_v28 }
 0x30f   : > { %v2787_v9 = vcombine.high %v2785_v36, %v2785_v36  ;;  %v15475_v50 = vrot.slane %v2786_v44, 9  ;;  %v15476_v6 = vrot.slane %v2785_v36, 9  ;;  %v4142_v37 = vmax.f32 %v2778_v4, %v15474_v47 }
 0x310   : > { %v6151_v11 = vsel %vm19158_vm12, %v16881_v25, %v6150_v53  ;;  %v16849_v4 = vpack.c.bf16 %v4152_v5, %v4152_v5  ;;  %v20611_v47 = vcombine.low %v6248_v22, %v20605_v55  ;;  %v15913_v0 = vcombine.low %v6348_v56, %v6312_v61 }
 0x311   : > { %6152 = vst [vmem:[#allocation2 + $0xbc] sm:$0x1] %v6151_v11  ;;  %v15477_v49 = vrot.slane %v2787_v9, 9  ;;  %v4143_v33 = vmax.f32 %v2786_v44, %v15475_v50  ;;  %v4144_v32 = vmax.f32 %v2785_v36, %v15476_v6  ;;  %v16839_v2 = vpack.c.bf16 %v4142_v37, %v4142_v37  ;;  %v1531_v11 = vpop.f32.mrf.mxu0 }
 0x312   : > { %23825 = vst [vmem:[#allocation49_spill] sm:$0xff] %v20611_v47  ;;  %v5486_v29 = vunpack.c.l.b16 %v16847_v60  ;;  %v5487_v44 = vunpack.c.l.b16 %v16848_v1  ;;  %6907 = vrot.lane.b32.xlu0 %v20611_v47, %s18721_s14  ;;  %v1672_v36 = vmax.f32 %v1540_v48, 0.0  ;;  %v7716_v3 = vrot.slane %v15913_v0, 1 }
 0x313   : > { %v4145_v53 = vmax.f32 %v2787_v9, %v15477_v49  ;;  %v16840_v25 = vpack.c.bf16 %v4143_v33, %v4143_v33  ;;  %v16841_v31 = vpack.c.bf16 %v4144_v32, %v4144_v32  ;;  %v5478_v59 = vunpack.c.l.b16 %v16839_v2 }
 0x314   : > { %v5488_v37 = vunpack.c.l.b16 %v16849_v4  ;;  %v1736_v28 = vmax.f32 %v1668_v62, %v1672_v36  ;;  %v7717_v19 = vrot.slane %v18000_v52, 1  ;;  %v1532_v56 = vadd.f32 %v20357_v40, %v1531_v11 }
 0x315   : > { %v16842_v5 = vpack.c.bf16 %v4145_v53, %v4145_v53  ;;  %v5479_v50 = vunpack.c.l.b16 %v16840_v25  ;;  %v5480_v22 = vunpack.c.l.b16 %v16841_v31  ;;  %v5898_v6 = vrot.slane %v5478_v59, 3  ;;  %v6146_v25 = vld [vmem:[#allocation2 + $0xb4] sm:$0xf] }
 0x316   : > { %v2856_v61 = vcombine.high %v1736_v28, %v1736_v28  ;;  %v2863_v60 = vrot.slane %v1736_v28, %v19095_v26  ;;  %v7718_v1 = vsel %vm6754_vm1, %v7716_v3, %v7717_v19  ;;  %v1670_v0 = vmax.f32 %v1532_v56, 0.0 }
 0x317   : > { %v5481_v33 = vunpack.c.l.b16 %v16842_v5  ;;  %v5899_v32 = vsel %vm5517_vm9, %v5898_v6, %v5897_v17  ;;  %v5900_v2 = vrot.slane %v5479_v50, 2  ;;  %v5902_v9 = vrot.slane %v5480_v22, 1  ;;  %17778 = vmatmul.mubr.msk.bf16.gmra.mxu0 %vm7731_vm2, %v7718_v1 }
 0x318   : > { %v5912_v49 = vrot.slane %v5486_v29, 3  ;;  %v5914_v48 = vrot.slane %v5487_v44, 2  ;;  %v23826_v62 = vrot.slane %v20561_v41, 7  ;;  %v23827_v17 = vrot.slane %v20572_v24, 6 }
 0x319   : > { %v5901_v53 = vsel %vm5520_vm10, %v5900_v2, %v5899_v32  ;;  %v2870_v19 = vrot.slane %v2856_v61, %v19095_v26  ;;  %v2871_v31 = vcombine.high %v2863_v60, %v2863_v60  ;;  %v23828_v29 = vrot.slane %v20574_v18, 5  ;;  %v20649_v32 = vld [vmem:[#allocation2 + $0x84] sm:$0xe] }
 0x31a   : > { %v5905_v4 = vsel %vm5526_vm11, %v23826_v62, %v5481_v33  ;;  %v5903_v40 = vsel %vm5523_vm13, %v5902_v9, %v5901_v53  ;;  %v15494_v41 = vrot.slane %v2863_v60, 9  ;;  %v1734_v44 = vmax.f32 %v1666_v30, %v1670_v0  ;;  %v20643_v30 = vld [vmem:[%s23689_s2] ss:$0 sm:$0xff]  ;;  %v6213_v53 = vld [vmem:[#allocation2 + $0x3c] sm:$0xe] }
 0x31b   : > { %v5907_v52 = vsel %vm5508_vm5, %v23827_v17, %v5905_v4  ;;  %v5987_v11 = vpack.c.b16 %v5903_v40, %v5903_v40  ;;  %v23829_v36 = vrot.slane %v20582_v42, 4  ;;  %v2872_v5 = vcombine.high %v2870_v19, %v2870_v19  ;;  %v18617_v40 = vld [vmem:[#allocation2 + $0x40] sm:$0xf] }
 0x31c   : > { %v5909_v59 = vsel %vm5511_vm6, %v23828_v29, %v5907_v52  ;;  %v15495_v50 = vrot.slane %v2871_v31, 9  ;;  %v15496_v24 = vrot.slane %v2870_v19, 9  ;;  %v5916_v22 = vrot.slane %v5488_v37, 1 }
 0x31d   : > { %v5911_v3 = vsel %vm5514_vm7, %v23829_v36, %v5909_v59  ;;  %v6147_v28 = vsel %vm19198_vm15, %v5987_v11, %v6146_v25  ;;  %v2822_v56 = vcombine.high %v1734_v44, %v1734_v44  ;;  %v20647_v42 = vadd.f32 %v20643_v30, %v20579_v58 }
 0x31e   : > { %v5913_v6 = vsel %vm5517_vm9, %v5912_v49, %v5911_v3  ;;  %6148 = vst [vmem:[#allocation2 + $0xb4] sm:$0xf] %v6147_v28  ;;  %v15497_v33 = vrot.slane %v2872_v5, 9  ;;  %v4162_v37 = vmax.f32 %v2863_v60, %v15494_v41  ;;  %v4163_v9 = vmax.f32 %v2871_v31, %v15495_v50  ;;  %v18618_v50 = vld [vmem:[#allocation2 + $0x44] ss:$0 sps:$4 sm:$0x11]  }
 0x31f   : > { %v5915_v18 = vsel %vm5520_vm10, %v5914_v48, %v5913_v6  ;;  %v2829_v61 = vrot.slane %v1734_v44, %v19095_v26  ;;  %v2836_v1 = vrot.slane %v2822_v56, %v19095_v26  ;;  %v20658_v48 = vadd.f32 %v20643_v30, %v20591_v54  ;;  %v17748_v54 = vpop.f32.mrf.mxu0  ;;  %v6894_v6 = vpop.permute.xlu0 %6893 }
 0x320   : > { %v5917_v2 = vsel %vm5523_vm13, %v5916_v22, %v5915_v18  ;;  %v4164_v58 = vmax.f32 %v2870_v19, %v15496_v24  ;;  %v15811_v17 = vcombine.low %v6213_v53, %v18617_v40  ;;  %v1669_v52 = vmax.f32 %v20647_v42, 0.0  ;;  %v18049_v22 = vld [vmem:[%s23690_s3 + $0xd0] sm:$0xff]  }
 0x321   : > { %v5988_v49 = vpack.c.b16 %v5917_v2, %v5917_v2  ;;  %v2837_v60 = vcombine.high %v2829_v61, %v2829_v61  ;;  %v2838_v62 = vcombine.high %v2836_v1, %v2836_v1  ;;  %v15486_v4 = vrot.slane %v2829_v61, 9  ;;  %17143 = vmatprep.subr.bf16.mxu1 %v18049_v22  ;;  %v18619_v2 = vld [vmem:[#allocation2 + $0x4c] sm:$0xf] }
 0x322   : > { %v4165_v25 = vmax.f32 %v2872_v5, %v15497_v33  ;;  %v16859_v31 = vpack.c.bf16 %v4162_v37, %v4162_v37  ;;  %v15488_v29 = vrot.slane %v2836_v1, 9  ;;  %v16860_v59 = vpack.c.bf16 %v4163_v9, %v4163_v9  ;;  %v18050_v5 = vld [vmem:[%s23690_s3 + $0x90] sm:$0xff]   ;;  %v6187_v33 = vld [vmem:[#allocation2 + $0xa0] sm:$0xf]  ;;  %v6685_v37 = vpop.permute.xlu1 %6684 }
 0x323   : > { %6149 = vst.msk [vmem:[#allocation2 + $0xb8] sm:$0xf] %vm4170_vm4, %v5988_v49  ;;  %v15487_v11 = vrot.slane %v2837_v60, 9  ;;  %v15489_v41 = vrot.slane %v2838_v62, 9  ;;  %v4154_v44 = vmax.f32 %v2829_v61, %v15486_v4  ;;  %v1667_v19 = vmax.f32 %v20658_v48, 0.0  ;;  %17144 = vmatpush3.bf16.msra.mxu1 %v18050_v5 }
 0x324   : > { %v16861_v36 = vpack.c.bf16 %v4164_v58, %v4164_v58  ;;  %v4156_v3 = vmax.f32 %v2836_v1, %v15488_v29  ;;  %v6771_v24 = vrot.slane %v18618_v50, 1  ;;  %v6770_v42 = vrot.slane %v15811_v17, 1 }
 0x325   : > { %v4155_v28 = vmax.f32 %v2837_v60, %v15487_v11  ;;  %v4157_v56 = vmax.f32 %v2838_v62, %v15489_v41  ;;  %v16851_v18 = vpack.c.bf16 %v4154_v44, %v4154_v44  ;;  %v20670_v9 = vunpack.c.l.b16 %v16859_v31  ;;  %v6186_v60 = vld [vmem:[#allocation2 + $0x9c] sm:$0xf]  ;;  %v18003_v62 = vld [vmem:[#allocation2 + $0xa4] ss:$0 sps:$4 sm:$0x11]   ;;  %v1534_v11 = vpop.f32.mrf.mxu0 }
 0x326   : > { %v16853_v61 = vpack.c.bf16 %v4156_v3, %v4156_v3  ;;  %v1543_v1 = vadd.f32 %v20643_v30, %v17748_v54  ;;  %v16862_v49 = vpack.c.bf16 %v4165_v25, %v4165_v25  ;;  %v20673_v58 = vunpack.c.l.b16 %v16860_v59  ;;  %v20683_v59 = vld [vmem:[#allocation2 + $0xac] sm:$0xf] }
 0x327   : > { %v16852_v53 = vpack.c.bf16 %v4155_v28, %v4155_v28  ;;  %v6772_v4 = vsel %vm6754_vm1, %v6770_v42, %v6771_v24  ;;  %v20676_v40 = vunpack.c.l.b16 %v16861_v36  ;;  %v20679_v31 = vcombine.low %v6186_v60, %v6187_v33 }
 0x328   : > { %v7802_v17 = vsel %vm7731_vm2, %v6772_v4, %v6894_v6  ;;  %v1673_v29 = vmax.f32 %v1543_v1, 0.0  ;;  %v16854_v41 = vpack.c.bf16 %v4157_v56, %v4157_v56  ;;  %v5490_v44 = vunpack.c.l.b16 %v16851_v18  ;;  %v6250_v56 = vld [vmem:[#allocation2 + $0xa8] sm:$0xf] }
 0x329   : > { %23830 = vst [vmem:[#allocation50_spill] sm:$0xff] %v20679_v31  ;;  %v5491_v54 = vunpack.c.l.b16 %v16852_v53  ;;  %8371 = vmatprep.mubr.bf16.mxu1 %v7802_v17  ;;  %v7748_v25 = vsel %vm7731_vm2, %v19810_v7, %v6685_v37  ;;  %v5931_v3 = vrot.slane %v20670_v9, 7  ;;  %v5492_v50 = vunpack.c.l.b16 %v16853_v61 }
 0x32a   : > { %8372 = vmatmul.mubr.bf16.gmra.mxu1 %v7748_v25  ;;  %v1737_v36 = vmax.f32 %v1669_v52, %v1673_v29  ;;  %v6641_v24 = vshll.u32 %v20679_v31, 16  ;;  %v20687_v22 = vunpack.c.l.b16 %v16862_v49  ;;  %v6646_v6 = vshll.u32 %v18003_v62, 16 }
 0x32b   : > { %v5919_v5 = vrot.slane %v5491_v54, 6  ;;  %v1535_v28 = vadd.f32 %v20643_v30, %v1534_v11  ;;  %v20692_v33 = vcombine.low %v6250_v56, %v20683_v59  ;;  %v5493_v37 = vunpack.c.l.b16 %v16854_v41 }
 0x32c   : > { %v2873_v18 = vcombine.high %v1737_v36, %v1737_v36  ;;  %v2880_v42 = vrot.slane %v1737_v36, %v19095_v26  ;;  %v6643_v7 = vrot.slane %v6641_v24, 1  ;;  %v5918_v61 = vrot.slane %v5490_v44, 7 }
 0x32d   : > { %23831 = vst [vmem:[#allocation51_spill] sm:$0xff] %v20692_v33  ;;  %v6639_v52 = vshrl.u32 %v20679_v31, 16  ;;  %v1671_v1 = vmax.f32 %v1535_v28, 0.0  ;;  %v5921_v53 = vrot.slane %v5492_v50, 5  ;;  %6909 = vrot.lane.b32.xlu0 %v20692_v33, %s18721_s14  ;;  %v6648_v17 = vrot.slane %v6646_v6, 1 }
 0x32e   : > { %v2887_v49 = vrot.slane %v2873_v18, %v19095_v26  ;;  %v2888_v4 = vcombine.high %v2880_v42, %v2880_v42  ;;  %v15498_v60 = vrot.slane %v2880_v42, 9  ;;  %v5920_v30 = vsel %vm5508_vm5, %v5919_v5, %v5918_v61  ;;  %v20875_v31 = vld [vmem:[#allocation2 + $0x38] ss:$0 sps:$4 sm:$0x11]  }
 0x32f   : > { %v6644_v62 = vor.u32 %v6643_v7, %v6639_v52  ;;  %v1735_v29 = vmax.f32 %v1667_v19, %v1671_v1  ;;  %v5933_v25 = vrot.slane %v20673_v58, 6  ;;  %v5923_v28 = vrot.slane %v5493_v37, 4  ;;  %v6350_v58 = vld [vmem:[#allocation2 + $0xb4] sm:$0xe] }
 0x330   : > { %v2889_v11 = vcombine.high %v2887_v49, %v2887_v49  ;;  %v15499_v41 = vrot.slane %v2888_v4, 9  ;;  %v15500_v44 = vrot.slane %v2887_v49, 9  ;;  %v4166_v54 = vmax.f32 %v2880_v42, %v15498_v60  ;;  %v6157_v60 = vld [vmem:[#allocation2 + $0xc8] sm:$0x1]  ;;  %v20738_v42 = vld [vmem:[#allocation2 + $0xb8] sm:$0xf] }
 0x331   : > { %v6649_v50 = vsel %vm6481_vm0, %v6644_v62, %v6648_v17  ;;  %v2839_v36 = vcombine.high %v1735_v29, %v1735_v29  ;;  %v2846_v24 = vrot.slane %v1735_v29, %v19095_v26  ;;  %v5922_v48 = vsel %vm5511_vm6, %v5921_v53, %v5920_v30 }
 0x332   : > { %v15501_v56 = vrot.slane %v2889_v11, 9  ;;  %v4167_v18 = vmax.f32 %v2888_v4, %v15499_v41  ;;  %v4168_v5 = vmax.f32 %v2887_v49, %v15500_v44  ;;  %6700 = vrot.lane.b32.xlu1 %v6649_v50, %s18721_s14  ;;  %v16863_v52 = vpack.c.bf16 %v4166_v54, %v4166_v54  ;;  %v20708_v4 = vld [vmem:[#allocation2 + $0xac] sm:$0xf]  ;;  %v20712_v44 = vld [vmem:[#allocation2 + $0xb0] ss:$0 sps:$4 sm:$0x11]  }
 0x333   : > { %v2853_v19 = vrot.slane %v2839_v36, %v19095_v26  ;;  %v2854_v6 = vcombine.high %v2846_v24, %v2846_v24  ;;  %v15490_v7 = vrot.slane %v2846_v24, 9  ;;  %v5924_v30 = vsel %vm5514_vm7, %v5923_v28, %v5922_v48 }
 0x334   : > { %v4169_v61 = vmax.f32 %v2889_v11, %v15501_v56  ;;  %v16864_v1 = vpack.c.bf16 %v4167_v18, %v4167_v18  ;;  %v16865_v41 = vpack.c.bf16 %v4168_v5, %v4168_v5  ;;  %v6349_v56 = vld [vmem:[#allocation2 + $0xa8] sm:$0xe] }
 0x335   : > { %v2855_v62 = vcombine.high %v2853_v19, %v2853_v19  ;;  %v15491_v17 = vrot.slane %v2854_v6, 9  ;;  %v15492_v37 = vrot.slane %v2853_v19, 9  ;;  %v4158_v29 = vmax.f32 %v2846_v24, %v15490_v7  ;;  %v18051_v18 = vld [vmem:[%s23690_s3 + $0xc8] sm:$0xff]  }
 0x336   : > { %v16882_v53 = vpack.c.bf16 %v4169_v61, %v4169_v61  ;;  %v18052_v24 = vld [vmem:[%s23690_s3 + $0x88] sm:$0xff]   ;;  %v20720_v7 = vunpack.c.l.b16 %v16863_v52  ;;  %v20722_v5 = vunpack.c.l.b16 %v16864_v1  ;;  %v15914_v48 = vcombine.low %v6349_v56, %v20708_v4  ;;  %17145 = vmatprep.subr.bf16.mxu1 %v18051_v18 }
 0x337   : > { %v15493_v50 = vrot.slane %v2855_v62, 9  ;;  %v4159_v36 = vmax.f32 %v2854_v6, %v15491_v17  ;;  %v4160_v11 = vmax.f32 %v2853_v19, %v15492_v37  ;;  %v16855_v54 = vpack.c.bf16 %v4158_v29, %v4158_v29  ;;  %v6214_v37 = vld [vmem:[#allocation2 + $0x48] sm:$0xe]  ;;  %v20727_v29 = vld [vmem:[#allocation2 + $0xac] sm:$0xf]  ;;  %17146 = vmatpush3.bf16.msra.mxu1 %v18052_v24 }
 0x338   : > { %v6158_v28 = vsel %vm19158_vm12, %v16882_v53, %v6157_v60  ;;  %v20729_v0 = vunpack.c.l.b16 %v16865_v41  ;;  %v7719_v52 = vrot.slane %v15914_v48, 1  ;;  %v7720_v1 = vrot.slane %v20712_v44, 1  ;;  %v18620_v41 = vld [vmem:[#allocation2 + $0x50] ss:$0 sps:$4 sm:$0x11]   ;;  %vm21781_vm12 = vmand %vm9920_vm3, %vm6050_vm8 }
 0x339   : > { %6159 = vst [vmem:[#allocation2 + $0xc8] sm:$0x1] %v6158_v28  ;;  %v4161_v19 = vmax.f32 %v2855_v62, %v15493_v50  ;;  %v16856_v6 = vpack.c.bf16 %v4159_v36, %v4159_v36  ;;  %v16857_v61 = vpack.c.bf16 %v4160_v11, %v4160_v11  ;;  %v5494_v17 = vunpack.c.l.b16 %v16855_v54  ;;  %v6687_v36 = vpop.permute.xlu1 %6686  ;;  %v6188_v11 = vld [vmem:[#allocation2 + $0xa8] sm:$0xf]  ;;  %v6896_v54 = vpop.permute.xlu0 %6895 }
 0x33a   : > { %v15812_v49 = vcombine.low %v6214_v37, %v18619_v2  ;;  %v7721_v56 = vsel %vm6754_vm1, %v7719_v52, %v7720_v1  ;;  %v6774_v28 = vrot.slane %v18620_v41, 1  ;;  %v20736_v48 = vcombine.low %v6188_v11, %v20727_v29  ;;  %v6252_v1 = vld [vmem:[#allocation2 + $0xb4] sm:$0xf] }
 0x33b   : > { %v16858_v60 = vpack.c.bf16 %v4161_v19, %v4161_v19  ;;  %v5495_v53 = vunpack.c.l.b16 %v16856_v6  ;;  %v5496_v62 = vunpack.c.l.b16 %v16857_v61  ;;  %v5925_v50 = vrot.slane %v5494_v17, 3  ;;  %17781 = vmatprep.mubr.msk.bf16.mxu0 %vm7731_vm2, %v7721_v56  ;;  %v6153_v61 = vld [vmem:[#allocation2 + $0xc0] sm:$0xf] }
 0x33c   : > { %v6773_v18 = vrot.slane %v15812_v49, 1  ;;  %23832 = vst [vmem:[#allocation52_spill] sm:$0xff] %v20736_v48  ;;  %v7751_v49 = vsel %vm7731_vm2, %v19922_v35, %v6687_v36  ;;  %v6653_v37 = vshll.u32 %v20736_v48, 16  ;;  %v6658_v52 = vshll.u32 %v20732_v27, 16 }
 0x33d   : > { %v5497_v2 = vunpack.c.l.b16 %v16858_v60  ;;  %v5926_v24 = vsel %vm5517_vm9, %v5925_v50, %v5924_v30  ;;  %v5927_v19 = vrot.slane %v5495_v53, 2  ;;  %v5929_v6 = vrot.slane %v5496_v62, 1  ;;  %v20755_v62 = vld [vmem:[#allocation2 + $0xb8] sm:$0xf] }
 0x33e   : > { %v6775_v17 = vsel %vm6754_vm1, %v6773_v18, %v6774_v28  ;;  %v20753_v53 = vcombine.low %v6252_v1, %v20738_v42  ;;  %v20757_v50 = vld [vmem:[#allocation2 + $0xbc] ss:$0 sps:$4 sm:$0x11]   ;;  %v6651_v9 = vshrl.u32 %v20736_v48, 16  ;;  %v6655_v56 = vrot.slane %v6653_v37, 1 }
 0x33f   : > { %v5928_v11 = vsel %vm5520_vm10, %v5927_v19, %v5926_v24  ;;  %v5932_v30 = vsel %vm5526_vm11, %v5931_v3, %v5497_v2  ;;  %v7806_v60 = vsel %vm7731_vm2, %v6775_v17, %v6896_v54  ;;  %v5939_v3 = vrot.slane %v20720_v7, 3  ;;  %v6215_v19 = vld [vmem:[#allocation2 + $0x54] sm:$0xe]  ;;  %v18055_v17 = vld [vmem:[%s23690_s3 + $0x80] sm:$0xff]  }
 0x340   : > { %23833 = vst [vmem:[#allocation53_spill] sm:$0xff] %v20753_v53  ;;  %v5930_v35 = vsel %vm5523_vm13, %v5929_v6, %v5928_v11  ;;  %v5934_v36 = vsel %vm5508_vm5, %v5933_v25, %v5932_v30  ;;  %8379 = vmatprep.mubr.bf16.mxu1 %v7806_v60  ;;  %v5941_v54 = vrot.slane %v20722_v5, 2  ;;  %v23834_v18 = vrot.slane %v20676_v40, 5  ;;  %6911 = vrot.lane.b32.xlu0 %v20753_v53, %s18721_s14  ;;  %v18054_v25 = vld [vmem:[%s23690_s3 + $0xc0] sm:$0xff]   ;;  %v20778_v6 = vld [vmem:[#allocation2 + $0xb8] sm:$0xf] }
 0x341   : > { %v5990_v28 = vpack.c.b16 %v5930_v35, %v5930_v35  ;;  %8380 = vmatmul.mubr.bf16.gmra.mxu1 %v7751_v49  ;;  %v23835_v2 = vrot.slane %v20687_v22, 4  ;;  %v6656_v24 = vor.u32 %v6655_v56, %v6651_v9  ;;  %v6660_v5 = vrot.slane %v6658_v52, 1  ;;  %v20788_v11 = vld [vmem:[#allocation2 + $0xbc] ss:$0 sps:$4 sm:$0x11]   ;;  %17147 = vmatprep.subr.bf16.mxu1 %v18054_v25 }
 0x342   : > { %v5936_v41 = vsel %vm5511_vm6, %v23834_v18, %v5934_v36  ;;  %v15915_v40 = vcombine.low %v6350_v58, %v20755_v62  ;;  %v5943_v49 = vrot.slane %v20729_v0, 1  ;;  %v7723_v1 = vrot.slane %v20757_v50, 1  ;;  %v20790_v52 = vld [vmem:[#allocation2 + $0x90] sm:$0xe]  ;;  %v18621_v36 = vld [vmem:[#allocation2 + $0x58] sm:$0xf]  ;;  %17148 = vmatpush3.bf16.msra.mxu1 %v18055_v17 }
 0x343   : > { %v5938_v7 = vsel %vm5514_vm7, %v23835_v2, %v5936_v41  ;;  %v6154_v22 = vsel %vm19198_vm15, %v5990_v28, %v6153_v61  ;;  %v6661_v60 = vsel %vm6481_vm0, %v6656_v24, %v6660_v5  ;;  %v15813_v0 = vcombine.low %v6215_v19, %v18621_v36  ;;  %v6190_v9 = vld [vmem:[#allocation2 + $0xb4] sm:$0xf]  ;;  %v20802_v18 = vld [vmem:[#allocation2 + $0x9c] sm:$0xe]  ;;  %v6898_v28 = vpop.permute.xlu0 %6897  ;;  %v18623_v36 = vld [vmem:[#allocation2 + $0x64] sm:$0xf] }
 0x344   : > { %v5940_v37 = vsel %vm5517_vm9, %v5939_v3, %v5938_v7  ;;  %6155 = vst [vmem:[#allocation2 + $0xc0] sm:$0xf] %v6154_v22  ;;  %v7722_v35 = vrot.slane %v15915_v40, 1  ;;  %v7122_v56 = vshll.u32 %v20692_v33, 16  ;;  %6702 = vrot.lane.b32.xlu1 %v6661_v60, %s18721_s14  ;;  %v20800_v3 = vcombine.low %v6190_v9, %v20778_v6  ;;  %v6689_v40 = vpop.permute.xlu1 %6688  ;;  %v18624_v5 = vld [vmem:[#allocation2 + $0x28] sm:$0xf] }
 0x345   : > { %v5942_v30 = vsel %vm5520_vm10, %v5941_v54, %v5940_v37  ;;  %v6309_v54 = vld [vmem:[#allocation2 + $0x90] sm:$0xf]  ;;  %v6776_v25 = vrot.slane %v15813_v0, 1  ;;  %v18622_v2 = vld [vmem:[#allocation2 + $0x5c] ss:$0 sps:$4 sm:$0x11]  }
 0x346   : > { %v5944_v61 = vsel %vm5523_vm13, %v5943_v49, %v5942_v30  ;;  %23836 = vst [vmem:[#allocation54_spill] sm:$0xff] %v20800_v3  ;;  %v7724_v58 = vsel %vm6754_vm1, %v7722_v35, %v7723_v1  ;;  %v6777_v7 = vrot.slane %v18622_v2, 1  ;;  %v20806_v24 = vcombine.low %v6309_v54, %v20485_v14  ;;  %v20813_v49 = vld [vmem:[#allocation2 + $0x14] ss:$0 sps:$4 sm:$0x11]   ;;  %v23857_v33 = vld [vmem:[#allocation31_spill] sm:$0xff] }
 0x347   : > { %v5991_v41 = vpack.c.b16 %v5944_v61, %v5944_v61  ;;  %17782 = vmatmul.mubr.msk.bf16.gmra.mxu0 %vm7731_vm2, %v7724_v58  ;;  %v6665_v19 = vshll.u32 %v20800_v3, 16  ;;  %v6670_v17 = vshll.u32 %v20788_v11, 16  ;;  %v23837_v22 = vshll.u32 %v20611_v47, 16  ;;  %v20821_v14 = vld [vmem:[#allocation2 + $0xa8] sm:$0xe] }
 0x348   : > { %v7134_v30 = vshll.u32 %v20753_v53, 16  ;;  %v6778_v60 = vsel %vm6754_vm1, %v6776_v25, %v6777_v7  ;;  %v20825_v35 = vld [vmem:[#allocation2 + $0x20] ss:$0 sps:$4 sm:$0x11]   ;;  %v6663_v9 = vshrl.u32 %v20800_v3, 16  ;;  %v7754_v2 = vsel %vm7731_vm2, %v20018_v43, %v6689_v40 }
 0x349   : > { %v20818_v1 = vrot.slane %v23837_v22, 1  ;;  %6156 = vst.msk [vmem:[#allocation2 + $0xc4] sm:$0xf] %vm4170_vm4, %v5991_v41  ;;  %v7810_v0 = vsel %vm7731_vm2, %v6778_v60, %v6898_v28  ;;  %v6667_v61 = vrot.slane %v6665_v19, 1  ;;  %v6216_v54 = vld [vmem:[#allocation2 + $0x60] sm:$0xe]  ;;  %v23840_v25 = vcombine.low %v19646_v45, %v19651_v20 }
 0x34a   : > { %v20832_v41 = vrot.slane %v7122_v56, 1  ;;  %8387 = vmatprep.mubr.bf16.mxu1 %v7810_v0  ;;  %v6291_v22 = vld [vmem:[#allocation2 + $0x24] sm:$0xf]  ;;  %v6313_v37 = vld [vmem:[#allocation2 + $0xa8] sm:$0xf]  ;;  %v6672_v60 = vrot.slane %v6670_v17, 1  ;;  %v15814_v19 = vcombine.low %v6216_v54, %v18623_v36  ;;  %v6900_v54 = vpop.permute.xlu0 %6899 }
 0x34b   : > { %23838 = vst [vmem:[#allocation55_spill] sm:$0xff] %v20818_v1  ;;  %v7203_v7 = vrot.slane %v23840_v25, 1  ;;  %8388 = vmatmul.mubr.bf16.gmra.mxu1 %v7754_v2  ;;  %v6668_v28 = vor.u32 %v6667_v61, %v6663_v9  ;;  %v20839_v16 = vcombine.low %v6291_v22, %v18624_v5  ;;  %v20842_v56 = vcombine.low %v6313_v37, %v20708_v4  ;;  %v20844_v0 = vld [vmem:[#allocation2 + $0xb4] sm:$0xe]  ;;  %v6254_v9 = vld [vmem:[#allocation2 + $0xc0] sm:$0xf] }
 0x34c   : > { %23839 = vst [vmem:[#allocation56_spill] sm:$0xff] %v20832_v41  ;;  %v20847_v40 = vrot.slane %v7134_v30, 1  ;;  %v20849_v45 = vld [vmem:[#allocation2 + $0xc8] ss:$0 sps:$4 sm:$0x11]   ;;  %v7414_v17 = vshll.u32 %v19792_v38, 16  ;;  %v23843_v4 = vcombine.low %v19780_v12, %v19785_v34 }
 0x34d   : > { %23841 = vst [vmem:[#allocation57_spill] sm:$0xff] %v20839_v16  ;;  %v20851_v20 = vld [vmem:[#allocation2 + $0x2c] ss:$0 sps:$4 sm:$0x11]   ;;  %v6673_v36 = vsel %vm6481_vm0, %v6668_v28, %v6672_v60  ;;  %v7204_v5 = vrot.slane %v20813_v49, 1  ;;  %v6779_v61 = vrot.slane %v15814_v19, 1  ;;  %v6691_v60 = vpop.permute.xlu1 %6690 }
 0x34e   : > { %23842 = vst [vmem:[#allocation58_spill] sm:$0xff] %v20847_v40  ;;  %v7206_v37 = vrot.slane %v23843_v4, 1  ;;  %6704 = vrot.lane.b32.xlu1 %v6673_v36, %s18721_s14  ;;  %v7207_v30 = vrot.slane %v20825_v35, 1  ;;  %v6351_v2 = vld [vmem:[#allocation2 + $0xc0] sm:$0xe]  ;;  %v7416_v25 = vrot.slane %v7414_v17, 1 }
 0x34f   : > { %v18625_v22 = vld [vmem:[#allocation2 + $0x68] ss:$0 sps:$4 sm:$0x11]   ;;  %v7426_v58 = vshll.u32 %v20839_v16, 16  ;;  %v7205_v12 = vsel %vm6754_vm1, %v7203_v7, %v7204_v5  ;;  %v7412_v36 = vshrl.u32 %v19792_v38, 16  ;;  %v7726_v7 = vrot.slane %v20849_v45, 1 }
 0x350   : > { %v6780_v43 = vrot.slane %v18625_v22, 1  ;;  %v20865_v34 = vld [vmem:[#allocation2 + $0xc4] sm:$0xf]  ;;  %v18626_v4 = vld [vmem:[#allocation2 + $0x20] ss:$0 sps:$4 sm:$0x11]   ;;  %v23845_v22 = vcombine.low %v19799_v15, %v19511_v51  ;;  %v7757_v51 = vsel %vm7731_vm2, %v20124_v10, %v6691_v60 }
 0x351   : > { %v6318_v19 = vld [vmem:[#allocation2 + $0xc4] sm:$0xf]  ;;  %v7419_v26 = vshll.u32 %v18626_v4, 16  ;;  %v20869_v3 = vcombine.low %v6254_v9, %v20865_v34  ;;  %v7417_v5 = vor.u32 %v7416_v25, %v7412_v36  ;;  %v7428_v38 = vrot.slane %v7426_v58, 1  ;;  %v23846_v15 = vld [vmem:[#allocation20_spill] sm:$0xff] }
 0x352   : > { %v15916_v17 = vcombine.low %v6351_v2, %v6318_v19  ;;  %v7209_v48 = vrot.slane %v23845_v22, 1  ;;  %v6781_v28 = vsel %vm6754_vm1, %v6779_v61, %v6780_v43  ;;  %7251 = vrot.lane.b32.xlu1 %v7205_v12, %s18721_s14  ;;  %v7210_v2 = vrot.slane %v20851_v20, 1  ;;  %v23847_v43 = vld [vmem:[#allocation12_spill] sm:$0xff]  ;;  %v18627_v58 = vld [vmem:[#allocation2 + $0x2c] ss:$0 sps:$4 sm:$0x11]  }
 0x353   : > { %23844 = vst [vmem:[#allocation59_spill] sm:$0xff] %v20869_v3  ;;  %v7814_v40 = vsel %vm7731_vm2, %v6781_v28, %v6900_v54  ;;  %6913 = vrot.lane.b32.xlu0 %v20869_v3, %s18721_s14  ;;  %v23848_v61 = vcombine.low %v23846_v15, %v23847_v43  ;;  %v7421_v22 = vrot.slane %v7419_v26, 1  ;;  %v7424_v54 = vshrl.u32 %v20839_v16, 16  ;;  %v23849_v28 = vld [vmem:[#allocation22_spill] sm:$0xff] }
 0x354   : > { %v7725_v9 = vrot.slane %v15916_v17, 1  ;;  %8395 = vmatprep.mubr.bf16.mxu1 %v7814_v40  ;;  %v7431_v25 = vshll.u32 %v18627_v58, 16  ;;  %v7438_v12 = vshll.u32 %v23849_v28, 16  ;;  %v7208_v36 = vsel %vm6754_vm1, %v7206_v37, %v7207_v30  ;;  %v20894_v60 = vld [vmem:[#allocation2 + $0x44] ss:$0 sps:$4 sm:$0x11]  }
 0x355   : > { %v7212_v4 = vrot.slane %v23848_v61, 1  ;;  %v7211_v53 = vsel %vm6754_vm1, %v7209_v48, %v7210_v2  ;;  %8396 = vmatmul.mubr.bf16.gmra.mxu1 %v7757_v51  ;;  %v7213_v10 = vrot.slane %v20875_v31, 1  ;;  %23850 = vst [vmem:[#allocation20_spill] sm:$0xff] %v20894_v60  ;;  %v7146_v26 = vshll.u32 %v20869_v3, 16  ;;  %v6295_v61 = vld [vmem:[#allocation2 + $0x3c] sm:$0xf] }
 0x356   : > { %v7727_v17 = vsel %vm6754_vm1, %v7725_v9, %v7726_v7  ;;  %v7422_v40 = vsel %vm6481_vm0, %v7417_v5, %v7421_v22  ;;  %v7429_v15 = vor.u32 %v7428_v38, %v7424_v54  ;;  %v7440_v43 = vrot.slane %v7438_v12, 1  ;;  %7253 = vrot.lane.b32.xlu1 %v7208_v36, %s18721_s14  ;;  %v20900_v37 = vld [vmem:[#allocation2 + $0xc0] sm:$0xe]  ;;  %v23851_v7 = vld [vmem:[#allocation24_spill] sm:$0xff]  ;;  %v23852_v9 = vld [vmem:[#allocation15_spill] sm:$0xff] }
 0x357   : > { %17785 = vmatprep.mubr.msk.bf16.mxu0 %vm7731_vm2, %v7727_v17  ;;  %v6317_v30 = vld [vmem:[#allocation2 + $0xc0] sm:$0xf]  ;;  %7603 = vrot.lane.b32.xlu0 %v7422_v40, %s18721_s14  ;;  %v7214_v48 = vsel %vm6754_vm1, %v7212_v4, %v7213_v10  ;;  %v23853_v2 = vcombine.low %v23851_v7, %v23852_v9  ;;  %v18628_v58 = vld [vmem:[#allocation2 + $0x38] ss:$0 sps:$4 sm:$0x11]   ;;  %v7433_v54 = vrot.slane %v7431_v25, 1 }
 0x358   : > { %v7443_v17 = vshll.u32 %v18628_v58, 16  ;;  %v18629_v16 = vld [vmem:[#allocation2 + $0x40] sm:$0xf]  ;;  %v20911_v22 = vcombine.low %v6317_v30, %v6318_v19  ;;  %v7436_v12 = vshrl.u32 %v23849_v28, 16  ;;  %v7216_v10 = vrot.slane %v20894_v60, 1 }
 0x359   : > { %v7215_v51 = vrot.slane %v23853_v2, 1  ;;  %v20907_v5 = vcombine.low %v6295_v61, %v18629_v16  ;;  %v20914_v36 = vld [vmem:[#allocation2 + $0x50] ss:$0 sps:$4 sm:$0x11]   ;;  %v7462_v7 = vshll.u32 %v20227_v13, 16  ;;  %v20920_v61 = vrot.slane %v7146_v26, 1  ;;  %v20923_v2 = vpop.f32.mrf.mxu1 }
 0x35a   : > { %v6217_v16 = vld [vmem:[#allocation2 + $0x6c] sm:$0xe]  ;;  %v7434_v9 = vsel %vm6481_vm0, %v7429_v15, %v7433_v54  ;;  %v7441_v19 = vor.u32 %v7440_v43, %v7436_v12  ;;  %v18630_v30 = vld [vmem:[#allocation2 + $0x70] sm:$0xf]  ;;  %7255 = vrot.lane.b32.xlu1 %v7211_v53, %s18721_s14  ;;  %v7445_v4 = vrot.slane %v7443_v17, 1  ;;  %v6902_v15 = vpop.permute.xlu0 %6901  ;;  %v23856_v53 = vld [vmem:[#allocation30_spill] sm:$0xff] }
 0x35b   : > { %23854 = vst [vmem:[#allocation12_spill] sm:$0xff] %v20907_v5  ;;  %v7450_v40 = vshll.u32 %v20907_v5, 16  ;;  %23855 = vst [vmem:[#allocation24_spill] sm:$0xff] %v20920_v61  ;;  %v15815_v25 = vcombine.low %v6217_v16, %v18630_v30  ;;  %7605 = vrot.lane.b32.xlu0 %v7434_v9, %s18721_s14  ;;  %v7217_v58 = vsel %vm6754_vm1, %v7215_v51, %v7216_v10  ;;  %v18631_v28 = vld [vmem:[#allocation2 + $0x44] ss:$0 sps:$4 sm:$0x11]   ;;  %v6693_v61 = vpop.permute.xlu1 %6692  ;;  %v20942_v60 = vpop.f32.mrf.mxu1 }
 0x35c   : > { %v7455_v3 = vshll.u32 %v18631_v28, 16  ;;  %v20928_v41 = vld [vmem:[#allocation2 + $0x5c] ss:$0 sps:$4 sm:$0x11]   ;;  %v7448_v26 = vshrl.u32 %v20907_v5, 16  ;;  %v7464_v43 = vrot.slane %v7462_v7, 1  ;;  %v23858_v9 = vcombine.low %v23856_v53, %v23857_v33 }
 0x35d   : > { %v7452_v38 = vrot.slane %v7450_v40, 1  ;;  %v6782_v54 = vrot.slane %v15815_v25, 1  ;;  %v18632_v12 = vld [vmem:[#allocation2 + $0x74] ss:$0 sps:$4 sm:$0x11]   ;;  %v7219_v51 = vrot.slane %v20914_v36, 1  ;;  %v7446_v7 = vsel %vm6481_vm0, %v7441_v19, %v7445_v4 }
 0x35e   : > { %v6783_v16 = vrot.slane %v18632_v12, 1  ;;  %v6299_v30 = vld [vmem:[#allocation2 + $0x54] sm:$0xf]  ;;  %v7218_v1 = vrot.slane %v23858_v9, 1  ;;  %v18634_v40 = vld [vmem:[#allocation2 + $0x58] sm:$0xf]  ;;  %7257 = vrot.lane.b32.xlu1 %v7214_v48, %s18721_s14 }
 0x35f   : > { %v18633_v17 = vld [vmem:[#allocation2 + $0x50] ss:$0 sps:$4 sm:$0x11]   ;;  %v20935_v28 = vld [vmem:[#allocation2 + $0x68] ss:$0 sps:$4 sm:$0x11]   ;;  %v20937_v47 = vcombine.low %v6299_v30, %v18634_v40  ;;  %v7453_v25 = vor.u32 %v7452_v38, %v7448_v26  ;;  %7607 = vrot.lane.b32.xlu0 %v7446_v7, %s18721_s14  ;;  %v23863_v38 = vcombine.low %v20323_v21, %v20048_v57 }
 0x360   : > { %v7467_v10 = vshll.u32 %v18633_v17, 16  ;;  %v7460_v12 = vshrl.u32 %v20227_v13, 16  ;;  %v6784_v5 = vsel %vm6754_vm1, %v6782_v54, %v6783_v16  ;;  %v23860_v33 = vld [vmem:[#allocation34_spill] sm:$0xff]  ;;  %v23861_v53 = vld [vmem:[#allocation25_spill] sm:$0xff]  ;;  %v7222_v30 = vrot.slane %v20928_v41, 1 }
 0x361   : > { %23859 = vst [vmem:[#allocation15_spill] sm:$0xff] %v20937_v47  ;;  %v23862_v9 = vcombine.low %v23860_v33, %v23861_v53  ;;  %v7818_v40 = vsel %vm7731_vm2, %v6784_v5, %v6902_v15  ;;  %v7224_v4 = vrot.slane %v23863_v38, 1  ;;  %v20954_v19 = vld [vmem:[#allocation2 + $0x74] ss:$0 sps:$4 sm:$0x11]   ;;  %v7457_v26 = vrot.slane %v7455_v3, 1 }
 0x362   : > { %23864 = vst [vmem:[#allocation30_spill] sm:$0xff] %v20954_v19  ;;  %v7465_v54 = vor.u32 %v7464_v43, %v7460_v12  ;;  %8403 = vmatprep.mubr.bf16.mxu1 %v7818_v40  ;;  %v23865_v48 = vld [vmem:[#allocation33_spill] sm:$0xff]  ;;  %v7474_v7 = vshll.u32 %v20937_v47, 16  ;;  %v7469_v33 = vrot.slane %v7467_v10, 1  ;;  %v7225_v53 = vrot.slane %v20935_v28, 1  ;;  %v20967_v40 = vpop.f32.mrf.mxu1  ;;  %7259 = vrot.lane.b32.xlu1 %v7217_v58, %s18721_s14 }
 0x363   : > { %v7221_v17 = vrot.slane %v23862_v9, 1  ;;  %v7760_v16 = vsel %vm7731_vm2, %v23865_v48, %v6693_v61  ;;  %v18635_v9 = vld [vmem:[#allocation2 + $0x5c] ss:$0 sps:$4 sm:$0x11]   ;;  %v7486_v15 = vshll.u32 %v20417_v46, 16  ;;  %v7458_v21 = vsel %vm6481_vm0, %v7453_v25, %v7457_v26  ;;  %23867 = vst [vmem:[#allocation31_spill] sm:$0xff] %v20967_v40 }
 0x364   : > { %8404 = vmatmul.mubr.bf16.gmra.mxu1 %v7760_v16  ;;  %v7479_v5 = vshll.u32 %v18635_v9, 16  ;;  %v6303_v57 = vld [vmem:[#allocation2 + $0x6c] sm:$0xf]  ;;  %v7476_v38 = vrot.slane %v7474_v7, 1  ;;  %v23866_v3 = vcombine.low %v20525_v63, %v20529_v23  ;;  %v18636_v12 = vld [vmem:[#allocation2 + $0x70] sm:$0xf]  ;;  %v7220_v10 = vsel %vm6754_vm1, %v7218_v1, %v7219_v51  ;;  %7609 = vrot.lane.b32.xlu0 %v7458_v21, %s18721_s14  ;;  %v20992_v13 = vpop.f32.mrf.mxu1 }
 0x365   : > { %v20965_v61 = vcombine.low %v6303_v57, %v18636_v12  ;;  %v7223_v48 = vsel %vm6754_vm1, %v7221_v17, %v7222_v30  ;;  %v20974_v25 = vsel %vm6754_vm1, %v7224_v4, %v7225_v53  ;;  %v7228_v26 = vrot.slane %v20954_v19, 1  ;;  %v20977_v63 = vld [vmem:[#allocation2 + $0x80] ss:$0 sps:$4 sm:$0x11]   ;;  %v23870_v21 = vld [vmem:[#allocation46_spill] sm:$0xff]  ;;  %v23872_v4 = vld [vmem:[#allocation48_spill] sm:$0xff]  ;;  %v6695_v19 = vpop.permute.xlu1 %6694 }
 0x366   : > { %v7227_v43 = vrot.slane %v23866_v3, 1  ;;  %23868 = vst [vmem:[#allocation34_spill] sm:$0xff] %v20977_v63  ;;  %v7470_v23 = vsel %vm6481_vm0, %v7465_v54, %v7469_v33  ;;  %v7472_v16 = vshrl.u32 %v20937_v47, 16  ;;  %v18637_v7 = vld [vmem:[#allocation2 + $0x68] ss:$0 sps:$4 sm:$0x11]   ;;  %7261 = vrot.lane.b32.xlu1 %v7220_v10, %s18721_s14 }
 0x367   : > { %v7491_v9 = vshll.u32 %v18637_v7, 16  ;;  %v7498_v58 = vshll.u32 %v20965_v61, 16  ;;  %v7481_v1 = vrot.slane %v7479_v5, 1  ;;  %v7488_v51 = vrot.slane %v7486_v15, 1  ;;  %v23869_v57 = vld [vmem:[#allocation45_spill] sm:$0xff]  ;;  %23873 = vst [vmem:[#allocation25_spill] sm:$0xff] %v20992_v13 }
 0x368   : > { %v23871_v17 = vcombine.low %v23869_v57, %v23870_v21  ;;  %v7510_v53 = vshll.u32 %v23872_v4, 16  ;;  %v6218_v3 = vld [vmem:[#allocation2 + $0x78] sm:$0xe]  ;;  %v7477_v12 = vor.u32 %v7476_v38, %v7472_v16  ;;  %v20987_v40 = vsel %vm6754_vm1, %v7227_v43, %v7228_v26  ;;  %v20990_v33 = vld [vmem:[#allocation2 + $0x8c] ss:$0 sps:$4 sm:$0x11]   ;;  %7611 = vrot.lane.b32.xlu0 %v7470_v23, %s18721_s14  ;;  %v6904_v21 = vpop.permute.xlu0 %6903 }
 0x369   : > { %v7484_v54 = vshrl.u32 %v20417_v46, 16  ;;  %v18638_v7 = vld [vmem:[#allocation2 + $0x7c] sm:$0xf]  ;;  %v7231_v5 = vrot.slane %v20977_v63, 1  ;;  %v7500_v15 = vrot.slane %v7498_v58, 1  ;;  %v23874_v43 = vcombine.low %v20649_v32, %v20379_v8 }
 0x36a   : > { %v7230_v30 = vrot.slane %v23871_v17, 1  ;;  %v15816_v47 = vcombine.low %v6218_v3, %v18638_v7  ;;  %v18639_v57 = vld [vmem:[#allocation2 + $0x74] ss:$0 sps:$4 sm:$0x11]   ;;  %v7493_v16 = vrot.slane %v7491_v9, 1  ;;  %v7512_v17 = vrot.slane %v7510_v53, 1  ;;  %7263 = vrot.lane.b32.xlu1 %v7223_v48, %s18721_s14 }
 0x36b   : > { %v7503_v38 = vshll.u32 %v18639_v57, 16  ;;  %v7233_v26 = vrot.slane %v23874_v43, 1  ;;  %v18640_v3 = vld [vmem:[#allocation2 + $0x80] ss:$0 sps:$4 sm:$0x11]   ;;  %v7489_v10 = vor.u32 %v7488_v51, %v7484_v54  ;;  %v7496_v58 = vshrl.u32 %v20965_v61, 16 }
 0x36c   : > { %v6785_v46 = vrot.slane %v15816_v47, 1  ;;  %v6786_v7 = vrot.slane %v18640_v3, 1  ;;  %v6307_v13 = vld [vmem:[#allocation2 + $0x84] sm:$0xf]  ;;  %v21001_v23 = vsel %vm6754_vm1, %v7230_v30, %v7231_v5  ;;  %v18641_v63 = vld [vmem:[#allocation2 + $0x88] sm:$0xf]  ;;  %v7482_v8 = vsel %vm6481_vm0, %v7477_v12, %v7481_v1  ;;  %v21011_v3 = vpop.f32.mrf.mxu1 }
 0x36d   : > { %v21004_v57 = vcombine.low %v6307_v13, %v18641_v63  ;;  %v7508_v32 = vshrl.u32 %v23872_v4, 16  ;;  %v18642_v9 = vld [vmem:[#allocation2 + $0x80] ss:$0 sps:$4 sm:$0x11]   ;;  %7613 = vrot.lane.b32.xlu0 %v7482_v8, %s18721_s14  ;;  %v7501_v51 = vor.u32 %v7500_v15, %v7496_v58  ;;  %v7505_v30 = vrot.slane %v7503_v38, 1  ;;  %v23876_v54 = vld [vmem:[#allocation38_spill] sm:$0xff] }
 0x36e   : > { %v7515_v53 = vshll.u32 %v18642_v9, 16  ;;  %v6787_v47 = vsel %vm6754_vm1, %v6785_v46, %v6786_v7  ;;  %v21009_v43 = vld [vmem:[#allocation2 + $0x98] ss:$0 sps:$4 sm:$0x11]   ;;  %v7234_v13 = vrot.slane %v20990_v33, 1  ;;  %v7763_v46 = vsel %vm7731_vm2, %v23876_v54, %v6695_v19  ;;  %7265 = vrot.lane.b32.xlu1 %v20974_v25, %s18721_s14 }
 0x36f   : > { %23875 = vst [vmem:[#allocation33_spill] sm:$0xff] %v21004_v57  ;;  %v7822_v63 = vsel %vm7731_vm2, %v6787_v47, %v6904_v21  ;;  %v21017_v1 = vld [vmem:[#allocation2 + $0xa4] ss:$0 sps:$4 sm:$0x11]   ;;  %v7513_v12 = vor.u32 %v7512_v17, %v7508_v32  ;;  %v23877_v5 = vcombine.low %v20790_v52, %v20479_v39  ;;  %v7522_v48 = vshll.u32 %v21004_v57, 16 }
 0x370   : > { %8411 = vmatprep.mubr.bf16.mxu1 %v7822_v63  ;;  %v7494_v15 = vsel %vm6481_vm0, %v7489_v10, %v7493_v16  ;;  %v21027_v38 = vsel %vm6754_vm1, %v7233_v26, %v7234_v13  ;;  %v18643_v21 = vld [vmem:[#allocation2 + $0x8c] ss:$0 sps:$4 sm:$0x11]   ;;  %v23878_v17 = vcombine.low %v20802_v18, %v20605_v55  ;;  %v6311_v32 = vld [vmem:[#allocation2 + $0x9c] sm:$0xf]  ;;  %v7517_v19 = vrot.slane %v7515_v53, 1  ;;  %v21038_v26 = vpop.f32.mrf.mxu1 }
 0x371   : > { %v7236_v7 = vrot.slane %v23877_v5, 1  ;;  %8412 = vmatmul.mubr.bf16.gmra.mxu1 %v7763_v46  ;;  %v7527_v58 = vshll.u32 %v18643_v21, 16  ;;  %v7237_v9 = vrot.slane %v21009_v43, 1  ;;  %v7534_v39 = vshll.u32 %v20806_v24, 16  ;;  %v18644_v47 = vld [vmem:[#allocation2 + $0xa0] sm:$0xf]  ;;  %7615 = vrot.lane.b32.xlu0 %v7494_v15, %s18721_s14 }
 0x372   : > { %v7239_v8 = vrot.slane %v23878_v17, 1  ;;  %v21034_v52 = vld [vmem:[#allocation2 + $0xb0] ss:$0 sps:$4 sm:$0x11]   ;;  %v21036_v16 = vcombine.low %v6311_v32, %v18644_v47  ;;  %v7506_v55 = vsel %vm6481_vm0, %v7501_v51, %v7505_v30  ;;  %v7524_v18 = vrot.slane %v7522_v48, 1  ;;  %7267 = vrot.lane.b32.xlu1 %v20987_v40, %s18721_s14  ;;  %v6697_v40 = vpop.permute.xlu1 %6696 }
 0x373   : > { %v7240_v10 = vrot.slane %v21017_v1, 1  ;;  %v18645_v53 = vld [vmem:[#allocation2 + $0x98] ss:$0 sps:$4 sm:$0x11]   ;;  %v7518_v63 = vsel %vm6481_vm0, %v7513_v12, %v7517_v19  ;;  %v21047_v54 = vsel %vm6754_vm1, %v7236_v7, %v7237_v9  ;;  %v23879_v46 = vcombine.low %v20821_v14, %v20683_v59  ;;  %v6219_v21 = vld [vmem:[#allocation2 + $0x84] sm:$0xe]  ;;  %v21061_v9 = vpop.f32.mrf.mxu1 }
 0x374   : > { %v7539_v13 = vshll.u32 %v18645_v53, 16  ;;  %v7546_v25 = vshll.u32 %v21036_v16, 16  ;;  %v7520_v15 = vshrl.u32 %v21004_v57, 16  ;;  %v7529_v51 = vrot.slane %v7527_v58, 1  ;;  %v18647_v59 = vld [vmem:[#allocation2 + $0x88] sm:$0xf] }
 0x375   : > { %v7242_v5 = vrot.slane %v23879_v46, 1  ;;  %v21055_v30 = vsel %vm6754_vm1, %v7239_v8, %v7240_v10  ;;  %v18646_v48 = vld [vmem:[#allocation2 + $0xa4] ss:$0 sps:$4 sm:$0x11]   ;;  %v7536_v12 = vrot.slane %v7534_v39, 1  ;;  %v7243_v7 = vrot.slane %v21034_v52, 1  ;;  %7617 = vrot.lane.b32.xlu0 %v7506_v55, %s18721_s14 }
 0x376   : > { %v7551_v17 = vshll.u32 %v18646_v48, 16  ;;  %v21057_v32 = vld [vmem:[#allocation2 + $0xbc] ss:$0 sps:$4 sm:$0x11]   ;;  %v7558_v19 = vshll.u32 %v20842_v56, 16  ;;  %v15817_v14 = vcombine.low %v6219_v21, %v18647_v59  ;;  %23880 = vst [vmem:[#allocation45_spill] sm:$0xff] %v21061_v9  ;;  %v7525_v58 = vor.u32 %v7524_v18, %v7520_v15  ;;  %v6906_v21 = vpop.permute.xlu0 %6905  ;;  %7269 = vrot.lane.b32.xlu1 %v21001_v23, %s18721_s14 }
 0x377   : > { %v7532_v8 = vshrl.u32 %v20806_v24, 16  ;;  %v7541_v47 = vrot.slane %v7539_v13, 1  ;;  %v23881_v39 = vcombine.low %v20844_v0, %v20738_v42  ;;  %v21071_v53 = vsel %vm6754_vm1, %v7242_v5, %v7243_v7  ;;  %v18648_v59 = vld [vmem:[#allocation2 + $0x8c] ss:$0 sps:$4 sm:$0x11]   ;;  %v21080_v7 = vpop.f32.mrf.mxu1 }
 0x378   : > { %v7548_v46 = vrot.slane %v7546_v25, 1  ;;  %v6788_v48 = vrot.slane %v15817_v14, 1  ;;  %v6789_v9 = vrot.slane %v18648_v59, 1  ;;  %v6315_v57 = vld [vmem:[#allocation2 + $0xb4] sm:$0xf]  ;;  %v7544_v55 = vshrl.u32 %v21036_v16, 16 }
 0x379   : > { %v7245_v10 = vrot.slane %v23881_v39, 1  ;;  %v7553_v18 = vrot.slane %v7551_v17, 1  ;;  %v7246_v15 = vrot.slane %v21057_v32, 1  ;;  %v21076_v13 = vcombine.low %v6315_v57, %v20755_v62  ;;  %7619 = vrot.lane.b32.xlu0 %v7518_v63, %s18721_s14  ;;  %v21091_v39 = vld [vmem:[#allocation2 + $0xc8] ss:$0 sps:$4 sm:$0x11]   ;;  %v17049_v63 = vpop.f32.mrf.mxu1 }
 0x37a   : > { %v7537_v42 = vor.u32 %v7536_v12, %v7532_v8  ;;  %v7560_v0 = vrot.slane %v7558_v19, 1  ;;  %v6790_v5 = vsel %vm6754_vm1, %v6788_v48, %v6789_v9  ;;  %v7582_v25 = vshll.u32 %v20911_v22, 16  ;;  %v6220_v12 = vld [vmem:[#allocation2 + $0x90] sm:$0xe]  ;;  %v23882_v9 = vld [vmem:[#allocation41_spill] sm:$0xff]  ;;  %7271 = vrot.lane.b32.xlu1 %v21027_v38, %s18721_s14 }
 0x37b   : > { %v7530_v17 = vsel %vm6481_vm0, %v7525_v58, %v7529_v51  ;;  %v7556_v14 = vshrl.u32 %v20842_v56, 16  ;;  %v7563_v62 = vshll.u32 %v20712_v44, 16  ;;  %v7826_v57 = vsel %vm7731_vm2, %v6790_v5, %v6906_v21  ;;  %v18649_v44 = vld [vmem:[#allocation2 + $0x94] sm:$0xf]  ;;  %v17050_v38 = vpop.f32.mrf.mxu1 }
 0x37c   : > { %v7549_v19 = vor.u32 %v7548_v46, %v7544_v55  ;;  %8419 = vmatprep.mubr.bf16.mxu1 %v7826_v57  ;;  %v7766_v8 = vsel %vm7731_vm2, %v23882_v9, %v6697_v40  ;;  %v7570_v23 = vshll.u32 %v21076_v13, 16  ;;  %v7584_v48 = vrot.slane %v7582_v25, 1 }
 0x37d   : > { %8420 = vmatmul.mubr.bf16.gmra.mxu1 %v7766_v8  ;;  %v7580_v51 = vshrl.u32 %v20911_v22, 16  ;;  %v7587_v58 = vshll.u32 %v20849_v45, 16  ;;  %v15818_v59 = vcombine.low %v6220_v12, %v18649_v44  ;;  %v21098_v46 = vadd.f32 %v20942_v60, %v20923_v2  ;;  %7621 = vrot.lane.b32.xlu0 %v7530_v17, %s18721_s14 }
 0x37e   : > { %v7561_v21 = vor.u32 %v7560_v0, %v7556_v14  ;;  %v23883_v40 = vcombine.low %v20900_v37, %v20865_v34  ;;  %v7572_v5 = vrot.slane %v7570_v23, 1  ;;  %v7575_v25 = vshll.u32 %v20757_v50, 16  ;;  %v6222_v14 = vld [vmem:[#allocation2 + $0xa8] sm:$0xe]  ;;  %v6699_v23 = vpop.permute.xlu1 %6698  ;;  %7273 = vrot.lane.b32.xlu1 %v21047_v54, %s18721_s14 }
 0x37f   : > { %v7542_v45 = vsel %vm6481_vm0, %v7537_v42, %v7541_v47  ;;  %v21109_v57 = vsel %vm6754_vm1, %v7245_v10, %v7246_v15  ;;  %v7568_v60 = vshrl.u32 %v21076_v13, 16  ;;  %v7585_v2 = vor.u32 %v7584_v48, %v7580_v51  ;;  %v6319_v15 = vld [vmem:[#allocation2 + $0xcc] sm:$0xf]  ;;  %v21119_v42 = vld [vmem:[#allocation2 + $0xd0] sm:$0xf] }
 0x380   : > { %v7248_v55 = vrot.slane %v23883_v40, 1  ;;  %v7565_v0 = vrot.slane %v7563_v62, 1  ;;  %v7249_v34 = vrot.slane %v21091_v39, 1  ;;  %v6791_v37 = vrot.slane %v15818_v59, 1  ;;  %v23884_v59 = vld [vmem:[#allocation9_spill] sm:$0xff]  ;;  %v23886_v40 = vld [vmem:[#allocation14_spill] sm:$0xff] }
 0x381   : > { %v21115_v50 = vadd.f32 %v21038_v26, %v21011_v3  ;;  %v7554_v17 = vsel %vm6481_vm0, %v7549_v19, %v7553_v18  ;;  %v7573_v12 = vor.u32 %v7572_v5, %v7568_v60  ;;  %v7589_v47 = vrot.slane %v7587_v58, 1  ;;  %v18650_v3 = vld [vmem:[#allocation2 + $0x98] ss:$0 sps:$4 sm:$0x11]   ;;  %7623 = vrot.lane.b32.xlu0 %v7542_v45, %s18721_s14  ;;  %v6223_v58 = vld [vmem:[#allocation2 + $0xb4] sm:$0xe] }
 0x382   : > { %v15820_v10 = vcombine.low %v6222_v14, %v20727_v29  ;;  %v7566_v62 = vsel %vm6481_vm0, %v7561_v21, %v7565_v0  ;;  %v21123_v9 = vsel %vm6754_vm1, %v7248_v55, %v7249_v34  ;;  %v7577_v8 = vrot.slane %v7575_v25, 1  ;;  %v21125_v48 = vld [vmem:[#allocation2 + $0xd4] ss:$0 sps:$4 sm:$0x11]   ;;  %v23887_v45 = vld [vmem:[#allocation47_spill] sm:$0xff]  ;;  %7275 = vrot.lane.b32.xlu1 %v21055_v30, %s18721_s14  ;;  %v23888_v14 = vld [vmem:[#allocation10_spill] sm:$0xff] }
 0x383   : > { %v6792_v26 = vrot.slane %v18650_v3, 1  ;;  %v21131_v29 = vsel %vm6481_vm0, %v7585_v2, %v7589_v47  ;;  %v6798_v19 = vrot.slane %v20732_v27, 1  ;;  %v21134_v51 = vadd.f32 %v17050_v38, %v17049_v63 }
 0x384   : > { %v6797_v18 = vrot.slane %v15820_v10, 1  ;;  %v23885_v21 = vshrl.u32 %v23884_v59, 16  ;;  %v6971_v5 = vshll.u32 %v20813_v49, 16  ;;  %v15821_v54 = vcombine.low %v6223_v58, %v20778_v6  ;;  %v23896_v59 = vld [vmem:[#allocation23_spill] sm:$0xff] }
 0x385   : > { %v6793_v44 = vsel %vm6754_vm1, %v6791_v37, %v6792_v26  ;;  %v7578_v25 = vsel %vm6481_vm0, %v7573_v12, %v7577_v8  ;;  %v7769_v60 = vsel %vm7731_vm2, %v23887_v45, %v6699_v23  ;;  %v21149_v63 = vcombine.low %v6319_v15, %v21119_v42  ;;  %7625 = vrot.lane.b32.xlu0 %v7554_v17, %s18721_s14  ;;  %v23890_v12 = vld [vmem:[#allocation18_spill] sm:$0xff]  ;;  %v23891_v8 = vld [vmem:[#allocation11_spill] sm:$0xff]  ;;  %v23893_v23 = vld [vmem:[#allocation21_spill] sm:$0xff] }
 0x386   : > { %v6969_v55 = vor.u32 %v23886_v40, %v23885_v21  ;;  %v21146_v27 = vsel %vm6754_vm1, %v6797_v18, %v6798_v19  ;;  %v6973_v2 = vrot.slane %v6971_v5, 1  ;;  %v6800_v0 = vrot.slane %v15821_v54, 1  ;;  %v23894_v19 = vld [vmem:[#allocation13_spill] sm:$0xff]  ;;  %v23897_v5 = vld [vmem:[#allocation16_spill] sm:$0xff]  ;;  %7277 = vrot.lane.b32.xlu1 %v21071_v53, %s18721_s14 }
 0x387   : > { %v6801_v34 = vrot.slane %v20788_v11, 1  ;;  %v7599_v37 = vshll.u32 %v21125_v48, 16  ;;  %v7592_v6 = vshrl.u32 %v21149_v63, 16  ;;  %v7594_v49 = vshll.u32 %v21149_v63, 16  ;;  %v23899_v45 = vld [vmem:[#allocation29_spill] sm:$0xff] }
 0x388   : > { %v23889_v38 = vshrl.u32 %v23888_v14, 16  ;;  %v6983_v10 = vshll.u32 %v20825_v35, 16  ;;  %v21163_v15 = vsel %vm6481_vm0, %v6969_v55, %v6973_v2  ;;  %v23892_v30 = vshrl.u32 %v23891_v8, 16 }
 0x389   : > { %v21166_v11 = vsel %vm6754_vm1, %v6800_v0, %v6801_v34  ;;  %v6995_v3 = vshll.u32 %v20851_v20, 16  ;;  %v7596_v26 = vrot.slane %v7594_v49, 1  ;;  %v23895_v58 = vshrl.u32 %v23894_v19, 16  ;;  %v23900_v0 = vld [vmem:[#allocation20_spill] sm:$0xff]  ;;  %7627 = vrot.lane.b32.xlu0 %v7566_v62, %s18721_s14  ;;  %v6908_v20 = vpop.permute.xlu0 %6907 }
 0x38a   : > { %v6981_v47 = vor.u32 %v23890_v12, %v23889_v38  ;;  %v6993_v17 = vor.u32 %v23893_v23, %v23892_v30  ;;  %v6985_v18 = vrot.slane %v6983_v10, 1  ;;  %v7007_v35 = vshll.u32 %v20875_v31, 16  ;;  %v23901_v38 = vld [vmem:[#allocation49_spill] sm:$0xff]  ;;  %v23906_v19 = vld [vmem:[#allocation56_spill] sm:$0xff]  ;;  %7279 = vrot.lane.b32.xlu1 %v21109_v57, %s18721_s14 }
 0x38b   : > { %v7005_v21 = vor.u32 %v23896_v59, %v23895_v58  ;;  %v7601_v40 = vrot.slane %v7599_v37, 1  ;;  %v6997_v55 = vrot.slane %v6995_v3, 1  ;;  %v23898_v54 = vshrl.u32 %v23897_v5, 16  ;;  %v23903_v37 = vld [vmem:[#allocation55_spill] sm:$0xff]  ;;  %v23912_v5 = vld [vmem:[#allocation58_spill] sm:$0xff] }
 0x38c   : > { %v7019_v34 = vshll.u32 %v23900_v0, 16  ;;  %v21184_v49 = vsel %vm6481_vm0, %v6981_v47, %v6985_v18  ;;  %v7009_v14 = vrot.slane %v7007_v35, 1  ;;  %v23902_v31 = vshrl.u32 %v23901_v38, 16  ;;  %v23904_v3 = vld [vmem:[#allocation51_spill] sm:$0xff]  ;;  %v23916_v38 = vld [vmem:[#allocation26_spill] sm:$0xff] }
 0x38d   : > { %v7017_v2 = vor.u32 %v23899_v45, %v23898_v54  ;;  %v7115_v10 = vshll.u32 %v21017_v1, 16  ;;  %v7830_v8 = vsel %vm7731_vm2, %v6793_v44, %v6908_v20  ;;  %v7597_v30 = vor.u32 %v7596_v26, %v7592_v6  ;;  %v23907_v44 = vld [vmem:[#allocation19_spill] sm:$0xff]  ;;  %7629 = vrot.lane.b32.xlu0 %v7578_v25, %s18721_s14 }
 0x38e   : > { %v7113_v12 = vor.u32 %v23903_v37, %v23902_v31  ;;  %v21192_v23 = vsel %vm6481_vm0, %v6993_v17, %v6997_v55  ;;  %v7021_v53 = vrot.slane %v7019_v34, 1  ;;  %8427 = vmatprep.mubr.bf16.mxu1 %v7830_v8  ;;  %v21195_v62 = vsel %vm6481_vm0, %v7005_v21, %v7009_v14  ;;  %v23909_v17 = vld [vmem:[#allocation35_spill] sm:$0xff]  ;;  %v23910_v55 = vld [vmem:[#allocation53_spill] sm:$0xff]  ;;  %v23915_v34 = vld [vmem:[#allocation24_spill] sm:$0xff]  ;;  %7281 = vrot.lane.b32.xlu1 %v21123_v9, %s18721_s14 }
 0x38f   : > { %v7117_v47 = vrot.slane %v7115_v10, 1  ;;  %v23905_v18 = vshrl.u32 %v23904_v3, 16  ;;  %v7127_v59 = vshll.u32 %v21034_v52, 16  ;;  %8428 = vmatmul.mubr.bf16.gmra.mxu1 %v7769_v60  ;;  %v23908_v6 = vshrl.u32 %v23907_v44, 16  ;;  %v23918_v37 = vld [vmem:[#allocation36_spill] sm:$0xff]  ;;  %v23919_v8 = vld [vmem:[#allocation27_spill] sm:$0xff] }
 0x390   : > { %v21202_v1 = vsel %vm6481_vm0, %v7017_v2, %v7021_v53  ;;  %v7031_v35 = vshll.u32 %v20914_v36, 16  ;;  %v23911_v21 = vshrl.u32 %v23910_v55, 16  ;;  %v7139_v45 = vshll.u32 %v21057_v32, 16  ;;  %v23913_v2 = vld [vmem:[#allocation59_spill] sm:$0xff] }
 0x391   : > { %v7125_v58 = vor.u32 %v23906_v19, %v23905_v18  ;;  %v7029_v26 = vor.u32 %v23909_v17, %v23908_v6  ;;  %v21215_v52 = vsel %vm6481_vm0, %v7113_v12, %v7117_v47  ;;  %v7129_v60 = vrot.slane %v7127_v59, 1  ;;  %v23921_v32 = vld [vmem:[#allocation43_spill] sm:$0xff]  ;;  %v23922_v59 = vld [vmem:[#allocation30_spill] sm:$0xff]  ;;  %v23923_v6 = vld [vmem:[#allocation28_spill] sm:$0xff]  ;;  %7631 = vrot.lane.b32.xlu0 %v21131_v29, %s18721_s14 }
 0x392   : > { %v7137_v54 = vor.u32 %v23912_v5, %v23911_v21  ;;  %v23914_v0 = vshrl.u32 %v23913_v2, 16  ;;  %v7033_v36 = vrot.slane %v7031_v35, 1  ;;  %v7151_v14 = vshll.u32 %v21091_v39, 16 }
 0x393   : > { %v23917_v31 = vshrl.u32 %v23916_v38, 16  ;;  %v7043_v57 = vshll.u32 %v20928_v41, 16  ;;  %v21227_v25 = vsel %vm6481_vm0, %v7125_v58, %v7129_v60  ;;  %v7141_v12 = vrot.slane %v7139_v45, 1  ;;  %v23926_v60 = vld [vmem:[#allocation44_spill] sm:$0xff] }
 0x394   : > { %v7149_v20 = vor.u32 %v23915_v34, %v23914_v0  ;;  %v23920_v53 = vshrl.u32 %v23919_v8, 16  ;;  %v7055_v3 = vshll.u32 %v20935_v28, 16  ;;  %v21234_v18 = vsel %vm6481_vm0, %v7029_v26, %v7033_v36  ;;  %v23924_v28 = vld [vmem:[#allocation37_spill] sm:$0xff]  ;;  %v23928_v36 = vld [vmem:[#allocation39_spill] sm:$0xff] }
 0x395   : > { %v7041_v10 = vor.u32 %v23918_v37, %v23917_v31  ;;  %v7153_v39 = vrot.slane %v7151_v14, 1  ;;  %v7045_v19 = vrot.slane %v7043_v57, 1  ;;  %v7067_v44 = vshll.u32 %v23922_v59, 16  ;;  %v6221_v31 = vld [vmem:[#allocation2 + $0x9c] sm:$0xe]  ;;  %v23929_v37 = vld [vmem:[#allocation42_spill] sm:$0xff] }
 0x396   : > { %v7053_v47 = vor.u32 %v23921_v32, %v23920_v53  ;;  %v7060_v17 = vshrl.u32 %v23923_v6, 16  ;;  %v21243_v41 = vsel %vm6481_vm0, %v7137_v54, %v7141_v12  ;;  %v7057_v58 = vrot.slane %v7055_v3, 1  ;;  %v23927_v54 = vld [vmem:[#allocation34_spill] sm:$0xff] }
 0x397   : > { %v23925_v35 = vshll.u32 %v23924_v28, 16  ;;  %v7602_v55 = vsel %vm6481_vm0, %v7597_v30, %v7601_v40  ;;  %v21249_v21 = vsel %vm6481_vm0, %v7149_v20, %v7153_v39  ;;  %v21252_v5 = vsel %vm6481_vm0, %v7041_v10, %v7045_v19  ;;  %v21264_v30 = vpop.f32.mrf.mxu1  ;;  %v18651_v57 = vld [vmem:[#allocation2 + $0xa0] sm:$0xf] }
 0x398   : > { %v21255_v9 = vsel %vm6481_vm0, %v7053_v47, %v7057_v58  ;;  %v7065_v29 = vor.u32 %v23926_v60, %v7060_v17  ;;  %v7069_v45 = vrot.slane %v7067_v44, 1  ;;  %v7079_v2 = vshll.u32 %v23927_v54, 16  ;;  %7633 = vrot.lane.b32.xlu0 %v7602_v55, %s18721_s14  ;;  %v18652_v58 = vld [vmem:[#allocation2 + $0xa4] ss:$0 sps:$4 sm:$0x11]   ;;  %s18656_s14 = scalar_lea.vmem %s15055_s22, 16 }
 0x399   : > { %v7076_v26 = vrot.slane %v23925_v35, 1  ;;  %v7072_v0 = vshrl.u32 %v23924_v28, 16  ;;  %v7086_v14 = vshll.u32 %v23928_v36, 16  ;;  %v7098_v10 = vshll.u32 %v23929_v37, 16  ;;  %v21271_v8 = vpop.f32.mrf.mxu1  ;;  %p18657_p11 = scmp.ne.s32.totalorder %s15055_s22, %s18656_s14  ;;  %p18664_p1 = scmp.lt.s32.totalorder %s18662_s28, %s18656_s14 }
 0x39a   : > { %v21262_v40 = vsel %vm6481_vm0, %v7065_v29, %v7069_v45  ;;  %v7081_v20 = vrot.slane %v7079_v2, 1  ;;  %v15819_v12 = vcombine.low %v6221_v31, %v18651_v57  ;;  %v7084_v47 = vshrl.u32 %v23928_v36, 16 }
 0x39b   : > { %v7077_v34 = vor.u32 %v7076_v26, %v7072_v0  ;;  %v7088_v53 = vrot.slane %v7086_v14, 1  ;;  %v17055_v32 = vpop.f32.mrf.mxu1  ;;  %v7100_v3 = vrot.slane %v7098_v10, 1  ;;  %v7091_v6 = vshll.u32 %v20990_v33, 16  ;;  %p18658_p12 = pnand %p18657_p11, %p18813_p5  ;;  %p18665_p2 = por %p18664_p1, %p18663_p0 }
 0x39c   : > { %v6794_v39 = vrot.slane %v15819_v12, 1  ;;  %v7096_v17 = vshrl.u32 %v23929_v37, 16  ;;  %v6795_v28 = vrot.slane %v18652_v58, 1  ;;  %v7103_v29 = vshll.u32 %v21009_v43, 16  ;;  %v23931_v37 = vld [vmem:[#allocation52_spill] sm:$0xff]  ;;  %v23932_v58 = vld [vmem:[#allocation54_spill] sm:$0xff] }
 0x39d   : > { %v21268_v38 = vsel %vm6481_vm0, %v7077_v34, %v7081_v20  ;;  %v17056_v19 = vpop.f32.mrf.mxu1  ;;  %v7089_v44 = vor.u32 %v7088_v53, %v7084_v47  ;;  %v7093_v35 = vrot.slane %v7091_v6, 1  ;;  %v23930_v34 = vld [vmem:[#allocation50_spill] sm:$0xff]  ;;  %v6352_v47 = vld [vmem:[#allocation2 + $0xcc] sm:$0xe]  ;;  %vm9915_vm4 = vcmask 1043456   ;;  %p18659_p13 = pneg %p18658_p12 }
 0x39e   : > { %v21274_v59 = vadd.f32 %v17056_v19, %v17055_v32  ;;  %v6796_v55 = vsel %vm6754_vm1, %v6794_v39, %v6795_v28  ;;  %v7101_v60 = vor.u32 %v7100_v3, %v7096_v17  ;;  %v7105_v2 = vrot.slane %v7103_v29, 1  ;;  %v23934_v29 = vld [vmem:[#allocation57_spill] sm:$0xff]  ;;  %vm21803_vm8 = vmand %vm9915_vm4, %vm6043_vm14 }
 0x39f   : > { %v6910_v26 = vpop.permute.xlu0 %6909  ;;  %v21282_v54 = vsel %vm6481_vm0, %v7089_v44, %v7093_v35  ;;  %v21291_v43 = vpop.f32.mrf.mxu1  ;;  %v15917_v3 = vcombine.low %v6352_v47, %v21119_v42  ;;  %v7729_v39 = vrot.slane %v21125_v48, 1  ;;  %v23937_v47 = vld [vmem:[#allocation32_spill] sm:$0xff]  ;;  %p18666_p3 = pnand %p18665_p2, %p18659_p13 }
 0x3a0   : > { %v7834_v45 = vsel %vm7731_vm2, %v6796_v55, %v6910_v26  ;;  %v21285_v33 = vsel %vm6481_vm0, %v7101_v60, %v7105_v2  ;;  %v23933_v26 = vld [vmem:[#allocation17_spill] sm:$0xff] }
 0x3a1   : > { %8435 = vmatprep.mubr.bf16.mxu1 %v7834_v45  ;;  %v21295_v57 = vpop.f32.mrf.mxu1 }
 0x3a4   : > { %v6701_v0 = vpop.permute.xlu1 %6700 }
 0x3a5   : > { %v7772_v20 = vsel %vm7731_vm2, %v23930_v34, %v6701_v0  ;;  %v23935_v34 = vld [vmem:[#allocation22_spill] sm:$0xff] }
 0x3a6   : > { %8436 = vmatmul.mubr.bf16.gmra.mxu1 %v7772_v20 }
 0x3b2   : > { %v6912_v36 = vpop.permute.xlu0 %6911 }
 0x3b3   : > { %v7838_v14 = vsel %vm7731_vm2, %v21146_v27, %v6912_v36  ;;  %v7728_v27 = vrot.slane %v15917_v3, 1 }
 0x3b4   : > { %8443 = vmatprep.mubr.bf16.mxu1 %v7838_v14 }
 0x3b5   : > { %v7730_v6 = vsel %vm6754_vm1, %v7728_v27, %v7729_v39 }
 0x3b6   : > { %v6703_v31 = vpop.permute.xlu1 %6702  ;;  %17786 = vmatmul.mubr.msk.bf16.gmra.mxu0 %vm7731_vm2, %v7730_v6 }
 0x3b7   : > { %v7775_v10 = vsel %vm7731_vm2, %v23931_v37, %v6703_v31  ;;  %v23936_v31 = vld [vmem:[#allocation12_spill] sm:$0xff] }
 0x3b8   : > { %8444 = vmatmul.mubr.bf16.gmra.mxu1 %v7775_v10 }
 0x3bc   : > { %v17061_v12 = vpop.f32.mrf.mxu1 }
 0x3be   : > { %v17062_v53 = vpop.f32.mrf.mxu1 }
 0x3bf   : > { %v21297_v32 = vadd.f32 %v17062_v53, %v17061_v12 }
 0x3c0   : > { %v6705_v19 = vpop.permute.xlu1 %6704  ;;  %v21321_v53 = vpop.f32.mrf.mxu1 }
 0x3c1   : > { %v7778_v28 = vsel %vm7731_vm2, %v23932_v58, %v6705_v19  ;;  %v23938_v58 = vld [vmem:[#allocation15_spill] sm:$0xff] }
 0x3c2   : > { %v21327_v39 = vpop.f32.mrf.mxu1 }
 0x3c4   : > { %v7252_v48 = vpop.permute.xlu1 %7251 }
 0x3c5   : > { %v6914_v44 = vpop.permute.xlu0 %6913  ;;  %v7846_v60 = vsel %vm7731_vm2, %v21163_v15, %v7252_v48  ;;  %v23939_v48 = vld [vmem:[#allocation40_spill] sm:$0xff] }
 0x3c6   : > { %v7842_v17 = vsel %vm7731_vm2, %v21166_v11, %v6914_v44 }
 0x3c7   : > { %8451 = vmatprep.mubr.bf16.mxu1 %v7842_v17 }
 0x3c8   : > { %8452 = vmatmul.mubr.bf16.gmra.mxu1 %v7778_v28  ;;  %v7254_v45 = vpop.permute.xlu1 %7253  ;;  %v18060_v28 = vld [vmem:[%s23692_s5 + $0x70] ss:$8 sps:$4 sm:$0xff]  }
 0x3c9   : > { %v7604_v35 = vpop.permute.xlu0 %7603  ;;  %v7850_v0 = vsel %vm7731_vm2, %v21184_v49, %v7254_v45 }
 0x3ca   : > { %v7909_v42 = vsel %vm7731_vm2, %v23933_v26, %v7604_v35  ;;  %v18062_v35 = vld [vmem:[%s23692_s5 + $0x74] ss:$8 sps:$4 sm:$0xff]  }
 0x3cb   : > { %8492 = vmatprep.mubr.bf16.mxu1 %v7909_v42  ;;  %11420 = vmatprep.subr.bf16.mxu1 %v18062_v35 }
 0x3cc   : > { %v7256_v36 = vpop.permute.xlu1 %7255 }
 0x3cd   : > { %v7606_v55 = vpop.permute.xlu0 %7605  ;;  %v7854_v15 = vsel %vm7731_vm2, %v21192_v23, %v7256_v36 }
 0x3ce   : > { %v7912_v11 = vsel %vm7731_vm2, %v23934_v29, %v7606_v55 }
 0x3d0   : > { %8493 = vmatmul.mubr.bf16.vlgmr.msra.gmra.mxu1 %v7846_v60  ;;  %v7258_v10 = vpop.permute.xlu1 %7257 }
 0x3d1   : > { %8500 = vmatprep.mubr.bf16.mxu1 %v7912_v11  ;;  %v7608_v2 = vpop.permute.xlu0 %7607  ;;  %v7858_v49 = vsel %vm7731_vm2, %v21195_v62, %v7258_v10  ;;  %11421 = vmatpush1.bf16.msra.mxu1 %v18060_v28 }
 0x3d2   : > { %v7915_v20 = vsel %vm7731_vm2, %v23935_v34, %v7608_v2  ;;  %v18063_v34 = vld [vmem:[%s23692_s5 + $0x60] ss:$8 sps:$4 sm:$0xff]  }
 0x3d4   : > { %v7260_v27 = vpop.permute.xlu1 %7259 }
 0x3d5   : > { %v7862_v17 = vsel %vm7731_vm2, %v21202_v1, %v7260_v27 }
 0x3d6   : > { %v7610_v14 = vpop.permute.xlu0 %7609 }
 0x3d7   : > { %v7918_v37 = vsel %vm7731_vm2, %v23936_v31, %v7610_v14 }
 0x3d8   : > { %8501 = vmatmul.mubr.bf16.gmra.mxu1 %v7850_v0  ;;  %v7262_v26 = vpop.permute.xlu1 %7261 }
 0x3d9   : > { %8508 = vmatprep.mubr.bf16.mxu1 %v7915_v20  ;;  %v7866_v1 = vsel %vm7731_vm2, %v21234_v18, %v7262_v26  ;;  %v18065_v20 = vld [vmem:[%s23692_s5 + $0x64] ss:$8 sps:$4 sm:$0xff]  }
 0x3da   : > { %v7612_v12 = vpop.permute.xlu0 %7611  ;;  %11422 = vmatprep.subr.bf16.mxu1 %v18065_v20 }
 0x3db   : > { %v7921_v3 = vsel %vm7731_vm2, %v23937_v47, %v7612_v12  ;;  %11423 = vmatpush1.bf16.msra.mxu1 %v18063_v34 }
 0x3dc   : > { %v7264_v60 = vpop.permute.xlu1 %7263 }
 0x3dd   : > { %v7870_v45 = vsel %vm7731_vm2, %v21252_v5, %v7264_v60  ;;  %v18068_v5 = vld [vmem:[%s23692_s5 + $0x54] ss:$8 sps:$4 sm:$0xff]  }
 0x3de   : > { %11424 = vmatprep.subr.bf16.mxu1 %v18068_v5 }
 0x3df   : > { %v7614_v19 = vpop.permute.xlu0 %7613 }
 0x3e0   : > { %8509 = vmatmul.mubr.bf16.gmra.mxu1 %v7854_v15  ;;  %v7924_v62 = vsel %vm7731_vm2, %v23938_v58, %v7614_v19  ;;  %v7266_v36 = vpop.permute.xlu1 %7265 }
 0x3e1   : > { %8516 = vmatprep.mubr.bf16.mxu1 %v7918_v37  ;;  %v18066_v37 = vld [vmem:[%s23692_s5 + $0x50] ss:$8 sps:$4 sm:$0xff]   ;;  %v7874_v10 = vsel %vm7731_vm2, %v21255_v9, %v7266_v36 }
 0x3e2   : > { %11425 = vmatpush1.bf16.msra.mxu1 %v18066_v37  ;;  %v23940_v9 = vld [vmem:[#allocation33_spill] sm:$0xff] }
 0x3e3   : > { %v7616_v42 = vpop.permute.xlu0 %7615 }
 0x3e4   : > { %v7927_v55 = vsel %vm7731_vm2, %v23939_v48, %v7616_v42  ;;  %v7268_v47 = vpop.permute.xlu1 %7267 }
 0x3e7   : > { %v7618_v11 = vpop.permute.xlu0 %7617 }
 0x3e8   : > { %8517 = vmatmul.mubr.bf16.gmra.mxu1 %v7858_v49  ;;  %v7930_v0 = vsel %vm7731_vm2, %v20965_v61, %v7618_v11  ;;  %v7270_v35 = vpop.permute.xlu1 %7269 }
 0x3e9   : > { %8524 = vmatprep.mubr.bf16.mxu1 %v7921_v3  ;;  %v7882_v42 = vsel %vm7731_vm2, %v21268_v38, %v7270_v35  ;;  %v18074_v38 = vld [vmem:[%s23692_s5 + $0x34] ss:$8 sps:$4 sm:$0xff]   ;;  %v18080_v35 = vld [vmem:[%s23692_s5 + $0x164] ss:$8 sps:$4 sm:$0xff]  }
 0x3ea   : > { %v17067_v23 = vpop.f32.mrf.mxu1 }
 0x3eb   : > { %v7620_v15 = vpop.permute.xlu0 %7619 }
 0x3ec   : > { %v17068_v44 = vpop.f32.mrf.mxu1  ;;  %v7933_v12 = vsel %vm7731_vm2, %v23872_v4, %v7620_v15  ;;  %v18069_v4 = vld [vmem:[%s23692_s5 + $0x40] ss:$8 sps:$4 sm:$0xff]   ;;  %v7272_v11 = vpop.permute.xlu1 %7271 }
 0x3ed   : > { %v21329_v6 = vadd.f32 %v17068_v44, %v17067_v23  ;;  %v7878_v44 = vsel %vm7731_vm2, %v21262_v40, %v7268_v47  ;;  %v7886_v20 = vsel %vm7731_vm2, %v21282_v54, %v7272_v11 }
 0x3ee   : > { %v21345_v29 = vpop.f32.mrf.mxu1 }
 0x3ef   : > { %v7622_v23 = vpop.permute.xlu0 %7621 }
 0x3f0   : > { %8525 = vmatmul.mubr.bf16.gmra.mxu1 %v7862_v17  ;;  %v21349_v2 = vpop.f32.mrf.mxu1  ;;  %v7936_v58 = vsel %vm7731_vm2, %v23940_v9, %v7622_v23  ;;  %v7274_v15 = vpop.permute.xlu1 %7273 }
 0x3f1   : > { %8532 = vmatprep.mubr.bf16.mxu1 %v7924_v62  ;;  %v18071_v62 = vld [vmem:[%s23692_s5 + $0x44] ss:$8 sps:$4 sm:$0xff]  }
 0x3f2   : > { %11426 = vmatprep.subr.bf16.mxu1 %v18071_v62  ;;  %v18078_v62 = vld [vmem:[%s23692_s5 + $0x160] ss:$8 sps:$4 sm:$0xff]  }
 0x3f3   : > { %11427 = vmatpush1.bf16.msra.mxu1 %v18069_v4  ;;  %v7624_v40 = vpop.permute.xlu0 %7623 }
 0x3f4   : > { %v7939_v48 = vsel %vm7731_vm2, %v20806_v24, %v7624_v40  ;;  %v18077_v24 = vld [vmem:[%s23692_s5 + $0x174] ss:$8 sps:$4 sm:$0xff]   ;;  %11428 = vmatprep.subr.bf16.mxu1 %v18074_v38  ;;  %v18083_v38 = vld [vmem:[%s23692_s5 + $0x24] ss:$8 sps:$4 sm:$0xff]  }
 0x3f5   : > { %11493 = vmatprep.subr.bf16.mxu0 %v18077_v24  ;;  %v18086_v24 = vld [vmem:[%s23692_s5 + $0x154] ss:$8 sps:$4 sm:$0xff]  }
 0x3f8   : > { %8533 = vmatmul.mubr.bf16.gmra.mxu1 %v7866_v1 }
 0x3f9   : > { %8540 = vmatprep.mubr.bf16.mxu1 %v7927_v55 }
 0x400   : > { %8541 = vmatmul.mubr.bf16.gmra.mxu1 %v7870_v45  ;;  %v7626_v45 = vpop.permute.xlu0 %7625 }
 0x401   : > { %8548 = vmatprep.mubr.bf16.mxu1 %v7930_v0  ;;  %v17073_v18 = vpop.f32.mrf.mxu1  ;;  %v18072_v0 = vld [vmem:[%s23692_s5 + $0x30] ss:$8 sps:$4 sm:$0xff]   ;;  %v7942_v36 = vsel %vm7731_vm2, %v21036_v16, %v7626_v45 }
 0x402   : > { %11429 = vmatpush1.bf16.msra.mxu1 %v18072_v0 }
 0x403   : > { %v17074_v14 = vpop.f32.mrf.mxu1  ;;  %11430 = vmatprep.subr.bf16.mxu1 %v18083_v38  ;;  %v18122_v38 = vld [vmem:[%s23692_s5 + $0xc4] ss:$8 sps:$4 sm:$0xff]  }
 0x404   : > { %v21362_v31 = vadd.f32 %v17074_v14, %v17073_v18  ;;  %v18075_v18 = vld [vmem:[%s23692_s5 + $0x170] ss:$8 sps:$4 sm:$0xff]  }
 0x405   : > { %v21364_v61 = vpop.f32.mrf.mxu1  ;;  %11494 = vmatpush1.bf16.msra.mxu0 %v18075_v18 }
 0x406   : > { %11495 = vmatprep.subr.bf16.mxu0 %v18080_v35  ;;  %v18105_v35 = vld [vmem:[%s23692_s5 + $0x110] ss:$8 sps:$4 sm:$0xff]  }
 0x407   : > { %v21373_v49 = vpop.f32.mrf.mxu1 }
 0x408   : > { %8549 = vmatmul.mubr.bf16.gmra.mxu1 %v7874_v10  ;;  %v7628_v10 = vpop.permute.xlu0 %7627 }
 0x409   : > { %8556 = vmatprep.mubr.bf16.mxu1 %v7933_v12  ;;  %v7890_v12 = vsel %vm7731_vm2, %v21285_v33, %v7274_v15  ;;  %v7945_v54 = vsel %vm7731_vm2, %v20842_v56, %v7628_v10  ;;  %11496 = vmatpush1.bf16.msra.mxu0 %v18078_v62  ;;  %v18093_v10 = vld [vmem:[%s23692_s5 + $0x130] ss:$8 sps:$4 sm:$0xff]   ;;  %v18104_v62 = vld [vmem:[%s23692_s5 + $0xf4] ss:$8 sps:$4 sm:$0xff]  }
 0x40a   : > { %11497 = vmatprep.subr.bf16.mxu0 %v18086_v24  ;;  %v18123_v24 = vld [vmem:[%s23692_s5 + $0x1e0] ss:$8 sps:$4 sm:$0xff]  }
 0x40b   : > { %v17079_v3 = vpop.f32.mrf.mxu1 }
 0x40c   : > { %v7630_v23 = vpop.permute.xlu0 %7629 }
 0x40d   : > { %v17080_v27 = vpop.f32.mrf.mxu1  ;;  %v7948_v33 = vsel %vm7731_vm2, %v21076_v13, %v7630_v23 }
 0x40e   : > { %v21375_v19 = vadd.f32 %v17080_v27, %v17079_v3  ;;  %v7276_v3 = vpop.permute.xlu1 %7275 }
 0x40f   : > { %v21379_v17 = vpop.f32.mrf.mxu1 }
 0x410   : > { %8557 = vmatmul.mubr.bf16.gmra.mxu1 %v7878_v44  ;;  %v7894_v44 = vsel %vm7731_vm2, %v21215_v52, %v7276_v3  ;;  %v7632_v52 = vpop.permute.xlu0 %7631 }
 0x411   : > { %8564 = vmatprep.mubr.bf16.mxu1 %v7936_v58  ;;  %v21389_v28 = vpop.f32.mrf.mxu1 }
 0x412   : > { %v7278_v56 = vpop.permute.xlu1 %7277 }
 0x413   : > { %v7898_v40 = vsel %vm7731_vm2, %v21227_v25, %v7278_v56  ;;  %v18081_v25 = vld [vmem:[%s23692_s5 + $0x20] ss:$8 sps:$4 sm:$0xff]   ;;  %v18102_v56 = vld [vmem:[%s23692_s5 + $0xf0] ss:$8 sps:$4 sm:$0xff]  }
 0x414   : > { %11431 = vmatpush1.bf16.msra.mxu1 %v18081_v25  ;;  %v18117_v25 = vld [vmem:[%s23692_s5 + $0x1f0] ss:$8 sps:$4 sm:$0xff]  }
 0x415   : > { %v17085_v26 = vpop.f32.mrf.mxu1 }
 0x416   : > { %v7280_v11 = vpop.permute.xlu1 %7279 }
 0x417   : > { %v17086_v1 = vpop.f32.mrf.mxu1  ;;  %v7902_v18 = vsel %vm7731_vm2, %v21243_v41, %v7280_v11  ;;  %v18087_v41 = vld [vmem:[%s23692_s5 + $0x140] ss:$8 sps:$4 sm:$0xff]   ;;  %v18119_v11 = vld [vmem:[%s23692_s5 + $0x1f4] ss:$8 sps:$4 sm:$0xff]  }
 0x418   : > { %8565 = vmatmul.mubr.bf16.gmra.mxu1 %v7882_v42  ;;  %v21395_v55 = vadd.f32 %v17086_v1, %v17085_v26  ;;  %v7951_v26 = vsel %vm7731_vm2, %v20911_v22, %v7632_v52  ;;  %v7634_v1 = vpop.permute.xlu0 %7633  ;;  %v18084_v22 = vld [vmem:[%s23692_s5 + $0x150] ss:$8 sps:$4 sm:$0xff]   ;;  %v18107_v52 = vld [vmem:[%s23692_s5 + $0x114] ss:$8 sps:$4 sm:$0xff]  }
 0x419   : > { %8572 = vmatprep.mubr.bf16.mxu1 %v7939_v48  ;;  %v21397_v60 = vpop.f32.mrf.mxu1  ;;  %v7954_v0 = vsel %vm7731_vm2, %v21149_v63, %v7634_v1  ;;  %v18089_v63 = vld [vmem:[%s23692_s5 + $0x144] ss:$8 sps:$4 sm:$0xff]   ;;  %11498 = vmatpush1.bf16.msra.mxu0 %v18084_v22  ;;  %v18111_v1 = vld [vmem:[%s23692_s5 + $0x100] ss:$8 sps:$4 sm:$0xff]  }
 0x41a   : > { %11499 = vmatprep.subr.bf16.mxu0 %v18089_v63  ;;  %v18125_v22 = vld [vmem:[%s23692_s5 + $0x1e4] ss:$8 sps:$4 sm:$0xff]  }
 0x41b   : > { %v21411_v34 = vpop.f32.mrf.mxu1 }
 0x41d   : > { %11500 = vmatpush1.bf16.msra.mxu0 %v18087_v41  ;;  %v18126_v41 = vld [vmem:[%s23692_s5 + $0xb0] ss:$8 sps:$4 sm:$0xff]  }
 0x420   : > { %8573 = vmatmul.mubr.bf16.gmra.mxu1 %v7886_v20  ;;  %v18092_v20 = vld [vmem:[%s23692_s5 + $0x14] ss:$8 sps:$4 sm:$0xff]  }
 0x421   : > { %8580 = vmatprep.mubr.bf16.mxu1 %v7942_v36  ;;  %v18090_v36 = vld [vmem:[%s23692_s5 + $0x10] ss:$8 sps:$4 sm:$0xff]   ;;  %11432 = vmatprep.subr.bf16.mxu1 %v18092_v20 }
 0x422   : > { %11433 = vmatpush1.bf16.msra.mxu1 %v18090_v36  ;;  %v18128_v36 = vld [vmem:[%s23692_s5 + $0xb4] ss:$8 sps:$4 sm:$0xff]  }
 0x424   : > { %v17091_v14 = vpop.f32.mrf.mxu1 }
 0x426   : > { %v17092_v5 = vpop.f32.mrf.mxu1 }
 0x427   : > { %v21417_v37 = vadd.f32 %v17092_v5, %v17091_v14  ;;  %v18095_v14 = vld [vmem:[%s23692_s5 + $0x134] ss:$8 sps:$4 sm:$0xff]   ;;  %v7282_v5 = vpop.permute.xlu1 %7281 }
 0x428   : > { %v21421_v47 = vpop.f32.mrf.mxu1  ;;  %8581 = vmatmul.mubr.bf16.gmra.mxu1 %v7890_v12  ;;  %v7906_v12 = vsel %vm7731_vm2, %v21249_v21, %v7282_v5  ;;  %11501 = vmatprep.subr.bf16.mxu0 %v18095_v14  ;;  %v18129_v14 = vld [vmem:[%s23692_s5 + $0x1d0] ss:$8 sps:$4 sm:$0xff]   ;;  %v18131_v5 = vld [vmem:[%s23692_s5 + $0x1d4] ss:$8 sps:$4 sm:$0xff]  }
 0x429   : > { %8588 = vmatprep.mubr.bf16.mxu1 %v7945_v54  ;;  %11502 = vmatpush1.bf16.msra.mxu0 %v18093_v10 }
 0x42a   : > { %v21425_v16 = vpop.f32.mrf.mxu1 }
 0x430   : > { %8589 = vmatmul.mubr.bf16.gmra.mxu1 %v7894_v44  ;;  %v18098_v44 = vld [vmem:[%s23692_s5 + $0x4] ss:$8 sps:$4 sm:$0xff]  }
 0x431   : > { %v17097_v27 = vpop.f32.mrf.mxu1  ;;  %8596 = vmatprep.mubr.bf16.mxu1 %v7948_v33  ;;  %v18101_v33 = vld [vmem:[%s23692_s5 + $0x124] ss:$8 sps:$4 sm:$0xff]   ;;  %11434 = vmatprep.subr.bf16.mxu1 %v18098_v44  ;;  %v18135_v44 = vld [vmem:[%s23692_s5 + $0x1c0] ss:$8 sps:$4 sm:$0xff]  }
 0x432   : > { %11503 = vmatprep.subr.bf16.mxu0 %v18101_v33 }
 0x433   : > { %v17098_v9 = vpop.f32.mrf.mxu1 }
 0x434   : > { %v21431_v58 = vadd.f32 %v17098_v9, %v17097_v27  ;;  %v18096_v27 = vld [vmem:[%s23692_s5] ss:$8 sps:$4 sm:$0xff]  }
 0x435   : > { %v21433_v4 = vpop.f32.mrf.mxu1  ;;  %v18099_v9 = vld [vmem:[%s23692_s5 + $0x120] ss:$8 sps:$4 sm:$0xff]   ;;  %11435 = vmatpush1.bf16.msra.mxu1 %v18096_v27 }
 0x436   : > { %11504 = vmatpush1.bf16.msra.mxu0 %v18099_v9  ;;  %11436 = vmatprep.subr.bf16.mxu1 %v18104_v62  ;;  %v18140_v9 = vld [vmem:[%s23692_s5 + $0x94] ss:$8 sps:$4 sm:$0xff]   ;;  %v18138_v62 = vld [vmem:[%s23692_s5 + $0x90] ss:$8 sps:$4 sm:$0xff]  }
 0x437   : > { %v21443_v13 = vpop.f32.mrf.mxu1  ;;  %11505 = vmatprep.subr.bf16.mxu0 %v18107_v52  ;;  %v18144_v52 = vld [vmem:[%s23692_s5 + $0x80] ss:$8 sps:$4 sm:$0xff]  }
 0x438   : > { %8597 = vmatmul.mubr.bf16.gmra.mxu1 %v7898_v40  ;;  %v18110_v40 = vld [vmem:[%s23692_s5 + $0xe4] ss:$8 sps:$4 sm:$0xff]  }
 0x439   : > { %8604 = vmatprep.mubr.bf16.mxu1 %v7951_v26  ;;  %v18113_v26 = vld [vmem:[%s23692_s5 + $0x104] ss:$8 sps:$4 sm:$0xff]   ;;  %11437 = vmatpush2.bf16.msra.mxu1 %v18102_v56  ;;  %v18143_v56 = vld [vmem:[%s23692_s5 + $0x1b4] ss:$8 sps:$4 sm:$0xff]  }
 0x43a   : > { %11506 = vmatpush1.bf16.msra.mxu0 %v18105_v35  ;;  %11438 = vmatprep.subr.bf16.mxu1 %v18110_v40  ;;  %v18141_v35 = vld [vmem:[%s23692_s5 + $0x1b0] ss:$8 sps:$4 sm:$0xff]   ;;  %v18146_v40 = vld [vmem:[%s23692_s5 + $0x84] ss:$8 sps:$4 sm:$0xff]  }
 0x43b   : > { %11507 = vmatprep.subr.bf16.mxu0 %v18113_v26  ;;  %v18147_v26 = vld [vmem:[%s23692_s5 + $0x1a0] ss:$8 sps:$4 sm:$0xff]  }
 0x43d   : > { %v17103_v42 = vpop.f32.mrf.mxu1 }
 0x43e   : > { %11508 = vmatpush1.bf16.msra.mxu0 %v18111_v1 }
 0x43f   : > { %v17104_v48 = vpop.f32.mrf.mxu1  ;;  %11509 = vmatprep.subr.bf16.mxu0 %v18119_v11 }
 0x440   : > { %v21447_v45 = vadd.f32 %v17104_v48, %v17103_v42  ;;  %8605 = vmatmul.mubr.bf16.gmra.mxu1 %v7902_v18  ;;  %v18108_v42 = vld [vmem:[%s23692_s5 + $0xe0] ss:$8 sps:$4 sm:$0xff]   ;;  %v18116_v48 = vld [vmem:[%s23692_s5 + $0xd4] ss:$8 sps:$4 sm:$0xff]  }
 0x441   : > { %8612 = vmatprep.mubr.bf16.mxu1 %v7954_v0  ;;  %v21480_v15 = vpop.f32.mrf.mxu1  ;;  %11439 = vmatpush2.bf16.msra.mxu1 %v18108_v42  ;;  %v18114_v0 = vld [vmem:[%s23692_s5 + $0xd0] ss:$8 sps:$4 sm:$0xff]   ;;  %v18120_v18 = vld [vmem:[%s23692_s5 + $0xc0] ss:$8 sps:$4 sm:$0xff]   ;;  %v18149_v42 = vld [vmem:[%s23692_s5 + $0x1a4] ss:$8 sps:$4 sm:$0xff]  }
 0x442   : > { %11440 = vmatprep.subr.bf16.mxu1 %v18116_v48  ;;  %11510 = vmatpush2.bf16.msra.mxu0 %v18117_v25  ;;  %v18157_v25 = vld [vmem:[%s23692_s5 + $0x194] ss:$8 sps:$4 sm:$0xff]  }
 0x443   : > { %v21487_v54 = vpop.f32.mrf.mxu1  ;;  %11511 = vmatprep.subr.bf16.mxu0 %v18125_v22 }
 0x445   : > { %11441 = vmatpush2.bf16.msra.mxu1 %v18114_v0  ;;  %v18155_v0 = vld [vmem:[%s23692_s5 + $0x190] ss:$8 sps:$4 sm:$0xff]  }
 0x446   : > { %11442 = vmatprep.subr.bf16.mxu1 %v18122_v38  ;;  %11512 = vmatpush2.bf16.msra.mxu0 %v18123_v24  ;;  %v18160_v38 = vld [vmem:[%s23692_s5 + $0x184] ss:$8 sps:$4 sm:$0xff]   ;;  %v18158_v24 = vld [vmem:[%s23692_s5 + $0x180] ss:$8 sps:$4 sm:$0xff]  }
 0x447   : > { %11513 = vmatprep.subr.bf16.mxu0 %v18131_v5 }
 0x448   : > { %8613 = vmatmul.mubr.bf16.gmra.mxu1 %v7906_v12  ;;  %v18134_v12 = vld [vmem:[%s23692_s5 + $0xa4] ss:$8 sps:$4 sm:$0xff]  }
 0x449   : > { %11443 = vmatpush2.bf16.msra.mxu1 %v18120_v18 }
 0x44a   : > { %11444 = vmatprep.subr.bf16.mxu1 %v18128_v36  ;;  %11514 = vmatpush2.bf16.msra.mxu0 %v18129_v14 }
 0x44d   : > { %11445 = vmatpush2.bf16.msra.mxu1 %v18126_v41 }
 0x44e   : > { %11446 = vmatprep.subr.bf16.mxu1 %v18134_v12 }
 0x44f   : > { %v17109_v3 = vpop.f32.mrf.mxu1 }
 0x451   : > { %v17110_v23 = vpop.f32.mrf.mxu1 }
 0x452   : > { %v21498_v21 = vadd.f32 %v17110_v23, %v17109_v3  ;;  %v18137_v3 = vld [vmem:[%s23692_s5 + $0x1c4] ss:$8 sps:$4 sm:$0xff]   ;;  %v18132_v23 = vld [vmem:[%s23692_s5 + $0xa0] ss:$8 sps:$4 sm:$0xff]  }
 0x453   : > { %v21551_v63 = vpop.f32.mrf.mxu1  ;;  %11515 = vmatprep.subr.bf16.mxu0 %v18137_v3  ;;  %11447 = vmatpush2.bf16.msra.mxu1 %v18132_v23 }
 0x454   : > { %11516 = vmatpush2.bf16.msra.mxu0 %v18135_v44  ;;  %11448 = vmatprep.subr.bf16.mxu1 %v18140_v9  ;;  %v17759_v44 = vpop.f32.mrf.mxu0 }
 0x455   : > { %v21553_v20 = vpop.f32.mrf.mxu1  ;;  %11517 = vmatprep.subr.bf16.mxu0 %v18143_v56 }
 0x457   : > { %11449 = vmatpush2.bf16.msra.mxu1 %v18138_v62  ;;  %v21636_v62 = vld [vmem:[%s23691_s4] ss:$0 sm:$0xff] }
 0x458   : > { %11518 = vmatpush2.bf16.msra.mxu0 %v18141_v35  ;;  %11450 = vmatprep.subr.bf16.mxu1 %v18146_v40  ;;  %v23944_v35 = vld [vmem:[#allocation31_spill] sm:$0xff] }
 0x459   : > { %11519 = vmatprep.subr.bf16.mxu0 %v18149_v42  ;;  %v8334_v42 = vadd.f32 %v21098_v46, %v21636_v62  ;;  %v17066_v46 = vadd.f32 %v21327_v39, %v21321_v53  ;;  %v17078_v39 = vadd.f32 %v21373_v49, %v21364_v61  ;;  %v17090_v61 = vadd.f32 %v21411_v34, %v21397_v60 }
 0x45b   : > { %11451 = vmatpush2.bf16.msra.mxu1 %v18144_v52  ;;  %v23945_v52 = vld [vmem:[#allocation25_spill] sm:$0xff] }
 0x45c   : > { %11520 = vmatpush2.bf16.msra.mxu0 %v18147_v26  ;;  %v17042_v40 = vadd.f32 %v23945_v52, %v23944_v35 }
 0x45d   : > { %11521 = vmatprep.subr.bf16.mxu0 %v18157_v25  ;;  %v8655_v25 = vpop.f32.mrf.mxu0 }
 0x460   : > { %11522 = vmatpush2.bf16.msra.mxu0 %v18155_v0 }
 0x461   : > { %11523 = vmatprep.subr.bf16.mxu0 %v18160_v38  ;;  %v17054_v38 = vadd.f32 %v21271_v8, %v21264_v30  ;;  %v21656_v30 = vadd.f32 %v21134_v51, %v21636_v62  ;;  %v17072_v8 = vadd.f32 %v21349_v2, %v21345_v29 }
 0x464   : > { %11524 = vmatpush2.bf16.msra.mxu0 %v18158_v24 }
 0x466   : > { %v17115_v10 = vpop.f32.mrf.mxu1 }
 0x468   : > { %v17116_v27 = vpop.f32.mrf.mxu1 }
 0x469   : > { %v21582_v33 = vadd.f32 %v17116_v27, %v17115_v10 }
 0x46a   : > { %v21605_v1 = vpop.f32.mrf.mxu1 }
 0x46b   : > { %23941 = vst [vmem:[#allocation46_spill] sm:$0xff] %v21582_v33 }
 0x46c   : > { %v21607_v48 = vpop.f32.mrf.mxu1 }
 0x478   : > { %v17121_v11 = vpop.f32.mrf.mxu1 }
 0x47a   : > { %v17122_v22 = vpop.f32.mrf.mxu1 }
 0x47b   : > { %v21618_v18 = vadd.f32 %v17122_v22, %v17121_v11  ;;  %v23946_v11 = vld [vmem:[#allocation45_spill] sm:$0xff]  ;;  %v17060_v22 = vadd.f32 %v21295_v57, %v21291_v43  ;;  %v17760_v57 = vpop.f32.mrf.mxu0 }
 0x47c   : > { %v21623_v41 = vpop.f32.mrf.mxu1  ;;  %v17048_v0 = vadd.f32 %v21080_v7, %v23946_v11 }
 0x47d   : > { %23942 = vst [vmem:[#allocation48_spill] sm:$0xff] %v21618_v18  ;;  %v21668_v53 = vadd.f32 %v17060_v22, %v21636_v62 }
 0x47e   : > { %v21625_v36 = vpop.f32.mrf.mxu1  ;;  %v8345_v7 = vadd.f32 %v17048_v0, %v21636_v62 }
 0x488   : > { %v17127_v14 = vpop.f32.mrf.mxu1 }
 0x48a   : > { %v17128_v5 = vpop.f32.mrf.mxu1 }
 0x48b   : > { %v21627_v10 = vadd.f32 %v17128_v5, %v17127_v14 }
 0x48c   : > { %v21629_v12 = vpop.f32.mrf.mxu1 }
 0x48d   : > { %23943 = vst [vmem:[#allocation38_spill] sm:$0xff] %v21627_v10 }
 0x48e   : > { %v21631_v3 = vpop.f32.mrf.mxu1 }
 0x490   : > { %v17149_v23 = vpop.f32.mrf.mxu1 }
 0x492   : > { %v17150_v27 = vpop.f32.mrf.mxu1 }
 0x493   : > { %v17151_v56 = vadd.f32 %v17150_v27, %v17149_v23  ;;  %v8337_v23 = vadd.f32 %v17042_v40, %v21636_v62  ;;  %v8342_v27 = vadd.f32 %v21115_v50, %v21636_v62  ;;  %v21665_v50 = vadd.f32 %v21274_v59, %v21636_v62 }
 0x494   : > { %v17152_v9 = vpop.f32.mrf.mxu1  ;;  %v21677_v40 = vadd.f32 %v17066_v46, %v21636_v62  ;;  %v21681_v59 = vadd.f32 %v21329_v6, %v21636_v62  ;;  %v21694_v6 = vadd.f32 %v21362_v31, %v21636_v62  ;;  %v21726_v46 = vld [vmem:[#allocation3] sm:$0xf] }
 0x495   : > { %v8495_v14 = vadd.f32 %v17151_v56, %v8334_v42  ;;  %v21674_v56 = vadd.f32 %v21297_v32, %v21636_v62  ;;  %v21688_v32 = vadd.f32 %v17072_v8, %v21636_v62  ;;  %v17096_v42 = vadd.f32 %v21425_v16, %v21421_v47  ;;  %v18172_v8 = vld [vmem:[%s23692_s5 + $0x274] ss:$8 sps:$4 sm:$0xff]  }
 0x496   : > { %v17153_v26 = vpop.f32.mrf.mxu1  ;;  %11566 = vmatprep.subr.bf16.mxu1 %v18172_v8 }
 0x497   : > { %v17154_v5 = vadd.f32 %v17153_v26, %v17152_v9  ;;  %v21661_v9 = vadd.f32 %v17054_v38, %v21636_v62  ;;  %v8656_v29 = vadd.f32 %v8655_v25, %v8495_v14  ;;  %v17084_v26 = vadd.f32 %v21389_v28, %v21379_v17  ;;  %v8658_v25 = vpop.f32.mrf.mxu0 }
 0x498   : > { %v17155_v24 = vpop.f32.mrf.mxu1  ;;  %v21697_v38 = vadd.f32 %v17078_v39, %v21636_v62  ;;  %v21701_v17 = vadd.f32 %v21375_v19, %v21636_v62  ;;  %v17102_v28 = vadd.f32 %v21443_v13, %v21433_v4  ;;  %v21715_v19 = vadd.f32 %v17090_v61, %v21636_v62  ;;  %v23951_v39 = vld [vmem:[#allocation8_spill] sm:$0xff] }
 0x499   : > { %v8498_v2 = vadd.f32 %v17154_v5, %v8337_v23  ;;  %v8782_v34 = vmax.f32 %v8656_v29, 0.0  ;;  %v21705_v22 = vpop.f32.mrf.mxu0  ;;  %v21708_v31 = vadd.f32 %v17084_v26, %v21636_v62  ;;  %v17108_v4 = vadd.f32 %v21487_v54, %v21480_v15 }
 0x49a   : > { %v17156_v35 = vpop.f32.mrf.mxu1  ;;  %v21721_v14 = vadd.f32 %v21417_v37, %v21636_v62  ;;  %v21724_v5 = vadd.f32 %v17096_v42, %v21636_v62  ;;  %v21735_v15 = vadd.f32 %v17102_v28, %v21636_v62  ;;  %v21739_v37 = vadd.f32 %v21447_v45, %v21636_v62 }
 0x49b   : > { %v17157_v43 = vadd.f32 %v17156_v35, %v17155_v24  ;;  %v8659_v47 = vadd.f32 %v8658_v25, %v8498_v2  ;;  %v21712_v24 = vadd.f32 %v21395_v55, %v21636_v62  ;;  %v21728_v55 = vld [vmem:[#allocation3 + $0x4] sm:$0x1]  ;;  %v21732_v35 = vadd.f32 %v21431_v58, %v21636_v62  ;;  %v21745_v58 = vld [vmem:[#allocation3] sm:$0xe]  ;;  %v8671_v2 = vpop.f32.mrf.mxu0 }
 0x49c   : > { %v17158_v51 = vpop.f32.mrf.mxu1  ;;  %23947 = vst [vmem:[#allocation41_spill] sm:$0xff] %v21724_v5  ;;  %23949 = vst [vmem:[#allocation14_spill] sm:$0xff] %v21735_v15  ;;  %v21752_v45 = vadd.f32 %v21498_v21, %v21636_v62  ;;  %v21756_v26 = vadd.f32 %v21553_v20, %v21551_v63 }
 0x49d   : > { %v8503_v52 = vadd.f32 %v17157_v43, %v8342_v27  ;;  %23948 = vst [vmem:[#allocation9_spill] sm:$0xff] %v21732_v35  ;;  %23950 = vst [vmem:[#allocation47_spill] sm:$0xff] %v21739_v37  ;;  %v8783_v43 = vmax.f32 %v8659_v47, 0.0 }
 0x49e   : > { %v17159_v49 = vpop.f32.mrf.mxu1  ;;  %23953 = vst [vmem:[#allocation18_spill] sm:$0xff] %v21752_v45 }
 0x49f   : > { %v8664_v11 = vadd.f32 %v17759_v44, %v8503_v52  ;;  %v17160_v0 = vadd.f32 %v17159_v49, %v17158_v51  ;;  %v21748_v52 = vadd.f32 %v17108_v4, %v21636_v62  ;;  %v21760_v49 = vcombine.low %v21726_v46, %v21728_v55  ;;  %v21767_v4 = vpop.f32.mrf.mxu0 }
 0x4a0   : > { %v17161_v60 = vpop.f32.mrf.mxu1 }
 0x4a1   : > { %v8784_v16 = vmax.f32 %v8664_v11, 0.0  ;;  %v8506_v44 = vadd.f32 %v17160_v0, %v8345_v7  ;;  %23952 = vst [vmem:[#allocation10_spill] sm:$0xff] %v21748_v52  ;;  %v8674_v45 = vpop.f32.mrf.mxu0 }
 0x4a2   : > { %v17162_v13 = vpop.f32.mrf.mxu1 }
 0x4a3   : > { %v8814_v23 = vmax.f32 %v8782_v34, %v8784_v16  ;;  %v8667_v27 = vadd.f32 %v17760_v57, %v8506_v44  ;;  %v17163_v54 = vadd.f32 %v17162_v13, %v17161_v60 }
 0x4a4   : > { %v17164_v7 = vpop.f32.mrf.mxu1 }
 0x4a5   : > { %v8846_v57 = vcombine.high %v8814_v23, %v8814_v23  ;;  %v8853_v51 = vrot.slane %v8814_v23, %v23951_v39  ;;  %v8785_v29 = vmax.f32 %v8667_v27, 0.0  ;;  %v8511_v28 = vadd.f32 %v17163_v54, %v21656_v30 }
 0x4a6   : > { %v17165_v61 = vpop.f32.mrf.mxu1 }
 0x4a7   : > { %v8860_v42 = vrot.slane %v8846_v57, %v23951_v39  ;;  %v8861_v11 = vcombine.high %v8853_v51, %v8853_v51  ;;  %v15971_v0 = vrot.slane %v8853_v51, 9  ;;  %v8815_v25 = vmax.f32 %v8783_v43, %v8785_v29 }
 0x4a8   : > { %v17166_v60 = vadd.f32 %v17165_v61, %v17164_v7  ;;  %v17167_v21 = vpop.f32.mrf.mxu1 }
 0x4a9   : > { %v8862_v20 = vcombine.high %v8860_v42, %v8860_v42  ;;  %v15972_v47 = vrot.slane %v8861_v11, 9  ;;  %v15973_v16 = vrot.slane %v8860_v42, 9  ;;  %v9374_v44 = vmax.f32 %v8853_v51, %v15971_v0 }
 0x4aa   : > { %v8863_v13 = vcombine.high %v8815_v25, %v8815_v25  ;;  %v8870_v23 = vrot.slane %v8815_v25, %v23951_v39  ;;  %v8514_v27 = vadd.f32 %v17166_v60, %v21661_v9  ;;  %v17168_v30 = vpop.f32.mrf.mxu1  ;;  %v21773_v51 = vadd.f32 %v8671_v2, %v8511_v28 }
 0x4ab   : > { %v15974_v7 = vrot.slane %v8862_v20, 9  ;;  %v9375_v8 = vmax.f32 %v8861_v11, %v15972_v47  ;;  %v9376_v43 = vmax.f32 %v8860_v42, %v15973_v16  ;;  %v16883_v57 = vpack.c.bf16 %v9374_v44, %v9374_v44 }
 0x4ac   : > { %v8877_v29 = vrot.slane %v8863_v13, %v23951_v39  ;;  %v8878_v61 = vcombine.high %v8870_v23, %v8870_v23  ;;  %v15975_v63 = vrot.slane %v8870_v23, 9  ;;  %v17170_v0 = vpop.f32.mrf.mxu1  ;;  %v8675_v44 = vadd.f32 %v8674_v45, %v8514_v27 }
 0x4ad   : > { %v9377_v34 = vmax.f32 %v8862_v20, %v15974_v7  ;;  %v16884_v10 = vpack.c.bf16 %v9375_v8, %v9375_v8  ;;  %v16885_v18 = vpack.c.bf16 %v9376_v43, %v9376_v43  ;;  %v9714_v25 = vunpack.c.l.b16 %v16883_v57  ;;  %v21775_v20 = vpop.f32.mrf.mxu0 }
 0x4ae   : > { %v8879_v9 = vcombine.high %v8877_v29, %v8877_v29  ;;  %v15976_v60 = vrot.slane %v8878_v61, 9  ;;  %v15977_v33 = vrot.slane %v8877_v29, 9  ;;  %v9378_v54 = vmax.f32 %v8870_v23, %v15975_v63  ;;  %v17171_v11 = vpop.f32.mrf.mxu1 }
 0x4af   : > { %v16886_v42 = vpack.c.bf16 %v9377_v34, %v9377_v34  ;;  %v9715_v47 = vunpack.c.l.b16 %v16884_v10  ;;  %v9716_v16 = vunpack.c.l.b16 %v16885_v18  ;;  %v9778_v8 = vrot.slane %v9714_v25, 7 }
 0x4b0   : > { %v15978_v13 = vrot.slane %v8879_v9, 9  ;;  %v9379_v52 = vmax.f32 %v8878_v61, %v15976_v60  ;;  %v9380_v2 = vmax.f32 %v8877_v29, %v15977_v33  ;;  %v16887_v28 = vpack.c.bf16 %v9378_v54, %v9378_v54  ;;  %v17173_v37 = vpop.f32.mrf.mxu1 }
 0x4b1   : > { %v9717_v7 = vunpack.c.l.b16 %v16886_v42  ;;  %v9779_v43 = vrot.slane %v9715_v47, 6  ;;  %v9781_v57 = vrot.slane %v9716_v16, 5  ;;  %v17169_v45 = vadd.f32 %v17168_v30, %v17167_v21 }
 0x4b2   : > { %v9381_v15 = vmax.f32 %v8879_v9, %v15978_v13  ;;  %v16888_v35 = vpack.c.bf16 %v9379_v52, %v9379_v52  ;;  %v16889_v63 = vpack.c.bf16 %v9380_v2, %v9380_v2  ;;  %v9718_v23 = vunpack.c.l.b16 %v16887_v28  ;;  %v17174_v5 = vpop.f32.mrf.mxu1  ;;  %v9922_v52 = vld [vmem:[#allocation3 + $0xc] sm:$0x1]  ;;  %v8687_v9 = vpop.f32.mrf.mxu0 }
 0x4b3   : > { %v9780_v10 = vsel %vm5508_vm5, %v9779_v43, %v9778_v8  ;;  %v9783_v18 = vrot.slane %v9717_v7, 4  ;;  %v17172_v34 = vadd.f32 %v17171_v11, %v17170_v0  ;;  %v8519_v21 = vadd.f32 %v17169_v45, %v21665_v50 }
 0x4b4   : > { %v9782_v33 = vsel %vm5511_vm6, %v9781_v57, %v9780_v10  ;;  %v9719_v27 = vunpack.c.l.b16 %v16888_v35  ;;  %v9720_v54 = vunpack.c.l.b16 %v16889_v63  ;;  %v9785_v29 = vrot.slane %v9718_v23, 3  ;;  %v17176_v25 = vpop.f32.mrf.mxu1 }
 0x4b5   : > { %v9784_v60 = vsel %vm5514_vm7, %v9783_v18, %v9782_v33  ;;  %v16947_v42 = vpack.c.bf16 %v9381_v15, %v9381_v15  ;;  %v8522_v30 = vadd.f32 %v17172_v34, %v21668_v53  ;;  %v17175_v47 = vadd.f32 %v17174_v5, %v17173_v37  ;;  %v21798_v37 = vpop.f32.mrf.mxu0 }
 0x4b6   : > { %v9786_v35 = vsel %vm5517_vm9, %v9785_v29, %v9784_v60  ;;  %v9787_v0 = vrot.slane %v9719_v27, 2  ;;  %v9789_v11 = vrot.slane %v9720_v54, 1  ;;  %v17177_v16 = vpop.f32.mrf.mxu1  ;;  %v8680_v2 = vadd.f32 %v21705_v22, %v8519_v21 }
 0x4b7   : > { %v9923_v13 = vsel %vm21781_vm12, %v16947_v42, %v9922_v52  ;;  %v8683_v28 = vadd.f32 %v21767_v4, %v8522_v30  ;;  %v17178_v7 = vadd.f32 %v17177_v16, %v17176_v25  ;;  %v8786_v50 = vmax.f32 %v21773_v51, 0.0  ;;  %v9917_v4 = vld [vmem:[#allocation3 + $0x8] sm:$0xf] }
 0x4b8   : > { %v9788_v15 = vsel %vm5520_vm10, %v9787_v0, %v9786_v35  ;;  %9924 = vst [vmem:[#allocation3 + $0xc] sm:$0x1] %v9923_v13  ;;  %v8527_v53 = vadd.f32 %v17175_v47, %v21674_v56  ;;  %v17179_v8 = vpop.f32.mrf.mxu1  ;;  %v23956_v43 = vshll.u32 %v21760_v49, 16  ;;  %v8787_v63 = vmax.f32 %v8675_v44, 0.0 }
 0x4b9   : > { %v9790_v57 = vsel %vm5523_vm13, %v9789_v11, %v9788_v15  ;;  %v8788_v23 = vmax.f32 %v8680_v2, 0.0  ;;  %v8789_v51 = vmax.f32 %v8683_v28, 0.0  ;;  %v21809_v56 = vadd.f32 %v21756_v26, %v21636_v62 }
 0x4ba   : > { %v10085_v5 = vrot.slane %v23956_v43, 1  ;;  %v9882_v10 = vpack.c.b16 %v9790_v57, %v9790_v57  ;;  %v21811_v18 = vadd.f32 %v8687_v9, %v8527_v53  ;;  %v8530_v45 = vadd.f32 %v17178_v7, %v21677_v40  ;;  %v17180_v34 = vpop.f32.mrf.mxu1 }
 0x4bb   : > { %v21816_v33 = vadd.f32 %v21607_v48, %v21605_v1  ;;  %v8816_v27 = vmax.f32 %v8786_v50, %v8788_v23  ;;  %v8817_v54 = vmax.f32 %v8787_v63, %v8789_v51  ;;  %v17181_v29 = vadd.f32 %v17180_v34, %v17179_v8  ;;  %v8690_v48 = vpop.f32.mrf.mxu0 }
 0x4bc   : > { %v21820_v44 = vadd.f32 %v21625_v36, %v21623_v41  ;;  %v9918_v62 = vsel %vm21803_vm8, %v9882_v10, %v9917_v4  ;;  %v17182_v26 = vpop.f32.mrf.mxu1  ;;  %v23959_v52 = vshrl.u32 %v21760_v49, 16  ;;  %v23960_v40 = vcombine.low %v21745_v58, %v21728_v55 }
 0x4bd   : > { %9919 = vst [vmem:[#allocation3 + $0x8] sm:$0xf] %v9918_v62  ;;  %v8880_v9 = vcombine.high %v8816_v27, %v8816_v27  ;;  %v8887_v60 = vrot.slane %v8816_v27, %v23951_v39  ;;  %v8897_v41 = vcombine.high %v8817_v54, %v8817_v54  ;;  %v8904_v36 = vrot.slane %v8817_v54, %v23951_v39  ;;  %v21846_v34 = vpop.f32.mrf.mxu0 }
 0x4be   : > { %v21826_v25 = vor.u32 %v10085_v5, %v23959_v52  ;;  %v21831_v1 = vrot.slane %v23960_v40, 1  ;;  %v21837_v42 = vadd.f32 %v21631_v3, %v21629_v12  ;;  %v8790_v49 = vmax.f32 %v21811_v18, 0.0  ;;  %v17183_v58 = vpop.f32.mrf.mxu1 }
 0x4bf   : > { %v21840_v21 = vadd.f32 %v8690_v48, %v8530_v45  ;;  %v8535_v55 = vadd.f32 %v17181_v29, %v21681_v59  ;;  %v8894_v30 = vrot.slane %v8880_v9, %v23951_v39  ;;  %v8895_v35 = vcombine.high %v8887_v60, %v8887_v60 }
 0x4c0   : > { %v15979_v0 = vrot.slane %v8887_v60, 9  ;;  %v8911_v11 = vrot.slane %v8897_v41, %v23951_v39  ;;  %v8912_v47 = vcombine.high %v8904_v36, %v8904_v36  ;;  %v15983_v16 = vrot.slane %v8904_v36, 9  ;;  %v17185_v12 = vpop.f32.mrf.mxu1 }
 0x4c1   : > { %v8696_v13 = vadd.f32 %v21775_v20, %v8535_v55  ;;  %v17184_v2 = vadd.f32 %v17183_v58, %v17182_v26  ;;  %v8896_v3 = vcombine.high %v8894_v30, %v8894_v30  ;;  %v15980_v28 = vrot.slane %v8895_v35, 9  ;;  %v18183_v26 = vld [vmem:[%s23692_s5 + $0x374] ss:$8 sps:$4 sm:$0xff]  }
 0x4c2   : > { %v15981_v7 = vrot.slane %v8894_v30, 9  ;;  %v9382_v15 = vmax.f32 %v8887_v60, %v15979_v0  ;;  %v8913_v50 = vcombine.high %v8911_v11, %v8911_v11  ;;  %v15984_v53 = vrot.slane %v8912_v47, 9  ;;  %v17186_v43 = vpop.f32.mrf.mxu1  ;;  %11639 = vmatprep.subr.bf16.mxu0 %v18183_v26 }
 0x4c3   : > { %v15985_v59 = vrot.slane %v8911_v11, 9  ;;  %v9386_v8 = vmax.f32 %v8904_v36, %v15983_v16  ;;  %v15982_v5 = vrot.slane %v8896_v3, 9  ;;  %v9383_v57 = vmax.f32 %v8895_v35, %v15980_v28 }
 0x4c4   : > { %v9384_v4 = vmax.f32 %v8894_v30, %v15981_v7  ;;  %v16891_v63 = vpack.c.bf16 %v9382_v15, %v9382_v15  ;;  %v15986_v23 = vrot.slane %v8913_v50, 9  ;;  %v9387_v51 = vmax.f32 %v8912_v47, %v15984_v53  ;;  %v17188_v20 = vpop.f32.mrf.mxu1  ;;  %v9928_v30 = vld [vmem:[#allocation3 + $0x14] sm:$0x1] }
 0x4c5   : > { %v9388_v10 = vmax.f32 %v8911_v11, %v15985_v59  ;;  %v16895_v45 = vpack.c.bf16 %v9386_v8, %v9386_v8  ;;  %v9385_v27 = vmax.f32 %v8896_v3, %v15982_v5  ;;  %v16892_v54 = vpack.c.bf16 %v9383_v57, %v9383_v57  ;;  %v8703_v3 = vpop.f32.mrf.mxu0 }
 0x4c6   : > { %v16893_v29 = vpack.c.bf16 %v9384_v4, %v9384_v4  ;;  %v9722_v62 = vunpack.c.l.b16 %v16891_v63  ;;  %v9389_v52 = vmax.f32 %v8913_v50, %v15986_v23  ;;  %v16896_v40 = vpack.c.bf16 %v9387_v51, %v9387_v51  ;;  %v17189_v60 = vpop.f32.mrf.mxu1 }
 0x4c7   : > { %v16897_v48 = vpack.c.bf16 %v9388_v10, %v9388_v10  ;;  %v9726_v9 = vunpack.c.l.b16 %v16895_v45  ;;  %v16894_v41 = vpack.c.bf16 %v9385_v27, %v9385_v27  ;;  %v9723_v36 = vunpack.c.l.b16 %v16892_v54 }
 0x4c8   : > { %v9724_v55 = vunpack.c.l.b16 %v16893_v29  ;;  %v9791_v58 = vrot.slane %v9722_v62, 7  ;;  %v9727_v35 = vunpack.c.l.b16 %v16896_v40  ;;  %v16948_v47 = vpack.c.bf16 %v9389_v52, %v9389_v52  ;;  %v17191_v16 = vpop.f32.mrf.mxu1  ;;  %v21861_v29 = vpop.f32.mrf.mxu0 }
 0x4c9   : > { %v9728_v0 = vunpack.c.l.b16 %v16897_v48  ;;  %v9798_v11 = vrot.slane %v9726_v9, 3  ;;  %v9725_v28 = vunpack.c.l.b16 %v16894_v41  ;;  %v9792_v7 = vrot.slane %v9723_v36, 6 }
 0x4ca   : > { %v9794_v15 = vrot.slane %v9724_v55, 5  ;;  %v8792_v50 = vmax.f32 %v8696_v13, 0.0  ;;  %v9800_v53 = vrot.slane %v9727_v35, 2  ;;  %v9929_v8 = vsel %vm21781_vm12, %v16948_v47, %v9928_v30  ;;  %v17192_v57 = vpop.f32.mrf.mxu1 }
 0x4cb   : > { %v9802_v59 = vrot.slane %v9728_v0, 1  ;;  %v8538_v5 = vadd.f32 %v17184_v2, %v21688_v32  ;;  %v9793_v4 = vsel %vm5508_vm5, %v9792_v7, %v9791_v58  ;;  %v9796_v63 = vrot.slane %v9725_v28, 4  ;;  %9930 = vst [vmem:[#allocation3 + $0x14] sm:$0x1] %v9929_v8 }
 0x4cc   : > { %v8818_v23 = vmax.f32 %v8790_v49, %v8792_v50  ;;  %v17187_v51 = vadd.f32 %v17186_v43, %v17185_v12  ;;  %v9795_v10 = vsel %vm5511_vm6, %v9794_v15, %v9793_v4  ;;  %v17190_v45 = vadd.f32 %v17189_v60, %v17188_v20  ;;  %v21859_v54 = vpop.f32.mrf.mxu1  ;;  %v9925_v60 = vld [vmem:[#allocation3 + $0x10] sm:$0xf] }
 0x4cd   : > { %v8699_v13 = vadd.f32 %v21798_v37, %v8538_v5  ;;  %v17193_v27 = vadd.f32 %v17192_v57, %v17191_v16  ;;  %v9797_v32 = vsel %vm5514_vm7, %v9796_v63, %v9795_v10  ;;  %v8791_v49 = vmax.f32 %v21840_v21, 0.0  ;;  %v8706_v21 = vpop.f32.mrf.mxu0 }
 0x4ce   : > { %v8914_v2 = vcombine.high %v8818_v23, %v8818_v23  ;;  %v8921_v62 = vrot.slane %v8818_v23, %v23951_v39  ;;  %v8543_v26 = vadd.f32 %v17187_v51, %v21694_v6  ;;  %v9799_v18 = vsel %vm5517_vm9, %v9798_v11, %v9797_v32  ;;  %v17195_v43 = vpop.f32.mrf.mxu1 }
 0x4cf   : > { %v8793_v12 = vmax.f32 %v8699_v13, 0.0  ;;  %v8546_v37 = vadd.f32 %v17190_v45, %v21697_v38  ;;  %v9801_v20 = vsel %vm5520_vm10, %v9800_v53, %v9799_v18  ;;  %v8551_v6 = vadd.f32 %v17193_v27, %v21701_v17 }
 0x4d0   : > { %v8928_v52 = vrot.slane %v8914_v2, %v23951_v39  ;;  %v8929_v40 = vcombine.high %v8921_v62, %v8921_v62  ;;  %v15987_v48 = vrot.slane %v8921_v62, 9  ;;  %v9803_v9 = vsel %vm5523_vm13, %v9802_v59, %v9801_v20  ;;  %v21875_v55 = vpop.f32.mrf.mxu1 }
 0x4d1   : > { %v8819_v41 = vmax.f32 %v8791_v49, %v8793_v12  ;;  %v21872_v36 = vadd.f32 %v8703_v3, %v8543_v26  ;;  %v9884_v58 = vpack.c.b16 %v9803_v9, %v9803_v9  ;;  %v21878_v16 = vadd.f32 %v8706_v21, %v8546_v37 }
 0x4d2   : > { %v8930_v38 = vcombine.high %v8928_v52, %v8928_v52  ;;  %v15988_v30 = vrot.slane %v8929_v40, 9  ;;  %v15989_v35 = vrot.slane %v8928_v52, 9  ;;  %v9390_v0 = vmax.f32 %v8921_v62, %v15987_v48  ;;  %v21880_v28 = vpop.f32.mrf.mxu1 }
 0x4d3   : > { %v8931_v11 = vcombine.high %v8819_v41, %v8819_v41  ;;  %v8938_v47 = vrot.slane %v8819_v41, %v23951_v39  ;;  %v9926_v3 = vsel %vm21803_vm8, %v9884_v58, %v9925_v60  ;;  %v8794_v23 = vmax.f32 %v21872_v36, 0.0 }
 0x4d4   : > { %v15990_v7 = vrot.slane %v8930_v38, 9  ;;  %v9391_v17 = vmax.f32 %v8929_v40, %v15988_v30  ;;  %v9392_v15 = vmax.f32 %v8928_v52, %v15989_v35  ;;  %9927 = vst [vmem:[#allocation3 + $0x10] sm:$0xf] %v9926_v3  ;;  %v16899_v50 = vpack.c.bf16 %v9390_v0, %v9390_v0  ;;  %v21885_v5 = vpop.f32.mrf.mxu1  ;;  %v9934_v0 = vld [vmem:[#allocation3 + $0x1c] sm:$0x1] }
 0x4d5   : > { %v8945_v53 = vrot.slane %v8931_v11, %v23951_v39  ;;  %v8946_v59 = vcombine.high %v8938_v47, %v8938_v47  ;;  %v15991_v8 = vrot.slane %v8938_v47, 9  ;;  %v8712_v21 = vadd.f32 %v21846_v34, %v8551_v6 }
 0x4d6   : > { %v9393_v57 = vmax.f32 %v8930_v38, %v15990_v7  ;;  %v16900_v4 = vpack.c.bf16 %v9391_v17, %v9391_v17  ;;  %v16901_v63 = vpack.c.bf16 %v9392_v15, %v9392_v15  ;;  %v9730_v51 = vunpack.c.l.b16 %v16899_v50  ;;  %v21888_v27 = vpop.f32.mrf.mxu1  ;;  %v9984_v50 = vld [vmem:[#allocation3 + $0x8] sm:$0xe] }
 0x4d7   : > { %v8947_v10 = vcombine.high %v8945_v53, %v8945_v53  ;;  %v15992_v13 = vrot.slane %v8946_v59, 9  ;;  %v15993_v45 = vrot.slane %v8945_v53, 9  ;;  %v9394_v26 = vmax.f32 %v8938_v47, %v15991_v8  ;;  %v21897_v47 = vld [vmem:[#allocation3 + $0x8] sm:$0xf] }
 0x4d8   : > { %v16902_v32 = vpack.c.bf16 %v9393_v57, %v9393_v57  ;;  %v9731_v2 = vunpack.c.l.b16 %v16900_v4  ;;  %v9732_v62 = vunpack.c.l.b16 %v16901_v63  ;;  %v9804_v18 = vrot.slane %v9730_v51, 7  ;;  %v21890_v20 = vpop.f32.mrf.mxu1  ;;  %v9976_v57 = vld [vmem:[#allocation3 + $0xc] sm:$0x1] }
 0x4d9   : > { %v15994_v49 = vrot.slane %v8947_v10, 9  ;;  %v9395_v12 = vmax.f32 %v8946_v59, %v15992_v13  ;;  %v9396_v37 = vmax.f32 %v8945_v53, %v15993_v45  ;;  %v16903_v9 = vpack.c.bf16 %v9394_v26, %v9394_v26 }
 0x4da   : > { %v9733_v52 = vunpack.c.l.b16 %v16902_v32  ;;  %v9805_v40 = vrot.slane %v9731_v2, 6  ;;  %v9807_v48 = vrot.slane %v9732_v62, 5  ;;  %v21893_v58 = vpop.f32.mrf.mxu1  ;;  %v17196_v11 = vadd.f32 %v17195_v43, %v21859_v54 }
 0x4db   : > { %v9397_v60 = vmax.f32 %v8947_v10, %v15994_v49  ;;  %v16904_v41 = vpack.c.bf16 %v9395_v12, %v9395_v12  ;;  %v16905_v36 = vpack.c.bf16 %v9396_v37, %v9396_v37  ;;  %v9734_v35 = vunpack.c.l.b16 %v16903_v9  ;;  %v21909_v10 = vpop.f32.mrf.mxu0  ;;  %v9931_v37 = vld [vmem:[#allocation3 + $0x18] sm:$0xf] }
 0x4dc   : > { %v9806_v38 = vsel %vm5508_vm5, %v9805_v40, %v9804_v18  ;;  %v9809_v30 = vrot.slane %v9733_v52, 4  ;;  %v21900_v53 = vpop.f32.mrf.mxu1  ;;  %v8796_v59 = vmax.f32 %v8712_v21, 0.0  ;;  %v8554_v8 = vadd.f32 %v17196_v11, %v21708_v31 }
 0x4dd   : > { %v9808_v3 = vsel %vm5511_vm6, %v9807_v48, %v9806_v38  ;;  %v9735_v7 = vunpack.c.l.b16 %v16904_v41  ;;  %v9736_v17 = vunpack.c.l.b16 %v16905_v36  ;;  %v16949_v15 = vpack.c.bf16 %v9397_v60, %v9397_v60 }
 0x4de   : > { %v9810_v34 = vsel %vm5514_vm7, %v9809_v30, %v9808_v3  ;;  %v9811_v6 = vrot.slane %v9734_v35, 3  ;;  %v16108_v43 = vcombine.low %v21897_v47, %v9976_v57  ;;  %v21907_v51 = vpop.f32.mrf.mxu1  ;;  %v8820_v45 = vmax.f32 %v8794_v23, %v8796_v59 }
 0x4df   : > { %v9813_v4 = vrot.slane %v9735_v7, 2  ;;  %v9815_v63 = vrot.slane %v9736_v17, 1  ;;  %v9935_v54 = vsel %vm21781_vm12, %v16949_v15, %v9934_v0  ;;  %v8715_v32 = vadd.f32 %v21861_v29, %v8554_v8 }
 0x4e0   : > { %v9812_v13 = vsel %vm5517_vm9, %v9811_v6, %v9810_v34  ;;  %9936 = vst [vmem:[#allocation3 + $0x1c] sm:$0x1] %v9935_v54  ;;  %v16116_v2 = vcombine.low %v9984_v50, %v9976_v57  ;;  %v8795_v62 = vmax.f32 %v21878_v16, 0.0  ;;  %v10088_v26 = vshrl.u32 %v16108_v43, 16  ;;  %v21915_v49 = vpop.f32.mrf.mxu1  ;;  %v8719_v16 = vpop.f32.mrf.mxu0  ;;  %v18177_v54 = vld [vmem:[%s23692_s5 + $0x264] ss:$8 sps:$4 sm:$0xff]  }
 0x4e1   : > { %v9814_v31 = vsel %vm5520_vm10, %v9813_v4, %v9812_v13  ;;  %v10090_v18 = vshll.u32 %v16108_v43, 16  ;;  %v8948_v52 = vcombine.high %v8820_v45, %v8820_v45  ;;  %v8955_v40 = vrot.slane %v8820_v45, %v23951_v39 }
 0x4e2   : > { %v9816_v12 = vsel %vm5523_vm13, %v9815_v63, %v9814_v31  ;;  %v8797_v48 = vmax.f32 %v8715_v32, 0.0  ;;  %v21919_v60 = vrot.slane %v16116_v2, 1  ;;  %v17199_v29 = vadd.f32 %v21880_v28, %v21875_v55  ;;  %v21923_v41 = vpop.f32.mrf.mxu1 }
 0x4e3   : > { %v9886_v9 = vpack.c.b16 %v9816_v12, %v9816_v12  ;;  %v10092_v23 = vrot.slane %v10090_v18, 1  ;;  %v8962_v36 = vrot.slane %v8948_v52, %v23951_v39  ;;  %v8963_v21 = vcombine.high %v8955_v40, %v8955_v40 }
 0x4e4   : > { %v15995_v38 = vrot.slane %v8955_v40, 9  ;;  %v8821_v30 = vmax.f32 %v8795_v62, %v8797_v48  ;;  %v16155_v11 = vcombine.low %v21726_v46, %v21897_v47  ;;  %v8559_v3 = vadd.f32 %v17199_v29, %v21712_v24  ;;  %v21931_v7 = vpop.f32.mrf.mxu1  ;;  %v18170_v24 = vld [vmem:[%s23692_s5 + $0x270] ss:$8 sps:$4 sm:$0xff]   ;;  %v21942_v46 = vpop.f32.mrf.mxu0  ;;  %v18175_v48 = vld [vmem:[%s23692_s5 + $0x260] ss:$8 sps:$4 sm:$0xff]  }
 0x4e5   : > { %v9932_v35 = vsel %vm21803_vm8, %v9886_v9, %v9931_v37  ;;  %v10093_v0 = vor.u32 %v10092_v23, %v10088_v26  ;;  %v8964_v55 = vcombine.high %v8962_v36, %v8962_v36  ;;  %v15996_v28 = vrot.slane %v8963_v21, 9 }
 0x4e6   : > { %9933 = vst [vmem:[#allocation3 + $0x18] sm:$0xf] %v9932_v35  ;;  %v15997_v17 = vrot.slane %v8962_v36, 9  ;;  %v9398_v15 = vmax.f32 %v8955_v40, %v15995_v38  ;;  %v8965_v50 = vcombine.high %v8821_v30, %v8821_v30  ;;  %v8972_v34 = vrot.slane %v8821_v30, %v23951_v39  ;;  %v21937_v8 = vpop.f32.mrf.mxu1  ;;  %v8722_v9 = vpop.f32.mrf.mxu0 }
 0x4e7   : > { %v16156_v6 = vcombine.low %v21826_v25, %v10093_v0  ;;  %v16157_v59 = vcombine.low %v21831_v1, %v21919_v60  ;;  %v15998_v47 = vrot.slane %v8964_v55, 9  ;;  %v9399_v57 = vmax.f32 %v8963_v21, %v15996_v28  ;;  %v18180_v21 = vld [vmem:[%s23692_s5 + $0x254] ss:$8 sps:$4 sm:$0xff]   ;;  %v23963_v60 = vld [vmem:[#allocation14_spill] sm:$0xff] }
 0x4e8   : > { %v9400_v4 = vmax.f32 %v8962_v36, %v15997_v17  ;;  %v16907_v63 = vpack.c.bf16 %v9398_v15, %v9398_v15  ;;  %v8979_v25 = vrot.slane %v8965_v50, %v23951_v39  ;;  %v8980_v43 = vcombine.high %v8972_v34, %v8972_v34  ;;  %v21950_v32 = vpop.f32.mrf.mxu1 }
 0x4e9   : > { %v15999_v13 = vrot.slane %v8972_v34, 9  ;;  %11452 = vmatprep.mubr.bf16.mxu1 %v16156_v6  ;;  %v21948_v45 = vadd.f32 %v8719_v16, %v8559_v3  ;;  %v9401_v2 = vmax.f32 %v8964_v55, %v15998_v47  ;;  %v16908_v31 = vpack.c.bf16 %v9399_v57, %v9399_v57  ;;  %v21962_v55 = vpop.f32.mrf.mxu0  ;;  %v9992_v57 = vld [vmem:[#allocation3 + $0x10] sm:$0xf] }
 0x4ea   : > { %v16909_v62 = vpack.c.bf16 %v9400_v4, %v9400_v4  ;;  %v9738_v26 = vunpack.c.l.b16 %v16907_v63  ;;  %11453 = vmatmul.mubr.bf16.vlgmr.msra.gmra.mxu1 %v16155_v11  ;;  %v8981_v18 = vcombine.high %v8979_v25, %v8979_v25  ;;  %v16000_v12 = vrot.slane %v8980_v43, 9  ;;  %v21952_v40 = vpop.f32.mrf.mxu1  ;;  %v9991_v11 = vld [vmem:[#allocation3 + $0x8] sm:$0xf]  ;;  %v9999_v4 = vld [vmem:[#allocation3 + $0xc] sm:$0x1] }
 0x4eb   : > { %v16001_v37 = vrot.slane %v8979_v25, 9  ;;  %v9402_v52 = vmax.f32 %v8972_v34, %v15999_v13  ;;  %11567 = vmatpush1.bf16.msra.mxu1 %v18170_v24  ;;  %v16910_v23 = vpack.c.bf16 %v9401_v2, %v9401_v2  ;;  %v9739_v29 = vunpack.c.l.b16 %v16908_v31 }
 0x4ec   : > { %v9740_v16 = vunpack.c.l.b16 %v16909_v62  ;;  %v9817_v36 = vrot.slane %v9738_v26, 7  ;;  %11568 = vmatprep.subr.bf16.mxu1 %v18177_v54  ;;  %v16002_v38 = vrot.slane %v8981_v18, 9  ;;  %v9403_v30 = vmax.f32 %v8980_v43, %v16000_v12  ;;  %v21960_v3 = vpop.f32.mrf.mxu1  ;;  %v18178_v54 = vld [vmem:[%s23692_s5 + $0x250] ss:$8 sps:$4 sm:$0xff]   ;;  %v10000_v12 = vld [vmem:[#allocation3 + $0x14] sm:$0x1] }
 0x4ed   : > { %v9404_v35 = vmax.f32 %v8979_v25, %v16001_v37  ;;  %v16911_v0 = vpack.c.bf16 %v9402_v52, %v9402_v52  ;;  %v9741_v28 = vunpack.c.l.b16 %v16910_v23  ;;  %v9818_v17 = vrot.slane %v9739_v29, 6  ;;  %v8735_v52 = vpop.f32.mrf.mxu0 }
 0x4ee   : > { %v9820_v15 = vrot.slane %v9740_v16, 5  ;;  %v17202_v50 = vadd.f32 %v21888_v27, %v21885_v5  ;;  %v9405_v34 = vmax.f32 %v8981_v18, %v16002_v38  ;;  %v16912_v6 = vpack.c.bf16 %v9403_v30, %v9403_v30  ;;  %v21966_v63 = vpop.f32.mrf.mxu1  ;;  %v18186_v5 = vld [vmem:[%s23692_s5 + $0x244] ss:$8 sps:$4 sm:$0xff]   ;;  %v9940_v18 = vld [vmem:[#allocation3 + $0x24] sm:$0x1] }
 0x4ef   : > { %v16913_v24 = vpack.c.bf16 %v9404_v35, %v9404_v35  ;;  %v9742_v47 = vunpack.c.l.b16 %v16911_v0  ;;  %11569 = vmatpush1.bf16.msra.mxu1 %v18175_v48  ;;  %v9819_v25 = vsel %vm5508_vm5, %v9818_v17, %v9817_v36  ;;  %v9822_v43 = vrot.slane %v9741_v28, 4  ;;  %v18184_v35 = vld [vmem:[%s23692_s5 + $0x240] ss:$8 sps:$4 sm:$0xff]  }
 0x4f0   : > { %v8562_v13 = vadd.f32 %v17202_v50, %v21715_v19  ;;  %v16123_v2 = vcombine.low %v9991_v11, %v9999_v4  ;;  %11570 = vmatprep.subr.bf16.mxu1 %v18180_v21  ;;  %v9821_v27 = vsel %vm5511_vm6, %v9820_v15, %v9819_v25  ;;  %v9743_v31 = vunpack.c.l.b16 %v16912_v6  ;;  %v21977_v37 = vpop.f32.mrf.mxu1  ;;  %v21999_v4 = vpop.f32.mrf.mxu0  ;;  %v9937_v25 = vld [vmem:[#allocation3 + $0x20] sm:$0xf] }
 0x4f1   : > { %v9744_v62 = vunpack.c.l.b16 %v16913_v24  ;;  %v9824_v26 = vrot.slane %v9742_v47, 3  ;;  %v9823_v48 = vsel %vm5514_vm7, %v9822_v43, %v9821_v27  ;;  %v16950_v23 = vpack.c.bf16 %v9405_v34, %v9405_v34  ;;  %v18181_v47 = vld [vmem:[%s23692_s5 + $0x370] ss:$8 sps:$4 sm:$0xff]  }
 0x4f2   : > { %v8798_v19 = vmax.f32 %v21948_v45, 0.0  ;;  %v16124_v29 = vcombine.low %v9992_v57, %v10000_v12  ;;  %v9826_v36 = vrot.slane %v9743_v31, 2  ;;  %v21982_v38 = vadd.f32 %v8722_v9, %v8562_v13  ;;  %v21984_v30 = vpop.f32.mrf.mxu1  ;;  %v23962_v31 = vld [vmem:[#allocation9_spill] sm:$0xff] }
 0x4f3   : > { %v9825_v16 = vsel %vm5517_vm9, %v9824_v26, %v9823_v48  ;;  %v9828_v21 = vrot.slane %v9744_v62, 1  ;;  %11571 = vmatpush1.bf16.msra.mxu1 %v18178_v54  ;;  %v9941_v0 = vsel %vm21781_vm12, %v16950_v23, %v9940_v18  ;;  %v10209_v28 = vshrl.u32 %v16123_v2, 16  ;;  %v18190_v62 = vld [vmem:[%s23692_s5 + $0x230] ss:$8 sps:$4 sm:$0xff]   ;;  %v8738_v48 = vpop.f32.mrf.mxu0 }
 0x4f4   : > { %v10211_v17 = vshll.u32 %v16123_v2, 16  ;;  %v10216_v15 = vshrl.u32 %v16124_v29, 16  ;;  %11572 = vmatprep.subr.bf16.mxu1 %v18186_v5  ;;  %v9827_v50 = vsel %vm5520_vm10, %v9826_v36, %v9825_v16  ;;  %9942 = vst [vmem:[#allocation3 + $0x24] sm:$0x1] %v9941_v0  ;;  %v10218_v34 = vshll.u32 %v16124_v29, 16  ;;  %v21994_v24 = vpop.f32.mrf.mxu1  ;;  %v23964_v16 = vld [vmem:[#allocation47_spill] sm:$0xff] }
 0x4f5   : > { %v16158_v9 = vcombine.low %v9991_v11, %v9992_v57  ;;  %v17205_v6 = vadd.f32 %v21893_v58, %v21890_v20  ;;  %v9829_v54 = vsel %vm5523_vm13, %v9828_v21, %v9827_v50  ;;  %v17208_v13 = vadd.f32 %v21907_v51, %v21900_v53  ;;  %v18189_v20 = vld [vmem:[%s23692_s5 + $0x364] ss:$8 sps:$4 sm:$0xff]   ;;  %v18192_v53 = vld [vmem:[%s23692_s5 + $0x234] ss:$8 sps:$4 sm:$0xff]   ;;  %v22049_v21 = vld [vmem:[#allocation3 + $0x18] sm:$0xf] }
 0x4f6   : > { %v10213_v43 = vrot.slane %v10211_v17, 1  ;;  %v17211_v11 = vadd.f32 %v21923_v41, %v21915_v49  ;;  %v9888_v58 = vpack.c.b16 %v9829_v54, %v9829_v54  ;;  %v10220_v57 = vrot.slane %v10218_v34, 1  ;;  %v22012_v27 = vpop.f32.mrf.mxu1  ;;  %v23961_v49 = vld [vmem:[#allocation41_spill] sm:$0xff]  ;;  %v23965_v34 = vld [vmem:[#allocation10_spill] sm:$0xff] }
 0x4f7   : > { %11525 = vmatprep.mubr.bf16.mxu0 %v16158_v9  ;;  %v8567_v2 = vadd.f32 %v17205_v6, %v21721_v14  ;;  %v17214_v5 = vadd.f32 %v21937_v8, %v21931_v7  ;;  %11573 = vmatpush1.bf16.msra.mxu1 %v18184_v35  ;;  %v8570_v41 = vadd.f32 %v17208_v13, %v23961_v49  ;;  %v22026_v8 = vld [vmem:[#allocation3 + $0x10] sm:$0xf]  ;;  %v22051_v35 = vld [vmem:[#allocation3 + $0x14] sm:$0x1]  ;;  %v18195_v0 = vld [vmem:[%s23692_s5 + $0x354] ss:$8 sps:$4 sm:$0xff]  }
 0x4f8   : > { %v22017_v51 = vor.u32 %v10213_v43, %v10209_v28  ;;  %11526 = vmatmul.mubr.bf16.vlgmr.msra.gmra.mxu0 %v16157_v59  ;;  %v8575_v14 = vadd.f32 %v17211_v11, %v23962_v31  ;;  %v17217_v7 = vadd.f32 %v21952_v40, %v21950_v32  ;;  %v9938_v26 = vsel %vm21803_vm8, %v9888_v58, %v9937_v25  ;;  %v22037_v12 = vpop.f32.mrf.mxu1  ;;  %v18187_v32 = vld [vmem:[%s23692_s5 + $0x360] ss:$8 sps:$4 sm:$0xff]   ;;  %v18198_v40 = vld [vmem:[%s23692_s5 + $0x224] ss:$8 sps:$4 sm:$0xff]   ;;  %v22069_v6 = vld [vmem:[#allocation3 + $0x1c] sm:$0x1] }
 0x4f9   : > { %v22033_v18 = vor.u32 %v10220_v57, %v10216_v15  ;;  %v8728_v1 = vadd.f32 %v21909_v10, %v8567_v2  ;;  %v8578_v59 = vadd.f32 %v17214_v5, %v23963_v60  ;;  %11640 = vmatpush1.bf16.msra.mxu0 %v18181_v47  ;;  %9939 = vst [vmem:[#allocation3 + $0x20] sm:$0xf] %v9938_v26  ;;  %v18196_v47 = vld [vmem:[%s23692_s5 + $0x220] ss:$8 sps:$4 sm:$0xff]   ;;  %v18206_v13 = vld [vmem:[%s23692_s5 + $0x214] ss:$8 sps:$4 sm:$0xff]  }
 0x4fa   : > { %v8731_v23 = vadd.f32 %v21942_v46, %v8570_v41  ;;  %v8736_v29 = vadd.f32 %v8735_v52, %v8575_v14  ;;  %v8583_v10 = vadd.f32 %v17217_v7, %v23964_v16  ;;  %v17220_v36 = vadd.f32 %v21966_v63, %v21960_v3  ;;  %11641 = vmatprep.subr.bf16.mxu0 %v18189_v20  ;;  %v22064_v3 = vpop.f32.mrf.mxu1  ;;  %v18201_v57 = vld [vmem:[%s23692_s5 + $0x344] ss:$8 sps:$4 sm:$0xff]   ;;  %v18204_v7 = vld [vmem:[%s23692_s5 + $0x210] ss:$8 sps:$4 sm:$0xff]  }
 0x4fb   : > { %v16159_v28 = vcombine.low %v22017_v51, %v22033_v18  ;;  %v8800_v17 = vmax.f32 %v8728_v1, 0.0  ;;  %v22058_v46 = vadd.f32 %v8738_v48, %v8578_v59  ;;  %v22062_v52 = vcombine.low %v22026_v8, %v22051_v35  ;;  %11574 = vmatprep.subr.bf16.mxu1 %v18192_v53  ;;  %v18199_v59 = vld [vmem:[%s23692_s5 + $0x340] ss:$8 sps:$4 sm:$0xff]  }
 0x4fc   : > { %v8799_v63 = vmax.f32 %v21982_v38, 0.0  ;;  %v8801_v15 = vmax.f32 %v8731_v23, 0.0  ;;  %v8744_v50 = vadd.f32 %v21962_v55, %v8583_v10  ;;  %v8586_v9 = vadd.f32 %v17220_v36, %v23965_v34  ;;  %11575 = vmatpush1.bf16.msra.mxu1 %v18190_v62  ;;  %v18193_v55 = vld [vmem:[%s23692_s5 + $0x350] ss:$8 sps:$4 sm:$0xff]   ;;  %v22091_v58 = vpop.f32.mrf.mxu1  ;;  %v18210_v10 = vld [vmem:[%s23692_s5 + $0x334] ss:$8 sps:$4 sm:$0xff]  }
 0x4fd   : > { %v8822_v54 = vmax.f32 %v8798_v19, %v8800_v17  ;;  %v8802_v25 = vmax.f32 %v8736_v29, 0.0  ;;  %v8803_v43 = vmax.f32 %v22058_v46, 0.0  ;;  %v22079_v38 = vcombine.low %v22049_v21, %v22069_v6  ;;  %11642 = vmatpush1.bf16.msra.mxu0 %v18187_v32  ;;  %11576 = vmatprep.subr.bf16.mxu1 %v18198_v40  ;;  %v18213_v32 = vld [vmem:[%s23692_s5 + $0x204] ss:$8 sps:$4 sm:$0xff]   ;;  %v18236_v46 = vld [vmem:[%s23692_s5 + $0x2d4] ss:$8 sps:$4 sm:$0xff]  }
 0x4fe   : > { %v8823_v11 = vmax.f32 %v8799_v63, %v8801_v15  ;;  %v8804_v45 = vmax.f32 %v8744_v50, 0.0  ;;  %v22088_v19 = vadd.f32 %v21999_v4, %v8586_v9  ;;  %v10095_v20 = vshrl.u32 %v22062_v52, 16  ;;  %11643 = vmatprep.subr.bf16.mxu0 %v18195_v0  ;;  %v22117_v16 = vpop.f32.mrf.mxu1  ;;  %v22510_v18 = vld [vmem:[#allocation3 + $0x48] sm:$0xf] }
 0x4ff   : > { %v8982_v2 = vcombine.high %v8822_v54, %v8822_v54  ;;  %v8989_v5 = vrot.slane %v8822_v54, %v23951_v39  ;;  %v10097_v53 = vshll.u32 %v22062_v52, 16  ;;  %v10102_v49 = vshrl.u32 %v22079_v38, 16  ;;  %v18243_v52 = vld [vmem:[%s23692_s5 + $0x3e0] ss:$8 sps:$4 sm:$0xff]  }
 0x500   : > { %v8999_v41 = vcombine.high %v8823_v11, %v8823_v11  ;;  %v9006_v4 = vrot.slane %v8823_v11, %v23951_v39  ;;  %v22100_v31 = vmax.f32 %v8802_v25, %v8804_v45  ;;  %v10104_v14 = vshll.u32 %v22079_v38, 16  ;;  %11577 = vmatpush1.bf16.msra.mxu1 %v18196_v47  ;;  %v18211_v47 = vld [vmem:[%s23692_s5 + $0x200] ss:$8 sps:$4 sm:$0xff]   ;;  %v18208_v11 = vld [vmem:[%s23692_s5 + $0x330] ss:$8 sps:$4 sm:$0xff]  }
 0x501   : > { %v8996_v62 = vrot.slane %v8982_v2, %v23951_v39  ;;  %v8997_v26 = vcombine.high %v8989_v5, %v8989_v5  ;;  %v16003_v1 = vrot.slane %v8989_v5, 9  ;;  %v8805_v60 = vmax.f32 %v22088_v19, 0.0  ;;  %11644 = vmatpush1.bf16.msra.mxu0 %v18193_v55  ;;  %11578 = vmatprep.subr.bf16.mxu1 %v18206_v13  ;;  %v18222_v45 = vld [vmem:[%s23692_s5 + $0x2f4] ss:$8 sps:$4 sm:$0xff]  }
 0x502   : > { %v9013_v40 = vrot.slane %v8999_v41, %v23951_v39  ;;  %v9014_v48 = vcombine.high %v9006_v4, %v9006_v4  ;;  %v16007_v23 = vrot.slane %v9006_v4, 9  ;;  %v9016_v29 = vcombine.high %v22100_v31, %v22100_v31  ;;  %11645 = vmatprep.subr.bf16.mxu0 %v18201_v57  ;;  %v18251_v38 = vld [vmem:[%s23692_s5 + $0x3d4] ss:$8 sps:$4 sm:$0xff]  }
 0x503   : > { %v8998_v36 = vcombine.high %v8996_v62, %v8996_v62  ;;  %v16004_v0 = vrot.slane %v8997_v26, 9  ;;  %v16005_v17 = vrot.slane %v8996_v62, 9  ;;  %v9406_v63 = vmax.f32 %v8989_v5, %v16003_v1 }
 0x504   : > { %v9015_v15 = vcombine.high %v9013_v40, %v9013_v40  ;;  %v16008_v50 = vrot.slane %v9014_v48, 9  ;;  %v16009_v34 = vrot.slane %v9013_v40, 9  ;;  %v9410_v9 = vmax.f32 %v9006_v4, %v16007_v23  ;;  %11579 = vmatpush1.bf16.msra.mxu1 %v18204_v7  ;;  %v22131_v4 = vpop.f32.mrf.mxu1  ;;  %v18216_v7 = vld [vmem:[%s23692_s5 + $0x324] ss:$8 sps:$4 sm:$0xff]  }
 0x505   : > { %v16006_v54 = vrot.slane %v8998_v36, 9  ;;  %v9407_v25 = vmax.f32 %v8997_v26, %v16004_v0  ;;  %v9408_v55 = vmax.f32 %v8996_v62, %v16005_v17  ;;  %v16915_v13 = vpack.c.bf16 %v9406_v63, %v9406_v63  ;;  %11646 = vmatpush1.bf16.msra.mxu0 %v18199_v59  ;;  %11580 = vmatprep.subr.bf16.mxu1 %v18213_v32  ;;  %v9946_v63 = vld [vmem:[#allocation3 + $0x2c] sm:$0x1] }
 0x506   : > { %v16010_v57 = vrot.slane %v9015_v15, 9  ;;  %v9411_v2 = vmax.f32 %v9014_v48, %v16008_v50  ;;  %v9412_v5 = vmax.f32 %v9013_v40, %v16009_v34  ;;  %v16919_v41 = vpack.c.bf16 %v9410_v9, %v9410_v9  ;;  %11647 = vmatprep.subr.bf16.mxu0 %v18210_v10  ;;  %v18220_v40 = vld [vmem:[%s23692_s5 + $0x2f0] ss:$8 sps:$4 sm:$0xff]  }
 0x507   : > { %v9409_v62 = vmax.f32 %v8998_v36, %v16006_v54  ;;  %v16916_v26 = vpack.c.bf16 %v9407_v25, %v9407_v25  ;;  %v16917_v1 = vpack.c.bf16 %v9408_v55, %v9408_v55  ;;  %v9746_v59 = vunpack.c.l.b16 %v16915_v13  ;;  %v18214_v36 = vld [vmem:[%s23692_s5 + $0x320] ss:$8 sps:$4 sm:$0xff]   ;;  %v22145_v55 = vpop.f32.mrf.mxu1  ;;  %v18227_v13 = vld [vmem:[%s23692_s5 + $0x314] ss:$8 sps:$4 sm:$0xff]  }
 0x508   : > { %v9413_v32 = vmax.f32 %v9015_v15, %v16010_v57  ;;  %v16920_v23 = vpack.c.bf16 %v9411_v2, %v9411_v2  ;;  %v16921_v0 = vpack.c.bf16 %v9412_v5, %v9412_v5  ;;  %v9750_v17 = vunpack.c.l.b16 %v16919_v41  ;;  %11581 = vmatpush1.bf16.msra.mxu1 %v18211_v47  ;;  %v18230_v15 = vld [vmem:[%s23692_s5 + $0x2e4] ss:$8 sps:$4 sm:$0xff]  }
 0x509   : > { %v16918_v48 = vpack.c.bf16 %v9409_v62, %v9409_v62  ;;  %v9747_v10 = vunpack.c.l.b16 %v16916_v26  ;;  %v9748_v50 = vunpack.c.l.b16 %v16917_v1  ;;  %v9830_v34 = vrot.slane %v9746_v59, 7  ;;  %11648 = vmatpush1.bf16.msra.mxu0 %v18208_v11  ;;  %11582 = vmatprep.subr.bf16.mxu1 %v18222_v45  ;;  %v22150_v11 = vpop.f32.mrf.mxu0  ;;  %v18228_v1 = vld [vmem:[%s23692_s5 + $0x2e0] ss:$8 sps:$4 sm:$0xff]  }
 0x50a   : > { %v9751_v9 = vunpack.c.l.b16 %v16920_v23  ;;  %v9752_v47 = vunpack.c.l.b16 %v16921_v0  ;;  %v9837_v54 = vrot.slane %v9750_v17, 3  ;;  %v16951_v25 = vpack.c.bf16 %v9413_v32, %v9413_v32  ;;  %11649 = vmatprep.subr.bf16.mxu0 %v18216_v7  ;;  %v18225_v17 = vld [vmem:[%s23692_s5 + $0x310] ss:$8 sps:$4 sm:$0xff]  }
 0x50b   : > { %v9749_v57 = vunpack.c.l.b16 %v16918_v48  ;;  %v9831_v2 = vrot.slane %v9747_v10, 6  ;;  %v9833_v45 = vrot.slane %v9748_v50, 5  ;;  %v9023_v5 = vrot.slane %v22100_v31, %v23951_v39  ;;  %v22172_v48 = vpop.f32.mrf.mxu1  ;;  %v18233_v10 = vld [vmem:[%s23692_s5 + $0x304] ss:$8 sps:$4 sm:$0xff]   ;;  %v22177_v50 = vpop.f32.mrf.mxu0 }
 0x50c   : > { %v9839_v41 = vrot.slane %v9751_v9, 2  ;;  %v9841_v62 = vrot.slane %v9752_v47, 1  ;;  %v9947_v26 = vsel %vm21781_vm12, %v16951_v25, %v9946_v63  ;;  %v9030_v7 = vrot.slane %v9016_v29, %v23951_v39  ;;  %11583 = vmatpush2.bf16.msra.mxu1 %v18220_v40  ;;  %v18234_v25 = vld [vmem:[%s23692_s5 + $0x2d0] ss:$8 sps:$4 sm:$0xff]  }
 0x50d   : > { %v9832_v59 = vsel %vm5508_vm5, %v9831_v2, %v9830_v34  ;;  %v9835_v32 = vrot.slane %v9749_v57, 4  ;;  %9948 = vst [vmem:[#allocation3 + $0x2c] sm:$0x1] %v9947_v26  ;;  %v9031_v23 = vcombine.high %v9023_v5, %v9023_v5  ;;  %v16011_v0 = vrot.slane %v9023_v5, 9  ;;  %11650 = vmatpush1.bf16.msra.mxu0 %v18214_v36  ;;  %11584 = vmatprep.subr.bf16.mxu1 %v18230_v15  ;;  %v9943_v26 = vld [vmem:[#allocation3 + $0x28] sm:$0xf] }
 0x50e   : > { %v9834_v31 = vsel %vm5511_vm6, %v9833_v45, %v9832_v59  ;;  %v9032_v29 = vcombine.high %v9030_v7, %v9030_v7  ;;  %v16013_v63 = vrot.slane %v9030_v7, 9  ;;  %v8825_v40 = vmax.f32 %v8803_v43, %v8805_v60  ;;  %11651 = vmatprep.subr.bf16.mxu0 %v18227_v13  ;;  %v18231_v45 = vld [vmem:[%s23692_s5 + $0x300] ss:$8 sps:$4 sm:$0xff]   ;;  %v22199_v59 = vpop.f32.mrf.mxu1 }
 0x50f   : > { %v9836_v34 = vsel %vm5514_vm7, %v9835_v32, %v9834_v31  ;;  %v16012_v36 = vrot.slane %v9031_v23, 9  ;;  %v9414_v15 = vmax.f32 %v9023_v5, %v16011_v0  ;;  %v10099_v9 = vrot.slane %v10097_v53, 1  ;;  %v18239_v32 = vld [vmem:[%s23692_s5 + $0x3f4] ss:$8 sps:$4 sm:$0xff]  }
 0x510   : > { %v9838_v43 = vsel %vm5517_vm9, %v9837_v54, %v9836_v34  ;;  %v16014_v19 = vrot.slane %v9032_v29, 9  ;;  %v9416_v60 = vmax.f32 %v9030_v7, %v16013_v63  ;;  %v9033_v47 = vcombine.high %v8825_v40, %v8825_v40  ;;  %11585 = vmatpush2.bf16.msra.mxu1 %v18228_v1  ;;  %v18242_v54 = vld [vmem:[%s23692_s5 + $0x2c4] ss:$8 sps:$4 sm:$0xff]  }
 0x511   : > { %v9840_v13 = vsel %vm5520_vm10, %v9839_v41, %v9838_v43  ;;  %v9415_v57 = vmax.f32 %v9031_v23, %v16012_v36  ;;  %v16923_v2 = vpack.c.bf16 %v9414_v15, %v9414_v15  ;;  %v9040_v53 = vrot.slane %v8825_v40, %v23951_v39  ;;  %11652 = vmatpush1.bf16.msra.mxu0 %v18225_v17  ;;  %v22204_v23 = vpop.f32.mrf.mxu0 }
 0x512   : > { %v9842_v5 = vsel %vm5523_vm13, %v9841_v62, %v9840_v13  ;;  %v9417_v7 = vmax.f32 %v9032_v29, %v16014_v19  ;;  %v16925_v1 = vpack.c.bf16 %v9416_v60, %v9416_v60  ;;  %v9047_v41 = vrot.slane %v9033_v47, %v23951_v39  ;;  %11653 = vmatprep.subr.bf16.mxu0 %v18233_v10  ;;  %v18240_v10 = vld [vmem:[%s23692_s5 + $0x2c0] ss:$8 sps:$4 sm:$0xff]  }
 0x513   : > { %v9890_v0 = vpack.c.b16 %v9842_v5, %v9842_v5  ;;  %v16924_v17 = vpack.c.bf16 %v9415_v57, %v9415_v57  ;;  %v9754_v31 = vunpack.c.l.b16 %v16923_v2  ;;  %v9048_v63 = vcombine.high %v9040_v53, %v9040_v53  ;;  %11586 = vmatprep.subr.bf16.mxu1 %v18236_v46  ;;  %v18237_v46 = vld [vmem:[%s23692_s5 + $0x3f0] ss:$8 sps:$4 sm:$0xff]   ;;  %v22214_v57 = vpop.f32.mrf.mxu1  ;;  %v18245_v2 = vld [vmem:[%s23692_s5 + $0x3e4] ss:$8 sps:$4 sm:$0xff]   ;;  %v22219_v5 = vpop.f32.mrf.mxu0 }
 0x514   : > { %v16926_v62 = vpack.c.bf16 %v9417_v7, %v9417_v7  ;;  %v9756_v40 = vunpack.c.l.b16 %v16925_v1  ;;  %v9049_v29 = vcombine.high %v9047_v41, %v9047_v41  ;;  %v16015_v34 = vrot.slane %v9040_v53, 9  ;;  %11587 = vmatpush2.bf16.msra.mxu1 %v18234_v25  ;;  %v18248_v1 = vld [vmem:[%s23692_s5 + $0x2b4] ss:$8 sps:$4 sm:$0xff]  }
 0x515   : > { %v9944_v36 = vsel %vm21803_vm8, %v9890_v0, %v9943_v26  ;;  %v9755_v15 = vunpack.c.l.b16 %v16924_v17  ;;  %v9843_v43 = vrot.slane %v9754_v31, 7  ;;  %v16016_v19 = vrot.slane %v9048_v63, 9  ;;  %11654 = vmatpush1.bf16.msra.mxu0 %v18231_v45  ;;  %11588 = vmatprep.subr.bf16.mxu1 %v18242_v54 }
 0x516   : > { %9945 = vst [vmem:[#allocation3 + $0x28] sm:$0xf] %v9944_v36  ;;  %v9757_v60 = vunpack.c.l.b16 %v16926_v62  ;;  %v9846_v47 = vrot.slane %v9756_v40, 5  ;;  %v16017_v25 = vrot.slane %v9047_v41, 9  ;;  %v16018_v13 = vrot.slane %v9049_v29, 9  ;;  %11655 = vmatprep.subr.bf16.mxu0 %v18239_v32  ;;  %v22234_v36 = vpop.f32.mrf.mxu0 }
 0x517   : > { %v9844_v45 = vrot.slane %v9755_v15, 6  ;;  %v9418_v26 = vmax.f32 %v9040_v53, %v16015_v34  ;;  %v9419_v7 = vmax.f32 %v9048_v63, %v16016_v19  ;;  %v10106_v54 = vrot.slane %v10104_v14, 1  ;;  %v18246_v62 = vld [vmem:[%s23692_s5 + $0x2b0] ss:$8 sps:$4 sm:$0xff]   ;;  %v9952_v14 = vld [vmem:[#allocation3 + $0x34] sm:$0x1] }
 0x518   : > { %v9848_v0 = vrot.slane %v9757_v60, 4  ;;  %v9420_v17 = vmax.f32 %v9047_v41, %v16017_v25  ;;  %v9421_v31 = vmax.f32 %v9049_v29, %v16018_v13  ;;  %v10100_v32 = vor.u32 %v10099_v9, %v10095_v20  ;;  %11589 = vmatpush2.bf16.msra.mxu1 %v18240_v10  ;;  %v22242_v10 = vpop.f32.mrf.mxu1  ;;  %v9985_v13 = vld [vmem:[#allocation3 + $0x10] sm:$0xe] }
 0x519   : > { %v9845_v53 = vsel %vm5508_vm5, %v9844_v45, %v9843_v43  ;;  %v16927_v63 = vpack.c.bf16 %v9418_v26, %v9418_v26  ;;  %v16928_v40 = vpack.c.bf16 %v9419_v7, %v9419_v7  ;;  %v10107_v34 = vor.u32 %v10106_v54, %v10102_v49  ;;  %11656 = vmatpush2.bf16.msra.mxu0 %v18237_v46  ;;  %v22249_v46 = vld [vmem:[#allocation3 + $0x20] sm:$0xf]  ;;  %v23966_v45 = vld [vmem:[#allocation46_spill] sm:$0xff] }
 0x51a   : > { %v9847_v20 = vsel %vm5511_vm6, %v9846_v47, %v9845_v53  ;;  %v16929_v9 = vpack.c.bf16 %v9420_v17, %v9420_v17  ;;  %v16952_v41 = vpack.c.bf16 %v9421_v31, %v9421_v31  ;;  %v17223_v29 = vadd.f32 %v21984_v30, %v21977_v37  ;;  %11657 = vmatprep.subr.bf16.mxu0 %v18245_v2  ;;  %v18254_v37 = vld [vmem:[%s23692_s5 + $0x2a4] ss:$8 sps:$4 sm:$0xff]   ;;  %v18653_v2 = vld [vmem:[%s23691_s4] ss:$0 sm:$0xff]  ;;  %v9986_v53 = vld [vmem:[#allocation3 + $0x18] sm:$0xe] }
 0x51b   : > { %v9758_v49 = vunpack.c.l.b16 %v16927_v63  ;;  %v9759_v15 = vunpack.c.l.b16 %v16928_v40  ;;  %v16165_v43 = vcombine.low %v10100_v32, %v10107_v34  ;;  %v16164_v19 = vcombine.low %v22026_v8, %v22049_v21  ;;  %11590 = vmatprep.subr.bf16.mxu1 %v18248_v1  ;;  %v18249_v8 = vld [vmem:[%s23692_s5 + $0x3d0] ss:$8 sps:$4 sm:$0xff]   ;;  %v18252_v21 = vld [vmem:[%s23692_s5 + $0x2a0] ss:$8 sps:$4 sm:$0xff]   ;;  %v18262_v1 = vld [vmem:[%s23692_s5 + $0x294] ss:$8 sps:$4 sm:$0xff]   ;;  %v17242_v63 = vpop.f32.mrf.mxu1 }
 0x51c   : > { %v9760_v30 = vunpack.c.l.b16 %v16929_v9  ;;  %v9849_v60 = vsel %vm5514_vm7, %v9848_v0, %v9847_v20  ;;  %v9953_v47 = vsel %vm21781_vm12, %v16952_v41, %v9952_v14  ;;  %v17226_v25 = vadd.f32 %v22012_v27, %v21994_v24  ;;  %11591 = vmatpush2.bf16.msra.mxu1 %v18246_v62  ;;  %v22269_v24 = vld [vmem:[#allocation3 + $0x18] sm:$0xf]  ;;  %v22271_v27 = vpop.f32.mrf.mxu0  ;;  %v23967_v17 = vld [vmem:[#allocation18_spill] sm:$0xff] }
 0x51d   : > { %v8438_v26 = vadd.f32 %v18653_v2, %v23966_v45  ;;  %v9850_v7 = vrot.slane %v9758_v49, 3  ;;  %v9852_v54 = vrot.slane %v9759_v15, 2  ;;  %9954 = vst [vmem:[#allocation3 + $0x34] sm:$0x1] %v9953_v47  ;;  %11462 = vmatprep.mubr.bf16.mxu1 %v16165_v43  ;;  %11658 = vmatpush2.bf16.msra.mxu0 %v18243_v52  ;;  %v8591_v31 = vadd.f32 %v17223_v29, %v23967_v17  ;;  %v18257_v40 = vld [vmem:[%s23692_s5 + $0x3c4] ss:$8 sps:$4 sm:$0xff]  }
 0x51e   : > { %v9854_v0 = vrot.slane %v9760_v30, 1  ;;  %11463 = vmatmul.mubr.bf16.gmra.mxu1 %v16164_v19  ;;  %v8594_v32 = vadd.f32 %v17226_v25, %v21809_v56  ;;  %v16167_v62 = vcombine.low %v22269_v24, %v22249_v46  ;;  %11659 = vmatprep.subr.bf16.mxu0 %v18251_v38  ;;  %v8441_v14 = vadd.f32 %v18653_v2, %v21816_v33  ;;  %v23968_v34 = vld [vmem:[#allocation48_spill] sm:$0xff]  ;;  %v23969_v56 = vld [vmem:[#allocation38_spill] sm:$0xff]  ;;  %v17788_v19 = vpop.f32.mrf.mxu0  ;;  %v17243_v25 = vpop.f32.mrf.mxu1 }
 0x51f   : > { %v8446_v52 = vadd.f32 %v18653_v2, %v23968_v34  ;;  %v8449_v20 = vadd.f32 %v18653_v2, %v21820_v44  ;;  %v9851_v9 = vsel %vm5517_vm9, %v9850_v7, %v9849_v60  ;;  %11592 = vmatprep.subr.bf16.mxu1 %v18254_v37  ;;  %v8454_v41 = vadd.f32 %v18653_v2, %v23969_v56  ;;  %v18260_v38 = vld [vmem:[%s23692_s5 + $0x290] ss:$8 sps:$4 sm:$0xff]   ;;  %v9949_v15 = vld [vmem:[#allocation3 + $0x30] sm:$0xf]  ;;  %v22318_v45 = vld [vmem:[#allocation3 + $0x28] sm:$0xf] }
 0x520   : > { %v8457_v29 = vadd.f32 %v18653_v2, %v21837_v42  ;;  %v9853_v49 = vsel %vm5520_vm10, %v9852_v54, %v9851_v9  ;;  %11535 = vmatprep.mubr.bf16.mxu0 %v16167_v62  ;;  %11593 = vmatpush2.bf16.msra.mxu1 %v18252_v21  ;;  %v16117_v44 = vcombine.low %v9985_v13, %v22051_v35  ;;  %v18255_v42 = vld [vmem:[%s23692_s5 + $0x3c0] ss:$8 sps:$4 sm:$0xff]   ;;  %v18266_v35 = vld [vmem:[%s23692_s5 + $0x3b4] ss:$8 sps:$4 sm:$0xff]   ;;  %v8770_v7 = vpop.f32.mrf.mxu0 }
 0x521   : > { %v9855_v33 = vsel %vm5523_vm13, %v9854_v0, %v9853_v49  ;;  %v16118_v43 = vcombine.low %v9986_v53, %v22069_v6  ;;  %11660 = vmatpush2.bf16.msra.mxu0 %v18249_v8  ;;  %11594 = vmatprep.subr.bf16.mxu1 %v18262_v1  ;;  %v8752_v30 = vadd.f32 %v22177_v50, %v8591_v31  ;;  %v22310_v50 = vld [vmem:[#allocation3 + $0x20] sm:$0xf]  ;;  %v22332_v0 = vld [vmem:[#allocation3 + $0x2c] sm:$0x1] }
 0x522   : > { %v9892_v37 = vpack.c.b16 %v9855_v33, %v9855_v33  ;;  %v8755_v60 = vadd.f32 %v22219_v5, %v8594_v32  ;;  %v17229_v47 = vadd.f32 %v22064_v3, %v22037_v12  ;;  %11661 = vmatprep.subr.bf16.mxu0 %v18257_v40  ;;  %v10162_v6 = vrot.slane %v16117_v44, 1  ;;  %v18274_v31 = vld [vmem:[%s23692_s5 + $0x3a4] ss:$8 sps:$4 sm:$0xff]   ;;  %v18280_v32 = vld [vmem:[%s23692_s5 + $0x474] ss:$8 sps:$4 sm:$0xff]  }
 0x523   : > { %v10163_v13 = vrot.slane %v16118_v43, 1  ;;  %v17232_v8 = vadd.f32 %v22117_v16, %v22091_v58  ;;  %v17235_v21 = vadd.f32 %v22145_v55, %v22131_v4  ;;  %v17238_v3 = vadd.f32 %v22199_v59, %v22172_v48  ;;  %v18271_v58 = vld [vmem:[%s23692_s5 + $0x284] ss:$8 sps:$4 sm:$0xff]   ;;  %v18264_v48 = vld [vmem:[%s23692_s5 + $0x3b0] ss:$8 sps:$4 sm:$0xff]  }
 0x524   : > { %v9950_v5 = vsel %vm21803_vm8, %v9892_v37, %v9949_v15  ;;  %v8599_v12 = vadd.f32 %v17229_v47, %v8438_v26  ;;  %v17241_v2 = vadd.f32 %v22242_v10, %v22214_v57  ;;  %11595 = vmatpush2.bf16.msra.mxu1 %v18260_v38  ;;  %v17244_v54 = vadd.f32 %v17243_v25, %v17242_v63  ;;  %v22323_v26 = vld [vmem:[#allocation3 + $0x24] sm:$0x1]  ;;  %v18269_v59 = vld [vmem:[%s23692_s5 + $0x280] ss:$8 sps:$4 sm:$0xff]  }
 0x525   : > { %9951 = vst [vmem:[#allocation3 + $0x30] sm:$0xf] %v9950_v5  ;;  %v16166_v16 = vcombine.low %v10162_v6, %v10163_v13  ;;  %v8602_v4 = vadd.f32 %v17232_v8, %v8441_v14  ;;  %v8607_v55 = vadd.f32 %v17235_v21, %v8446_v52  ;;  %11662 = vmatpush2.bf16.msra.mxu0 %v18255_v42  ;;  %v8806_v40 = vmax.f32 %v8752_v30, 0.0  ;;  %v18283_v6 = vld [vmem:[%s23692_s5 + $0x390] ss:$8 sps:$4 sm:$0xff]  }
 0x526   : > { %v8760_v57 = vadd.f32 %v22150_v11, %v8599_v12  ;;  %v8615_v10 = vadd.f32 %v17241_v2, %v8454_v41  ;;  %v8610_v1 = vadd.f32 %v17238_v3, %v8449_v20  ;;  %v22336_v17 = vcombine.low %v22310_v50, %v22323_v26  ;;  %11663 = vmatprep.subr.bf16.mxu0 %v18266_v35  ;;  %v18298_v12 = vld [vmem:[%s23692_s5 + $0x384] ss:$8 sps:$4 sm:$0xff]  }
 0x527   : > { %11536 = vmatmul.mubr.bf16.gmra.mxu0 %v16166_v16  ;;  %v8763_v11 = vadd.f32 %v22204_v23, %v8602_v4  ;;  %v8768_v62 = vadd.f32 %v22271_v27, %v8607_v55  ;;  %v8618_v53 = vadd.f32 %v17244_v54, %v8457_v29  ;;  %v22348_v63 = vcombine.low %v22318_v45, %v22332_v0  ;;  %v18272_v23 = vld [vmem:[%s23692_s5 + $0x3a0] ss:$8 sps:$4 sm:$0xff]  }
 0x528   : > { %v8808_v14 = vmax.f32 %v8760_v57, 0.0  ;;  %v8776_v34 = vadd.f32 %v22234_v36, %v8615_v10  ;;  %v8771_v52 = vadd.f32 %v8770_v7, %v8610_v1  ;;  %11596 = vmatprep.subr.bf16.mxu1 %v18271_v58  ;;  %v8807_v20 = vmax.f32 %v8755_v60, 0.0  ;;  %v18285_v36 = vld [vmem:[%s23692_s5 + $0x394] ss:$8 sps:$4 sm:$0xff]   ;;  %v18296_v1 = vld [vmem:[%s23692_s5 + $0x380] ss:$8 sps:$4 sm:$0xff]  }
 0x529   : > { %v8809_v9 = vmax.f32 %v8763_v11, 0.0  ;;  %v8779_v56 = vadd.f32 %v17788_v19, %v8618_v53  ;;  %v10111_v41 = vshll.u32 %v22336_v17, 16  ;;  %11664 = vmatpush2.bf16.msra.mxu0 %v18264_v48  ;;  %11597 = vmatpush2.bf16.msra.mxu1 %v18269_v59  ;;  %v8810_v29 = vmax.f32 %v8768_v62, 0.0 }
 0x52a   : > { %v8826_v27 = vmax.f32 %v8806_v40, %v8808_v14  ;;  %v8812_v49 = vmax.f32 %v8776_v34, 0.0  ;;  %v10109_v38 = vshrl.u32 %v22336_v17, 16  ;;  %11665 = vmatprep.subr.bf16.mxu0 %v18274_v31  ;;  %11712 = vmatprep.subr.bf16.mxu1 %v18280_v32  ;;  %v8811_v15 = vmax.f32 %v8771_v52, 0.0 }
 0x52b   : > { %v8827_v33 = vmax.f32 %v8807_v20, %v8809_v9  ;;  %v8813_v44 = vmax.f32 %v8779_v56, 0.0  ;;  %v10116_v43 = vshrl.u32 %v22348_v63, 16  ;;  %v22361_v30 = vrot.slane %v10111_v41, 1 }
 0x52c   : > { %v9050_v19 = vcombine.high %v8826_v27, %v8826_v27  ;;  %v9057_v42 = vrot.slane %v8826_v27, %v23951_v39  ;;  %v8828_v37 = vmax.f32 %v8810_v29, %v8812_v49  ;;  %v10118_v35 = vshll.u32 %v22348_v63, 16 }
 0x52d   : > { %v9067_v60 = vcombine.high %v8827_v33, %v8827_v33  ;;  %v9074_v47 = vrot.slane %v8827_v33, %v23951_v39  ;;  %v22364_v25 = vmax.f32 %v8811_v15, %v8813_v44  ;;  %11666 = vmatpush2.bf16.msra.mxu0 %v18272_v23  ;;  %v9958_v44 = vld [vmem:[#allocation3 + $0x3c] sm:$0x1]  ;;  %v16173_v63 = vcombine.low %v22310_v50, %v22318_v45 }
 0x52e   : > { %v9064_v13 = vrot.slane %v9050_v19, %v23951_v39  ;;  %v9065_v8 = vcombine.high %v9057_v42, %v9057_v42  ;;  %v16019_v21 = vrot.slane %v9057_v42, 9  ;;  %v9084_v5 = vcombine.high %v8828_v37, %v8828_v37  ;;  %11667 = vmatprep.subr.bf16.mxu0 %v18285_v36 }
 0x52f   : > { %v9081_v3 = vrot.slane %v9067_v60, %v23951_v39  ;;  %v9082_v2 = vcombine.high %v9074_v47, %v9074_v47  ;;  %v16023_v58 = vrot.slane %v9074_v47, 9  ;;  %v9091_v16 = vrot.slane %v8828_v37, %v23951_v39 }
 0x530   : > { %v9066_v4 = vcombine.high %v9064_v13, %v9064_v13  ;;  %v16020_v55 = vrot.slane %v9065_v8, 9  ;;  %v16021_v7 = vrot.slane %v9064_v13, 9  ;;  %v9422_v54 = vmax.f32 %v9057_v42, %v16019_v21 }
 0x531   : > { %v9083_v48 = vcombine.high %v9081_v3, %v9081_v3  ;;  %v16024_v59 = vrot.slane %v9082_v2, 9  ;;  %v16025_v57 = vrot.slane %v9081_v3, 9  ;;  %v9426_v10 = vmax.f32 %v9074_v47, %v16023_v58  ;;  %11668 = vmatpush2.bf16.msra.mxu0 %v18283_v6 }
 0x532   : > { %v16022_v31 = vrot.slane %v9066_v4, 9  ;;  %v9423_v32 = vmax.f32 %v9065_v8, %v16020_v55  ;;  %v9424_v11 = vmax.f32 %v9064_v13, %v16021_v7  ;;  %v16931_v62 = vpack.c.bf16 %v9422_v54, %v9422_v54  ;;  %11669 = vmatprep.subr.bf16.mxu0 %v18298_v12 }
 0x533   : > { %v16026_v53 = vrot.slane %v9083_v48, 9  ;;  %v9427_v40 = vmax.f32 %v9082_v2, %v16024_v59  ;;  %v9428_v14 = vmax.f32 %v9081_v3, %v16025_v57  ;;  %v16935_v34 = vpack.c.bf16 %v9426_v10, %v9426_v10 }
 0x534   : > { %v9425_v52 = vmax.f32 %v9066_v4, %v16022_v31  ;;  %v16932_v20 = vpack.c.bf16 %v9423_v32, %v9423_v32  ;;  %v16933_v9 = vpack.c.bf16 %v9424_v11, %v9424_v11  ;;  %v9762_v56 = vunpack.c.l.b16 %v16931_v62 }
 0x535   : > { %v9429_v41 = vmax.f32 %v9083_v48, %v16026_v53  ;;  %v16936_v23 = vpack.c.bf16 %v9427_v40, %v9427_v40  ;;  %v16937_v27 = vpack.c.bf16 %v9428_v14, %v9428_v14  ;;  %v9766_v29 = vunpack.c.l.b16 %v16935_v34  ;;  %11670 = vmatpush2.bf16.msra.mxu0 %v18296_v1 }
 0x536   : > { %v16934_v49 = vpack.c.bf16 %v9425_v52, %v9425_v52  ;;  %v9763_v36 = vunpack.c.l.b16 %v16932_v20  ;;  %v9764_v33 = vunpack.c.l.b16 %v16933_v9  ;;  %v9856_v15 = vrot.slane %v9762_v56, 7  ;;  %v9955_v9 = vld [vmem:[#allocation3 + $0x38] sm:$0xf] }
 0x537   : > { %v9767_v19 = vunpack.c.l.b16 %v16936_v23  ;;  %v9768_v42 = vunpack.c.l.b16 %v16937_v27  ;;  %v9863_v37 = vrot.slane %v9766_v29, 3  ;;  %v16953_v60 = vpack.c.bf16 %v9429_v41, %v9429_v41 }
 0x538   : > { %v9765_v47 = vunpack.c.l.b16 %v16934_v49  ;;  %v9857_v6 = vrot.slane %v9763_v36, 6  ;;  %v9859_v13 = vrot.slane %v9764_v33, 5  ;;  %v9098_v8 = vrot.slane %v9084_v5, %v23951_v39 }
 0x539   : > { %v9865_v21 = vrot.slane %v9767_v19, 2  ;;  %v9867_v12 = vrot.slane %v9768_v42, 1  ;;  %v9959_v3 = vsel %vm21781_vm12, %v16953_v60, %v9958_v44  ;;  %v9099_v2 = vcombine.high %v9091_v16, %v9091_v16 }
 0x53a   : > { %v9858_v58 = vsel %vm5508_vm5, %v9857_v6, %v9856_v15  ;;  %v9861_v4 = vrot.slane %v9765_v47, 4  ;;  %9960 = vst [vmem:[#allocation3 + $0x3c] sm:$0x1] %v9959_v3  ;;  %v9100_v55 = vcombine.high %v9098_v8, %v9098_v8  ;;  %v16027_v7 = vrot.slane %v9091_v16, 9 }
 0x53b   : > { %v9860_v54 = vsel %vm5511_vm6, %v9859_v13, %v9858_v58  ;;  %v16028_v48 = vrot.slane %v9099_v2, 9  ;;  %v16029_v59 = vrot.slane %v9098_v8, 9  ;;  %v9101_v57 = vcombine.high %v22364_v25, %v22364_v25 }
 0x53c   : > { %v9862_v5 = vsel %vm5514_vm7, %v9861_v4, %v9860_v54  ;;  %v16030_v10 = vrot.slane %v9100_v55, 9  ;;  %v9430_v1 = vmax.f32 %v9091_v16, %v16027_v7  ;;  %v9108_v31 = vrot.slane %v22364_v25, %v23951_v39 }
 0x53d   : > { %v9864_v32 = vsel %vm5517_vm9, %v9863_v37, %v9862_v5  ;;  %v9431_v11 = vmax.f32 %v9099_v2, %v16028_v48  ;;  %v9432_v62 = vmax.f32 %v9098_v8, %v16029_v59  ;;  %v9115_v53 = vrot.slane %v9101_v57, %v23951_v39 }
 0x53e   : > { %v9866_v40 = vsel %vm5520_vm10, %v9865_v21, %v9864_v32  ;;  %v9433_v14 = vmax.f32 %v9100_v55, %v16030_v10  ;;  %v16939_v34 = vpack.c.bf16 %v9430_v1, %v9430_v1  ;;  %v9116_v52 = vcombine.high %v9108_v31, %v9108_v31  ;;  %v9964_v55 = vld [vmem:[#allocation3 + $0x44] sm:$0x1]  ;;  %v22404_v1 = vld [vmem:[#allocation3 + $0x30] sm:$0xf] }
 0x53f   : > { %v9868_v20 = vsel %vm5523_vm13, %v9867_v12, %v9866_v40  ;;  %v16940_v56 = vpack.c.bf16 %v9431_v11, %v9431_v11  ;;  %v16941_v41 = vpack.c.bf16 %v9432_v62, %v9432_v62  ;;  %v9117_v16 = vcombine.high %v9115_v53, %v9115_v53 }
 0x540   : > { %v9894_v23 = vpack.c.b16 %v9868_v20, %v9868_v20  ;;  %v16942_v27 = vpack.c.bf16 %v9433_v14, %v9433_v14  ;;  %v9770_v25 = vunpack.c.l.b16 %v16939_v34  ;;  %v16031_v29 = vrot.slane %v9108_v31, 9 }
 0x541   : > { %v9771_v49 = vunpack.c.l.b16 %v16940_v56  ;;  %v9772_v36 = vunpack.c.l.b16 %v16941_v41  ;;  %v16032_v33 = vrot.slane %v9116_v52, 9  ;;  %v16033_v15 = vrot.slane %v9115_v53, 9  ;;  %v9982_v56 = vld [vmem:[#allocation3 + $0x3c] sm:$0x1] }
 0x542   : > { %v9956_v44 = vsel %vm21803_vm8, %v9894_v23, %v9955_v9  ;;  %v9773_v19 = vunpack.c.l.b16 %v16942_v27  ;;  %v9869_v42 = vrot.slane %v9770_v25, 7  ;;  %v16034_v37 = vrot.slane %v9117_v16, 9  ;;  %v10008_v23 = vld [vmem:[#allocation3 + $0x10] sm:$0xe]  ;;  %v9961_v25 = vld [vmem:[#allocation3 + $0x40] sm:$0xf] }
 0x543   : > { %9957 = vst [vmem:[#allocation3 + $0x38] sm:$0xf] %v9956_v44  ;;  %v9870_v60 = vrot.slane %v9771_v49, 6  ;;  %v9872_v47 = vrot.slane %v9772_v36, 5  ;;  %v9434_v6 = vmax.f32 %v9108_v31, %v16031_v29  ;;  %v9435_v13 = vmax.f32 %v9116_v52, %v16032_v33  ;;  %v9981_v52 = vld [vmem:[#allocation3 + $0x34] sm:$0x1] }
 0x544   : > { %v9874_v8 = vrot.slane %v9773_v19, 4  ;;  %v9436_v21 = vmax.f32 %v9115_v53, %v16033_v15  ;;  %v9437_v12 = vmax.f32 %v9117_v16, %v16034_v37  ;;  %v10120_v3 = vrot.slane %v10118_v35, 1  ;;  %v9987_v35 = vld [vmem:[#allocation3 + $0x20] sm:$0xe]  ;;  %v10007_v16 = vld [vmem:[#allocation3 + $0x8] sm:$0xe] }
 0x545   : > { %v9871_v2 = vsel %vm5508_vm5, %v9870_v60, %v9869_v42  ;;  %v16943_v58 = vpack.c.bf16 %v9434_v6, %v9434_v6  ;;  %v16944_v4 = vpack.c.bf16 %v9435_v13, %v9435_v13  ;;  %v10114_v7 = vor.u32 %v22361_v30, %v10109_v38  ;;  %v9988_v38 = vld [vmem:[#allocation3 + $0x28] sm:$0xe]  ;;  %v22409_v30 = vld [vmem:[#allocation3 + $0x30] sm:$0xf]  ;;  %v18655_v42 = vld [vmem:[#allocation3 + $0x14] sm:$0x1] }
 0x546   : > { %v9873_v54 = vsel %vm5511_vm6, %v9872_v47, %v9871_v2  ;;  %v16945_v48 = vpack.c.bf16 %v9436_v21, %v9436_v21  ;;  %v16954_v59 = vpack.c.bf16 %v9437_v12, %v9437_v12  ;;  %v10121_v57 = vor.u32 %v10120_v3, %v10116_v43  ;;  %v22413_v43 = vld [vmem:[#allocation3 + $0x28] sm:$0xf]  ;;  %v9989_v21 = vld [vmem:[#allocation3 + $0x30] sm:$0xe]  ;;  %v22427_v2 = vld [vmem:[#allocation3 + $0x18] sm:$0xf] }
 0x547   : > { %v9774_v5 = vunpack.c.l.b16 %v16943_v58  ;;  %v9775_v10 = vunpack.c.l.b16 %v16944_v4  ;;  %v9875_v32 = vsel %vm5514_vm7, %v9874_v8, %v9873_v54  ;;  %v16176_v14 = vcombine.low %v22413_v43, %v22404_v1  ;;  %v22425_v3 = vld [vmem:[#allocation3 + $0x10] sm:$0xf]  ;;  %v10002_v58 = vld [vmem:[#allocation3 + $0x24] sm:$0x1]  ;;  %v22429_v54 = vld [vmem:[#allocation3 + $0x14] sm:$0x1] }
 0x548   : > { %v9776_v31 = vunpack.c.l.b16 %v16945_v48  ;;  %v9965_v17 = vsel %vm21781_vm12, %v16954_v59, %v9964_v55  ;;  %v16174_v11 = vcombine.low %v10114_v7, %v10121_v57  ;;  %v16119_v61 = vcombine.low %v9987_v35, %v22323_v26  ;;  %v10010_v57 = vld [vmem:[#allocation3 + $0x20] sm:$0xe] }
 0x549   : > { %v9876_v62 = vrot.slane %v9774_v5, 3  ;;  %v9878_v53 = vrot.slane %v9775_v10, 2  ;;  %9966 = vst [vmem:[#allocation3 + $0x44] sm:$0x1] %v9965_v17  ;;  %v16120_v9 = vcombine.low %v9988_v38, %v22332_v0  ;;  %v16113_v41 = vcombine.low %v22409_v30, %v9981_v52  ;;  %11545 = vmatprep.mubr.bf16.mxu0 %v16176_v14  ;;  %v18654_v0 = vld [vmem:[#allocation3 + $0xc] sm:$0x1] }
 0x54a   : > { %v9880_v40 = vrot.slane %v9776_v31, 1  ;;  %11472 = vmatprep.mubr.bf16.mxu1 %v16174_v11  ;;  %v9974_v34 = vld [vmem:[#allocation3 + $0x38] sm:$0xf]  ;;  %v10164_v26 = vrot.slane %v16119_v61, 1  ;;  %v16131_v19 = vcombine.low %v10007_v16, %v18654_v0  ;;  %v16132_v37 = vcombine.low %v10008_v23, %v18655_v42  ;;  %v22434_v5 = vld [vmem:[#allocation3 + $0x1c] sm:$0x1] }
 0x54b   : > { %v9877_v20 = vsel %vm5517_vm9, %v9876_v62, %v9875_v32  ;;  %11473 = vmatmul.mubr.bf16.gmra.mxu1 %v16173_v63  ;;  %v16114_v45 = vcombine.low %v9974_v34, %v9982_v56  ;;  %v10165_v29 = vrot.slane %v16120_v9, 1  ;;  %v10125_v49 = vshll.u32 %v16113_v41, 16  ;;  %v9990_v60 = vld [vmem:[#allocation3 + $0x38] sm:$0xe]  ;;  %v10001_v10 = vld [vmem:[#allocation3 + $0x1c] sm:$0x1] }
 0x54c   : > { %v9879_v50 = vsel %vm5520_vm10, %v9878_v53, %v9877_v20  ;;  %v10123_v6 = vshrl.u32 %v16113_v41, 16  ;;  %v10289_v12 = vrot.slane %v16132_v37, 1  ;;  %v16122_v7 = vcombine.low %v9990_v60, %v9982_v56  ;;  %v10009_v31 = vld [vmem:[#allocation3 + $0x18] sm:$0xe]  ;;  %v22445_v61 = vld [vmem:[#allocation3 + $0x34] sm:$0x1] }
 0x54d   : > { %v9881_v27 = vsel %vm5523_vm13, %v9880_v40, %v9879_v50  ;;  %v10132_v33 = vshll.u32 %v16114_v45, 16  ;;  %v16175_v15 = vcombine.low %v10164_v26, %v10165_v29  ;;  %v10127_v44 = vrot.slane %v10125_v49, 1  ;;  %v22458_v23 = vld [vmem:[#allocation3 + $0x20] sm:$0xf]  ;;  %v22474_v42 = vld [vmem:[#allocation3 + $0x2c] sm:$0x1] }
 0x54e   : > { %v9896_v36 = vpack.c.b16 %v9881_v27, %v9881_v27  ;;  %v10130_v13 = vshrl.u32 %v16114_v45, 16  ;;  %v22432_v22 = vcombine.low %v22249_v46, %v10002_v58  ;;  %v10288_v48 = vrot.slane %v16131_v19, 1  ;;  %v22460_v27 = vld [vmem:[#allocation3 + $0x28] sm:$0xf]  ;;  %v18278_v26 = vld [vmem:[%s23692_s5 + $0x470] ss:$8 sps:$4 sm:$0xff]  }
 0x54f   : > { %v10134_v8 = vrot.slane %v10132_v33, 1  ;;  %11546 = vmatmul.mubr.bf16.gmra.mxu0 %v16175_v15  ;;  %v10128_v4 = vor.u32 %v10127_v44, %v10123_v6  ;;  %v16121_v59 = vcombine.low %v9989_v21, %v9981_v52  ;;  %v16139_v32 = vcombine.low %v22425_v3, %v22429_v54  ;;  %v22447_v52 = vld [vmem:[#allocation3 + $0x38] sm:$0xf]  ;;  %v22467_v15 = vld [vmem:[#allocation3 + $0x24] sm:$0x1] }
 0x550   : > { %v9962_v47 = vsel %vm21803_vm8, %v9896_v36, %v9961_v25  ;;  %v16140_v17 = vcombine.low %v22427_v2, %v22434_v5  ;;  %v22441_v11 = vcombine.low %v22269_v24, %v10001_v10  ;;  %v16182_v46 = vcombine.low %v22409_v30, %v9974_v34  ;;  %v22462_v25 = vld [vmem:[#allocation3 + $0x2c] sm:$0x1]  ;;  %v10012_v19 = vld [vmem:[#allocation3 + $0x30] sm:$0xe]  ;;  %v10011_v6 = vld [vmem:[#allocation3 + $0x28] sm:$0xe] }
 0x551   : > { %9963 = vst [vmem:[#allocation3 + $0x40] sm:$0xf] %v9962_v47  ;;  %v10135_v55 = vor.u32 %v10134_v8, %v10130_v13  ;;  %v16160_v38 = vcombine.low %v10288_v48, %v10289_v12  ;;  %v10167_v62 = vrot.slane %v16122_v7, 1  ;;  %v16134_v53 = vcombine.low %v10010_v57, %v10002_v58  ;;  %v18295_v47 = vld [vmem:[%s23692_s5 + $0x464] ss:$8 sps:$4 sm:$0xff]  }
 0x552   : > { %v10339_v63 = vshll.u32 %v16139_v32, 16  ;;  %v10346_v40 = vshll.u32 %v16140_v17, 16  ;;  %v10232_v14 = vshll.u32 %v22432_v22, 16  ;;  %v10166_v20 = vrot.slane %v16121_v59, 1  ;;  %v22485_v12 = vld [vmem:[#allocation3 + $0x30] sm:$0xf] }
 0x553   : > { %v16183_v35 = vcombine.low %v10128_v4, %v10135_v55  ;;  %v16133_v9 = vcombine.low %v10009_v31, %v10001_v10  ;;  %v10337_v56 = vshrl.u32 %v16139_v32, 16  ;;  %v10344_v34 = vshrl.u32 %v16140_v17, 16  ;;  %v22487_v58 = vld [vmem:[#allocation3 + $0x38] sm:$0xf]  ;;  %v18293_v7 = vld [vmem:[%s23692_s5 + $0x460] ss:$8 sps:$4 sm:$0xff]  }
 0x554   : > { %v10341_v30 = vrot.slane %v10339_v63, 1  ;;  %v10348_v41 = vrot.slane %v10346_v40, 1  ;;  %v10225_v50 = vshll.u32 %v22441_v11, 16  ;;  %v22454_v45 = vcombine.low %v22404_v1, %v22445_v61  ;;  %v22493_v57 = vld [vmem:[#allocation3 + $0x34] sm:$0x1] }
 0x555   : > { %11482 = vmatprep.mubr.bf16.mxu1 %v16183_v35  ;;  %v16184_v29 = vcombine.low %v10166_v20, %v10167_v62  ;;  %v10291_v49 = vrot.slane %v16134_v53, 1  ;;  %v10223_v1 = vshrl.u32 %v22441_v11, 16  ;;  %v10234_v44 = vrot.slane %v10232_v14, 1  ;;  %v18301_v35 = vld [vmem:[%s23692_s5 + $0x454] ss:$8 sps:$4 sm:$0xff]  }
 0x556   : > { %11483 = vmatmul.mubr.bf16.gmra.mxu1 %v16182_v46  ;;  %v10342_v36 = vor.u32 %v10341_v30, %v10337_v56  ;;  %v10349_v33 = vor.u32 %v10348_v41, %v10344_v34  ;;  %v22472_v0 = vcombine.low %v22413_v43, %v22462_v25  ;;  %v10290_v37 = vrot.slane %v16133_v9, 1  ;;  %v22503_v17 = vld [vmem:[#allocation3 + $0x3c] sm:$0x1]  ;;  %v18299_v9 = vld [vmem:[%s23692_s5 + $0x450] ss:$8 sps:$4 sm:$0xff]  }
 0x557   : > { %11598 = vmatprep.mubr.bf16.mxu1 %v16160_v38  ;;  %v16141_v13 = vcombine.low %v22458_v23, %v22467_v15  ;;  %v16142_v8 = vcombine.low %v22460_v27, %v22474_v42  ;;  %v10230_v43 = vshrl.u32 %v22432_v22, 16  ;;  %v10246_v21 = vshll.u32 %v22454_v45, 16 }
 0x558   : > { %v22449_v24 = vld [vmem:[#allocation3 + $0x40] sm:$0xf]  ;;  %v16162_v60 = vcombine.low %v10342_v36, %v10349_v33  ;;  %v10227_v4 = vrot.slane %v10225_v50, 1  ;;  %v16169_v55 = vcombine.low %v10290_v37, %v10291_v49  ;;  %v16136_v48 = vcombine.low %v10012_v19, %v22445_v61  ;;  %v10006_v61 = vld [vmem:[#allocation3 + $0x44] sm:$0x1] }
 0x559   : > { %v16185_v16 = vcombine.low %v22447_v52, %v22449_v24  ;;  %v10353_v59 = vshll.u32 %v16141_v13, 16  ;;  %v10239_v22 = vshll.u32 %v22472_v0, 16  ;;  %v10244_v10 = vshrl.u32 %v22454_v45, 16  ;;  %v22514_v14 = vld [vmem:[#allocation3 + $0x40] sm:$0xf] }
 0x55a   : > { %v10235_v31 = vor.u32 %v10234_v44, %v10230_v43  ;;  %v10360_v32 = vshll.u32 %v16142_v8, 16  ;;  %v16135_v11 = vcombine.low %v10011_v6, %v22462_v25  ;;  %v16143_v38 = vcombine.low %v22485_v12, %v22493_v57  ;;  %v10014_v25 = vld [vmem:[#allocation3 + $0x40] sm:$0xe]  ;;  %v10005_v49 = vld [vmem:[#allocation3 + $0x3c] sm:$0x1] }
 0x55b   : > { %11555 = vmatprep.mubr.bf16.mxu0 %v16185_v16  ;;  %v10355_v46 = vrot.slane %v10353_v59, 1  ;;  %v16144_v51 = vcombine.low %v22487_v58, %v22503_v17  ;;  %v10248_v62 = vrot.slane %v10246_v21, 1  ;;  %v10351_v53 = vshrl.u32 %v16141_v13, 16  ;;  %v10013_v44 = vld [vmem:[#allocation3 + $0x38] sm:$0xe] }
 0x55c   : > { %11556 = vmatmul.mubr.bf16.gmra.mxu0 %v16184_v29  ;;  %v10358_v63 = vshrl.u32 %v16142_v8, 16  ;;  %v10362_v40 = vrot.slane %v10360_v32, 1  ;;  %v16161_v20 = vcombine.low %v22425_v3, %v22427_v2  ;;  %v10228_v56 = vor.u32 %v10227_v4, %v10223_v1  ;;  %v22524_v29 = vld [vmem:[#allocation3 + $0x44] sm:$0x1]  ;;  %v18308_v2 = vld [vmem:[%s23692_s5 + $0x444] ss:$8 sps:$4 sm:$0xff]  }
 0x55d   : > { %11671 = vmatprep.mubr.bf16.mxu0 %v16162_v60  ;;  %v10293_v30 = vrot.slane %v16136_v48, 1  ;;  %v10367_v34 = vshll.u32 %v16143_v38, 16  ;;  %v22522_v41 = vcombine.low %v22449_v24, %v10006_v61  ;;  %v10356_v50 = vor.u32 %v10355_v46, %v10351_v53  ;;  %v18306_v48 = vld [vmem:[%s23692_s5 + $0x440] ss:$8 sps:$4 sm:$0xff]  }
 0x55e   : > { %11599 = vmatmul.mubr.bf16.vlgmr.msra.gmra.mxu1 %v16159_v28  ;;  %v22512_v28 = vld [vmem:[#allocation3 + $0x4c] sm:$0x1]  ;;  %v10363_v16 = vor.u32 %v10362_v40, %v10358_v63  ;;  %v16168_v36 = vcombine.low %v10228_v56, %v10235_v31  ;;  %v10292_v3 = vrot.slane %v16135_v11, 1  ;;  %v16145_v33 = vcombine.low %v22514_v14, %v22524_v29  ;;  %v18309_v40 = vld [vmem:[%s23692_s5 + $0x430] ss:$8 sps:$4 sm:$0xff]  }
 0x55f   : > { %11713 = vmatpush1.bf16.msra.mxu1 %v18278_v26  ;;  %11608 = vmatprep.mubr.bf16.mxu1 %v16169_v55  ;;  %v10374_v26 = vshll.u32 %v16144_v51, 16  ;;  %v16146_v24 = vcombine.low %v22510_v18, %v22512_v28  ;;  %v10369_v19 = vrot.slane %v10367_v34, 1  ;;  %v10372_v37 = vshrl.u32 %v16144_v51, 16  ;;  %v18317_v34 = vld [vmem:[%s23692_s5 + $0x420] ss:$8 sps:$4 sm:$0xff]  }
 0x560   : > { %11714 = vmatprep.subr.bf16.mxu1 %v18295_v47  ;;  %v16171_v1 = vcombine.low %v10356_v50, %v10363_v16  ;;  %v10241_v47 = vrot.slane %v10239_v22, 1  ;;  %v16129_v6 = vcombine.low %v22447_v52, %v10005_v49  ;;  %v16178_v13 = vcombine.low %v10292_v3, %v10293_v30  ;;  %v18311_v52 = vld [vmem:[%s23692_s5 + $0x434] ss:$8 sps:$4 sm:$0xff]   ;;  %v10032_v3 = vld [vmem:[#allocation3 + $0x10] sm:$0xe] }
 0x561   : > { %v10376_v60 = vrot.slane %v10374_v26, 1  ;;  %v16138_v8 = vcombine.low %v10014_v25, %v10006_v61  ;;  %v10365_v43 = vshrl.u32 %v16143_v38, 16  ;;  %v10381_v4 = vshll.u32 %v16145_v33, 16  ;;  %v18322_v16 = vld [vmem:[%s23692_s5 + $0x414] ss:$8 sps:$4 sm:$0xff]  }
 0x562   : > { %v10388_v55 = vshll.u32 %v16146_v24, 16  ;;  %v16137_v59 = vcombine.low %v10013_v44, %v10005_v49  ;;  %v10260_v22 = vshll.u32 %v22522_v41, 16  ;;  %v10253_v32 = vshll.u32 %v16129_v6, 16  ;;  %v10033_v26 = vld [vmem:[#allocation3 + $0x18] sm:$0xe] }
 0x563   : > { %11715 = vmatpush1.bf16.msra.mxu1 %v18293_v7  ;;  %v10377_v21 = vor.u32 %v10376_v60, %v10372_v37  ;;  %v10237_v7 = vshrl.u32 %v22472_v0, 16  ;;  %v10370_v31 = vor.u32 %v10369_v19, %v10365_v43  ;;  %v16170_v11 = vcombine.low %v22458_v23, %v22460_v27  ;;  %v18319_v23 = vld [vmem:[%s23692_s5 + $0x424] ss:$8 sps:$4 sm:$0xff]   ;;  %v10035_v37 = vld [vmem:[#allocation3 + $0x28] sm:$0xe] }
 0x564   : > { %11672 = vmatmul.mubr.bf16.vlgmr.msra.gmra.mxu0 %v16161_v20  ;;  %11716 = vmatprep.subr.bf16.mxu1 %v18301_v35  ;;  %v10249_v35 = vor.u32 %v10248_v62, %v10244_v10  ;;  %v10295_v46 = vrot.slane %v16138_v8, 1  ;;  %v10383_v51 = vrot.slane %v10381_v4, 1  ;;  %v10386_v53 = vshrl.u32 %v16146_v24, 16  ;;  %v10037_v43 = vld [vmem:[#allocation3 + $0x38] sm:$0xe] }
 0x565   : > { %11681 = vmatprep.mubr.bf16.mxu0 %v16171_v1  ;;  %v10242_v0 = vor.u32 %v10241_v47, %v10237_v7  ;;  %v16180_v38 = vcombine.low %v10370_v31, %v10377_v21  ;;  %v10390_v63 = vrot.slane %v10388_v55, 1  ;;  %v10294_v61 = vrot.slane %v16137_v59, 1  ;;  %v18328_v1 = vld [vmem:[%s23692_s5 + $0x404] ss:$8 sps:$4 sm:$0xff]   ;;  %v10034_v47 = vld [vmem:[#allocation3 + $0x20] sm:$0xe] }
 0x566   : > { %11609 = vmatmul.mubr.bf16.gmra.mxu1 %v16168_v36  ;;  %v10262_v45 = vrot.slane %v10260_v22, 1  ;;  %v10379_v27 = vshrl.u32 %v16145_v33, 16  ;;  %v10255_v20 = vrot.slane %v10253_v32, 1  ;;  %v10251_v50 = vshrl.u32 %v16129_v6, 16  ;;  %v10036_v4 = vld [vmem:[#allocation3 + $0x30] sm:$0xe] }
 0x567   : > { %11717 = vmatpush1.bf16.msra.mxu1 %v18299_v9  ;;  %11618 = vmatprep.mubr.bf16.mxu1 %v16178_v13  ;;  %v16177_v10 = vcombine.low %v10242_v0, %v10249_v35  ;;  %v16187_v62 = vcombine.low %v10294_v61, %v10295_v46  ;;  %v10258_v9 = vshrl.u32 %v22522_v41, 16  ;;  %v10391_v30 = vor.u32 %v10390_v63, %v10386_v53  ;;  %v18337_v32 = vld [vmem:[%s23694_s7 + $0xf8] sm:$0xff]   ;;  %v18340_v0 = vld [vmem:[%s23694_s7 + $0x70] sm:$0xff]   ;;  %v18345_v53 = vld [vmem:[%s23694_s7 + $0xe8] sm:$0xff]  }
 0x568   : > { %11718 = vmatprep.subr.bf16.mxu1 %v18308_v2  ;;  %v10384_v56 = vor.u32 %v10383_v51, %v10379_v27  ;;  %v16179_v41 = vcombine.low %v22485_v12, %v22487_v58  ;;  %v10256_v49 = vor.u32 %v10255_v20, %v10251_v50  ;;  %v18320_v2 = vld [vmem:[%s23692_s5 + $0x410] ss:$8 sps:$4 sm:$0xff]   ;;  %v16148_v33 = vcombine.low %v10033_v26, %v22434_v5  ;;  %v18326_v58 = vld [vmem:[%s23692_s5 + $0x400] ss:$8 sps:$4 sm:$0xff]  }
 0x569   : > { %v10263_v25 = vor.u32 %v10262_v45, %v10258_v9  ;;  %v16147_v12 = vcombine.low %v10032_v3, %v22429_v54  ;;  %v23970_v44 = vmov 0   ;;  %v16188_v5 = vcombine.low %v22514_v14, %v22510_v18  ;;  %17287 = vmatprep.subr.bf16.mxu0 %v18337_v32  ;;  %v18342_v46 = vld [vmem:[%s23694_s7 + $0x30] sm:$0xff]   ;;  %v18344_v51 = vld [vmem:[%s23694_s7 + $0x68] sm:$0xff]   ;;  %v18348_v61 = vld [vmem:[%s23694_s7 + $0x60] sm:$0xff]  }
 0x56a   : > { %v16189_v36 = vcombine.low %v10384_v56, %v10391_v30  ;;  %v10417_v19 = vrot.slane %v16148_v33, 1  ;;  %v16150_v54 = vcombine.low %v10035_v37, %v22474_v42  ;;  %v16149_v13 = vcombine.low %v10034_v47, %v22467_v15  ;;  %v10039_v42 = vld [vmem:[#allocation3 + $0x48] sm:$0xe]  ;;  %v18346_v63 = vld [vmem:[%s23694_s7 + $0x28] sm:$0xff]   ;;  %v18352_v27 = vld [vmem:[%s23694_s7 + $0x58] sm:$0xff]  }
 0x56b   : > { %11719 = vmatpush1.bf16.msra.mxu1 %v18306_v48  ;;  %v16186_v24 = vcombine.low %v10256_v49, %v10263_v25  ;;  %v10416_v60 = vrot.slane %v16147_v12, 1  ;;  %v16152_v18 = vcombine.low %v10037_v43, %v22503_v17  ;;  %v16151_v14 = vcombine.low %v10036_v4, %v22493_v57  ;;  %v10038_v48 = vld [vmem:[#allocation3 + $0x40] sm:$0xe]  ;;  %v18349_v45 = vld [vmem:[%s23694_s7 + $0xe0] sm:$0xff]   ;;  %v18356_v56 = vld [vmem:[%s23694_s7 + $0x50] sm:$0xff]  }
 0x56c   : > { %11682 = vmatmul.mubr.bf16.gmra.mxu0 %v16170_v11  ;;  %11720 = vmatprep.subr.bf16.mxu1 %v18311_v52  ;;  %v10419_v8 = vrot.slane %v16150_v54, 1  ;;  %v10418_v21 = vrot.slane %v16149_v13, 1  ;;  %v16153_v15 = vcombine.low %v10038_v48, %v22524_v29  ;;  %v16154_v52 = vcombine.low %v10039_v42, %v22512_v28  ;;  %v18336_v57 = vld [vmem:[%s23694_s7 + $0x78] sm:$0xff]   ;;  %v18341_v11 = vld [vmem:[%s23694_s7 + $0xf0] sm:$0xff]   ;;  %v18360_v25 = vld [vmem:[%s23694_s7 + $0x48] sm:$0xff]  }
 0x56d   : > { %11691 = vmatprep.mubr.bf16.mxu0 %v16180_v38  ;;  %v16163_v6 = vcombine.low %v10416_v60, %v10417_v19  ;;  %v10421_v7 = vrot.slane %v16152_v18, 1  ;;  %v10420_v59 = vrot.slane %v16151_v14, 1  ;;  %v18338_v28 = vld [vmem:[%s23694_s7 + $0x38] sm:$0xff]   ;;  %v18343_v38 = vld [vmem:[%s23694_s7 + $0xb0] sm:$0xff]   ;;  %v18361_v26 = vld [vmem:[%s23694_s7 + $0xc8] sm:$0xff]  }
 0x56e   : > { %11619 = vmatmul.mubr.bf16.gmra.mxu1 %v16177_v10  ;;  %v16172_v55 = vcombine.low %v10418_v21, %v10419_v8  ;;  %v10422_v35 = vrot.slane %v16153_v15, 1  ;;  %v10423_v31 = vrot.slane %v16154_v52, 1  ;;  %v18339_v29 = vld [vmem:[%s23694_s7 + $0xb8] sm:$0xff]   ;;  %v18350_v10 = vld [vmem:[%s23694_s7 + $0x20] sm:$0xff]   ;;  %v18358_v50 = vld [vmem:[%s23694_s7 + $0x10] sm:$0xff]  }
 0x56f   : > { %11721 = vmatpush1.bf16.msra.mxu1 %v18309_v40  ;;  %11628 = vmatprep.mubr.bf16.mxu1 %v16187_v62  ;;  %v16181_v22 = vcombine.low %v10420_v59, %v10421_v7  ;;  %v18347_v40 = vld [vmem:[%s23694_s7 + $0xa8] sm:$0xff]   ;;  %v18353_v62 = vld [vmem:[%s23694_s7 + $0xd8] sm:$0xff]  }
 0x570   : > { %11722 = vmatprep.subr.bf16.mxu1 %v18319_v23  ;;  %v16190_v17 = vcombine.low %v10422_v35, %v10423_v31  ;;  %17288 = vmatpush3.bf16.msra.mxu0 %v18339_v29  ;;  %v18351_v23 = vld [vmem:[%s23694_s7 + $0xa0] sm:$0xff]   ;;  %v18354_v20 = vld [vmem:[%s23694_s7 + $0x18] sm:$0xff]   ;;  %v18363_v33 = vld [vmem:[%s23694_s7 + $0x88] sm:$0xff]  }
 0x571   : > { %17289 = vmatprep.subr.bf16.mxu0 %v18341_v11  ;;  %v18355_v9 = vld [vmem:[%s23694_s7 + $0x98] sm:$0xff]   ;;  %v23971_v21 = vld [vmem:[#allocation7_spill] sm:$0xff] }
 0x572   : > { %v18368_v19 = vld [vmem:[%s23694_s7 + $0x178] sm:$0xff]   ;;  %v22715_v4 = vsub.s32 0, %v23971_v21  ;;  %v22723_v7 = vsub.s32 1, %v23971_v21 }
 0x573   : > { %11723 = vmatpush1.bf16.msra.mxu1 %v18317_v34  ;;  %v18357_v34 = vld [vmem:[%s23694_s7 + $0xd0] sm:$0xff]  }
 0x574   : > { %11692 = vmatmul.mubr.bf16.gmra.mxu0 %v16179_v41  ;;  %11724 = vmatprep.subr.bf16.mxu1 %v18322_v16  ;;  %v18359_v16 = vld [vmem:[%s23694_s7 + $0x90] sm:$0xff]   ;;  %23972 = vst [vmem:[#allocation11_spill] sm:$0xff] %v22715_v4 }
 0x575   : > { %11701 = vmatprep.mubr.bf16.mxu0 %v16189_v36  ;;  %17290 = vmatpush3.bf16.msra.mxu0 %v18343_v38 }
 0x576   : > { %11629 = vmatmul.mubr.bf16.gmra.mxu1 %v16186_v24  ;;  %17291 = vmatprep.subr.bf16.mxu0 %v18345_v53  ;;  %v18364_v24 = vld [vmem:[%s23694_s7 + $0x40] sm:$0xff]  }
 0x577   : > { %11725 = vmatpush1.bf16.msra.mxu1 %v18320_v2  ;;  %11744 = vmatprep.mubr.bf16.mxu1 %v23970_v44  ;;  %v18362_v2 = vld [vmem:[%s23694_s7 + $0x8] sm:$0xff]  }
 0x578   : > { %11726 = vmatprep.subr.bf16.mxu1 %v18328_v1  ;;  %v18365_v1 = vld [vmem:[%s23694_s7 + $0xc0] sm:$0xff]  }
 0x579   : > { %17292 = vmatpush3.bf16.msra.mxu0 %v18347_v40 }
 0x57a   : > { %17293 = vmatprep.subr.bf16.mxu0 %v18349_v45 }
 0x57b   : > { %11727 = vmatpush1.bf16.msra.mxu1 %v18326_v58  ;;  %v18366_v58 = vld [vmem:[%s23694_s7] sm:$0xff]  }
 0x57c   : > { %11702 = vmatmul.mubr.bf16.gmra.mxu0 %v16188_v5  ;;  %17265 = vmatprep.subr.bf16.mxu1 %v18336_v57  ;;  %v18369_v5 = vld [vmem:[%s23694_s7 + $0x1f8] sm:$0xff]  }
 0x57d   : > { %17294 = vmatpush3.bf16.msra.mxu0 %v18351_v23 }
 0x57e   : > { %11745 = vmatmul.mubr.bf16.vlgmr.msra.gmra.mxu1 %v16163_v6  ;;  %17295 = vmatprep.subr.bf16.mxu0 %v18353_v62 }
 0x57f   : > { %11754 = vmatprep.mubr.bf16.mxu1 %v23970_v44  ;;  %17266 = vmatpush3.bf16.msra.mxu1 %v18338_v28 }
 0x580   : > { %17267 = vmatprep.subr.bf16.mxu1 %v18340_v0 }
 0x581   : > { %17296 = vmatpush3.bf16.msra.mxu0 %v18355_v9 }
 0x582   : > { %17297 = vmatprep.subr.bf16.mxu0 %v18357_v34 }
 0x583   : > { %17268 = vmatpush3.bf16.msra.mxu1 %v18342_v46 }
 0x584   : > { %17269 = vmatprep.subr.bf16.mxu1 %v18344_v51 }
 0x585   : > { %17298 = vmatpush3.bf16.msra.mxu0 %v18359_v16 }
 0x586   : > { %11755 = vmatmul.mubr.bf16.gmra.mxu1 %v16172_v55  ;;  %17299 = vmatprep.subr.bf16.mxu0 %v18361_v26  ;;  %v10616_v55 = vld [vmem:[%s23693_s6] sm:$0x3] }
 0x587   : > { %11764 = vmatprep.mubr.bf16.mxu1 %v23970_v44  ;;  %17270 = vmatpush3.bf16.msra.mxu1 %v18346_v63  ;;  %v22726_v42 = vrot.slane %v10616_v55, %v22715_v4  ;;  %v22731_v15 = vrot.slane %v10616_v55, %v22723_v7 }
 0x588   : > { %17271 = vmatprep.subr.bf16.mxu1 %v18348_v61 }
 0x589   : > { %17300 = vmatpush3.bf16.msra.mxu0 %v18363_v33 }
 0x58a   : > { %17301 = vmatprep.subr.bf16.mxu0 %v18365_v1 }
 0x58b   : > { %17272 = vmatpush3.bf16.msra.mxu1 %v18350_v10 }
 0x58c   : > { %17273 = vmatprep.subr.bf16.mxu1 %v18352_v27 }
 0x58e   : > { %11765 = vmatmul.mubr.bf16.gmra.mxu1 %v16181_v22 }
 0x58f   : > { %11774 = vmatprep.mubr.bf16.mxu1 %v23970_v44  ;;  %17274 = vmatpush3.bf16.msra.mxu1 %v18354_v20  ;;  %v18367_v44 = vld [vmem:[%s23694_s7 + $0x80] sm:$0xff]  }
 0x590   : > { %17275 = vmatprep.subr.bf16.mxu1 %v18356_v56  ;;  %17302 = vmatpush3.bf16.msra.mxu0 %v18367_v44 }
 0x591   : > { %17331 = vmatprep.subr.bf16.mxu0 %v18369_v5 }
 0x593   : > { %17276 = vmatpush3.bf16.msra.mxu1 %v18358_v50 }
 0x594   : > { %17277 = vmatprep.subr.bf16.mxu1 %v18360_v25 }
 0x596   : > { %11775 = vmatmul.mubr.bf16.gmra.mxu1 %v16190_v17 }
 0x597   : > { %17278 = vmatpush3.bf16.msra.mxu1 %v18362_v2 }
 0x598   : > { %17279 = vmatprep.subr.bf16.mxu1 %v18364_v24 }
 0x59b   : > { %17280 = vmatpush3.bf16.msra.mxu1 %v18366_v58 }
 0x59c   : > { %17309 = vmatprep.subr.bf16.mxu1 %v18368_v19 }
 0x5aa   : > { %v22647_v30 = vpop.f32.mrf.mxu1 }
 0x5ac   : > { %v22664_v41 = vpop.f32.mrf.mxu1 }
 0x5ae   : > { %v22668_v36 = vpop.f32.mrf.mxu1 }
 0x5b0   : > { %v22684_v12 = vpop.f32.mrf.mxu1 }
 0x5b8   : > { %v22666_v49 = vpop.f32.mrf.mxu0 }
 0x5ba   : > { %v22670_v3 = vpop.f32.mrf.mxu0 }
 0x5bc   : > { %v22698_v37 = vpop.f32.mrf.mxu0 }
 0x5be   : > { %v22702_v47 = vpop.f32.mrf.mxu0 }
 0x5de   : > { %v22700_v60 = vpop.f32.mrf.mxu1 }
 0x5e0   : > { %v22704_v6 = vpop.f32.mrf.mxu1 }
 0x5e2   : > { %v22708_v13 = vpop.f32.mrf.mxu1 }
 0x5e4   : > { %v22712_v43 = vpop.f32.mrf.mxu1 }
 0x5e7   : > { %v22706_v54 = vpop.f32.mrf.mxu0 }
 0x5e9   : > { %v22710_v8 = vpop.f32.mrf.mxu0 }
 0x5eb   : > { %v22720_v18 = vpop.f32.mrf.mxu0 }
 0x5ed   : > { %v22728_v59 = vpop.f32.mrf.mxu0 }
 0x60b   : > { %v11474_v14 = vpop.f32.mrf.mxu1 }
 0x60c   : > { %v11475_v52 = vadd.f32 %v11474_v14, %v22726_v42 }
 0x60d   : > { %v11476_v48 = vpop.f32.mrf.mxu1 }
 0x60e   : > { %v11477_v31 = vadd.f32 %v11476_v48, %v22731_v15 }
 0x60f   : > { %v11478_v22 = vpop.f32.mrf.mxu1  ;;  %v11547_v35 = vpop.f32.mrf.mxu0 }
 0x610   : > { %v11548_v17 = vadd.f32 %v11547_v35, %v11475_v52  ;;  %v11479_v28 = vadd.f32 %v11478_v22, %v22726_v42 }
 0x611   : > { %v11480_v57 = vpop.f32.mrf.mxu1  ;;  %v11549_v32 = vpop.f32.mrf.mxu0 }
 0x612   : > { %v11550_v29 = vadd.f32 %v11549_v32, %v11477_v31  ;;  %v11481_v11 = vadd.f32 %v11480_v57, %v22731_v15 }
 0x613   : > { %v11551_v0 = vpop.f32.mrf.mxu0 }
 0x614   : > { %v11552_v46 = vadd.f32 %v11551_v0, %v11479_v28 }
 0x615   : > { %v11553_v38 = vpop.f32.mrf.mxu0 }
 0x616   : > { %v11484_v51 = vpop.f32.mrf.mxu1  ;;  %v11554_v53 = vadd.f32 %v11553_v38, %v11481_v11 }
 0x617   : > { %v11485_v40 = vadd.f32 %v11484_v51, %v22726_v42 }
 0x618   : > { %v11486_v63 = vpop.f32.mrf.mxu1 }
 0x619   : > { %v11487_v10 = vadd.f32 %v11486_v63, %v22731_v15 }
 0x61a   : > { %v11488_v61 = vpop.f32.mrf.mxu1 }
 0x61b   : > { %v11489_v20 = vadd.f32 %v11488_v61, %v22726_v42 }
 0x61c   : > { %v11557_v45 = vpop.f32.mrf.mxu0  ;;  %v11490_v23 = vpop.f32.mrf.mxu1 }
 0x61d   : > { %v11558_v27 = vadd.f32 %v11557_v45, %v11485_v40  ;;  %v11491_v50 = vadd.f32 %v11490_v23, %v22731_v15 }
 0x61e   : > { %v11559_v62 = vpop.f32.mrf.mxu0  ;;  %v11600_v9 = vpop.f32.mrf.mxu1 }
 0x61f   : > { %v11560_v56 = vadd.f32 %v11559_v62, %v11487_v10 }
 0x620   : > { %v11561_v34 = vpop.f32.mrf.mxu0  ;;  %v11602_v16 = vpop.f32.mrf.mxu1 }
 0x621   : > { %v11562_v25 = vadd.f32 %v11561_v34, %v11489_v20  ;;  %v11459_v20 = vadd.f32 %v22668_v36, %v22726_v42 }
 0x622   : > { %v11563_v26 = vpop.f32.mrf.mxu0  ;;  %v11604_v2 = vpop.f32.mrf.mxu1 }
 0x623   : > { %v11564_v33 = vadd.f32 %v11563_v26, %v11491_v50 }
 0x624   : > { %v11673_v24 = vpop.f32.mrf.mxu0  ;;  %v11606_v1 = vpop.f32.mrf.mxu1 }
 0x626   : > { %v11675_v58 = vpop.f32.mrf.mxu0  ;;  %v22741_v44 = vpop.f32.mrf.mxu1 }
 0x628   : > { %v11677_v19 = vpop.f32.mrf.mxu0  ;;  %v22743_v5 = vpop.f32.mrf.mxu1 }
 0x62a   : > { %v11679_v55 = vpop.f32.mrf.mxu0  ;;  %v22745_v14 = vpop.f32.mrf.mxu1 }
 0x62c   : > { %v22747_v48 = vpop.f32.mrf.mxu0  ;;  %v22749_v22 = vpop.f32.mrf.mxu1 }
 0x62e   : > { %v22751_v52 = vpop.f32.mrf.mxu0  ;;  %v11620_v35 = vpop.f32.mrf.mxu1 }
 0x62f   : > { %v22753_v31 = vadd.f32 %v11620_v35, %v11548_v17 }
 0x630   : > { %v22755_v57 = vpop.f32.mrf.mxu0  ;;  %v11622_v32 = vpop.f32.mrf.mxu1 }
 0x631   : > { %v22757_v28 = vadd.f32 %v11622_v32, %v11550_v29  ;;  %v11455_v29 = vadd.f32 %v22647_v30, %v22726_v42  ;;  %v11532_v30 = vadd.f32 %v22698_v37, %v11459_v20  ;;  %v11469_v37 = vadd.f32 %v22708_v13, %v22726_v42 }
 0x632   : > { %v22759_v0 = vpop.f32.mrf.mxu0  ;;  %v11624_v11 = vpop.f32.mrf.mxu1 }
 0x633   : > { %v22761_v38 = vadd.f32 %v11624_v11, %v11552_v46  ;;  %v11457_v46 = vadd.f32 %v22664_v41, %v22731_v15  ;;  %v11528_v34 = vadd.f32 %v22666_v49, %v11455_v29  ;;  %v11605_v11 = vadd.f32 %v11604_v2, %v11532_v30 }
 0x634   : > { %v11626_v51 = vpop.f32.mrf.mxu1  ;;  %v22763_v63 = vpop.f32.mrf.mxu0  ;;  %v11542_v13 = vadd.f32 %v22720_v18, %v11469_v37 }
 0x635   : > { %v22765_v40 = vadd.f32 %v11626_v51, %v11554_v53  ;;  %v11530_v26 = vadd.f32 %v22670_v3, %v11457_v46  ;;  %v11601_v36 = vadd.f32 %v11600_v9, %v11528_v34  ;;  %v11678_v4 = vadd.f32 %v11677_v19, %v11605_v11 }
 0x636   : > { %v11630_v61 = vpop.f32.mrf.mxu1  ;;  %v22769_v10 = vpop.f32.mrf.mxu0  ;;  %v11465_v3 = vadd.f32 %v22700_v60, %v22726_v42  ;;  %v11615_v30 = vadd.f32 %v22745_v14, %v11542_v13 }
 0x637   : > { %v22767_v45 = vadd.f32 %v11630_v61, %v11558_v27  ;;  %v11461_v27 = vadd.f32 %v22684_v12, %v22731_v15  ;;  %v18722_v61 = vmov 572653568   ;;  %v11674_v29 = vadd.f32 %v11673_v24, %v11601_v36 }
 0x638   : > { %v11632_v17 = vpop.f32.mrf.mxu1  ;;  %v22784_v50 = vpop.f32.mrf.mxu0  ;;  %v11986_v49 = vunpack.c.l.s4 %v18722_v61  ;;  %v11471_v24 = vadd.f32 %v22712_v43, %v22731_v15 }
 0x639   : > { %v22771_v23 = vadd.f32 %v11632_v17, %v11560_v56  ;;  %v11534_v41 = vadd.f32 %v22702_v47, %v11461_v27  ;;  %v11467_v27 = vadd.f32 %v22704_v6, %v22731_v15 }
 0x63a   : > { %v11634_v62 = vpop.f32.mrf.mxu1  ;;  %v22791_v51 = vpop.f32.mrf.mxu0  ;;  %v11987_v19 = vunpack.c.0.s8 %v11986_v49 }
 0x63b   : > { %v22779_v53 = vadd.f32 %v11634_v62, %v11562_v25  ;;  %v11603_v25 = vadd.f32 %v11602_v16, %v11530_v26  ;;  %v11607_v17 = vadd.f32 %v11606_v1, %v11534_v41  ;;  %v11538_v1 = vadd.f32 %v22706_v54, %v11465_v3 }
 0x63c   : > { %v11636_v56 = vpop.f32.mrf.mxu1  ;;  %v22810_v36 = vsub.s32 %v11987_v19, %v23971_v21 }
 0x63d   : > { %v22788_v35 = vadd.f32 %v11636_v56, %v11564_v33  ;;  %v11676_v62 = vadd.f32 %v11675_v58, %v11603_v25  ;;  %v18723_v33 = vmov 1935823168   ;;  %v11680_v16 = vadd.f32 %v11679_v55, %v11607_v17  ;;  %v11703_v58 = vpop.f32.mrf.mxu0 }
 0x63e   : > { %v11746_v32 = vpop.f32.mrf.mxu1  ;;  %v12126_v9 = vunpack.c.l.s4 %v18723_v33  ;;  %v11540_v55 = vadd.f32 %v22710_v8, %v11467_v27  ;;  %v11544_v56 = vadd.f32 %v22728_v59, %v11471_v24 }
 0x63f   : > { %v11747_v2 = vadd.f32 %v11746_v32, %v11674_v29  ;;  %v11705_v18 = vpop.f32.mrf.mxu0 }
 0x640   : > { %v11748_v12 = vpop.f32.mrf.mxu1  ;;  %v12127_v26 = vunpack.c.0.s8 %v12126_v9  ;;  %v11613_v41 = vadd.f32 %v22743_v5, %v11540_v55  ;;  %v11617_v59 = vadd.f32 %v22749_v22, %v11544_v56  ;;  %v11694_v22 = vadd.f32 %v22763_v63, %v22753_v31 }
 0x641   : > { %v11749_v46 = vadd.f32 %v11748_v12, %v11676_v62  ;;  %v11785_v43 = vmax.f32 %v11747_v2, 0.0  ;;  %v11696_v2 = vadd.f32 %v22769_v10, %v22757_v28  ;;  %v11698_v31 = vadd.f32 %v22784_v50, %v22761_v38 }
 0x642   : > { %v11750_v47 = vpop.f32.mrf.mxu1  ;;  %v11686_v14 = vadd.f32 %v22751_v52, %v11613_v41  ;;  %v22816_v12 = vsub.s32 %v12127_v26, %v23971_v21  ;;  %v11690_v49 = vadd.f32 %v22759_v0, %v11617_v59  ;;  %v22825_v52 = vsub.s32 2, %v23971_v21 }
 0x643   : > { %v11751_v20 = vadd.f32 %v11750_v47, %v11678_v4  ;;  %v11611_v4 = vadd.f32 %v22741_v44, %v11538_v1  ;;  %v11786_v15 = vmax.f32 %v11749_v46, 0.0  ;;  %v11688_v44 = vadd.f32 %v22755_v57, %v11615_v30  ;;  %v11707_v57 = vpop.f32.mrf.mxu0 }
 0x644   : > { %v11752_v60 = vpop.f32.mrf.mxu1  ;;  %v22828_v47 = vsub.s32 5, %v23971_v21  ;;  %v11700_v63 = vadd.f32 %v22791_v51, %v22765_v40  ;;  %v11704_v38 = vadd.f32 %v11703_v58, %v22767_v45  ;;  %v11706_v40 = vadd.f32 %v11705_v18, %v22771_v23 }
 0x645   : > { %v11787_v42 = vmax.f32 %v11751_v20, 0.0  ;;  %v11753_v34 = vadd.f32 %v11752_v60, %v11680_v16  ;;  %v11684_v32 = vadd.f32 %v22747_v48, %v11611_v4  ;;  %v22819_v48 = vsub.s32 3, %v23971_v21  ;;  %v11709_v19 = vpop.f32.mrf.mxu0 }
 0x646   : > { %v11756_v6 = vpop.f32.mrf.mxu1  ;;  %v11708_v30 = vadd.f32 %v11707_v57, %v22779_v53 }
 0x647   : > { %v11788_v54 = vmax.f32 %v11753_v34, 0.0  ;;  %v11801_v25 = vmax.f32 %v11785_v43, %v11787_v42  ;;  %v11757_v61 = vadd.f32 %v11756_v6, %v11684_v32  ;;  %v11710_v43 = vadd.f32 %v11709_v19, %v22788_v35 }
 0x648   : > { %v11758_v8 = vpop.f32.mrf.mxu1 }
 0x649   : > { %v11802_v11 = vmax.f32 %v11786_v15, %v11788_v54  ;;  %v11759_v3 = vadd.f32 %v11758_v8, %v11686_v14  ;;  %v11789_v46 = vmax.f32 %v11757_v61, 0.0 }
 0x64a   : > { %v11760_v5 = vpop.f32.mrf.mxu1 }
 0x64b   : > { %v11817_v17 = vcombine.low %v11801_v25, %v11802_v11  ;;  %v11818_v29 = vcombine.high %v11801_v25, %v11802_v11  ;;  %v11761_v62 = vadd.f32 %v11760_v5, %v11688_v44  ;;  %v11790_v13 = vmax.f32 %v11759_v3, 0.0 }
 0x64c   : > { %v11762_v37 = vpop.f32.mrf.mxu1 }
 0x64d   : > { %v11825_v33 = vrot.slane %v11817_v17, %v23951_v39  ;;  %v11832_v9 = vrot.slane %v11818_v29, %v23951_v39  ;;  %v11791_v0 = vmax.f32 %v11761_v62, 0.0  ;;  %v11763_v16 = vadd.f32 %v11762_v37, %v11690_v49 }
 0x64e   : > { %v11766_v20 = vpop.f32.mrf.mxu1 }
 0x64f   : > { %v11833_v27 = vcombine.high %v11825_v33, %v11825_v33  ;;  %v11834_v24 = vcombine.high %v11832_v9, %v11832_v9  ;;  %v16335_v1 = vrot.slane %v11825_v33, 9  ;;  %v16337_v60 = vrot.slane %v11832_v9, 9 }
 0x650   : > { %v11803_v42 = vmax.f32 %v11789_v46, %v11791_v0  ;;  %v11792_v34 = vmax.f32 %v11763_v16, 0.0  ;;  %v11767_v55 = vadd.f32 %v11766_v20, %v11694_v22  ;;  %v11768_v56 = vpop.f32.mrf.mxu1 }
 0x651   : > { %v16336_v4 = vrot.slane %v11833_v27, 9  ;;  %v16338_v28 = vrot.slane %v11834_v24, 9  ;;  %v11953_v10 = vmax.f32 %v11825_v33, %v16335_v1  ;;  %v11955_v26 = vmax.f32 %v11832_v9, %v16337_v60 }
 0x652   : > { %v11804_v50 = vmax.f32 %v11790_v13, %v11792_v34  ;;  %v11769_v51 = vadd.f32 %v11768_v56, %v11696_v2  ;;  %v11770_v6 = vpop.f32.mrf.mxu1  ;;  %v11793_v8 = vmax.f32 %v11767_v55, 0.0 }
 0x653   : > { %v11954_v15 = vmax.f32 %v11833_v27, %v16336_v4  ;;  %v11956_v54 = vmax.f32 %v11834_v24, %v16338_v28  ;;  %v11771_v59 = vadd.f32 %v11770_v6, %v11698_v31  ;;  %v11991_v25 = vrot.slane %v11953_v10, %v22810_v36 }
 0x654   : > { %v11835_v41 = vcombine.low %v11803_v42, %v11804_v50  ;;  %v11836_v32 = vcombine.high %v11803_v42, %v11804_v50  ;;  %v11772_v44 = vpop.f32.mrf.mxu1  ;;  %v12005_v23 = vrot.slane %v11955_v26, %v22810_v36  ;;  %v11794_v11 = vmax.f32 %v11769_v51, 0.0 }
 0x655   : > { %v11998_v45 = vrot.slane %v11954_v15, %v22810_v36  ;;  %v11773_v58 = vadd.f32 %v11772_v44, %v11700_v63  ;;  %v11795_v35 = vmax.f32 %v11771_v59, 0.0  ;;  %v12012_v61 = vrot.slane %v11956_v54, %v22810_v36 }
 0x656   : > { %v11843_v18 = vrot.slane %v11835_v41, %v23951_v39  ;;  %v11850_v53 = vrot.slane %v11836_v32, %v23951_v39  ;;  %v11776_v14 = vpop.f32.mrf.mxu1 }
 0x657   : > { %v12097_v5 = vsel %vm5526_vm11, %v11998_v45, %v11991_v25  ;;  %v11796_v49 = vmax.f32 %v11773_v58, 0.0  ;;  %v11777_v17 = vadd.f32 %v11776_v14, %v11704_v38  ;;  %v11805_v9 = vmax.f32 %v11793_v8, %v11795_v35 }
 0x658   : > { %v12098_v29 = vsel %vm5517_vm9, %v11998_v45, %v12097_v5  ;;  %v11851_v62 = vcombine.high %v11843_v18, %v11843_v18  ;;  %v11852_v22 = vcombine.high %v11850_v53, %v11850_v53  ;;  %v16339_v57 = vrot.slane %v11843_v18, 9  ;;  %v11778_v3 = vpop.f32.mrf.mxu1 }
 0x659   : > { %v12099_v37 = vsel %vm5508_vm5, %v12005_v23, %v12098_v29  ;;  %v16341_v33 = vrot.slane %v11850_v53, 9  ;;  %v11806_v0 = vmax.f32 %v11794_v11, %v11796_v49  ;;  %v11797_v38 = vmax.f32 %v11777_v17, 0.0 }
 0x65a   : > { %v12100_v16 = vsel %vm5520_vm10, %v12005_v23, %v12099_v37  ;;  %v16340_v2 = vrot.slane %v11851_v62, 9  ;;  %v16342_v31 = vrot.slane %v11852_v22, 9  ;;  %v11957_v63 = vmax.f32 %v11843_v18, %v16339_v57  ;;  %v11780_v46 = vpop.f32.mrf.mxu1 }
 0x65b   : > { %v12101_v20 = vsel %vm5511_vm6, %v12012_v61, %v12100_v16  ;;  %v11959_v27 = vmax.f32 %v11850_v53, %v16341_v33  ;;  %v11853_v24 = vcombine.low %v11805_v9, %v11806_v0  ;;  %v11854_v1 = vcombine.high %v11805_v9, %v11806_v0  ;;  %v23973_v16 = vld [vmem:[#allocation11_spill] sm:$0xff] }
 0x65c   : > { %v12102_v60 = vsel %vm5523_vm13, %v12012_v61, %v12101_v20  ;;  %v11958_v19 = vmax.f32 %v11851_v62, %v16340_v2  ;;  %v11960_v13 = vmax.f32 %v11852_v22, %v16342_v31  ;;  %v12019_v42 = vrot.slane %v11957_v63, %v22810_v36  ;;  %v11782_v28 = vpop.f32.mrf.mxu1 }
 0x65d   : > { %v22856_v34 = vrot.slane %v12102_v60, %v22816_v12  ;;  %v12033_v55 = vrot.slane %v11959_v27, %v22810_v36  ;;  %v11861_v56 = vrot.slane %v11853_v24, %v23951_v39  ;;  %v11868_v4 = vrot.slane %v11854_v1, %v23951_v39  ;;  %v18370_v24 = vld [vmem:[%s23694_s7 + $0x138] sm:$0xff]  }
 0x65e   : > { %v12026_v10 = vrot.slane %v11958_v19, %v22810_v36  ;;  %v12040_v26 = vrot.slane %v11960_v13, %v22810_v36  ;;  %v11779_v50 = vadd.f32 %v11778_v3, %v11706_v40  ;;  %v11781_v8 = vadd.f32 %v11780_v46, %v11708_v30  ;;  %v18371_v1 = vld [vmem:[%s23694_s7 + $0x1b8] sm:$0xff]  }
 0x65f   : > { %v11869_v51 = vcombine.high %v11861_v56, %v11861_v56  ;;  %v11870_v6 = vcombine.high %v11868_v4, %v11868_v4  ;;  %v16343_v15 = vrot.slane %v11861_v56, 9  ;;  %v16345_v54 = vrot.slane %v11868_v4, 9 }
 0x660   : > { %v12103_v41 = vsel %vm5526_vm11, %v12026_v10, %v12019_v42  ;;  %v11798_v32 = vmax.f32 %v11779_v50, 0.0  ;;  %v11783_v59 = vadd.f32 %v11782_v28, %v11710_v43  ;;  %v11799_v53 = vmax.f32 %v11781_v8, 0.0  ;;  %v18375_v8 = vld [vmem:[%s23694_s7 + $0x1b0] sm:$0xff]  }
 0x661   : > { %v12104_v44 = vsel %vm5517_vm9, %v12026_v10, %v12103_v41  ;;  %v16344_v25 = vrot.slane %v11869_v51, 9  ;;  %v16346_v45 = vrot.slane %v11870_v6, 9  ;;  %v11961_v23 = vmax.f32 %v11861_v56, %v16343_v15  ;;  %v18373_v10 = vld [vmem:[%s23694_s7 + $0x1f0] sm:$0xff]  }
 0x662   : > { %v12105_v58 = vsel %vm5508_vm5, %v12033_v55, %v12104_v44  ;;  %v11963_v18 = vmax.f32 %v11868_v4, %v16345_v54  ;;  %v11800_v11 = vmax.f32 %v11783_v59, 0.0  ;;  %v11807_v43 = vmax.f32 %v11797_v38, %v11799_v53 }
 0x663   : > { %v12106_v40 = vsel %vm5520_vm10, %v12033_v55, %v12105_v58  ;;  %v11962_v35 = vmax.f32 %v11869_v51, %v16344_v25  ;;  %v11964_v14 = vmax.f32 %v11870_v6, %v16346_v45  ;;  %v12047_v61 = vrot.slane %v11961_v23, %v22810_v36  ;;  %v18376_v45 = vld [vmem:[%s23694_s7 + $0x168] sm:$0xff]  }
 0x664   : > { %v12107_v5 = vsel %vm5511_vm6, %v12040_v26, %v12106_v40  ;;  %v12061_v30 = vrot.slane %v11963_v18, %v22810_v36  ;;  %v11808_v49 = vmax.f32 %v11798_v32, %v11800_v11  ;;  %v12164_v22 = vrot.slane %v22856_v34, %v22723_v7  ;;  %v18374_v32 = vld [vmem:[%s23694_s7 + $0x130] sm:$0xff]   ;;  %v18377_v23 = vld [vmem:[%s23694_s7 + $0x1e8] sm:$0xff]  }
 0x665   : > { %v22871_v17 = vsel %vm5523_vm13, %v12040_v26, %v12107_v5  ;;  %v12054_v29 = vrot.slane %v11962_v35, %v22810_v36  ;;  %v12068_v62 = vrot.slane %v11964_v14, %v22810_v36  ;;  %v12172_v37 = vrot.slane %v22856_v34, %v22819_v48  ;;  %v18378_v14 = vld [vmem:[%s23694_s7 + $0x128] sm:$0xff]   ;;  %v18380_v5 = vld [vmem:[%s23694_s7 + $0x160] sm:$0xff]  }
 0x666   : > { %v11871_v57 = vcombine.low %v11807_v43, %v11808_v49  ;;  %v11872_v3 = vcombine.high %v11807_v43, %v11808_v49  ;;  %v22880_v33 = vsub.s32 7, %v23971_v21  ;;  %v12318_v0 = vpack.c.bf16 %v12164_v22, %v12164_v22 }
 0x667   : > { %v12109_v9 = vsel %vm5526_vm11, %v12054_v29, %v12047_v61  ;;  %v12160_v2 = vrot.slane %v22856_v34, %v23973_v16  ;;  %v12168_v31 = vrot.slane %v22856_v34, %v22825_v52  ;;  %v12320_v27 = vpack.c.bf16 %v12172_v37, %v12172_v37  ;;  %v18379_v61 = vld [vmem:[%s23694_s7 + $0x1a8] sm:$0xff]  }
 0x668   : > { %v12110_v63 = vsel %vm5517_vm9, %v12054_v29, %v12109_v9  ;;  %v11879_v46 = vrot.slane %v11871_v57, %v23951_v39  ;;  %v11886_v20 = vrot.slane %v11872_v3, %v23951_v39  ;;  %14430 = vmatprep.mubr.bf16.mxu1 %v12318_v0  ;;  %v12180_v42 = vrot.slane %v22856_v34, %v22828_v47  ;;  %v18372_v39 = vld [vmem:[%s23694_s7 + $0x170] sm:$0xff]   ;;  %v18382_v29 = vld [vmem:[%s23694_s7 + $0x120] sm:$0xff]   ;;  %v18384_v57 = vld [vmem:[%s23694_s7 + $0x158] sm:$0xff]  }
 0x669   : > { %v12111_v60 = vsel %vm5508_vm5, %v12061_v30, %v12110_v63  ;;  %v12317_v19 = vpack.c.bf16 %v12160_v2, %v12160_v2  ;;  %v12319_v13 = vpack.c.bf16 %v12168_v31, %v12168_v31  ;;  %14470 = vmatprep.mubr.bf16.mxu0 %v12320_v27  ;;  %v12188_v51 = vrot.slane %v22856_v34, %v22880_v33  ;;  %v18385_v3 = vld [vmem:[%s23694_s7 + $0x1d8] sm:$0xff]   ;;  %v18390_v27 = vld [vmem:[%s23694_s7 + $0x110] sm:$0xff]  }
 0x66a   : > { %v12112_v55 = vsel %vm5520_vm10, %v12061_v30, %v12111_v60  ;;  %v11887_v56 = vcombine.high %v11879_v46, %v11879_v46  ;;  %v11888_v4 = vcombine.high %v11886_v20, %v11886_v20  ;;  %v16347_v28 = vrot.slane %v11879_v46, 9  ;;  %v18386_v31 = vld [vmem:[%s23694_s7 + $0x118] sm:$0xff]   ;;  %v18393_v60 = vld [vmem:[%s23694_s7 + $0x1c8] sm:$0xff]  }
 0x66b   : > { %v12113_v26 = vsel %vm5511_vm6, %v12068_v62, %v12112_v55  ;;  %v16349_v38 = vrot.slane %v11886_v20, 9  ;;  %14431 = vmatmul.mubr.bf16.vlgmr.msra.gmra.mxu1 %v12317_v19  ;;  %14471 = vmatmul.mubr.bf16.vlgmr.msra.gmra.mxu0 %v12319_v13  ;;  %v12322_v50 = vpack.c.bf16 %v12180_v42, %v12180_v42  ;;  %v12324_v25 = vpack.c.bf16 %v12188_v51, %v12188_v51  ;;  %v18387_v63 = vld [vmem:[%s23694_s7 + $0x198] sm:$0xff]   ;;  %v18394_v19 = vld [vmem:[%s23694_s7 + $0x108] sm:$0xff]   ;;  %v18396_v42 = vld [vmem:[%s23694_s7 + $0x140] sm:$0xff]  }
 0x66c   : > { %v12114_v6 = vsel %vm5523_vm13, %v12068_v62, %v12113_v26  ;;  %v16348_v15 = vrot.slane %v11887_v56, 9  ;;  %v16350_v54 = vrot.slane %v11888_v4, 9  ;;  %v11965_v41 = vmax.f32 %v11879_v46, %v16347_v28  ;;  %17310 = vmatpush3.bf16.msra.mxu1 %v18370_v24  ;;  %17332 = vmatpush3.bf16.msra.mxu0 %v18371_v1  ;;  %v18383_v62 = vld [vmem:[%s23694_s7 + $0x1a0] sm:$0xff]   ;;  %v18388_v46 = vld [vmem:[%s23694_s7 + $0x150] sm:$0xff]   ;;  %v18392_v1 = vld [vmem:[%s23694_s7 + $0x148] sm:$0xff]  }
 0x66d   : > { %v22917_v59 = vrot.slane %v12114_v6, %v22816_v12  ;;  %v11967_v44 = vmax.f32 %v11886_v20, %v16349_v38  ;;  %14510 = vmatprep.mubr.bf16.mxu1 %v12322_v50  ;;  %17311 = vmatprep.subr.bf16.mxu1 %v18372_v39  ;;  %v18389_v20 = vld [vmem:[%s23694_s7 + $0x1d0] sm:$0xff]   ;;  %v18395_v13 = vld [vmem:[%s23694_s7 + $0x188] sm:$0xff]   ;;  %v18397_v39 = vld [vmem:[%s23694_s7 + $0x1c0] sm:$0xff]   ;;  %v23003_v55 = vsub.s32 4, %v23971_v21 }
 0x66e   : > { %v11966_v58 = vmax.f32 %v11887_v56, %v16348_v15  ;;  %v11968_v18 = vmax.f32 %v11888_v4, %v16350_v54  ;;  %v12075_v53 = vrot.slane %v11965_v41, %v22810_v36  ;;  %17333 = vmatprep.subr.bf16.mxu0 %v18373_v10  ;;  %14550 = vmatprep.mubr.bf16.mxu0 %v12324_v25  ;;  %v18391_v24 = vld [vmem:[%s23694_s7 + $0x190] sm:$0xff]   ;;  %v23006_v56 = vsub.s32 6, %v23971_v21  ;;  %v18398_v28 = vld [vmem:[%s23694_s7 + $0x100] sm:$0xff]   ;;  %v18403_v15 = vld [vmem:[%s23694_s7 + $0x2b8] sm:$0xff]  }
 0x66f   : > { %v12089_v11 = vrot.slane %v11967_v44, %v22810_v36  ;;  %v22961_v0 = vrot.slane %v22917_v59, %v22819_v48  ;;  %v23010_v4 = vrot.slane %v22871_v17, %v22816_v12  ;;  %v18399_v10 = vld [vmem:[%s23694_s7 + $0x180] sm:$0xff]   ;;  %v12176_v21 = vrot.slane %v22856_v34, %v23003_v55  ;;  %v18401_v17 = vld [vmem:[%s23694_s7 + $0x2f8] sm:$0xff]   ;;  %v18404_v41 = vld [vmem:[%s23694_s7 + $0x270] sm:$0xff]  }
 0x670   : > { %v12082_v40 = vrot.slane %v11966_v58, %v22810_v36  ;;  %v12096_v35 = vrot.slane %v11968_v18, %v22810_v36  ;;  %17312 = vmatpush3.bf16.msra.mxu1 %v18374_v32  ;;  %17334 = vmatpush3.bf16.msra.mxu0 %v18375_v8  ;;  %v18381_v36 = vld [vmem:[%s23694_s7 + $0x1e0] sm:$0xff]   ;;  %v12184_v26 = vrot.slane %v22856_v34, %v23006_v56  ;;  %v18402_v34 = vld [vmem:[%s23694_s7 + $0x238] sm:$0xff]   ;;  %v18405_v32 = vld [vmem:[%s23694_s7 + $0x2f0] sm:$0xff]  }
 0x671   : > { %17313 = vmatprep.subr.bf16.mxu1 %v18376_v45  ;;  %17335 = vmatprep.subr.bf16.mxu0 %v18377_v23  ;;  %v12196_v38 = vrot.slane %v23010_v4, %v22723_v7  ;;  %v12204_v50 = vrot.slane %v23010_v4, %v22819_v48  ;;  %v12321_v51 = vpack.c.bf16 %v12176_v21, %v12176_v21  ;;  %v18406_v44 = vld [vmem:[%s23694_s7 + $0x230] sm:$0xff]   ;;  %v18408_v45 = vld [vmem:[%s23694_s7 + $0x268] sm:$0xff]  }
 0x672   : > { %v12115_v30 = vsel %vm5526_vm11, %v12082_v40, %v12075_v53  ;;  %v12323_v6 = vpack.c.bf16 %v12184_v26, %v12184_v26  ;;  %v18407_v25 = vld [vmem:[%s23694_s7 + $0x2b0] sm:$0xff]   ;;  %v18409_v58 = vld [vmem:[%s23694_s7 + $0x2e8] sm:$0xff]  }
 0x673   : > { %v12116_v43 = vsel %vm5517_vm9, %v12082_v40, %v12115_v30  ;;  %v12326_v54 = vpack.c.bf16 %v12196_v38, %v12196_v38  ;;  %v12328_v8 = vpack.c.bf16 %v12204_v50, %v12204_v50  ;;  %v18410_v18 = vld [vmem:[%s23694_s7 + $0x228] sm:$0xff]   ;;  %v18414_v40 = vld [vmem:[%s23694_s7 + $0x220] sm:$0xff]   ;;  %v18420_v30 = vld [vmem:[%s23694_s7 + $0x250] sm:$0xff]  }
 0x674   : > { %v12117_v49 = vsel %vm5508_vm5, %v12089_v11, %v12116_v43  ;;  %17314 = vmatpush3.bf16.msra.mxu1 %v18378_v14  ;;  %17336 = vmatpush3.bf16.msra.mxu0 %v18379_v61  ;;  %v18411_v53 = vld [vmem:[%s23694_s7 + $0x2a8] sm:$0xff]   ;;  %v18416_v14 = vld [vmem:[%s23694_s7 + $0x258] sm:$0xff]   ;;  %v18421_v43 = vld [vmem:[%s23694_s7 + $0x2d0] sm:$0xff]   ;;  %vm15039_vm5 = vcmask 253952  }
 0x675   : > { %v12118_v22 = vsel %vm5520_vm10, %v12089_v11, %v12117_v49  ;;  %17315 = vmatprep.subr.bf16.mxu1 %v18380_v5  ;;  %17337 = vmatprep.subr.bf16.mxu0 %v18381_v36  ;;  %v18413_v11 = vld [vmem:[%s23694_s7 + $0x2e0] sm:$0xff]   ;;  %v18417_v61 = vld [vmem:[%s23694_s7 + $0x2d8] sm:$0xff]   ;;  %v18422_v49 = vld [vmem:[%s23694_s7 + $0x210] sm:$0xff]  }
 0x676   : > { %v12119_v37 = vsel %vm5511_vm6, %v12096_v35, %v12118_v22  ;;  %v18418_v5 = vld [vmem:[%s23694_s7 + $0x218] sm:$0xff]   ;;  %v18425_v22 = vld [vmem:[%s23694_s7 + $0x2c8] sm:$0xff]   ;;  %v18437_v21 = vld [vmem:[%s23694_s7 + $0x3f0] sm:$0xff]  }
 0x677   : > { %v12120_v9 = vsel %vm5523_vm13, %v12096_v35, %v12119_v37  ;;  %v18415_v35 = vld [vmem:[%s23694_s7 + $0x2a0] sm:$0xff]   ;;  %v18419_v36 = vld [vmem:[%s23694_s7 + $0x298] sm:$0xff]   ;;  %v18440_v38 = vld [vmem:[%s23694_s7 + $0x368] sm:$0xff]  }
 0x678   : > { %v22964_v2 = vrot.slane %v12120_v9, %v22816_v12  ;;  %17316 = vmatpush3.bf16.msra.mxu1 %v18382_v29  ;;  %17338 = vmatpush3.bf16.msra.mxu0 %v18383_v62  ;;  %v18400_v12 = vld [vmem:[%s23694_s7 + $0x278] sm:$0xff]   ;;  %v18423_v29 = vld [vmem:[%s23694_s7 + $0x290] sm:$0xff]   ;;  %v18424_v62 = vld [vmem:[%s23694_s7 + $0x248] sm:$0xff]  }
 0x679   : > { %17317 = vmatprep.subr.bf16.mxu1 %v18384_v57  ;;  %17339 = vmatprep.subr.bf16.mxu0 %v18385_v3  ;;  %v18426_v57 = vld [vmem:[%s23694_s7 + $0x208] sm:$0xff]   ;;  %v18428_v37 = vld [vmem:[%s23694_s7 + $0x240] sm:$0xff]  }
 0x67a   : > { %v23055_v23 = vrot.slane %v22964_v2, %v22819_v48  ;;  %v18412_v48 = vld [vmem:[%s23694_s7 + $0x260] sm:$0xff]   ;;  %v18427_v3 = vld [vmem:[%s23694_s7 + $0x288] sm:$0xff]  }
 0x67b   : > { %v18429_v9 = vld [vmem:[%s23694_s7 + $0x2c0] sm:$0xff]   ;;  %v18441_v50 = vld [vmem:[%s23694_s7 + $0x3e8] sm:$0xff]  }
 0x67c   : > { %17318 = vmatpush3.bf16.msra.mxu1 %v18386_v31  ;;  %17340 = vmatpush3.bf16.msra.mxu0 %v18387_v63  ;;  %v18430_v31 = vld [vmem:[%s23694_s7 + $0x200] sm:$0xff]  }
 0x67d   : > { %17319 = vmatprep.subr.bf16.mxu1 %v18388_v46  ;;  %17341 = vmatprep.subr.bf16.mxu0 %v18389_v20  ;;  %v18431_v63 = vld [vmem:[%s23694_s7 + $0x280] sm:$0xff]   ;;  %v12192_v46 = vrot.slane %v23010_v4, %v23973_v16  ;;  %v18432_v20 = vld [vmem:[%s23694_s7 + $0x378] sm:$0xff]  }
 0x680   : > { %17320 = vmatpush3.bf16.msra.mxu1 %v18390_v27  ;;  %17342 = vmatpush3.bf16.msra.mxu0 %v18391_v24  ;;  %v12200_v27 = vrot.slane %v23010_v4, %v22825_v52  ;;  %v18433_v24 = vld [vmem:[%s23694_s7 + $0x3f8] sm:$0xff]  }
 0x681   : > { %17321 = vmatprep.subr.bf16.mxu1 %v18392_v1  ;;  %17343 = vmatprep.subr.bf16.mxu0 %v18393_v60  ;;  %v12212_v1 = vrot.slane %v23010_v4, %v22828_v47  ;;  %v18434_v60 = vld [vmem:[%s23694_s7 + $0x338] sm:$0xff]  }
 0x684   : > { %17322 = vmatpush3.bf16.msra.mxu1 %v18394_v19  ;;  %17344 = vmatpush3.bf16.msra.mxu0 %v18395_v13  ;;  %v12220_v19 = vrot.slane %v23010_v4, %v22880_v33  ;;  %v12325_v13 = vpack.c.bf16 %v12192_v46, %v12192_v46  ;;  %v18470_v46 = vld [vmem:[%s23694_s7 + $0x430] sm:$0xff]  }
 0x685   : > { %17323 = vmatprep.subr.bf16.mxu1 %v18396_v42  ;;  %17345 = vmatprep.subr.bf16.mxu0 %v18397_v39  ;;  %v18435_v42 = vld [vmem:[%s23694_s7 + $0x3b8] sm:$0xff]   ;;  %v12327_v39 = vpack.c.bf16 %v12200_v27, %v12200_v27  ;;  %v18472_v27 = vld [vmem:[%s23694_s7 + $0x468] sm:$0xff]  }
 0x686   : > { %v12332_v26 = vpack.c.bf16 %v12220_v19, %v12220_v19  ;;  %v18477_v19 = vld [vmem:[%s23694_s7 + $0x4e0] sm:$0xff]  }
 0x688   : > { %17324 = vmatpush3.bf16.msra.mxu1 %v18398_v28  ;;  %17346 = vmatpush3.bf16.msra.mxu0 %v18399_v10  ;;  %v18436_v28 = vld [vmem:[%s23694_s7 + $0x370] sm:$0xff]   ;;  %v12330_v10 = vpack.c.bf16 %v12212_v1, %v12212_v1  ;;  %v18475_v1 = vld [vmem:[%s23694_s7 + $0x4a8] sm:$0xff]  }
 0x689   : > { %17353 = vmatprep.subr.bf16.mxu1 %v18400_v12  ;;  %17375 = vmatprep.subr.bf16.mxu0 %v18401_v17  ;;  %v18438_v12 = vld [vmem:[%s23694_s7 + $0x330] sm:$0xff]  }
 0x68a   : > { %v18439_v17 = vld [vmem:[%s23694_s7 + $0x3b0] sm:$0xff]  }
 0x68b   : > { %14511 = vmatmul.mubr.bf16.vlgmr.msra.gmra.mxu1 %v12321_v51  ;;  %14551 = vmatmul.mubr.bf16.vlgmr.msra.gmra.mxu0 %v12323_v6  ;;  %v18443_v51 = vld [vmem:[%s23694_s7 + $0x3a8] sm:$0xff]   ;;  %v18444_v6 = vld [vmem:[%s23694_s7 + $0x360] sm:$0xff]  }
 0x68c   : > { %17354 = vmatpush3.bf16.msra.mxu1 %v18402_v34  ;;  %14590 = vmatprep.mubr.bf16.mxu1 %v12326_v54  ;;  %v18442_v34 = vld [vmem:[%s23694_s7 + $0x328] sm:$0xff]   ;;  %v18446_v54 = vld [vmem:[%s23694_s7 + $0x320] sm:$0xff]  }
 0x68d   : > { %17376 = vmatpush3.bf16.msra.mxu0 %v18403_v15  ;;  %14630 = vmatprep.mubr.bf16.mxu0 %v12328_v8  ;;  %v18445_v15 = vld [vmem:[%s23694_s7 + $0x3e0] sm:$0xff]   ;;  %v18449_v8 = vld [vmem:[%s23694_s7 + $0x3d8] sm:$0xff]  }
 0x68e   : > { %17355 = vmatprep.subr.bf16.mxu1 %v18404_v41  ;;  %17377 = vmatprep.subr.bf16.mxu0 %v18405_v32  ;;  %v18447_v41 = vld [vmem:[%s23694_s7 + $0x3a0] sm:$0xff]   ;;  %v18448_v32 = vld [vmem:[%s23694_s7 + $0x358] sm:$0xff]  }
 0x690   : > { %17356 = vmatpush3.bf16.msra.mxu1 %v18406_v44  ;;  %v18450_v44 = vld [vmem:[%s23694_s7 + $0x318] sm:$0xff]  }
 0x691   : > { %17378 = vmatpush3.bf16.msra.mxu0 %v18407_v25  ;;  %17357 = vmatprep.subr.bf16.mxu1 %v18408_v45  ;;  %v18451_v25 = vld [vmem:[%s23694_s7 + $0x398] sm:$0xff]   ;;  %v18452_v45 = vld [vmem:[%s23694_s7 + $0x350] sm:$0xff]  }
 0x692   : > { %17379 = vmatprep.subr.bf16.mxu0 %v18409_v58  ;;  %v18453_v58 = vld [vmem:[%s23694_s7 + $0x3d0] sm:$0xff]  }
 0x694   : > { %17358 = vmatpush3.bf16.msra.mxu1 %v18410_v18  ;;  %v18454_v18 = vld [vmem:[%s23694_s7 + $0x310] sm:$0xff]  }
 0x695   : > { %17380 = vmatpush3.bf16.msra.mxu0 %v18411_v53  ;;  %17359 = vmatprep.subr.bf16.mxu1 %v18412_v48  ;;  %v18455_v53 = vld [vmem:[%s23694_s7 + $0x390] sm:$0xff]   ;;  %v18456_v48 = vld [vmem:[%s23694_s7 + $0x348] sm:$0xff]  }
 0x696   : > { %17381 = vmatprep.subr.bf16.mxu0 %v18413_v11  ;;  %v18457_v11 = vld [vmem:[%s23694_s7 + $0x3c8] sm:$0xff]  }
 0x698   : > { %17360 = vmatpush3.bf16.msra.mxu1 %v18414_v40  ;;  %v18458_v40 = vld [vmem:[%s23694_s7 + $0x308] sm:$0xff]  }
 0x699   : > { %17382 = vmatpush3.bf16.msra.mxu0 %v18415_v35  ;;  %17361 = vmatprep.subr.bf16.mxu1 %v18416_v14  ;;  %v18459_v35 = vld [vmem:[%s23694_s7 + $0x388] sm:$0xff]   ;;  %v18460_v14 = vld [vmem:[%s23694_s7 + $0x340] sm:$0xff]  }
 0x69a   : > { %17383 = vmatprep.subr.bf16.mxu0 %v18417_v61  ;;  %v18461_v61 = vld [vmem:[%s23694_s7 + $0x3c0] sm:$0xff]  }
 0x69c   : > { %17362 = vmatpush3.bf16.msra.mxu1 %v18418_v5  ;;  %v18462_v5 = vld [vmem:[%s23694_s7 + $0x300] sm:$0xff]  }
 0x69d   : > { %17384 = vmatpush3.bf16.msra.mxu0 %v18419_v36  ;;  %17363 = vmatprep.subr.bf16.mxu1 %v18420_v30  ;;  %v18463_v36 = vld [vmem:[%s23694_s7 + $0x380] sm:$0xff]   ;;  %v12208_v30 = vrot.slane %v23010_v4, %v23003_v55 }
 0x69e   : > { %17385 = vmatprep.subr.bf16.mxu0 %v18421_v43  ;;  %v18464_v43 = vld [vmem:[%s23694_s7 + $0x478] sm:$0xff]  }
 0x6a0   : > { %17364 = vmatpush3.bf16.msra.mxu1 %v18422_v49  ;;  %v12216_v49 = vrot.slane %v23010_v4, %v23006_v56 }
 0x6a1   : > { %17386 = vmatpush3.bf16.msra.mxu0 %v18423_v29  ;;  %17365 = vmatprep.subr.bf16.mxu1 %v18424_v62  ;;  %v18465_v29 = vld [vmem:[%s23694_s7 + $0x4f8] sm:$0xff]   ;;  %v12228_v62 = vrot.slane %v22917_v59, %v22723_v7 }
 0x6a2   : > { %17387 = vmatprep.subr.bf16.mxu0 %v18425_v22  ;;  %v18466_v22 = vld [vmem:[%s23694_s7 + $0x438] sm:$0xff]   ;;  %v12331_v4 = vpack.c.bf16 %v12216_v49, %v12216_v49  ;;  %v18505_v49 = vld [vmem:[%s23694_s7 + $0x5e8] sm:$0xff]  }
 0x6a4   : > { %17366 = vmatpush3.bf16.msra.mxu1 %v18426_v57  ;;  %v12329_v57 = vpack.c.bf16 %v12208_v30, %v12208_v30  ;;  %v18503_v30 = vld [vmem:[%s23694_s7 + $0x5b0] sm:$0xff]  }
 0x6a5   : > { %17388 = vmatpush3.bf16.msra.mxu0 %v18427_v3  ;;  %17367 = vmatprep.subr.bf16.mxu1 %v18428_v37  ;;  %v18467_v3 = vld [vmem:[%s23694_s7 + $0x4b8] sm:$0xff]   ;;  %v18468_v37 = vld [vmem:[%s23694_s7 + $0x470] sm:$0xff]  }
 0x6a6   : > { %17389 = vmatprep.subr.bf16.mxu0 %v18429_v9  ;;  %v12334_v9 = vpack.c.bf16 %v12228_v62, %v12228_v62  ;;  %v18507_v62 = vld [vmem:[%s23694_s7 + $0x5a8] sm:$0xff]  }
 0x6a8   : > { %17368 = vmatpush3.bf16.msra.mxu1 %v18430_v31  ;;  %v18469_v31 = vld [vmem:[%s23694_s7 + $0x4f0] sm:$0xff]  }
 0x6a9   : > { %17390 = vmatpush3.bf16.msra.mxu0 %v18431_v63  ;;  %17397 = vmatprep.subr.bf16.mxu1 %v18432_v20  ;;  %v12336_v63 = vpack.c.bf16 %v22961_v0, %v22961_v0  ;;  %v18471_v20 = vld [vmem:[%s23694_s7 + $0x4b0] sm:$0xff]   ;;  %v18473_v0 = vld [vmem:[%s23694_s7 + $0x4e8] sm:$0xff]  }
 0x6aa   : > { %17419 = vmatprep.subr.bf16.mxu0 %v18433_v24  ;;  %v18474_v24 = vld [vmem:[%s23694_s7 + $0x428] sm:$0xff]  }
 0x6ab   : > { %14591 = vmatmul.mubr.bf16.vlgmr.msra.gmra.mxu1 %v12325_v13  ;;  %v18478_v13 = vld [vmem:[%s23694_s7 + $0x420] sm:$0xff]  }
 0x6ac   : > { %14631 = vmatmul.mubr.bf16.vlgmr.msra.gmra.mxu0 %v12327_v39  ;;  %17398 = vmatpush3.bf16.msra.mxu1 %v18434_v60  ;;  %v18476_v60 = vld [vmem:[%s23694_s7 + $0x460] sm:$0xff]   ;;  %v18480_v39 = vld [vmem:[%s23694_s7 + $0x458] sm:$0xff]  }
 0x6ad   : > { %14670 = vmatprep.mubr.bf16.mxu1 %v12330_v10  ;;  %17420 = vmatpush3.bf16.msra.mxu0 %v18435_v42  ;;  %v18479_v42 = vld [vmem:[%s23694_s7 + $0x4a0] sm:$0xff]   ;;  %v18482_v10 = vld [vmem:[%s23694_s7 + $0x418] sm:$0xff]  }
 0x6ae   : > { %14710 = vmatprep.mubr.bf16.mxu0 %v12332_v26  ;;  %17399 = vmatprep.subr.bf16.mxu1 %v18436_v28  ;;  %v18481_v28 = vld [vmem:[%s23694_s7 + $0x4d8] sm:$0xff]   ;;  %v18484_v26 = vld [vmem:[%s23694_s7 + $0x450] sm:$0xff]  }
 0x6af   : > { %17421 = vmatprep.subr.bf16.mxu0 %v18437_v21  ;;  %v18483_v21 = vld [vmem:[%s23694_s7 + $0x498] sm:$0xff]  }
 0x6b0   : > { %17400 = vmatpush3.bf16.msra.mxu1 %v18438_v12  ;;  %v18485_v12 = vld [vmem:[%s23694_s7 + $0x4d0] sm:$0xff]  }
 0x6b1   : > { %17422 = vmatpush3.bf16.msra.mxu0 %v18439_v17  ;;  %17401 = vmatprep.subr.bf16.mxu1 %v18440_v38  ;;  %v18486_v17 = vld [vmem:[%s23694_s7 + $0x410] sm:$0xff]  }
 0x6b2   : > { %17423 = vmatprep.subr.bf16.mxu0 %v18441_v50  ;;  %v18487_v38 = vld [vmem:[%s23694_s7 + $0x490] sm:$0xff]   ;;  %v18488_v50 = vld [vmem:[%s23694_s7 + $0x448] sm:$0xff]  }
 0x6b4   : > { %17402 = vmatpush3.bf16.msra.mxu1 %v18442_v34  ;;  %v18489_v34 = vld [vmem:[%s23694_s7 + $0x4c8] sm:$0xff]  }
 0x6b5   : > { %17424 = vmatpush3.bf16.msra.mxu0 %v18443_v51  ;;  %17403 = vmatprep.subr.bf16.mxu1 %v18444_v6  ;;  %v18490_v51 = vld [vmem:[%s23694_s7 + $0x408] sm:$0xff]  }
 0x6b6   : > { %17425 = vmatprep.subr.bf16.mxu0 %v18445_v15  ;;  %v18491_v6 = vld [vmem:[%s23694_s7 + $0x488] sm:$0xff]   ;;  %v18492_v15 = vld [vmem:[%s23694_s7 + $0x440] sm:$0xff]  }
 0x6b8   : > { %17404 = vmatpush3.bf16.msra.mxu1 %v18446_v54  ;;  %v18493_v54 = vld [vmem:[%s23694_s7 + $0x4c0] sm:$0xff]  }
 0x6b9   : > { %17426 = vmatpush3.bf16.msra.mxu0 %v18447_v41  ;;  %17405 = vmatprep.subr.bf16.mxu1 %v18448_v32  ;;  %v18494_v41 = vld [vmem:[%s23694_s7 + $0x400] sm:$0xff]  }
 0x6ba   : > { %17427 = vmatprep.subr.bf16.mxu0 %v18449_v8  ;;  %v18495_v32 = vld [vmem:[%s23694_s7 + $0x480] sm:$0xff]   ;;  %v12224_v8 = vrot.slane %v22917_v59, %v23973_v16 }
 0x6bc   : > { %17406 = vmatpush3.bf16.msra.mxu1 %v18450_v44  ;;  %v18496_v44 = vld [vmem:[%s23694_s7 + $0x578] sm:$0xff]  }
 0x6bd   : > { %17428 = vmatpush3.bf16.msra.mxu0 %v18451_v25  ;;  %17407 = vmatprep.subr.bf16.mxu1 %v18452_v45  ;;  %v12232_v25 = vrot.slane %v22917_v59, %v22825_v52  ;;  %v18497_v45 = vld [vmem:[%s23694_s7 + $0x5f8] sm:$0xff]  }
 0x6be   : > { %17429 = vmatprep.subr.bf16.mxu0 %v18453_v58  ;;  %v12244_v58 = vrot.slane %v22917_v59, %v22828_v47 }
 0x6c0   : > { %17408 = vmatpush3.bf16.msra.mxu1 %v18454_v18  ;;  %v18498_v18 = vld [vmem:[%s23694_s7 + $0x538] sm:$0xff]  }
 0x6c1   : > { %17430 = vmatpush3.bf16.msra.mxu0 %v18455_v53  ;;  %17409 = vmatprep.subr.bf16.mxu1 %v18456_v48  ;;  %v12252_v53 = vrot.slane %v22917_v59, %v22880_v33  ;;  %v12333_v48 = vpack.c.bf16 %v12224_v8, %v12224_v8  ;;  %v18538_v8 = vld [vmem:[%s23694_s7 + $0x628] sm:$0xff]  }
 0x6c2   : > { %17431 = vmatprep.subr.bf16.mxu0 %v18457_v11  ;;  %v18499_v11 = vld [vmem:[%s23694_s7 + $0x5b8] sm:$0xff]  }
 0x6c4   : > { %17410 = vmatpush3.bf16.msra.mxu1 %v18458_v40  ;;  %v12335_v40 = vpack.c.bf16 %v12232_v25, %v12232_v25  ;;  %v18540_v25 = vld [vmem:[%s23694_s7 + $0x660] sm:$0xff]  }
 0x6c5   : > { %17432 = vmatpush3.bf16.msra.mxu0 %v18459_v35  ;;  %17411 = vmatprep.subr.bf16.mxu1 %v18460_v14  ;;  %v18500_v35 = vld [vmem:[%s23694_s7 + $0x570] sm:$0xff]   ;;  %v12338_v14 = vpack.c.bf16 %v12244_v58, %v12244_v58  ;;  %v18542_v58 = vld [vmem:[%s23694_s7 + $0x620] sm:$0xff]  }
 0x6c6   : > { %17433 = vmatprep.subr.bf16.mxu0 %v18461_v61  ;;  %v18501_v61 = vld [vmem:[%s23694_s7 + $0x5f0] sm:$0xff]  }
 0x6c8   : > { %17412 = vmatpush3.bf16.msra.mxu1 %v18462_v5  ;;  %v12340_v5 = vpack.c.bf16 %v12252_v53, %v12252_v53  ;;  %v18544_v53 = vld [vmem:[%s23694_s7 + $0x658] sm:$0xff]  }
 0x6c9   : > { %17434 = vmatpush3.bf16.msra.mxu0 %v18463_v36  ;;  %17441 = vmatprep.subr.bf16.mxu1 %v18464_v43  ;;  %v18502_v36 = vld [vmem:[%s23694_s7 + $0x530] sm:$0xff]   ;;  %v18504_v43 = vld [vmem:[%s23694_s7 + $0x568] sm:$0xff]  }
 0x6ca   : > { %17463 = vmatprep.subr.bf16.mxu0 %v18465_v29  ;;  %v18506_v29 = vld [vmem:[%s23694_s7 + $0x528] sm:$0xff]  }
 0x6cb   : > { %14671 = vmatmul.mubr.bf16.vlgmr.msra.gmra.mxu1 %v12329_v57  ;;  %v18509_v57 = vld [vmem:[%s23694_s7 + $0x5e0] sm:$0xff]  }
 0x6cc   : > { %14711 = vmatmul.mubr.bf16.vlgmr.msra.gmra.mxu0 %v12331_v4  ;;  %17442 = vmatpush3.bf16.msra.mxu1 %v18466_v22  ;;  %v18508_v22 = vld [vmem:[%s23694_s7 + $0x560] sm:$0xff]  }
 0x6cd   : > { %14750 = vmatprep.mubr.bf16.mxu1 %v12334_v9  ;;  %17464 = vmatpush3.bf16.msra.mxu0 %v18467_v3  ;;  %v18510_v3 = vld [vmem:[%s23694_s7 + $0x520] sm:$0xff]   ;;  %v18513_v9 = vld [vmem:[%s23694_s7 + $0x5d8] sm:$0xff]  }
 0x6ce   : > { %14790 = vmatprep.mubr.bf16.mxu0 %v12336_v63  ;;  %17443 = vmatprep.subr.bf16.mxu1 %v18468_v37  ;;  %v18511_v4 = vld [vmem:[%s23694_s7 + $0x5a0] sm:$0xff]   ;;  %v18512_v37 = vld [vmem:[%s23694_s7 + $0x558] sm:$0xff]  }
 0x6cf   : > { %17465 = vmatprep.subr.bf16.mxu0 %v18469_v31  ;;  %v18514_v31 = vld [vmem:[%s23694_s7 + $0x518] sm:$0xff]  }
 0x6d0   : > { %17444 = vmatpush3.bf16.msra.mxu1 %v18470_v46  ;;  %v18515_v63 = vld [vmem:[%s23694_s7 + $0x598] sm:$0xff]   ;;  %v18516_v46 = vld [vmem:[%s23694_s7 + $0x550] sm:$0xff]  }
 0x6d1   : > { %17466 = vmatpush3.bf16.msra.mxu0 %v18471_v20  ;;  %17445 = vmatprep.subr.bf16.mxu1 %v18472_v27  ;;  %v18517_v20 = vld [vmem:[%s23694_s7 + $0x5d0] sm:$0xff]  }
 0x6d2   : > { %17467 = vmatprep.subr.bf16.mxu0 %v18473_v0  ;;  %v18518_v27 = vld [vmem:[%s23694_s7 + $0x510] sm:$0xff]  }
 0x6d3   : > { %v18519_v0 = vld [vmem:[%s23694_s7 + $0x590] sm:$0xff]  }
 0x6d4   : > { %17446 = vmatpush3.bf16.msra.mxu1 %v18474_v24  ;;  %v18520_v24 = vld [vmem:[%s23694_s7 + $0x548] sm:$0xff]  }
 0x6d5   : > { %17468 = vmatpush3.bf16.msra.mxu0 %v18475_v1  ;;  %17447 = vmatprep.subr.bf16.mxu1 %v18476_v60  ;;  %v18521_v1 = vld [vmem:[%s23694_s7 + $0x5c8] sm:$0xff]  }
 0x6d6   : > { %17469 = vmatprep.subr.bf16.mxu0 %v18477_v19  ;;  %v18522_v60 = vld [vmem:[%s23694_s7 + $0x508] sm:$0xff]  }
 0x6d7   : > { %v18523_v19 = vld [vmem:[%s23694_s7 + $0x588] sm:$0xff]  }
 0x6d8   : > { %17448 = vmatpush3.bf16.msra.mxu1 %v18478_v13  ;;  %v18524_v13 = vld [vmem:[%s23694_s7 + $0x540] sm:$0xff]  }
 0x6d9   : > { %17470 = vmatpush3.bf16.msra.mxu0 %v18479_v42  ;;  %17449 = vmatprep.subr.bf16.mxu1 %v18480_v39  ;;  %v18525_v42 = vld [vmem:[%s23694_s7 + $0x5c0] sm:$0xff]  }
 0x6da   : > { %17471 = vmatprep.subr.bf16.mxu0 %v18481_v28  ;;  %v18526_v39 = vld [vmem:[%s23694_s7 + $0x500] sm:$0xff]  }
 0x6db   : > { %v18527_v28 = vld [vmem:[%s23694_s7 + $0x580] sm:$0xff]  }
 0x6dc   : > { %17450 = vmatpush3.bf16.msra.mxu1 %v18482_v10  ;;  %v12240_v10 = vrot.slane %v22917_v59, %v23003_v55 }
 0x6dd   : > { %17472 = vmatpush3.bf16.msra.mxu0 %v18483_v21  ;;  %17451 = vmatprep.subr.bf16.mxu1 %v18484_v26  ;;  %v18528_v21 = vld [vmem:[%s23694_s7 + $0x678] sm:$0xff]   ;;  %v12248_v26 = vrot.slane %v22917_v59, %v23006_v56 }
 0x6de   : > { %17473 = vmatprep.subr.bf16.mxu0 %v18485_v12  ;;  %v18529_v12 = vld [vmem:[%s23694_s7 + $0x6f8] sm:$0xff]  }
 0x6df   : > { %v12339_v59 = vpack.c.bf16 %v12248_v26, %v12248_v26  ;;  %v18569_v26 = vld [vmem:[%s23694_s7 + $0x7e8] sm:$0xff]  }
 0x6e0   : > { %17452 = vmatpush3.bf16.msra.mxu1 %v18486_v17  ;;  %v12260_v17 = vrot.slane %v22964_v2, %v22723_v7 }
 0x6e1   : > { %17474 = vmatpush3.bf16.msra.mxu0 %v18487_v38  ;;  %17453 = vmatprep.subr.bf16.mxu1 %v18488_v50  ;;  %v18530_v38 = vld [vmem:[%s23694_s7 + $0x638] sm:$0xff]   ;;  %v12337_v50 = vpack.c.bf16 %v12240_v10, %v12240_v10 }
 0x6e2   : > { %17475 = vmatprep.subr.bf16.mxu0 %v18489_v34  ;;  %v18531_v34 = vld [vmem:[%s23694_s7 + $0x6b8] sm:$0xff]   ;;  %v12342_v7 = vpack.c.bf16 %v12260_v17, %v12260_v17 }
 0x6e4   : > { %17454 = vmatpush3.bf16.msra.mxu1 %v18490_v51  ;;  %v18532_v51 = vld [vmem:[%s23694_s7 + $0x670] sm:$0xff]  }
 0x6e5   : > { %17476 = vmatpush3.bf16.msra.mxu0 %v18491_v6  ;;  %17455 = vmatprep.subr.bf16.mxu1 %v18492_v15  ;;  %v18533_v6 = vld [vmem:[%s23694_s7 + $0x6f0] sm:$0xff]   ;;  %v12344_v15 = vpack.c.bf16 %v23055_v23, %v23055_v23  ;;  %v18537_v23 = vld [vmem:[%s23694_s7 + $0x6e8] sm:$0xff]  }
 0x6e6   : > { %17477 = vmatprep.subr.bf16.mxu0 %v18493_v54  ;;  %v18534_v54 = vld [vmem:[%s23694_s7 + $0x630] sm:$0xff]  }
 0x6e8   : > { %17456 = vmatpush3.bf16.msra.mxu1 %v18494_v41  ;;  %v18535_v41 = vld [vmem:[%s23694_s7 + $0x6b0] sm:$0xff]  }
 0x6e9   : > { %17478 = vmatpush3.bf16.msra.mxu0 %v18495_v32  ;;  %17485 = vmatprep.subr.bf16.mxu1 %v18496_v44  ;;  %v18536_v32 = vld [vmem:[%s23694_s7 + $0x668] sm:$0xff]  }
 0x6ea   : > { %17507 = vmatprep.subr.bf16.mxu0 %v18497_v45  ;;  %v18539_v44 = vld [vmem:[%s23694_s7 + $0x6a8] sm:$0xff]   ;;  %v18541_v45 = vld [vmem:[%s23694_s7 + $0x6e0] sm:$0xff]  }
 0x6eb   : > { %14751 = vmatmul.mubr.bf16.vlgmr.msra.gmra.mxu1 %v12333_v48  ;;  %v18545_v48 = vld [vmem:[%s23694_s7 + $0x6d8] sm:$0xff]  }
 0x6ec   : > { %14791 = vmatmul.mubr.bf16.vlgmr.msra.gmra.mxu0 %v12335_v40  ;;  %17486 = vmatpush3.bf16.msra.mxu1 %v18498_v18  ;;  %v18543_v18 = vld [vmem:[%s23694_s7 + $0x6a0] sm:$0xff]   ;;  %v18547_v40 = vld [vmem:[%s23694_s7 + $0x698] sm:$0xff]  }
 0x6ed   : > { %14830 = vmatprep.mubr.bf16.mxu1 %v12338_v14  ;;  %17508 = vmatpush3.bf16.msra.mxu0 %v18499_v11  ;;  %v18546_v11 = vld [vmem:[%s23694_s7 + $0x618] sm:$0xff]   ;;  %v18549_v14 = vld [vmem:[%s23694_s7 + $0x6d0] sm:$0xff]  }
 0x6ee   : > { %14870 = vmatprep.mubr.bf16.mxu0 %v12340_v5  ;;  %17487 = vmatprep.subr.bf16.mxu1 %v18500_v35  ;;  %v18548_v35 = vld [vmem:[%s23694_s7 + $0x650] sm:$0xff]  }
 0x6ef   : > { %17509 = vmatprep.subr.bf16.mxu0 %v18501_v61  ;;  %v18550_v61 = vld [vmem:[%s23694_s7 + $0x610] sm:$0xff]  }
 0x6f0   : > { %17488 = vmatpush3.bf16.msra.mxu1 %v18502_v36  ;;  %v18551_v5 = vld [vmem:[%s23694_s7 + $0x690] sm:$0xff]   ;;  %v18552_v36 = vld [vmem:[%s23694_s7 + $0x648] sm:$0xff]  }
 0x6f1   : > { %17510 = vmatpush3.bf16.msra.mxu0 %v18503_v30  ;;  %17489 = vmatprep.subr.bf16.mxu1 %v18504_v43  ;;  %v18553_v30 = vld [vmem:[%s23694_s7 + $0x6c8] sm:$0xff]  }
 0x6f2   : > { %17511 = vmatprep.subr.bf16.mxu0 %v18505_v49  ;;  %v18554_v43 = vld [vmem:[%s23694_s7 + $0x608] sm:$0xff]  }
 0x6f3   : > { %v18555_v49 = vld [vmem:[%s23694_s7 + $0x688] sm:$0xff]  }
 0x6f4   : > { %17490 = vmatpush3.bf16.msra.mxu1 %v18506_v29  ;;  %v18556_v29 = vld [vmem:[%s23694_s7 + $0x640] sm:$0xff]  }
 0x6f5   : > { %17512 = vmatpush3.bf16.msra.mxu0 %v18507_v62  ;;  %17491 = vmatprep.subr.bf16.mxu1 %v18508_v22  ;;  %v18557_v62 = vld [vmem:[%s23694_s7 + $0x6c0] sm:$0xff]  }
 0x6f6   : > { %17513 = vmatprep.subr.bf16.mxu0 %v18509_v57  ;;  %v18558_v22 = vld [vmem:[%s23694_s7 + $0x600] sm:$0xff]  }
 0x6f7   : > { %v18559_v57 = vld [vmem:[%s23694_s7 + $0x680] sm:$0xff]  }
 0x6f8   : > { %17492 = vmatpush3.bf16.msra.mxu1 %v18510_v3  ;;  %v12256_v3 = vrot.slane %v22964_v2, %v23973_v16  ;;  %v18562_v16 = vld [vmem:[%s23694_s7 + $0x738] sm:$0xff]  }
 0x6f9   : > { %17514 = vmatpush3.bf16.msra.mxu0 %v18511_v4  ;;  %17493 = vmatprep.subr.bf16.mxu1 %v18512_v37  ;;  %v18560_v4 = vld [vmem:[%s23694_s7 + $0x778] sm:$0xff]   ;;  %v12264_v37 = vrot.slane %v22964_v2, %v22825_v52 }
 0x6fa   : > { %17515 = vmatprep.subr.bf16.mxu0 %v18513_v9  ;;  %v18561_v9 = vld [vmem:[%s23694_s7 + $0x7f8] sm:$0xff]  }
 0x6fb   : > { %v18563_v52 = vld [vmem:[%s23694_s7 + $0x7b8] sm:$0xff]  }
 0x6fc   : > { %17494 = vmatpush3.bf16.msra.mxu1 %v18514_v31  ;;  %v12276_v31 = vrot.slane %v22964_v2, %v22828_v47  ;;  %v18564_v47 = vld [vmem:[%s23694_s7 + $0x770] sm:$0xff]  }
 0x6fd   : > { %17516 = vmatpush3.bf16.msra.mxu0 %v18515_v63  ;;  %17495 = vmatprep.subr.bf16.mxu1 %v18516_v46  ;;  %v12284_v63 = vrot.slane %v22964_v2, %v22880_v33  ;;  %v12341_v46 = vpack.c.bf16 %v12256_v3, %v12256_v3  ;;  %v18565_v33 = vld [vmem:[%s23694_s7 + $0x7f0] sm:$0xff]  }
 0x6fe   : > { %17517 = vmatprep.subr.bf16.mxu0 %v18517_v20  ;;  %v12343_v20 = vpack.c.bf16 %v12264_v37, %v12264_v37 }
 0x700   : > { %17496 = vmatpush3.bf16.msra.mxu1 %v18518_v27 }
 0x701   : > { %17518 = vmatpush3.bf16.msra.mxu0 %v18519_v0  ;;  %17497 = vmatprep.subr.bf16.mxu1 %v18520_v24  ;;  %v12346_v24 = vpack.c.bf16 %v12276_v31, %v12276_v31 }
 0x702   : > { %17519 = vmatprep.subr.bf16.mxu0 %v18521_v1  ;;  %v12348_v1 = vpack.c.bf16 %v12284_v63, %v12284_v63 }
 0x704   : > { %17498 = vmatpush3.bf16.msra.mxu1 %v18522_v60  ;;  %v18566_v60 = vld [vmem:[%s23694_s7 + $0x730] sm:$0xff]  }
 0x705   : > { %17520 = vmatpush3.bf16.msra.mxu0 %v18523_v19  ;;  %17499 = vmatprep.subr.bf16.mxu1 %v18524_v13  ;;  %v12861_v19 = vld [vmem:[%s23695_s8] sm:$0x1] }
 0x706   : > { %17521 = vmatprep.subr.bf16.mxu0 %v18525_v42 }
 0x708   : > { %17500 = vmatpush3.bf16.msra.mxu1 %v18526_v39  ;;  %v18567_v39 = vld [vmem:[%s23694_s7 + $0x7b0] sm:$0xff]  }
 0x709   : > { %17522 = vmatpush3.bf16.msra.mxu0 %v18527_v28  ;;  %17529 = vmatprep.subr.bf16.mxu1 %v18528_v21  ;;  %v18568_v28 = vld [vmem:[%s23694_s7 + $0x768] sm:$0xff]  }
 0x70a   : > { %17551 = vmatprep.subr.bf16.mxu0 %v18529_v12 }
 0x70b   : > { %14831 = vmatmul.mubr.bf16.vlgmr.msra.gmra.mxu1 %v12337_v50  ;;  %v18570_v50 = vld [vmem:[%s23694_s7 + $0x728] sm:$0xff]  }
 0x70c   : > { %14871 = vmatmul.mubr.bf16.vlgmr.msra.gmra.mxu0 %v12339_v59  ;;  %17530 = vmatpush3.bf16.msra.mxu1 %v18530_v38 }
 0x70d   : > { %14910 = vmatprep.mubr.bf16.mxu1 %v12342_v7  ;;  %17552 = vmatpush3.bf16.msra.mxu0 %v18531_v34  ;;  %v18572_v7 = vld [vmem:[%s23694_s7 + $0x760] sm:$0xff]  }
 0x70e   : > { %14950 = vmatprep.mubr.bf16.mxu0 %v12344_v15  ;;  %17531 = vmatprep.subr.bf16.mxu1 %v18532_v51  ;;  %v18571_v51 = vld [vmem:[%s23694_s7 + $0x7a8] sm:$0xff]   ;;  %v18573_v15 = vld [vmem:[%s23694_s7 + $0x7e0] sm:$0xff]  }
 0x70f   : > { %17553 = vmatprep.subr.bf16.mxu0 %v18533_v6 }
 0x710   : > { %17532 = vmatpush3.bf16.msra.mxu1 %v18534_v54  ;;  %v18574_v54 = vld [vmem:[%s23694_s7 + $0x720] sm:$0xff]  }
 0x711   : > { %17554 = vmatpush3.bf16.msra.mxu0 %v18535_v41  ;;  %17533 = vmatprep.subr.bf16.mxu1 %v18536_v32  ;;  %v18575_v41 = vld [vmem:[%s23694_s7 + $0x7a0] sm:$0xff]   ;;  %v18576_v32 = vld [vmem:[%s23694_s7 + $0x758] sm:$0xff]  }
 0x712   : > { %17555 = vmatprep.subr.bf16.mxu0 %v18537_v23  ;;  %v18577_v23 = vld [vmem:[%s23694_s7 + $0x7d8] sm:$0xff]  }
 0x714   : > { %17534 = vmatpush3.bf16.msra.mxu1 %v18538_v8  ;;  %v18578_v8 = vld [vmem:[%s23694_s7 + $0x718] sm:$0xff]  }
 0x715   : > { %17556 = vmatpush3.bf16.msra.mxu0 %v18539_v44  ;;  %17535 = vmatprep.subr.bf16.mxu1 %v18540_v25  ;;  %v18579_v44 = vld [vmem:[%s23694_s7 + $0x798] sm:$0xff]   ;;  %v18580_v25 = vld [vmem:[%s23694_s7 + $0x750] sm:$0xff]  }
 0x716   : > { %17557 = vmatprep.subr.bf16.mxu0 %v18541_v45  ;;  %v18581_v45 = vld [vmem:[%s23694_s7 + $0x7d0] sm:$0xff]  }
 0x718   : > { %17536 = vmatpush3.bf16.msra.mxu1 %v18542_v58  ;;  %v18582_v58 = vld [vmem:[%s23694_s7 + $0x710] sm:$0xff]  }
 0x719   : > { %17558 = vmatpush3.bf16.msra.mxu0 %v18543_v18  ;;  %17537 = vmatprep.subr.bf16.mxu1 %v18544_v53  ;;  %v18583_v18 = vld [vmem:[%s23694_s7 + $0x790] sm:$0xff]   ;;  %v18584_v53 = vld [vmem:[%s23694_s7 + $0x748] sm:$0xff]  }
 0x71a   : > { %17559 = vmatprep.subr.bf16.mxu0 %v18545_v48  ;;  %v18585_v48 = vld [vmem:[%s23694_s7 + $0x7c8] sm:$0xff]  }
 0x71c   : > { %17538 = vmatpush3.bf16.msra.mxu1 %v18546_v11  ;;  %v18586_v11 = vld [vmem:[%s23694_s7 + $0x708] sm:$0xff]  }
 0x71d   : > { %17560 = vmatpush3.bf16.msra.mxu0 %v18547_v40  ;;  %17539 = vmatprep.subr.bf16.mxu1 %v18548_v35  ;;  %v18587_v40 = vld [vmem:[%s23694_s7 + $0x788] sm:$0xff]   ;;  %v18588_v35 = vld [vmem:[%s23694_s7 + $0x740] sm:$0xff]  }
 0x71e   : > { %17561 = vmatprep.subr.bf16.mxu0 %v18549_v14  ;;  %v18589_v14 = vld [vmem:[%s23694_s7 + $0x7c0] sm:$0xff]  }
 0x720   : > { %17540 = vmatpush3.bf16.msra.mxu1 %v18550_v61  ;;  %v18590_v61 = vld [vmem:[%s23694_s7 + $0x700] sm:$0xff]  }
 0x721   : > { %17562 = vmatpush3.bf16.msra.mxu0 %v18551_v5  ;;  %17541 = vmatprep.subr.bf16.mxu1 %v18552_v36  ;;  %v18591_v5 = vld [vmem:[%s23694_s7 + $0x780] sm:$0xff]   ;;  %v12272_v36 = vrot.slane %v22964_v2, %v23003_v55 }
 0x722   : > { %17563 = vmatprep.subr.bf16.mxu0 %v18553_v30  ;;  %v12280_v30 = vrot.slane %v22964_v2, %v23006_v56 }
 0x724   : > { %17542 = vmatpush3.bf16.msra.mxu1 %v18554_v43  ;;  %v12345_v43 = vpack.c.bf16 %v12272_v36, %v12272_v36 }
 0x725   : > { %17564 = vmatpush3.bf16.msra.mxu0 %v18555_v49  ;;  %17543 = vmatprep.subr.bf16.mxu1 %v18556_v29  ;;  %v12347_v49 = vpack.c.bf16 %v12280_v30, %v12280_v30 }
 0x726   : > { %17565 = vmatprep.subr.bf16.mxu0 %v18557_v62 }
 0x728   : > { %17544 = vmatpush3.bf16.msra.mxu1 %v18558_v22 }
 0x729   : > { %17566 = vmatpush3.bf16.msra.mxu0 %v18559_v57  ;;  %17573 = vmatprep.subr.bf16.mxu1 %v18560_v4 }
 0x72a   : > { %17595 = vmatprep.subr.bf16.mxu0 %v18561_v9 }
 0x72b   : > { %14911 = vmatmul.mubr.bf16.vlgmr.msra.gmra.mxu1 %v12341_v46  ;;  %v17281_v27 = vpop.f32.mrf.mxu1  ;;  %v17303_v0 = vpop.f32.mrf.mxu0 }
 0x72c   : > { %14951 = vmatmul.mubr.bf16.vlgmr.msra.gmra.mxu0 %v12343_v20  ;;  %17574 = vmatpush3.bf16.msra.mxu1 %v18562_v16 }
 0x72d   : > { %14990 = vmatprep.mubr.bf16.mxu1 %v12346_v24  ;;  %17596 = vmatpush3.bf16.msra.mxu0 %v18563_v52  ;;  %v17282_v13 = vpop.f32.mrf.mxu1  ;;  %v17304_v42 = vpop.f32.mrf.mxu0 }
 0x72e   : > { %15030 = vmatprep.mubr.bf16.mxu0 %v12348_v1  ;;  %v17283_v10 = vadd.f32 %v17282_v13, %v17281_v27  ;;  %v17305_v21 = vadd.f32 %v17304_v42, %v17303_v0  ;;  %17575 = vmatprep.subr.bf16.mxu1 %v18564_v47 }
 0x72f   : > { %17597 = vmatprep.subr.bf16.mxu0 %v18565_v33  ;;  %v17284_v12 = vpop.f32.mrf.mxu1  ;;  %v17306_v17 = vpop.f32.mrf.mxu0 }
 0x730   : > { %v14433_v38 = vadd.f32 %v17283_v10, %v12861_v19  ;;  %17576 = vmatpush3.bf16.msra.mxu1 %v18566_v60 }
 0x731   : > { %17598 = vmatpush3.bf16.msra.mxu0 %v18567_v39  ;;  %v17285_v34 = vpop.f32.mrf.mxu1  ;;  %v17307_v59 = vpop.f32.mrf.mxu0  ;;  %17577 = vmatprep.subr.bf16.mxu1 %v18568_v28 }
 0x732   : > { %v14473_v6 = vadd.f32 %v17305_v21, %v14433_v38  ;;  %17599 = vmatprep.subr.bf16.mxu0 %v18569_v26 }
 0x734   : > { %17578 = vmatpush3.bf16.msra.mxu1 %v18570_v50 }
 0x735   : > { %17600 = vmatpush3.bf16.msra.mxu0 %v18571_v51  ;;  %17579 = vmatprep.subr.bf16.mxu1 %v18572_v7 }
 0x736   : > { %17601 = vmatprep.subr.bf16.mxu0 %v18573_v15 }
 0x738   : > { %17580 = vmatpush3.bf16.msra.mxu1 %v18574_v54 }
 0x739   : > { %17602 = vmatpush3.bf16.msra.mxu0 %v18575_v41  ;;  %17581 = vmatprep.subr.bf16.mxu1 %v18576_v32 }
 0x73a   : > { %17603 = vmatprep.subr.bf16.mxu0 %v18577_v23 }
 0x73c   : > { %17582 = vmatpush3.bf16.msra.mxu1 %v18578_v8 }
 0x73d   : > { %17604 = vmatpush3.bf16.msra.mxu0 %v18579_v44  ;;  %17583 = vmatprep.subr.bf16.mxu1 %v18580_v25 }
 0x73e   : > { %17605 = vmatprep.subr.bf16.mxu0 %v18581_v45 }
 0x740   : > { %17584 = vmatpush3.bf16.msra.mxu1 %v18582_v58 }
 0x741   : > { %17606 = vmatpush3.bf16.msra.mxu0 %v18583_v18  ;;  %17585 = vmatprep.subr.bf16.mxu1 %v18584_v53 }
 0x742   : > { %17607 = vmatprep.subr.bf16.mxu0 %v18585_v48 }
 0x744   : > { %17586 = vmatpush3.bf16.msra.mxu1 %v18586_v11 }
 0x745   : > { %17608 = vmatpush3.bf16.msra.mxu0 %v18587_v40  ;;  %17587 = vmatprep.subr.bf16.mxu1 %v18588_v35 }
 0x746   : > { %17609 = vmatprep.subr.bf16.mxu0 %v18589_v14 }
 0x748   : > { %17588 = vmatpush3.bf16.msra.mxu1 %v18590_v61 }
 0x749   : > { %17610 = vmatpush3.bf16.msra.mxu0 %v18591_v5 }
 0x74b   : > { %v17325_v29 = vpop.f32.mrf.mxu1  ;;  %v17347_v62 = vpop.f32.mrf.mxu0  ;;  %14991 = vmatmul.mubr.bf16.vlgmr.msra.gmra.mxu1 %v12345_v43 }
 0x74c   : > { %15031 = vmatmul.mubr.bf16.vlgmr.msra.gmra.mxu0 %v12347_v49 }
 0x74d   : > { %v17326_v22 = vpop.f32.mrf.mxu1  ;;  %v17348_v57 = vpop.f32.mrf.mxu0 }
 0x74e   : > { %v17327_v3 = vadd.f32 %v17326_v22, %v17325_v29  ;;  %v17349_v4 = vadd.f32 %v17348_v57, %v17347_v62 }
 0x74f   : > { %v17328_v37 = vpop.f32.mrf.mxu1  ;;  %v17350_v9 = vpop.f32.mrf.mxu0 }
 0x750   : > { %v14513_v31 = vadd.f32 %v17327_v3, %v14473_v6 }
 0x751   : > { %v17329_v55 = vpop.f32.mrf.mxu1  ;;  %v17351_v16 = vpop.f32.mrf.mxu0 }
 0x752   : > { %v14553_v63 = vadd.f32 %v17349_v4, %v14513_v31 }
 0x76b   : > { %v17369_v46 = vpop.f32.mrf.mxu1 }
 0x76c   : > { %v17391_v2 = vpop.f32.mrf.mxu0 }
 0x76d   : > { %v17370_v56 = vpop.f32.mrf.mxu1 }
 0x76e   : > { %v17371_v52 = vadd.f32 %v17370_v56, %v17369_v46  ;;  %v17392_v20 = vpop.f32.mrf.mxu0 }
 0x76f   : > { %v17393_v47 = vadd.f32 %v17392_v20, %v17391_v2  ;;  %v17372_v27 = vpop.f32.mrf.mxu1 }
 0x770   : > { %v14593_v0 = vadd.f32 %v17371_v52, %v14553_v63  ;;  %v17394_v24 = vpop.f32.mrf.mxu0 }
 0x771   : > { %v17373_v33 = vpop.f32.mrf.mxu1 }
 0x772   : > { %v14633_v1 = vadd.f32 %v17393_v47, %v14593_v0  ;;  %v17395_v60 = vpop.f32.mrf.mxu0 }
 0x78b   : > { %v17413_v19 = vpop.f32.mrf.mxu1 }
 0x78c   : > { %v17435_v13 = vpop.f32.mrf.mxu0 }
 0x78d   : > { %v17414_v42 = vpop.f32.mrf.mxu1 }
 0x78e   : > { %v17415_v39 = vadd.f32 %v17414_v42, %v17413_v19  ;;  %v17436_v28 = vpop.f32.mrf.mxu0 }
 0x78f   : > { %v17437_v10 = vadd.f32 %v17436_v28, %v17435_v13  ;;  %v17416_v21 = vpop.f32.mrf.mxu1 }
 0x790   : > { %v14673_v26 = vadd.f32 %v17415_v39, %v14633_v1  ;;  %v17438_v12 = vpop.f32.mrf.mxu0 }
 0x791   : > { %v17417_v17 = vpop.f32.mrf.mxu1 }
 0x792   : > { %v14713_v38 = vadd.f32 %v17437_v10, %v14673_v26  ;;  %v17439_v50 = vpop.f32.mrf.mxu0 }
 0x7ab   : > { %v17457_v34 = vpop.f32.mrf.mxu1 }
 0x7ac   : > { %v17479_v59 = vpop.f32.mrf.mxu0 }
 0x7ad   : > { %v17458_v51 = vpop.f32.mrf.mxu1 }
 0x7ae   : > { %v17459_v7 = vadd.f32 %v17458_v51, %v17457_v34  ;;  %v17480_v6 = vpop.f32.mrf.mxu0 }
 0x7af   : > { %v17481_v15 = vadd.f32 %v17480_v6, %v17479_v59  ;;  %v17460_v54 = vpop.f32.mrf.mxu1 }
 0x7b0   : > { %v14753_v41 = vadd.f32 %v17459_v7, %v14713_v38  ;;  %v17482_v32 = vpop.f32.mrf.mxu0 }
 0x7b1   : > { %v17461_v23 = vpop.f32.mrf.mxu1 }
 0x7b2   : > { %v14793_v8 = vadd.f32 %v17481_v15, %v14753_v41  ;;  %v17483_v44 = vpop.f32.mrf.mxu0 }
 0x7cb   : > { %v17501_v25 = vpop.f32.mrf.mxu1 }
 0x7cc   : > { %v17523_v45 = vpop.f32.mrf.mxu0 }
 0x7cd   : > { %v17502_v58 = vpop.f32.mrf.mxu1 }
 0x7ce   : > { %v17524_v18 = vpop.f32.mrf.mxu0  ;;  %v17503_v29 = vadd.f32 %v17502_v58, %v17501_v25 }
 0x7cf   : > { %v17504_v53 = vpop.f32.mrf.mxu1  ;;  %v17525_v22 = vadd.f32 %v17524_v18, %v17523_v45 }
 0x7d0   : > { %v17526_v48 = vpop.f32.mrf.mxu0  ;;  %v14833_v62 = vadd.f32 %v17503_v29, %v14793_v8 }
 0x7d1   : > { %v17505_v11 = vpop.f32.mrf.mxu1 }
 0x7d2   : > { %v17527_v40 = vpop.f32.mrf.mxu0  ;;  %v14873_v3 = vadd.f32 %v17525_v22, %v14833_v62 }
 0x7eb   : > { %v17545_v35 = vpop.f32.mrf.mxu1 }
 0x7ec   : > { %v17567_v14 = vpop.f32.mrf.mxu0 }
 0x7ed   : > { %v17546_v61 = vpop.f32.mrf.mxu1 }
 0x7ee   : > { %v17568_v5 = vpop.f32.mrf.mxu0  ;;  %v17547_v57 = vadd.f32 %v17546_v61, %v17545_v35 }
 0x7ef   : > { %v17548_v36 = vpop.f32.mrf.mxu1  ;;  %v17569_v9 = vadd.f32 %v17568_v5, %v17567_v14 }
 0x7f0   : > { %v17570_v30 = vpop.f32.mrf.mxu0  ;;  %v14913_v4 = vadd.f32 %v17547_v57, %v14873_v3 }
 0x7f1   : > { %v17549_v43 = vpop.f32.mrf.mxu1 }
 0x7f2   : > { %v17571_v49 = vpop.f32.mrf.mxu0  ;;  %v14953_v16 = vadd.f32 %v17569_v9, %v14913_v4 }
 0x80b   : > { %v17589_v37 = vpop.f32.mrf.mxu1 }
 0x80c   : > { %v17611_v31 = vpop.f32.mrf.mxu0 }
 0x80d   : > { %v17590_v55 = vpop.f32.mrf.mxu1 }
 0x80e   : > { %v17591_v63 = vadd.f32 %v17590_v55, %v17589_v37  ;;  %v17612_v46 = vpop.f32.mrf.mxu0 }
 0x80f   : > { %v17592_v2 = vpop.f32.mrf.mxu1  ;;  %v17613_v52 = vadd.f32 %v17612_v46, %v17611_v31 }
 0x810   : > { %v14993_v56 = vadd.f32 %v17591_v63, %v14953_v16  ;;  %v17614_v20 = vpop.f32.mrf.mxu0 }
 0x811   : > { %v17593_v47 = vpop.f32.mrf.mxu1 }
 0x812   : > { %v15033_v27 = vadd.f32 %v17613_v52, %v14993_v56  ;;  %v17615_v0 = vpop.f32.mrf.mxu0 }
 0x814   : > { %v15038_v24 = vmax.f32 %v15033_v27, 0.0 }
 0x816   : > { %15040 = vst.msk [vmem:[%s324_s21] sm:$0x1] %vm15039_vm5, %v15038_v24 }
 0x817   : > { %18669 = shalt.err (!%p18666_p3)
}
 0x818   : > { %s18670_s29 = scalar_lea.hbm %s15052_s25, 16  ;;  %s18674_s21 = scalar_lea.hbm %s23696_s9, 32 }
 0x819   : > { %p18671_p4 = scmp.ne.s32.totalorder %s15052_s25, %s18670_s29  ;;  %p18675_p9 = scmp.lt.s32.totalorder %s15052_s25, %s23696_s9 }
 0x81a   : > { %p18676_p10 = scmp.lt.s32.totalorder %s18674_s21, %s18670_s29 }
 0x81b   : > { %p18672_p7 = pnand %p18671_p4, %p18813_p5 }
 0x81c   : > { %p18677_p11 = por %p18676_p10, %p18675_p9 }
 0x81d   : > { %p18673_p8 = pneg %p18672_p7 }
 0x81f   : > { %p18678_p12 = pnand %p18677_p11, %p18673_p8 }
 0x821   : > { %18681 = shalt.err (!%p18678_p12)
}
 0x822   : > { %17789 = dma.vmem_to_hbm [thread:$0]  (%p18813_p5), %s15055_s22, 16, %s15052_s25, %s15042_s26  }
 0x823 PF: > { %p17795_p13 = scmp.ge.s32.totalorder %s18716_s12, 2  ;;  %s15066_s14 = sand.u32 1, %s18704_s30  }
 0x824   : > { %s15067_s27 = scalar_lea.sflag [#allocation5], %s15066_s14 }
 0x825   : > { %p17792_p0 = pnand %p17795_p13, %p18817_p6 }
 0x827   : > { %p17793_p1 = pneg %p17792_p0 }
 0x829   : > { %18699 = dma.done.wait (%p17793_p1), %s15067_s27, 16  }
 0x82a   : > { %18701 = vsyncadd (%p17793_p1), %s15067_s27, 4294967280  ;;  %p19_p2 = scmp.ge.s32.totalorder %s18800_s15, 4   ;;  %s23974_s30 = smov %s18708_s10 }
 0x82b   : > { %s23975_s10 = smov %s18712_s11  ;;  %s23976_s11 = smov %s18811_s18 }
 0x82c   : > { %s23977_s12 = smov %s18800_s15  ;;  %21 = sbr.rel (!%p19_p2) target bundleno = 3 (0x3), region = 95 }
 0x831   :  { %15071 = vsyncpa [#allocation5], 1 }
 0x832   :  { %15073 = vsyncpa [#allocation5 + $0x1], 1 }

</bundles_post_ra>
